<compile_context>
chip_gen: v5e
topology: v5e:2x2
jax: 0.10.0
libtpu: 0.0.40
codegen_flags: <defaults>
</compile_context>

<pallas_src>
import functools

import jax
import jax.numpy as jnp
from jax.experimental import pallas as pl
from jax.experimental.pallas import tpu as pltpu


def _clstm_layer_kernel(ax_ref, wh_ref, out_ref, hpad_ref, c_ref, patch_ref,
                        *, K, pad, H, W, HID):
    # ax_ref   : (1, 1, H*W, 4*HID)   precomputed conv(x, Wx) + bias for (b, t)
    # wh_ref   : (K*K*HID, 4*HID)     fused-tap h-part weights
    # out_ref  : (1, 1, H*W, HID)     h_t
    # hpad_ref : (H+2p, W+2p, HID)    zero-padded h_{t-1}     (VMEM scratch)
    # c_ref    : (H*W, HID)           cell state              (VMEM scratch)
    # patch_ref: (H*W, K*K*HID)       im2col patch of h_{t-1} (VMEM scratch)
    t = pl.program_id(1)
    HW = H * W

    @pl.when(t == 0)
    def _init():
        # Zero borders are written once and never touched again (interior-only
        # writes below); c starts at zero, matching CLSTMCell.init_hidden.
        hpad_ref[...] = jnp.zeros_like(hpad_ref)
        c_ref[...] = jnp.zeros_like(c_ref)

    # im2col of h_{t-1}: K*K static slab copies -> one deep-contraction matmul.
    for kh in range(K):
        for kw in range(K):
            tap = kh * K + kw
            slab = hpad_ref[kh:kh + H, kw:kw + W, :]          # (H, W, HID)
            patch_ref[:, tap * HID:(tap + 1) * HID] = slab.reshape(HW, HID)

    # Gate pre-activations: hoisted x-part + single h-part matmul
    # (M = 256, K = K*K*HID = 800, N = 4*HID = 128).
    A = ax_ref[0, 0] + jnp.dot(patch_ref[...], wh_ref[...],
                               preferred_element_type=jnp.float32)

    # Gate order along N: i | f | o | g (matches torch.split in the module).
    # sigmoid is applied on the full lane-dense (HW, 4*HID) block (EUP),
    # then sliced; only the g block needs tanh.
    sg = jax.nn.sigmoid(A)
    i_g = sg[:, 0:HID]
    f_g = sg[:, HID:2 * HID]
    o_g = sg[:, 2 * HID:3 * HID]
    g_g = jnp.tanh(A[:, 3 * HID:4 * HID])

    c_new = c_ref[...] * f_g + i_g * g_g
    h_new = o_g * jnp.tanh(c_new)

    c_ref[...] = c_new
    # Single contiguous write-back of the whole h_t into the padded interior.
    hpad_ref[pad:pad + H, pad:pad + W, :] = h_new.reshape(H, W, HID)
    out_ref[0, 0, :, :] = h_new


def clstm_layer_pallas(x_flat, w_hwio, b_vec, H, W):
    """One CLSTM layer over a full sequence.
    x_flat: (B, T, H*W, Cin); w_hwio: (K, K, Cin+HID, 4*HID); b_vec: (4*HID,).
    Returns the h sequence (B, T, H*W, HID)."""
    B, T, HW, Cin = x_flat.shape
    K = w_hwio.shape[0]
    C = w_hwio.shape[2]
    HID = b_vec.shape[0] // 4
    assert C == Cin + HID
    assert HW == H * W
    pad = (K - 1) // 2

    # Split the conv weight into the x-part and the h-part contraction.
    wx = w_hwio[:, :, :Cin, :]                       # (K, K, Cin, 4*HID)
    wh = w_hwio[:, :, Cin:, :]                       # (K, K, HID, 4*HID)

    # Hoist the recurrence-free x-part: one big conv over all B*T frames,
    # bias folded in (runs once at full MXU efficiency outside the kernel).
    x_nhwc = x_flat.reshape(B * T, H, W, Cin)
    ax = jax.lax.conv_general_dilated(
        x_nhwc, wx, (1, 1), 'SAME',
        dimension_numbers=('NHWC', 'HWIO', 'NHWC')) + b_vec
    ax = ax.reshape(B, T, HW, 4 * HID)

    # Fused-tap h weights: row index = (kh*K + kw)*HID + c  (matches the
    # im2col patch column order built inside the kernel).
    wh_fused = wh.reshape(K * K * HID, 4 * HID)

    kernel = functools.partial(
        _clstm_layer_kernel, K=K, pad=pad, H=H, W=W, HID=HID)

    # Grid: (B, T). B is "parallel" (megacore split on v7x — each core keeps
    # its own h/c scratch and runs its batch elements' full recurrence);
    # T is "arbitrary" and MUST remain the innermost sequential axis.
    return pl.pallas_call(
        kernel,
        out_shape=jax.ShapeDtypeStruct((B, T, HW, HID), jnp.float32),
        grid_spec=pltpu.PrefetchScalarGridSpec(
            num_scalar_prefetch=0,
            grid=(B, T),
            in_specs=[
                pl.BlockSpec((1, 1, HW, 4 * HID), lambda b, t: (b, t, 0, 0)),
                pl.BlockSpec((K * K * HID, 4 * HID), lambda b, t: (0, 0)),
            ],
            out_specs=pl.BlockSpec((1, 1, HW, HID), lambda b, t: (b, t, 0, 0)),
            scratch_shapes=[
                pltpu.VMEM((H + 2 * pad, W + 2 * pad, HID), jnp.float32),
                pltpu.VMEM((HW, HID), jnp.float32),
                pltpu.VMEM((HW, K * K * HID), jnp.float32),
            ],
        ),
        compiler_params=pltpu.CompilerParams(
            dimension_semantics=("parallel", "arbitrary")),
    )(ax, wh_fused)


def clstm_forward(x, params):
    """CLSTM.forward. x: (B, T, Cin, H, W) (PyTorch NCHW per step).
    params: list of (w_hwio, b_vec) per layer. Returns a list of per-step
    outputs of the last layer, each (B, HID_last, H, W)."""
    B, T, Cin, H, W = x.shape
    seq = jnp.transpose(x, (0, 1, 3, 4, 2)).reshape(B, T, H * W, Cin)
    for (w_hwio, b_vec) in params:
        seq = clstm_layer_pallas(seq, w_hwio, b_vec, H, W)
    HID = params[-1][1].shape[0] // 4
    out = jnp.transpose(seq.reshape(B, T, H, W, HID), (0, 1, 4, 2, 3))
    return [out[:, t] for t in range(T)]


# ---------------- pure-JAX reference (for correctness check) ----------------
def _ref_cell(x_nhwc, h, c, w_hwio, b_vec):
    comb = jnp.concatenate([x_nhwc, h], axis=-1)
    A = jax.lax.conv_general_dilated(
        comb, w_hwio, (1, 1), 'SAME',
        dimension_numbers=('NHWC', 'HWIO', 'NHWC')) + b_vec
    HID = b_vec.shape[0] // 4
    Ai, Af, Ao, Ag = (A[..., i * HID:(i + 1) * HID] for i in range(4))
    i_g = jax.nn.sigmoid(Ai)
    f_g = jax.nn.sigmoid(Af)
    o_g = jax.nn.sigmoid(Ao)
    g_g = jnp.tanh(Ag)
    c_new = c * f_g + i_g * g_g
    h_new = o_g * jnp.tanh(c_new)
    return h_new, c_new


def clstm_forward_ref(x, params):
    B, T, Cin, H, W = x.shape
    hids = [p[1].shape[0] // 4 for p in params]
    hs = [jnp.zeros((B, H, W, hd), jnp.float32) for hd in hids]
    cs = [jnp.zeros((B, H, W, hd), jnp.float32) for hd in hids]
    outputs = []
    for t in range(T):
        inp = jnp.transpose(x[:, t], (0, 2, 3, 1))
        for l, (w_hwio, b_vec) in enumerate(params):
            h_new, c_new = _ref_cell(inp, hs[l], cs[l], w_hwio, b_vec)
            hs[l], cs[l] = h_new, c_new
            inp = h_new
        outputs.append(jnp.transpose(inp, (0, 3, 1, 2)))
    return outputs


if __name__ == "__main__":
    B, T, Cin, H, W = 2, 8, 4, 16, 16
    hidden_channels = [32, 32]      # must be even (module asserts)
    kernel_size = 5

    key = jax.random.PRNGKey(0)
    kx, key = jax.random.split(key)
    x = jax.random.normal(kx, (B, T, Cin, H, W), dtype=jnp.float32)

    # Deterministic parameter init (shapes per nn.Conv2d in CLSTMCell.__init__).
    params = []
    in_chans = [Cin] + hidden_channels
    for l, hid in enumerate(hidden_channels):
        cin_total = in_chans[l] + hid
        kw_, kb_, key = jax.random.split(key, 3)
        fan_in = cin_total * kernel_size * kernel_size
        scale = 1.0 / jnp.sqrt(jnp.float32(fan_in))
        # PyTorch OIHW weight, then transpose to HWIO for the kernel/reference.
        w_oihw = scale * jax.random.normal(
            kw_, (4 * hid, cin_total, kernel_size, kernel_size), dtype=jnp.float32)
        b_vec = scale * jax.random.normal(kb_, (4 * hid,), dtype=jnp.float32)
        w_hwio = jnp.transpose(w_oihw, (2, 3, 1, 0))
        params.append((w_hwio, b_vec))

    fwd = jax.jit(clstm_forward)
    outs = fwd(x, params)
    outs = jax.block_until_ready(outs)

    refs = clstm_forward_ref(x, params)
    for o, r in zip(outs, refs):
        assert o.shape == (B, hidden_channels[-1], H, W)
        assert jnp.allclose(o, r, atol=5e-4, rtol=5e-4), \
            f"max abs diff {jnp.max(jnp.abs(o - r))}"

    print("KERNEL_OK")
</pallas_src>

<mosaic_0001>
module attributes {stable_mosaic.version = 11 : i64} {
  func.func @_clstm_layer_kernel(%arg0: i32, %arg1: i32, %arg2: memref<1x1x256x128xf32, #tpu.memory_space<vmem>>, %arg3: memref<800x128xf32, #tpu.memory_space<vmem>>, %arg4: memref<1x1x256x32xf32, #tpu.memory_space<vmem>>, %arg5: memref<20x20x32xf32, #tpu.memory_space<vmem>>, %arg6: memref<256x32xf32, #tpu.memory_space<vmem>>, %arg7: memref<256x800xf32, #tpu.memory_space<vmem>>) attributes {dimension_semantics = [#tpu.dimension_semantics<parallel>, #tpu.dimension_semantics<arbitrary>], iteration_bounds = array<i64: 2, 8>, scalar_prefetch = 0 : i64, scratch_operands = 3 : i64, tpu.core_type = #tpu.core_type<tc>, window_params = [{transform_indices = @transform_0, window_bounds = array<i64: 1, 1, 256, 128>}, {pipeline_mode = #tpu.pipeline_mode<synchronous>, transform_indices = @transform_1, window_bounds = array<i64: 800, 128>}, {transform_indices = @transform_2, window_bounds = array<i64: 1, 1, 256, 32>}]} {
    %c0_i32 = arith.constant 0 : i32
    %0 = arith.cmpi eq, %arg1, %c0_i32 : i32
    %1 = arith.extui %0 : i1 to i32
    %c0_i32_0 = arith.constant 0 : i32
    %2 = arith.cmpi ne, %1, %c0_i32_0 : i32
    scf.if %2 {
      %cst_117 = arith.constant 0.000000e+00 : f32
      %106 = vector.broadcast %cst_117 : f32 to vector<20x20x32xf32>
      %c0_118 = arith.constant 0 : index
      %c0_119 = arith.constant 0 : index
      %c0_120 = arith.constant 0 : index
      %107 = vector.load %arg5[%c0_118, %c0_119, %c0_120] : memref<20x20x32xf32, #tpu.memory_space<vmem>>, vector<20x20x32xf32>
      tpu.vector_store %arg5[%c0_118, %c0_119, %c0_120], %106 {strides = array<i32>} : memref<20x20x32xf32, #tpu.memory_space<vmem>>, vector<20x20x32xf32>,
      %cst_121 = arith.constant 0.000000e+00 : f32
      %108 = vector.broadcast %cst_121 : f32 to vector<256x32xf32>
      %c0_122 = arith.constant 0 : index
      %c0_123 = arith.constant 0 : index
      %109 = vector.load %arg6[%c0_122, %c0_123] : memref<256x32xf32, #tpu.memory_space<vmem>>, vector<256x32xf32>
      tpu.vector_store %arg6[%c0_122, %c0_123], %108 {strides = array<i32>} : memref<256x32xf32, #tpu.memory_space<vmem>>, vector<256x32xf32>,
    } else {
    }
    %c0 = arith.constant 0 : index
    %c0_1 = arith.constant 0 : index
    %c0_2 = arith.constant 0 : index
    %3 = vector.load %arg5[%c0, %c0_1, %c0_2] : memref<20x20x32xf32, #tpu.memory_space<vmem>>, vector<16x16x32xf32>
    %4 = vector.shape_cast %3 : vector<16x16x32xf32> to vector<256x32xf32>
    %c0_3 = arith.constant 0 : index
    %c0_4 = arith.constant 0 : index
    %5 = vector.load %arg7[%c0_3, %c0_4] : memref<256x800xf32, #tpu.memory_space<vmem>>, vector<256x32xf32>
    tpu.vector_store %arg7[%c0_3, %c0_4], %4 {strides = array<i32>} : memref<256x800xf32, #tpu.memory_space<vmem>>, vector<256x32xf32>,
    %c0_5 = arith.constant 0 : index
    %c1 = arith.constant 1 : index
    %c0_6 = arith.constant 0 : index
    %6 = vector.load %arg5[%c0_5, %c1, %c0_6] : memref<20x20x32xf32, #tpu.memory_space<vmem>>, vector<16x16x32xf32>
    %7 = vector.shape_cast %6 : vector<16x16x32xf32> to vector<256x32xf32>
    %c0_7 = arith.constant 0 : index
    %c32 = arith.constant 32 : index
    %8 = vector.load %arg7[%c0_7, %c32] : memref<256x800xf32, #tpu.memory_space<vmem>>, vector<256x32xf32>
    tpu.vector_store %arg7[%c0_7, %c32], %7 {strides = array<i32>} : memref<256x800xf32, #tpu.memory_space<vmem>>, vector<256x32xf32>,
    %c0_8 = arith.constant 0 : index
    %c2 = arith.constant 2 : index
    %c0_9 = arith.constant 0 : index
    %9 = vector.load %arg5[%c0_8, %c2, %c0_9] : memref<20x20x32xf32, #tpu.memory_space<vmem>>, vector<16x16x32xf32>
    %10 = vector.shape_cast %9 : vector<16x16x32xf32> to vector<256x32xf32>
    %c0_10 = arith.constant 0 : index
    %c64 = arith.constant 64 : index
    %11 = vector.load %arg7[%c0_10, %c64] : memref<256x800xf32, #tpu.memory_space<vmem>>, vector<256x32xf32>
    tpu.vector_store %arg7[%c0_10, %c64], %10 {strides = array<i32>} : memref<256x800xf32, #tpu.memory_space<vmem>>, vector<256x32xf32>,
    %c0_11 = arith.constant 0 : index
    %c3 = arith.constant 3 : index
    %c0_12 = arith.constant 0 : index
    %12 = vector.load %arg5[%c0_11, %c3, %c0_12] : memref<20x20x32xf32, #tpu.memory_space<vmem>>, vector<16x16x32xf32>
    %13 = vector.shape_cast %12 : vector<16x16x32xf32> to vector<256x32xf32>
    %c0_13 = arith.constant 0 : index
    %c96 = arith.constant 96 : index
    %14 = vector.load %arg7[%c0_13, %c96] : memref<256x800xf32, #tpu.memory_space<vmem>>, vector<256x32xf32>
    tpu.vector_store %arg7[%c0_13, %c96], %13 {strides = array<i32>} : memref<256x800xf32, #tpu.memory_space<vmem>>, vector<256x32xf32>,
    %c0_14 = arith.constant 0 : index
    %c4 = arith.constant 4 : index
    %c0_15 = arith.constant 0 : index
    %15 = vector.load %arg5[%c0_14, %c4, %c0_15] : memref<20x20x32xf32, #tpu.memory_space<vmem>>, vector<16x16x32xf32>
    %16 = vector.shape_cast %15 : vector<16x16x32xf32> to vector<256x32xf32>
    %c0_16 = arith.constant 0 : index
    %c128 = arith.constant 128 : index
    %17 = vector.load %arg7[%c0_16, %c128] : memref<256x800xf32, #tpu.memory_space<vmem>>, vector<256x32xf32>
    tpu.vector_store %arg7[%c0_16, %c128], %16 {strides = array<i32>} : memref<256x800xf32, #tpu.memory_space<vmem>>, vector<256x32xf32>,
    %c1_17 = arith.constant 1 : index
    %c0_18 = arith.constant 0 : index
    %c0_19 = arith.constant 0 : index
    %18 = vector.load %arg5[%c1_17, %c0_18, %c0_19] : memref<20x20x32xf32, #tpu.memory_space<vmem>>, vector<16x16x32xf32>
    %19 = vector.shape_cast %18 : vector<16x16x32xf32> to vector<256x32xf32>
    %c0_20 = arith.constant 0 : index
    %c160 = arith.constant 160 : index
    %20 = vector.load %arg7[%c0_20, %c160] : memref<256x800xf32, #tpu.memory_space<vmem>>, vector<256x32xf32>
    tpu.vector_store %arg7[%c0_20, %c160], %19 {strides = array<i32>} : memref<256x800xf32, #tpu.memory_space<vmem>>, vector<256x32xf32>,
    %c1_21 = arith.constant 1 : index
    %c1_22 = arith.constant 1 : index
    %c0_23 = arith.constant 0 : index
    %21 = vector.load %arg5[%c1_21, %c1_22, %c0_23] : memref<20x20x32xf32, #tpu.memory_space<vmem>>, vector<16x16x32xf32>
    %22 = vector.shape_cast %21 : vector<16x16x32xf32> to vector<256x32xf32>
    %c0_24 = arith.constant 0 : index
    %c192 = arith.constant 192 : index
    %23 = vector.load %arg7[%c0_24, %c192] : memref<256x800xf32, #tpu.memory_space<vmem>>, vector<256x32xf32>
    tpu.vector_store %arg7[%c0_24, %c192], %22 {strides = array<i32>} : memref<256x800xf32, #tpu.memory_space<vmem>>, vector<256x32xf32>,
    %c1_25 = arith.constant 1 : index
    %c2_26 = arith.constant 2 : index
    %c0_27 = arith.constant 0 : index
    %24 = vector.load %arg5[%c1_25, %c2_26, %c0_27] : memref<20x20x32xf32, #tpu.memory_space<vmem>>, vector<16x16x32xf32>
    %25 = vector.shape_cast %24 : vector<16x16x32xf32> to vector<256x32xf32>
    %c0_28 = arith.constant 0 : index
    %c224 = arith.constant 224 : index
    %26 = vector.load %arg7[%c0_28, %c224] : memref<256x800xf32, #tpu.memory_space<vmem>>, vector<256x32xf32>
    tpu.vector_store %arg7[%c0_28, %c224], %25 {strides = array<i32>} : memref<256x800xf32, #tpu.memory_space<vmem>>, vector<256x32xf32>,
    %c1_29 = arith.constant 1 : index
    %c3_30 = arith.constant 3 : index
    %c0_31 = arith.constant 0 : index
    %27 = vector.load %arg5[%c1_29, %c3_30, %c0_31] : memref<20x20x32xf32, #tpu.memory_space<vmem>>, vector<16x16x32xf32>
    %28 = vector.shape_cast %27 : vector<16x16x32xf32> to vector<256x32xf32>
    %c0_32 = arith.constant 0 : index
    %c256 = arith.constant 256 : index
    %29 = vector.load %arg7[%c0_32, %c256] : memref<256x800xf32, #tpu.memory_space<vmem>>, vector<256x32xf32>
    tpu.vector_store %arg7[%c0_32, %c256], %28 {strides = array<i32>} : memref<256x800xf32, #tpu.memory_space<vmem>>, vector<256x32xf32>,
    %c1_33 = arith.constant 1 : index
    %c4_34 = arith.constant 4 : index
    %c0_35 = arith.constant 0 : index
    %30 = vector.load %arg5[%c1_33, %c4_34, %c0_35] : memref<20x20x32xf32, #tpu.memory_space<vmem>>, vector<16x16x32xf32>
    %31 = vector.shape_cast %30 : vector<16x16x32xf32> to vector<256x32xf32>
    %c0_36 = arith.constant 0 : index
    %c288 = arith.constant 288 : index
    %32 = vector.load %arg7[%c0_36, %c288] : memref<256x800xf32, #tpu.memory_space<vmem>>, vector<256x32xf32>
    tpu.vector_store %arg7[%c0_36, %c288], %31 {strides = array<i32>} : memref<256x800xf32, #tpu.memory_space<vmem>>, vector<256x32xf32>,
    %c2_37 = arith.constant 2 : index
    %c0_38 = arith.constant 0 : index
    %c0_39 = arith.constant 0 : index
    %33 = vector.load %arg5[%c2_37, %c0_38, %c0_39] : memref<20x20x32xf32, #tpu.memory_space<vmem>>, vector<16x16x32xf32>
    %34 = vector.shape_cast %33 : vector<16x16x32xf32> to vector<256x32xf32>
    %c0_40 = arith.constant 0 : index
    %c320 = arith.constant 320 : index
    %35 = vector.load %arg7[%c0_40, %c320] : memref<256x800xf32, #tpu.memory_space<vmem>>, vector<256x32xf32>
    tpu.vector_store %arg7[%c0_40, %c320], %34 {strides = array<i32>} : memref<256x800xf32, #tpu.memory_space<vmem>>, vector<256x32xf32>,
    %c2_41 = arith.constant 2 : index
    %c1_42 = arith.constant 1 : index
    %c0_43 = arith.constant 0 : index
    %36 = vector.load %arg5[%c2_41, %c1_42, %c0_43] : memref<20x20x32xf32, #tpu.memory_space<vmem>>, vector<16x16x32xf32>
    %37 = vector.shape_cast %36 : vector<16x16x32xf32> to vector<256x32xf32>
    %c0_44 = arith.constant 0 : index
    %c352 = arith.constant 352 : index
    %38 = vector.load %arg7[%c0_44, %c352] : memref<256x800xf32, #tpu.memory_space<vmem>>, vector<256x32xf32>
    tpu.vector_store %arg7[%c0_44, %c352], %37 {strides = array<i32>} : memref<256x800xf32, #tpu.memory_space<vmem>>, vector<256x32xf32>,
    %c2_45 = arith.constant 2 : index
    %c2_46 = arith.constant 2 : index
    %c0_47 = arith.constant 0 : index
    %39 = vector.load %arg5[%c2_45, %c2_46, %c0_47] : memref<20x20x32xf32, #tpu.memory_space<vmem>>, vector<16x16x32xf32>
    %40 = vector.shape_cast %39 : vector<16x16x32xf32> to vector<256x32xf32>
    %c0_48 = arith.constant 0 : index
    %c384 = arith.constant 384 : index
    %41 = vector.load %arg7[%c0_48, %c384] : memref<256x800xf32, #tpu.memory_space<vmem>>, vector<256x32xf32>
    tpu.vector_store %arg7[%c0_48, %c384], %40 {strides = array<i32>} : memref<256x800xf32, #tpu.memory_space<vmem>>, vector<256x32xf32>,
    %c2_49 = arith.constant 2 : index
    %c3_50 = arith.constant 3 : index
    %c0_51 = arith.constant 0 : index
    %42 = vector.load %arg5[%c2_49, %c3_50, %c0_51] : memref<20x20x32xf32, #tpu.memory_space<vmem>>, vector<16x16x32xf32>
    %43 = vector.shape_cast %42 : vector<16x16x32xf32> to vector<256x32xf32>
    %c0_52 = arith.constant 0 : index
    %c416 = arith.constant 416 : index
    %44 = vector.load %arg7[%c0_52, %c416] : memref<256x800xf32, #tpu.memory_space<vmem>>, vector<256x32xf32>
    tpu.vector_store %arg7[%c0_52, %c416], %43 {strides = array<i32>} : memref<256x800xf32, #tpu.memory_space<vmem>>, vector<256x32xf32>,
    %c2_53 = arith.constant 2 : index
    %c4_54 = arith.constant 4 : index
    %c0_55 = arith.constant 0 : index
    %45 = vector.load %arg5[%c2_53, %c4_54, %c0_55] : memref<20x20x32xf32, #tpu.memory_space<vmem>>, vector<16x16x32xf32>
    %46 = vector.shape_cast %45 : vector<16x16x32xf32> to vector<256x32xf32>
    %c0_56 = arith.constant 0 : index
    %c448 = arith.constant 448 : index
    %47 = vector.load %arg7[%c0_56, %c448] : memref<256x800xf32, #tpu.memory_space<vmem>>, vector<256x32xf32>
    tpu.vector_store %arg7[%c0_56, %c448], %46 {strides = array<i32>} : memref<256x800xf32, #tpu.memory_space<vmem>>, vector<256x32xf32>,
    %c3_57 = arith.constant 3 : index
    %c0_58 = arith.constant 0 : index
    %c0_59 = arith.constant 0 : index
    %48 = vector.load %arg5[%c3_57, %c0_58, %c0_59] : memref<20x20x32xf32, #tpu.memory_space<vmem>>, vector<16x16x32xf32>
    %49 = vector.shape_cast %48 : vector<16x16x32xf32> to vector<256x32xf32>
    %c0_60 = arith.constant 0 : index
    %c480 = arith.constant 480 : index
    %50 = vector.load %arg7[%c0_60, %c480] : memref<256x800xf32, #tpu.memory_space<vmem>>, vector<256x32xf32>
    tpu.vector_store %arg7[%c0_60, %c480], %49 {strides = array<i32>} : memref<256x800xf32, #tpu.memory_space<vmem>>, vector<256x32xf32>,
    %c3_61 = arith.constant 3 : index
    %c1_62 = arith.constant 1 : index
    %c0_63 = arith.constant 0 : index
    %51 = vector.load %arg5[%c3_61, %c1_62, %c0_63] : memref<20x20x32xf32, #tpu.memory_space<vmem>>, vector<16x16x32xf32>
    %52 = vector.shape_cast %51 : vector<16x16x32xf32> to vector<256x32xf32>
    %c0_64 = arith.constant 0 : index
    %c512 = arith.constant 512 : index
    %53 = vector.load %arg7[%c0_64, %c512] : memref<256x800xf32, #tpu.memory_space<vmem>>, vector<256x32xf32>
    tpu.vector_store %arg7[%c0_64, %c512], %52 {strides = array<i32>} : memref<256x800xf32, #tpu.memory_space<vmem>>, vector<256x32xf32>,
    %c3_65 = arith.constant 3 : index
    %c2_66 = arith.constant 2 : index
    %c0_67 = arith.constant 0 : index
    %54 = vector.load %arg5[%c3_65, %c2_66, %c0_67] : memref<20x20x32xf32, #tpu.memory_space<vmem>>, vector<16x16x32xf32>
    %55 = vector.shape_cast %54 : vector<16x16x32xf32> to vector<256x32xf32>
    %c0_68 = arith.constant 0 : index
    %c544 = arith.constant 544 : index
    %56 = vector.load %arg7[%c0_68, %c544] : memref<256x800xf32, #tpu.memory_space<vmem>>, vector<256x32xf32>
    tpu.vector_store %arg7[%c0_68, %c544], %55 {strides = array<i32>} : memref<256x800xf32, #tpu.memory_space<vmem>>, vector<256x32xf32>,
    %c3_69 = arith.constant 3 : index
    %c3_70 = arith.constant 3 : index
    %c0_71 = arith.constant 0 : index
    %57 = vector.load %arg5[%c3_69, %c3_70, %c0_71] : memref<20x20x32xf32, #tpu.memory_space<vmem>>, vector<16x16x32xf32>
    %58 = vector.shape_cast %57 : vector<16x16x32xf32> to vector<256x32xf32>
    %c0_72 = arith.constant 0 : index
    %c576 = arith.constant 576 : index
    %59 = vector.load %arg7[%c0_72, %c576] : memref<256x800xf32, #tpu.memory_space<vmem>>, vector<256x32xf32>
    tpu.vector_store %arg7[%c0_72, %c576], %58 {strides = array<i32>} : memref<256x800xf32, #tpu.memory_space<vmem>>, vector<256x32xf32>,
    %c3_73 = arith.constant 3 : index
    %c4_74 = arith.constant 4 : index
    %c0_75 = arith.constant 0 : index
    %60 = vector.load %arg5[%c3_73, %c4_74, %c0_75] : memref<20x20x32xf32, #tpu.memory_space<vmem>>, vector<16x16x32xf32>
    %61 = vector.shape_cast %60 : vector<16x16x32xf32> to vector<256x32xf32>
    %c0_76 = arith.constant 0 : index
    %c608 = arith.constant 608 : index
    %62 = vector.load %arg7[%c0_76, %c608] : memref<256x800xf32, #tpu.memory_space<vmem>>, vector<256x32xf32>
    tpu.vector_store %arg7[%c0_76, %c608], %61 {strides = array<i32>} : memref<256x800xf32, #tpu.memory_space<vmem>>, vector<256x32xf32>,
    %c4_77 = arith.constant 4 : index
    %c0_78 = arith.constant 0 : index
    %c0_79 = arith.constant 0 : index
    %63 = vector.load %arg5[%c4_77, %c0_78, %c0_79] : memref<20x20x32xf32, #tpu.memory_space<vmem>>, vector<16x16x32xf32>
    %64 = vector.shape_cast %63 : vector<16x16x32xf32> to vector<256x32xf32>
    %c0_80 = arith.constant 0 : index
    %c640 = arith.constant 640 : index
    %65 = vector.load %arg7[%c0_80, %c640] : memref<256x800xf32, #tpu.memory_space<vmem>>, vector<256x32xf32>
    tpu.vector_store %arg7[%c0_80, %c640], %64 {strides = array<i32>} : memref<256x800xf32, #tpu.memory_space<vmem>>, vector<256x32xf32>,
    %c4_81 = arith.constant 4 : index
    %c1_82 = arith.constant 1 : index
    %c0_83 = arith.constant 0 : index
    %66 = vector.load %arg5[%c4_81, %c1_82, %c0_83] : memref<20x20x32xf32, #tpu.memory_space<vmem>>, vector<16x16x32xf32>
    %67 = vector.shape_cast %66 : vector<16x16x32xf32> to vector<256x32xf32>
    %c0_84 = arith.constant 0 : index
    %c672 = arith.constant 672 : index
    %68 = vector.load %arg7[%c0_84, %c672] : memref<256x800xf32, #tpu.memory_space<vmem>>, vector<256x32xf32>
    tpu.vector_store %arg7[%c0_84, %c672], %67 {strides = array<i32>} : memref<256x800xf32, #tpu.memory_space<vmem>>, vector<256x32xf32>,
    %c4_85 = arith.constant 4 : index
    %c2_86 = arith.constant 2 : index
    %c0_87 = arith.constant 0 : index
    %69 = vector.load %arg5[%c4_85, %c2_86, %c0_87] : memref<20x20x32xf32, #tpu.memory_space<vmem>>, vector<16x16x32xf32>
    %70 = vector.shape_cast %69 : vector<16x16x32xf32> to vector<256x32xf32>
    %c0_88 = arith.constant 0 : index
    %c704 = arith.constant 704 : index
    %71 = vector.load %arg7[%c0_88, %c704] : memref<256x800xf32, #tpu.memory_space<vmem>>, vector<256x32xf32>
    tpu.vector_store %arg7[%c0_88, %c704], %70 {strides = array<i32>} : memref<256x800xf32, #tpu.memory_space<vmem>>, vector<256x32xf32>,
    %c4_89 = arith.constant 4 : index
    %c3_90 = arith.constant 3 : index
    %c0_91 = arith.constant 0 : index
    %72 = vector.load %arg5[%c4_89, %c3_90, %c0_91] : memref<20x20x32xf32, #tpu.memory_space<vmem>>, vector<16x16x32xf32>
    %73 = vector.shape_cast %72 : vector<16x16x32xf32> to vector<256x32xf32>
    %c0_92 = arith.constant 0 : index
    %c736 = arith.constant 736 : index
    %74 = vector.load %arg7[%c0_92, %c736] : memref<256x800xf32, #tpu.memory_space<vmem>>, vector<256x32xf32>
    tpu.vector_store %arg7[%c0_92, %c736], %73 {strides = array<i32>} : memref<256x800xf32, #tpu.memory_space<vmem>>, vector<256x32xf32>,
    %c4_93 = arith.constant 4 : index
    %c4_94 = arith.constant 4 : index
    %c0_95 = arith.constant 0 : index
    %75 = vector.load %arg5[%c4_93, %c4_94, %c0_95] : memref<20x20x32xf32, #tpu.memory_space<vmem>>, vector<16x16x32xf32>
    %76 = vector.shape_cast %75 : vector<16x16x32xf32> to vector<256x32xf32>
    %c0_96 = arith.constant 0 : index
    %c768 = arith.constant 768 : index
    %77 = vector.load %arg7[%c0_96, %c768] : memref<256x800xf32, #tpu.memory_space<vmem>>, vector<256x32xf32>
    tpu.vector_store %arg7[%c0_96, %c768], %76 {strides = array<i32>} : memref<256x800xf32, #tpu.memory_space<vmem>>, vector<256x32xf32>,
    %c0_97 = arith.constant 0 : index
    %c0_98 = arith.constant 0 : index
    %c0_99 = arith.constant 0 : index
    %c0_100 = arith.constant 0 : index
    %78 = vector.load %arg2[%c0_97, %c0_98, %c0_99, %c0_100] : memref<1x1x256x128xf32, #tpu.memory_space<vmem>>, vector<1x1x256x128xf32>
    %79 = vector.shape_cast %78 : vector<1x1x256x128xf32> to vector<256x128xf32>
    %c0_101 = arith.constant 0 : index
    %c0_102 = arith.constant 0 : index
    %80 = vector.load %arg7[%c0_101, %c0_102] : memref<256x800xf32, #tpu.memory_space<vmem>>, vector<256x800xf32>
    %c0_103 = arith.constant 0 : index
    %c0_104 = arith.constant 0 : index
    %81 = vector.load %arg3[%c0_103, %c0_104] : memref<800x128xf32, #tpu.memory_space<vmem>>, vector<800x128xf32>
    %cst = arith.constant dense<0.000000e+00> : vector<256x128xf32>
    %82 = tpu.matmul %80, %81, %cst {dimension_numbers = #tpu.dot_dimension_numbers<[1], [0], [0], [1], [0, 0, 1, 1], [], []>} : vector<256x800xf32>, vector<800x128xf32>, vector<256x128xf32> -> vector<256x128xf32>
    %83 = arith.addf %79, %82 : vector<256x128xf32>
    %84 = arith.negf %83 : vector<256x128xf32>
    %85 = math.exp %84 : vector<256x128xf32>
    %cst_105 = arith.constant 1.000000e+00 : f32
    %86 = vector.broadcast %cst_105 : f32 to vector<256x128xf32>
    %87 = arith.addf %86, %85 : vector<256x128xf32>
    %88 = arith.divf %86, %87 : vector<256x128xf32>
    %89 = vector.extract_strided_slice %88 {offsets = [0, 0], sizes = [256, 32], strides = [1, 1]} : vector<256x128xf32> to vector<256x32xf32>
    %90 = vector.extract_strided_slice %88 {offsets = [0, 32], sizes = [256, 32], strides = [1, 1]} : vector<256x128xf32> to vector<256x32xf32>
    %91 = vector.extract_strided_slice %88 {offsets = [0, 64], sizes = [256, 32], strides = [1, 1]} : vector<256x128xf32> to vector<256x32xf32>
    %92 = vector.extract_strided_slice %83 {offsets = [0, 96], sizes = [256, 32], strides = [1, 1]} : vector<256x128xf32> to vector<256x32xf32>
    %93 = math.tanh %92 : vector<256x32xf32>
    %c0_106 = arith.constant 0 : index
    %c0_107 = arith.constant 0 : index
    %94 = vector.load %arg6[%c0_106, %c0_107] : memref<256x32xf32, #tpu.memory_space<vmem>>, vector<256x32xf32>
    %95 = arith.mulf %94, %90 : vector<256x32xf32>
    %96 = arith.mulf %89, %93 : vector<256x32xf32>
    %97 = arith.addf %95, %96 : vector<256x32xf32>
    %98 = math.tanh %97 : vector<256x32xf32>
    %99 = arith.mulf %91, %98 : vector<256x32xf32>
    %c0_108 = arith.constant 0 : index
    %c0_109 = arith.constant 0 : index
    %100 = vector.load %arg6[%c0_108, %c0_109] : memref<256x32xf32, #tpu.memory_space<vmem>>, vector<256x32xf32>
    tpu.vector_store %arg6[%c0_108, %c0_109], %97 {strides = array<i32>} : memref<256x32xf32, #tpu.memory_space<vmem>>, vector<256x32xf32>,
    %101 = vector.shape_cast %99 : vector<256x32xf32> to vector<16x16x32xf32>
    %c2_110 = arith.constant 2 : index
    %c2_111 = arith.constant 2 : index
    %c0_112 = arith.constant 0 : index
    %102 = vector.load %arg5[%c2_110, %c2_111, %c0_112] : memref<20x20x32xf32, #tpu.memory_space<vmem>>, vector<16x16x32xf32>
    tpu.vector_store %arg5[%c2_110, %c2_111, %c0_112], %101 {strides = array<i32>} : memref<20x20x32xf32, #tpu.memory_space<vmem>>, vector<16x16x32xf32>,
    %c0_113 = arith.constant 0 : index
    %c0_114 = arith.constant 0 : index
    %c0_115 = arith.constant 0 : index
    %c0_116 = arith.constant 0 : index
    %103 = vector.load %arg4[%c0_113, %c0_114, %c0_115, %c0_116] : memref<1x1x256x32xf32, #tpu.memory_space<vmem>>, vector<1x1x256x32xf32>
    %104 = vector.shape_cast %103 : vector<1x1x256x32xf32> to vector<256x32xf32>
    %105 = vector.shape_cast %99 : vector<256x32xf32> to vector<1x1x256x32xf32>
    tpu.vector_store %arg4[%c0_113, %c0_114, %c0_115, %c0_116], %105 {strides = array<i32>} : memref<1x1x256x32xf32, #tpu.memory_space<vmem>>, vector<1x1x256x32xf32>,
    return
  }
  func.func @transform_0(%arg0: i32, %arg1: i32) -> (i32, i32, i32, i32) {
    %c0_i32 = arith.constant 0 : i32
    %c0_i32_0 = arith.constant 0 : i32
    %c0_i32_1 = arith.constant 0 : i32
    return %arg0, %arg1, %c0_i32, %c0_i32_0 : i32, i32, i32, i32
  }
  func.func @transform_1(%arg0: i32, %arg1: i32) -> (i32, i32) {
    %c0_i32 = arith.constant 0 : i32
    %c0_i32_0 = arith.constant 0 : i32
    %c0_i32_1 = arith.constant 0 : i32
    return %c0_i32, %c0_i32_0 : i32, i32
  }
  func.func @transform_2(%arg0: i32, %arg1: i32) -> (i32, i32, i32, i32) {
    %c0_i32 = arith.constant 0 : i32
    %c0_i32_0 = arith.constant 0 : i32
    %c0_i32_1 = arith.constant 0 : i32
    return %arg0, %arg1, %c0_i32, %c0_i32_0 : i32, i32, i32, i32
  }
}

</mosaic_0001>

<bundles_post_ra>
// kernel: clstm_forward.2
= control target key start
LH: loop header
LB: loop body
LE: loop exit
PB: predicated region body
PF: predicated region fallthrough
CT: control target
= control target key end

     0   :  { %s7485_s9 = smov 0   ;;  %s7487_s10 = smov 0   ;;  %s11423_s0 = inlined_call_operand.vmem [shape: f32[2,8,256,128], index: 0, kind: input, shape index: {}]   ;;  %s11424_s1 = inlined_call_operand.vmem [shape: f32[800,128], index: 1, kind: input, shape index: {}]   ;;  %s11425_s2 = inlined_call_operand.vmem [shape: f32[2,8,256,32], index: 2, kind: output, shape index: {}]  }
   0x1   :  { %s7489_s11 = smov 0   ;;  %s7491_s12 = smov 0  }
   0x2   :  { %s7493_s13 = smov 0  }
   0x3 LB: > { %s21_s14 = sadd.s32 1, %s7456_s11  ;;  %s24_s15 = sadd.s32 1, %s7460_s12  ;;  %s7464_s13 = sphi %s7493_s13, %s12_s13   ;;  %s7460_s12 = sphi %s7491_s12, %s11619_s12   ;;  %s7456_s11 = sphi %s7489_s11, %s11618_s11   ;;  %s7452_s10 = sphi %s7487_s10, %s11617_s10   ;;  %s7448_s9 = sphi %s7485_s9, %s11616_s9  }
   0x4   : > { %p22_p0 = scmp.ge.s32.totalorder %s21_s14, 8  ;;  %p7004_p1 = scmp.ge.s32.totalorder %s7464_s13, 1 }
   0x5   : > { %p132_p2 = scmp.lt.s32.totalorder %s7464_s13, 17 }
   0x6   : > { %s11621_s14 = smov (%p22_p0, %s21_s14), 0  ;;  %s11623_s15 = smov (!%p22_p0, %s24_s15), %s7460_s12 }
   0x7   : > { %p133_p3 = pnand %p7004_p1, %p132_p2  ;;  %p26_p4 = scmp.ge.s32.totalorder %s11623_s15, 2 }
   0x9   : > { %s11625_s15 = smov (%p26_p4, %s11623_s15), 0  ;;  %136 = sbr.rel (%p133_p3) target bundleno = 2427 (0x97b), region = 28 }
   0xe   : > { %p162_p5 = scmp.lt.s32.totalorder %s7452_s10, 1  ;;  %p164_p6 = scmp.lt.s32.totalorder %s7448_s9, 7 }
   0xf   : > { %p7011_p7 = scmp.ne.s32.totalorder %s7448_s9, 0 }
  0x10   : > { %s11627_s10 = smov (!%p162_p5, %s7452_s10), 1 }
  0x11   : > { %s165_s16 = scalar_select %p164_p6, %s7448_s9, 7 }
  0x12   : > { %s7006_s17 = sshll.u32 %s11627_s10, 8  ;;  %183 = sbr.rel (%p7011_p7) target bundleno = 116 (0x74), region = 32 }
  0x13   : > { %s7005_s18 = sshll.u32 %s165_s16, 5 }
  0x14   : > { %s168_s19 = sadd.s32 %s7006_s17, %s7005_s18 }
  0x15   : > { %s7007_s20 = sshll.u32 %s168_s19, 3 }
  0x16   : > { %s7518_s23 = scalar_lea.vmem %s11423_s0, %s7007_s20  ;;  %s7523_s26 = scalar_lea.vmem %s11425_s2, %s7007_s20 }
  0x17   : > { %vm184_vm0 = vcmask 261120   ;;  %v7466_v0 = vmov 0.0   ;;  %vm187_vm1 = vcmask 257024  }
  0x18   : > { %185 = vst.msk [vmem:[#allocation2] sm:$0xff] %vm184_vm0, %v7466_v0 }
  0x19   : > { %186 = vst.msk [vmem:[#allocation2 + $0x8] sm:$0xff] %vm184_vm0, %v7466_v0 }
  0x1a   : > { %189 = vst.msk [vmem:[#allocation2 + $0x18] sm:$0xff] %vm184_vm0, %v7466_v0 }
  0x1b   : > { %190 = vst.msk [vmem:[#allocation2 + $0x20] sm:$0xff] %vm184_vm0, %v7466_v0 }
  0x1c   : > { %192 = vst.msk [vmem:[#allocation2 + $0x30] sm:$0xff] %vm184_vm0, %v7466_v0 }
  0x1d   : > { %193 = vst.msk [vmem:[#allocation2 + $0x38] sm:$0xff] %vm184_vm0, %v7466_v0 }
  0x1e   : > { %195 = vst.msk [vmem:[#allocation2 + $0x48] sm:$0xff] %vm184_vm0, %v7466_v0 }
  0x1f   : > { %196 = vst.msk [vmem:[#allocation2 + $0x50] sm:$0xff] %vm184_vm0, %v7466_v0 }
  0x20   : > { %198 = vst.msk [vmem:[#allocation2 + $0x60] sm:$0xff] %vm184_vm0, %v7466_v0 }
  0x21   : > { %199 = vst.msk [vmem:[#allocation2 + $0x68] sm:$0xff] %vm184_vm0, %v7466_v0 }
  0x22   : > { %201 = vst.msk [vmem:[#allocation2 + $0x78] sm:$0xff] %vm184_vm0, %v7466_v0 }
  0x23   : > { %202 = vst.msk [vmem:[#allocation2 + $0x80] sm:$0xff] %vm184_vm0, %v7466_v0 }
  0x24   : > { %204 = vst.msk [vmem:[#allocation2 + $0x90] sm:$0xff] %vm184_vm0, %v7466_v0 }
  0x25   : > { %205 = vst.msk [vmem:[#allocation2 + $0x98] sm:$0xff] %vm184_vm0, %v7466_v0 }
  0x26   : > { %207 = vst.msk [vmem:[#allocation2 + $0xa8] sm:$0xff] %vm184_vm0, %v7466_v0 }
  0x27   : > { %208 = vst.msk [vmem:[#allocation2 + $0xb0] sm:$0xff] %vm184_vm0, %v7466_v0 }
  0x28   : > { %210 = vst.msk [vmem:[#allocation2 + $0xc0] sm:$0xff] %vm184_vm0, %v7466_v0 }
  0x29   : > { %211 = vst.msk [vmem:[#allocation2 + $0xc8] sm:$0xff] %vm184_vm0, %v7466_v0 }
  0x2a   : > { %213 = vst.msk [vmem:[#allocation2 + $0xd8] sm:$0xff] %vm184_vm0, %v7466_v0 }
  0x2b   : > { %214 = vst.msk [vmem:[#allocation2 + $0xe0] sm:$0xff] %vm184_vm0, %v7466_v0 }
  0x2c   : > { %216 = vst.msk [vmem:[#allocation2 + $0xf0] sm:$0xff] %vm184_vm0, %v7466_v0 }
  0x2d   : > { %217 = vst.msk [vmem:[#allocation2 + $0xf8] sm:$0xff] %vm184_vm0, %v7466_v0 }
  0x2e   : > { %219 = vst.msk [vmem:[#allocation2 + $0x108] sm:$0xff] %vm184_vm0, %v7466_v0 }
  0x2f   : > { %220 = vst.msk [vmem:[#allocation2 + $0x110] sm:$0xff] %vm184_vm0, %v7466_v0 }
  0x30   : > { %222 = vst.msk [vmem:[#allocation2 + $0x120] sm:$0xff] %vm184_vm0, %v7466_v0 }
  0x31   : > { %223 = vst.msk [vmem:[#allocation2 + $0x128] sm:$0xff] %vm184_vm0, %v7466_v0 }
  0x32   : > { %225 = vst.msk [vmem:[#allocation2 + $0x138] sm:$0xff] %vm184_vm0, %v7466_v0 }
  0x33   : > { %226 = vst.msk [vmem:[#allocation2 + $0x140] sm:$0xff] %vm184_vm0, %v7466_v0 }
  0x34   : > { %228 = vst.msk [vmem:[#allocation2 + $0x150] sm:$0xff] %vm184_vm0, %v7466_v0 }
  0x35   : > { %229 = vst.msk [vmem:[#allocation2 + $0x158] sm:$0xff] %vm184_vm0, %v7466_v0 }
  0x36   : > { %231 = vst.msk [vmem:[#allocation2 + $0x168] sm:$0xff] %vm184_vm0, %v7466_v0 }
  0x37   : > { %232 = vst.msk [vmem:[#allocation2 + $0x170] sm:$0xff] %vm184_vm0, %v7466_v0 }
  0x38   : > { %234 = vst.msk [vmem:[#allocation2 + $0x180] sm:$0xff] %vm184_vm0, %v7466_v0 }
  0x39   : > { %235 = vst.msk [vmem:[#allocation2 + $0x188] sm:$0xff] %vm184_vm0, %v7466_v0 }
  0x3a   : > { %237 = vst.msk [vmem:[#allocation2 + $0x198] sm:$0xff] %vm184_vm0, %v7466_v0 }
  0x3b   : > { %238 = vst.msk [vmem:[#allocation2 + $0x1a0] sm:$0xff] %vm184_vm0, %v7466_v0 }
  0x3c   : > { %240 = vst.msk [vmem:[#allocation2 + $0x1b0] sm:$0xff] %vm184_vm0, %v7466_v0 }
  0x3d   : > { %241 = vst.msk [vmem:[#allocation2 + $0x1b8] sm:$0xff] %vm184_vm0, %v7466_v0 }
  0x3e   : > { %243 = vst.msk [vmem:[#allocation2 + $0x1c8] sm:$0xff] %vm184_vm0, %v7466_v0 }
  0x3f   : > { %244 = vst.msk [vmem:[#allocation2 + $0x1d0] sm:$0xff] %vm184_vm0, %v7466_v0 }
  0x40   : > { %246 = vst.msk [vmem:[#allocation3] sm:$0xff] %vm184_vm0, %v7466_v0 }
  0x41   : > { %247 = vst.msk [vmem:[#allocation3 + $0x8] sm:$0xff] %vm184_vm0, %v7466_v0 }
  0x42   : > { %248 = vst.msk [vmem:[#allocation3 + $0x10] sm:$0xff] %vm184_vm0, %v7466_v0 }
  0x43   : > { %249 = vst.msk [vmem:[#allocation3 + $0x18] sm:$0xff] %vm184_vm0, %v7466_v0 }
  0x44   : > { %250 = vst.msk [vmem:[#allocation3 + $0x20] sm:$0xff] %vm184_vm0, %v7466_v0 }
  0x45   : > { %251 = vst.msk [vmem:[#allocation3 + $0x28] sm:$0xff] %vm184_vm0, %v7466_v0 }
  0x46   : > { %252 = vst.msk [vmem:[#allocation3 + $0x30] sm:$0xff] %vm184_vm0, %v7466_v0 }
  0x47   : > { %253 = vst.msk [vmem:[#allocation3 + $0x38] sm:$0xff] %vm184_vm0, %v7466_v0 }
  0x48   : > { %254 = vst.msk [vmem:[#allocation3 + $0x40] sm:$0xff] %vm184_vm0, %v7466_v0 }
  0x49   : > { %255 = vst.msk [vmem:[#allocation3 + $0x48] sm:$0xff] %vm184_vm0, %v7466_v0 }
  0x4a   : > { %256 = vst.msk [vmem:[#allocation3 + $0x50] sm:$0xff] %vm184_vm0, %v7466_v0 }
  0x4b   : > { %257 = vst.msk [vmem:[#allocation3 + $0x58] sm:$0xff] %vm184_vm0, %v7466_v0 }
  0x4c   : > { %258 = vst.msk [vmem:[#allocation3 + $0x60] sm:$0xff] %vm184_vm0, %v7466_v0 }
  0x4d   : > { %259 = vst.msk [vmem:[#allocation3 + $0x68] sm:$0xff] %vm184_vm0, %v7466_v0 }
  0x4e   : > { %260 = vst.msk [vmem:[#allocation3 + $0x70] sm:$0xff] %vm184_vm0, %v7466_v0 }
  0x4f   : > { %261 = vst.msk [vmem:[#allocation3 + $0x78] sm:$0xff] %vm184_vm0, %v7466_v0 }
  0x50   : > { %262 = vst.msk [vmem:[#allocation3 + $0x80] sm:$0xff] %vm184_vm0, %v7466_v0 }
  0x51   : > { %263 = vst.msk [vmem:[#allocation3 + $0x88] sm:$0xff] %vm184_vm0, %v7466_v0 }
  0x52   : > { %264 = vst.msk [vmem:[#allocation3 + $0x90] sm:$0xff] %vm184_vm0, %v7466_v0 }
  0x53   : > { %265 = vst.msk [vmem:[#allocation3 + $0x98] sm:$0xff] %vm184_vm0, %v7466_v0 }
  0x54   : > { %266 = vst.msk [vmem:[#allocation3 + $0xa0] sm:$0xff] %vm184_vm0, %v7466_v0 }
  0x55   : > { %267 = vst.msk [vmem:[#allocation3 + $0xa8] sm:$0xff] %vm184_vm0, %v7466_v0 }
  0x56   : > { %268 = vst.msk [vmem:[#allocation3 + $0xb0] sm:$0xff] %vm184_vm0, %v7466_v0 }
  0x57   : > { %269 = vst.msk [vmem:[#allocation3 + $0xb8] sm:$0xff] %vm184_vm0, %v7466_v0 }
  0x58   : > { %270 = vst.msk [vmem:[#allocation3 + $0xc0] sm:$0xff] %vm184_vm0, %v7466_v0 }
  0x59   : > { %271 = vst.msk [vmem:[#allocation3 + $0xc8] sm:$0xff] %vm184_vm0, %v7466_v0 }
  0x5a   : > { %272 = vst.msk [vmem:[#allocation3 + $0xd0] sm:$0xff] %vm184_vm0, %v7466_v0 }
  0x5b   : > { %273 = vst.msk [vmem:[#allocation3 + $0xd8] sm:$0xff] %vm184_vm0, %v7466_v0 }
  0x5c   : > { %274 = vst.msk [vmem:[#allocation3 + $0xe0] sm:$0xff] %vm184_vm0, %v7466_v0 }
  0x5d   : > { %275 = vst.msk [vmem:[#allocation3 + $0xe8] sm:$0xff] %vm184_vm0, %v7466_v0 }
  0x5e   : > { %276 = vst.msk [vmem:[#allocation3 + $0xf0] sm:$0xff] %vm184_vm0, %v7466_v0 }
  0x5f   : > { %277 = vst.msk [vmem:[#allocation3 + $0xf8] sm:$0xff] %vm184_vm0, %v7466_v0 }
  0x60   : > { %188 = vst.msk [vmem:[#allocation2 + $0x10] sm:$0xf] %vm187_vm1, %v7466_v0 }
  0x61   : > { %191 = vst.msk [vmem:[#allocation2 + $0x28] sm:$0xf] %vm187_vm1, %v7466_v0 }
  0x62   : > { %194 = vst.msk [vmem:[#allocation2 + $0x40] sm:$0xf] %vm187_vm1, %v7466_v0 }
  0x63   : > { %197 = vst.msk [vmem:[#allocation2 + $0x58] sm:$0xf] %vm187_vm1, %v7466_v0 }
  0x64   : > { %200 = vst.msk [vmem:[#allocation2 + $0x70] sm:$0xf] %vm187_vm1, %v7466_v0 }
  0x65   : > { %203 = vst.msk [vmem:[#allocation2 + $0x88] sm:$0xf] %vm187_vm1, %v7466_v0 }
  0x66   : > { %206 = vst.msk [vmem:[#allocation2 + $0xa0] sm:$0xf] %vm187_vm1, %v7466_v0 }
  0x67   : > { %209 = vst.msk [vmem:[#allocation2 + $0xb8] sm:$0xf] %vm187_vm1, %v7466_v0 }
  0x68   : > { %212 = vst.msk [vmem:[#allocation2 + $0xd0] sm:$0xf] %vm187_vm1, %v7466_v0 }
  0x69   : > { %215 = vst.msk [vmem:[#allocation2 + $0xe8] sm:$0xf] %vm187_vm1, %v7466_v0 }
  0x6a   : > { %218 = vst.msk [vmem:[#allocation2 + $0x100] sm:$0xf] %vm187_vm1, %v7466_v0 }
  0x6b   : > { %221 = vst.msk [vmem:[#allocation2 + $0x118] sm:$0xf] %vm187_vm1, %v7466_v0 }
  0x6c   : > { %224 = vst.msk [vmem:[#allocation2 + $0x130] sm:$0xf] %vm187_vm1, %v7466_v0 }
  0x6d   : > { %227 = vst.msk [vmem:[#allocation2 + $0x148] sm:$0xf] %vm187_vm1, %v7466_v0 }
  0x6e   : > { %230 = vst.msk [vmem:[#allocation2 + $0x160] sm:$0xf] %vm187_vm1, %v7466_v0 }
  0x6f   : > { %233 = vst.msk [vmem:[#allocation2 + $0x178] sm:$0xf] %vm187_vm1, %v7466_v0 }
  0x70   : > { %236 = vst.msk [vmem:[#allocation2 + $0x190] sm:$0xf] %vm187_vm1, %v7466_v0 }
  0x71   : > { %239 = vst.msk [vmem:[#allocation2 + $0x1a8] sm:$0xf] %vm187_vm1, %v7466_v0 }
  0x72   : > { %242 = vst.msk [vmem:[#allocation2 + $0x1c0] sm:$0xf] %vm187_vm1, %v7466_v0 }
  0x73   : > { %245 = vst.msk [vmem:[#allocation2 + $0x1d8] sm:$0xf] %vm187_vm1, %v7466_v0 }
  0x74 PF: > { %v345_v1 = vld [vmem:[#allocation2 + $0x19] sm:$0xff]  ;;  %v343_v2 = vld [vmem:[#allocation2 + $0x1] sm:$0xff]  ;;  %s7467_s27 = smov 32   ;;  %v347_v3 = vld [vmem:[#allocation2 + $0x31] sm:$0xff]  ;;  %vm310_vm2 = vcmask 261120   ;;  %s7468_s28 = smov 64  }
  0x75   : > { %411 = vrot.lane.b32.xlu1 %v345_v1, %s7467_s27  ;;  %407 = vrot.lane.b32.xlu0 %v343_v2, %s7467_s27  ;;  %v346_v4 = vld [vmem:[#allocation2 + $0x21] sm:$0xff]  ;;  %v344_v5 = vld [vmem:[#allocation2 + $0x9] sm:$0xff]  ;;  %v348_v6 = vld [vmem:[#allocation2 + $0x39] sm:$0xff]  ;;  %vm503_vm3 = vcmask 523520   ;;  %s7469_s29 = smov 96   ;;  %vm696_vm4 = vcmask 785920  }
  0x76   : > { %415 = vrot.lane.b32.xlu2 %v347_v3, %s7467_s27  ;;  %v350_v7 = vld [vmem:[#allocation2 + $0x51] sm:$0xff]  ;;  %v349_v8 = vld [vmem:[#allocation2 + $0x49] sm:$0xff]  ;;  %v351_v9 = vld [vmem:[#allocation2 + $0x61] sm:$0xff]  ;;  %vm889_vm5 = vcmask 1048320  }
  0x77   : > { %v353_v10 = vld [vmem:[#allocation2 + $0x79] sm:$0xff]  ;;  %v352_v11 = vld [vmem:[#allocation2 + $0x69] sm:$0xff]  ;;  %v354_v12 = vld [vmem:[#allocation2 + $0x81] sm:$0xff] }
  0x78   : > { %v356_v13 = vld [vmem:[#allocation2 + $0x99] sm:$0xff]  ;;  %v355_v14 = vld [vmem:[#allocation2 + $0x91] sm:$0xff]  ;;  %v357_v15 = vld [vmem:[#allocation2 + $0xa9] sm:$0xff] }
  0x79   : > { %v359_v16 = vld [vmem:[#allocation2 + $0xc1] sm:$0xff]  ;;  %v358_v17 = vld [vmem:[#allocation2 + $0xb1] sm:$0xff]  ;;  %v360_v18 = vld [vmem:[#allocation2 + $0xc9] sm:$0xff] }
  0x7a   : > { %v362_v19 = vld [vmem:[#allocation2 + $0xe1] sm:$0xff]  ;;  %v361_v20 = vld [vmem:[#allocation2 + $0xd9] sm:$0xff]  ;;  %v363_v21 = vld [vmem:[#allocation2 + $0xf1] sm:$0xff] }
  0x7b   : > { %v365_v22 = vld [vmem:[#allocation2 + $0x109] sm:$0xff]  ;;  %v364_v23 = vld [vmem:[#allocation2 + $0xf9] sm:$0xff]  ;;  %v366_v24 = vld [vmem:[#allocation2 + $0x111] sm:$0xff] }
  0x7c   : > { %v368_v25 = vld [vmem:[#allocation2 + $0x129] sm:$0xff]  ;;  %v367_v26 = vld [vmem:[#allocation2 + $0x121] sm:$0xff]  ;;  %v369_v27 = vld [vmem:[#allocation2 + $0x139] sm:$0xff] }
  0x7d   : > { %413 = vrot.lane.b32.xlu1 %v346_v4, %s7467_s27  ;;  %409 = vrot.lane.b32.xlu0 %v344_v5, %s7467_s27  ;;  %v371_v28 = vld [vmem:[#allocation2 + $0x151] sm:$0xff]  ;;  %v370_v29 = vld [vmem:[#allocation2 + $0x141] sm:$0xff]  ;;  %v372_v30 = vld [vmem:[#allocation2 + $0x159] sm:$0xff] }
  0x7e   : > { %417 = vrot.lane.b32.xlu2 %v348_v6, %s7467_s27  ;;  %v374_v31 = vld [vmem:[#allocation2 + $0x171] sm:$0xff]  ;;  %v373_v32 = vld [vmem:[#allocation2 + $0x169] sm:$0xff]  ;;  %v278_v34 = vld [vmem:[#allocation2] sm:$0xff] }
  0x7f   : > { %v536_v33 = vld [vmem:[#allocation2 + $0x2] sm:$0xff]  ;;  %v7742_v35 = vld [vmem:[#allocation2 + $0x18] sm:$0xff]  ;;  %311 = vst.msk [vmem:[#allocation4] sm:$0xff] %vm310_vm2, %v278_v34  ;;  %v537_v37 = vld [vmem:[#allocation2 + $0xa] sm:$0xff] }
  0x80   : > { %313 = vst.msk [vmem:[#allocation4 + $0x70] sm:$0xff] %vm310_vm2, %v7742_v35  ;;  %v538_v36 = vld [vmem:[#allocation2 + $0x1a] sm:$0xff]  ;;  %v539_v38 = vld [vmem:[#allocation2 + $0x22] sm:$0xff]  ;;  %v7749_v39 = vld [vmem:[#allocation2 + $0x30] sm:$0xff] }
  0x81   : > { %315 = vst.msk [vmem:[#allocation4 + $0xe0] sm:$0xff] %vm310_vm2, %v7749_v39  ;;  %v7754_v40 = vld [vmem:[#allocation2 + $0x20] sm:$0xff]  ;;  %v279_v41 = vld [vmem:[#allocation2 + $0x8] sm:$0xff]  ;;  %v540_v44 = vld [vmem:[#allocation2 + $0x32] sm:$0xff] }
  0x82   : > { %314 = vst.msk [vmem:[#allocation4 + $0xa8] sm:$0xff] %vm310_vm2, %v7754_v40  ;;  %v541_v43 = vld [vmem:[#allocation2 + $0x3a] sm:$0xff]  ;;  %v542_v45 = vld [vmem:[#allocation2 + $0x4a] sm:$0xff]  ;;  %v544_v50 = vld [vmem:[#allocation2 + $0x62] sm:$0xff] }
  0x83   : > { %312 = vst.msk [vmem:[#allocation4 + $0x38] sm:$0xff] %vm310_vm2, %v279_v41  ;;  %v7762_v46 = vld [vmem:[#allocation2 + $0x38] sm:$0xff]  ;;  %v7767_v47 = vld [vmem:[#allocation2 + $0x50] sm:$0xff]  ;;  %v7769_v48 = vld [vmem:[#allocation2 + $0x48] sm:$0xff] }
  0x84   : > { %316 = vst.msk [vmem:[#allocation4 + $0x118] sm:$0xff] %vm310_vm2, %v7762_v46  ;;  %v543_v51 = vld [vmem:[#allocation2 + $0x52] sm:$0xff]  ;;  %v545_v52 = vld [vmem:[#allocation2 + $0x6a] sm:$0xff]  ;;  %v7778_v53 = vld [vmem:[#allocation2 + $0x60] sm:$0xff] }
  0x85   : > { %421 = vrot.lane.b32.xlu1 %v350_v7, %s7467_s27  ;;  %419 = vrot.lane.b32.xlu0 %v349_v8, %s7467_s27  ;;  %318 = vst.msk [vmem:[#allocation4 + $0x188] sm:$0xff] %vm310_vm2, %v7767_v47  ;;  %v7783_v54 = vld [vmem:[#allocation2 + $0x78] sm:$0xff]  ;;  %v7785_v55 = vld [vmem:[#allocation2 + $0x68] sm:$0xff]  ;;  %v7794_v60 = vld [vmem:[#allocation2 + $0x80] sm:$0xff] }
  0x86   : > { %423 = vrot.lane.b32.xlu2 %v351_v9, %s7467_s27  ;;  %317 = vst.msk [vmem:[#allocation4 + $0x150] sm:$0xff] %vm310_vm2, %v7769_v48  ;;  %v547_v57 = vld [vmem:[#allocation2 + $0x82] sm:$0xff]  ;;  %v546_v58 = vld [vmem:[#allocation2 + $0x7a] sm:$0xff]  ;;  %v548_v59 = vld [vmem:[#allocation2 + $0x92] sm:$0xff] }
  0x87   : > { %319 = vst.msk [vmem:[#allocation4 + $0x1c0] sm:$0xff] %vm310_vm2, %v7778_v53  ;;  %v7800_v63 = vld [vmem:[#allocation2 + $0x98] sm:$0xff]  ;;  %v7803_v1 = vld [vmem:[#allocation2 + $0x90] sm:$0xff]  ;;  %v7812_v5 = vld [vmem:[#allocation2 + $0xa8] sm:$0xff] }
  0x88   : > { %321 = vst.msk [vmem:[#allocation4 + $0x230] sm:$0xff] %vm310_vm2, %v7783_v54  ;;  %v550_v2 = vld [vmem:[#allocation2 + $0xaa] sm:$0xff]  ;;  %v549_v3 = vld [vmem:[#allocation2 + $0x9a] sm:$0xff]  ;;  %v551_v4 = vld [vmem:[#allocation2 + $0xb2] sm:$0xff] }
  0x89   : > { %320 = vst.msk [vmem:[#allocation4 + $0x1f8] sm:$0xff] %vm310_vm2, %v7785_v55  ;;  %v7818_v8 = vld [vmem:[#allocation2 + $0xc0] sm:$0xff] }
  0x8a   : > { %322 = vst.msk [vmem:[#allocation4 + $0x268] sm:$0xff] %vm310_vm2, %v7794_v60  ;;  %v562_v41 = vld [vmem:[#allocation2 + $0x13a] sm:$0xff] }
  0x8b   : > { %324 = vst.msk [vmem:[#allocation4 + $0x2d8] sm:$0xff] %vm310_vm2, %v7800_v63 }
  0x8c   : > { %323 = vst.msk [vmem:[#allocation4 + $0x2a0] sm:$0xff] %vm310_vm2, %v7803_v1 }
  0x8d   : > { %427 = vrot.lane.b32.xlu1 %v353_v10, %s7467_s27  ;;  %425 = vrot.lane.b32.xlu0 %v352_v11, %s7467_s27  ;;  %325 = vst.msk [vmem:[#allocation4 + $0x310] sm:$0xff] %vm310_vm2, %v7812_v5  ;;  %v7821_v10 = vld [vmem:[#allocation2 + $0xb0] sm:$0xff] }
  0x8e   : > { %429 = vrot.lane.b32.xlu2 %v354_v12, %s7467_s27  ;;  %v553_v11 = vld [vmem:[#allocation2 + $0xca] sm:$0xff]  ;;  %v552_v12 = vld [vmem:[#allocation2 + $0xc2] sm:$0xff]  ;;  %327 = vst.msk [vmem:[#allocation4 + $0x380] sm:$0xff] %vm310_vm2, %v7818_v8 }
  0x8f   : > { %326 = vst.msk [vmem:[#allocation4 + $0x348] sm:$0xff] %vm310_vm2, %v7821_v10 }
  0x95   : > { %433 = vrot.lane.b32.xlu1 %v356_v13, %s7467_s27  ;;  %431 = vrot.lane.b32.xlu0 %v355_v14, %s7467_s27  ;;  %v554_v13 = vld [vmem:[#allocation2 + $0xda] sm:$0xff]  ;;  %v7830_v14 = vld [vmem:[#allocation2 + $0xc8] sm:$0xff] }
  0x96   : > { %435 = vrot.lane.b32.xlu2 %v357_v15, %s7467_s27  ;;  %328 = vst.msk [vmem:[#allocation4 + $0x3b8] sm:$0xff] %vm310_vm2, %v7830_v14 }
  0x9d   : > { %439 = vrot.lane.b32.xlu1 %v359_v16, %s7467_s27  ;;  %437 = vrot.lane.b32.xlu0 %v358_v17, %s7467_s27  ;;  %v7836_v17 = vld [vmem:[#allocation2 + $0xe0] sm:$0xff] }
  0x9e   : > { %441 = vrot.lane.b32.xlu2 %v360_v18, %s7467_s27  ;;  %330 = vst.msk [vmem:[#allocation4 + $0x428] sm:$0xff] %vm310_vm2, %v7836_v17 }
  0xa5   : > { %445 = vrot.lane.b32.xlu1 %v362_v19, %s7467_s27  ;;  %443 = vrot.lane.b32.xlu0 %v361_v20, %s7467_s27  ;;  %v7839_v19 = vld [vmem:[#allocation2 + $0xd8] sm:$0xff] }
  0xa6   : > { %447 = vrot.lane.b32.xlu2 %v363_v21, %s7467_s27  ;;  %v556_v20 = vld [vmem:[#allocation2 + $0xf2] sm:$0xff]  ;;  %v555_v21 = vld [vmem:[#allocation2 + $0xe2] sm:$0xff]  ;;  %329 = vst.msk [vmem:[#allocation4 + $0x3f0] sm:$0xff] %vm310_vm2, %v7839_v19 }
  0xad   : > { %451 = vrot.lane.b32.xlu1 %v365_v22, %s7467_s27  ;;  %449 = vrot.lane.b32.xlu0 %v364_v23, %s7467_s27  ;;  %v557_v22 = vld [vmem:[#allocation2 + $0xfa] sm:$0xff]  ;;  %v7848_v23 = vld [vmem:[#allocation2 + $0xf0] sm:$0xff] }
  0xae   : > { %453 = vrot.lane.b32.xlu2 %v366_v24, %s7467_s27  ;;  %331 = vst.msk [vmem:[#allocation4 + $0x460] sm:$0xff] %vm310_vm2, %v7848_v23 }
  0xb5   : > { %457 = vrot.lane.b32.xlu1 %v368_v25, %s7467_s27  ;;  %455 = vrot.lane.b32.xlu0 %v367_v26, %s7467_s27  ;;  %v7854_v26 = vld [vmem:[#allocation2 + $0x108] sm:$0xff] }
  0xb6   : > { %459 = vrot.lane.b32.xlu2 %v369_v27, %s7467_s27  ;;  %333 = vst.msk [vmem:[#allocation4 + $0x4d0] sm:$0xff] %vm310_vm2, %v7854_v26 }
  0xbd   : > { %463 = vrot.lane.b32.xlu1 %v371_v28, %s7467_s27  ;;  %461 = vrot.lane.b32.xlu0 %v370_v29, %s7467_s27  ;;  %v7857_v28 = vld [vmem:[#allocation2 + $0xf8] sm:$0xff] }
  0xbe   : > { %465 = vrot.lane.b32.xlu2 %v372_v30, %s7467_s27  ;;  %v559_v29 = vld [vmem:[#allocation2 + $0x112] sm:$0xff]  ;;  %v558_v30 = vld [vmem:[#allocation2 + $0x10a] sm:$0xff]  ;;  %332 = vst.msk [vmem:[#allocation4 + $0x498] sm:$0xff] %vm310_vm2, %v7857_v28 }
  0xc5   : > { %469 = vrot.lane.b32.xlu1 %v374_v31, %s7467_s27  ;;  %467 = vrot.lane.b32.xlu0 %v373_v32, %s7467_s27  ;;  %v560_v31 = vld [vmem:[#allocation2 + $0x122] sm:$0xff]  ;;  %v7866_v32 = vld [vmem:[#allocation2 + $0x110] sm:$0xff] }
  0xc6   : > { %600 = vrot.lane.b32.xlu2 %v536_v33, %s7468_s28  ;;  %334 = vst.msk [vmem:[#allocation4 + $0x508] sm:$0xff] %vm310_vm2, %v7866_v32 }
  0xcd   : > { %604 = vrot.lane.b32.xlu1 %v538_v36, %s7468_s28  ;;  %602 = vrot.lane.b32.xlu0 %v537_v37, %s7468_s28  ;;  %v7872_v36 = vld [vmem:[#allocation2 + $0x128] sm:$0xff] }
  0xce   : > { %606 = vrot.lane.b32.xlu2 %v539_v38, %s7468_s28  ;;  %v7875_v38 = vld [vmem:[#allocation2 + $0x120] sm:$0xff]  ;;  %336 = vst.msk [vmem:[#allocation4 + $0x578] sm:$0xff] %vm310_vm2, %v7872_v36 }
  0xcf   : > { %335 = vst.msk [vmem:[#allocation4 + $0x540] sm:$0xff] %vm310_vm2, %v7875_v38 }
  0xd0   : > { %v416_v42 = vpop.permute.xlu2 %415 }
  0xd1   : > { %508 = vst.msk [vmem:[#allocation4 + $0xe0] sm:$0xff] %vm503_vm3, %v416_v42  ;;  %v561_v42 = vld [vmem:[#allocation2 + $0x12a] sm:$0xff] }
  0xd5   : > { %610 = vrot.lane.b32.xlu1 %v541_v43, %s7468_s28  ;;  %608 = vrot.lane.b32.xlu0 %v540_v44, %s7468_s28  ;;  %v563_v43 = vld [vmem:[#allocation2 + $0x142] sm:$0xff]  ;;  %v7884_v44 = vld [vmem:[#allocation2 + $0x138] sm:$0xff] }
  0xd6   : > { %612 = vrot.lane.b32.xlu2 %v542_v45, %s7468_s28  ;;  %337 = vst.msk [vmem:[#allocation4 + $0x5b0] sm:$0xff] %vm310_vm2, %v7884_v44 }
  0xd8   : > { %v418_v49 = vpop.permute.xlu2 %417 }
  0xd9   : > { %509 = vst.msk [vmem:[#allocation4 + $0x118] sm:$0xff] %vm503_vm3, %v418_v49 }
  0xdd   : > { %616 = vrot.lane.b32.xlu1 %v544_v50, %s7468_s28  ;;  %614 = vrot.lane.b32.xlu0 %v543_v51, %s7468_s28  ;;  %v7890_v50 = vld [vmem:[#allocation2 + $0x150] sm:$0xff] }
  0xde   : > { %618 = vrot.lane.b32.xlu2 %v545_v52, %s7468_s28  ;;  %v7893_v52 = vld [vmem:[#allocation2 + $0x140] sm:$0xff]  ;;  %339 = vst.msk [vmem:[#allocation4 + $0x620] sm:$0xff] %vm310_vm2, %v7890_v50 }
  0xdf   : > { %338 = vst.msk [vmem:[#allocation4 + $0x5e8] sm:$0xff] %vm310_vm2, %v7893_v52 }
  0xe0   : > { %v424_v56 = vpop.permute.xlu2 %423 }
  0xe1   : > { %512 = vst.msk [vmem:[#allocation4 + $0x1c0] sm:$0xff] %vm503_vm3, %v424_v56  ;;  %v565_v56 = vld [vmem:[#allocation2 + $0x15a] sm:$0xff] }
  0xe5   : > { %622 = vrot.lane.b32.xlu1 %v547_v57, %s7468_s28  ;;  %620 = vrot.lane.b32.xlu0 %v546_v58, %s7468_s28  ;;  %v564_v57 = vld [vmem:[#allocation2 + $0x152] sm:$0xff]  ;;  %v566_v58 = vld [vmem:[#allocation2 + $0x16a] sm:$0xff] }
  0xe6   : > { %624 = vrot.lane.b32.xlu2 %v548_v59, %s7468_s28  ;;  %v7902_v59 = vld [vmem:[#allocation2 + $0x158] sm:$0xff] }
  0xe7   : > { %v412_v61 = vpop.permute.xlu1 %411  ;;  %v408_v62 = vpop.permute.xlu0 %407  ;;  %340 = vst.msk [vmem:[#allocation4 + $0x658] sm:$0xff] %vm310_vm2, %v7902_v59 }
  0xe8   : > { %506 = vst.msk [vmem:[#allocation4 + $0x70] sm:$0xff] %vm503_vm3, %v412_v61  ;;  %v430_v0 = vpop.permute.xlu2 %429 }
  0xe9   : > { %504 = vst.msk [vmem:[#allocation4] sm:$0xff] %vm503_vm3, %v408_v62 }
  0xea   : > { %515 = vst.msk [vmem:[#allocation4 + $0x268] sm:$0xff] %vm503_vm3, %v430_v0  ;;  %v7908_v0 = vld [vmem:[#allocation2 + $0x170] sm:$0xff] }
  0xeb   : > { %342 = vst.msk [vmem:[#allocation4 + $0x6c8] sm:$0xff] %vm310_vm2, %v7908_v0 }
  0xed   : > { %628 = vrot.lane.b32.xlu1 %v550_v2, %s7468_s28  ;;  %626 = vrot.lane.b32.xlu0 %v549_v3, %s7468_s28  ;;  %v7911_v3 = vld [vmem:[#allocation2 + $0x168] sm:$0xff] }
  0xee   : > { %630 = vrot.lane.b32.xlu2 %v551_v4, %s7468_s28  ;;  %v729_v4 = vld [vmem:[#allocation2 + $0x3] sm:$0xff]  ;;  %341 = vst.msk [vmem:[#allocation4 + $0x690] sm:$0xff] %vm310_vm2, %v7911_v3 }
  0xef   : > { %v414_v6 = vpop.permute.xlu1 %413  ;;  %v410_v7 = vpop.permute.xlu0 %409 }
  0xf0   : > { %507 = vst.msk [vmem:[#allocation4 + $0xa8] sm:$0xff] %vm503_vm3, %v414_v6  ;;  %v436_v9 = vpop.permute.xlu2 %435  ;;  %v567_v6 = vld [vmem:[#allocation2 + $0x172] sm:$0xff] }
  0xf1   : > { %505 = vst.msk [vmem:[#allocation4 + $0x38] sm:$0xff] %vm503_vm3, %v410_v7  ;;  %v730_v7 = vld [vmem:[#allocation2 + $0xb] sm:$0xff] }
  0xf2   : > { %518 = vst.msk [vmem:[#allocation4 + $0x310] sm:$0xff] %vm503_vm3, %v436_v9 }
  0xf5   : > { %634 = vrot.lane.b32.xlu1 %v553_v11, %s7468_s28  ;;  %632 = vrot.lane.b32.xlu0 %v552_v12, %s7468_s28 }
  0xf6   : > { %636 = vrot.lane.b32.xlu2 %v554_v13, %s7468_s28  ;;  %v732_v13 = vld [vmem:[#allocation2 + $0x23] sm:$0xff] }
  0xf7   : > { %v422_v15 = vpop.permute.xlu1 %421  ;;  %v420_v16 = vpop.permute.xlu0 %419 }
  0xf8   : > { %511 = vst.msk [vmem:[#allocation4 + $0x188] sm:$0xff] %vm503_vm3, %v422_v15  ;;  %v442_v18 = vpop.permute.xlu2 %441  ;;  %v731_v15 = vld [vmem:[#allocation2 + $0x1b] sm:$0xff] }
  0xf9   : > { %510 = vst.msk [vmem:[#allocation4 + $0x150] sm:$0xff] %vm503_vm3, %v420_v16  ;;  %v733_v16 = vld [vmem:[#allocation2 + $0x33] sm:$0xff] }
  0xfa   : > { %521 = vst.msk [vmem:[#allocation4 + $0x3b8] sm:$0xff] %vm503_vm3, %v442_v18 }
  0xfd   : > { %640 = vrot.lane.b32.xlu1 %v556_v20, %s7468_s28  ;;  %638 = vrot.lane.b32.xlu0 %v555_v21, %s7468_s28 }
  0xfe   : > { %642 = vrot.lane.b32.xlu2 %v557_v22, %s7468_s28  ;;  %v735_v22 = vld [vmem:[#allocation2 + $0x4b] sm:$0xff] }
  0xff   : > { %v428_v24 = vpop.permute.xlu1 %427  ;;  %v426_v25 = vpop.permute.xlu0 %425 }
 0x100   : > { %514 = vst.msk [vmem:[#allocation4 + $0x230] sm:$0xff] %vm503_vm3, %v428_v24  ;;  %v448_v27 = vpop.permute.xlu2 %447  ;;  %v734_v24 = vld [vmem:[#allocation2 + $0x3b] sm:$0xff] }
 0x101   : > { %513 = vst.msk [vmem:[#allocation4 + $0x1f8] sm:$0xff] %vm503_vm3, %v426_v25  ;;  %v736_v25 = vld [vmem:[#allocation2 + $0x53] sm:$0xff] }
 0x102   : > { %524 = vst.msk [vmem:[#allocation4 + $0x460] sm:$0xff] %vm503_vm3, %v448_v27 }
 0x105   : > { %646 = vrot.lane.b32.xlu1 %v559_v29, %s7468_s28  ;;  %644 = vrot.lane.b32.xlu0 %v558_v30, %s7468_s28 }
 0x106   : > { %648 = vrot.lane.b32.xlu2 %v560_v31, %s7468_s28  ;;  %v738_v31 = vld [vmem:[#allocation2 + $0x6b] sm:$0xff] }
 0x107   : > { %v434_v33 = vpop.permute.xlu1 %433  ;;  %v432_v34 = vpop.permute.xlu0 %431 }
 0x108   : > { %517 = vst.msk [vmem:[#allocation4 + $0x2d8] sm:$0xff] %vm503_vm3, %v434_v33  ;;  %v454_v37 = vpop.permute.xlu2 %453  ;;  %v737_v33 = vld [vmem:[#allocation2 + $0x63] sm:$0xff] }
 0x109   : > { %516 = vst.msk [vmem:[#allocation4 + $0x2a0] sm:$0xff] %vm503_vm3, %v432_v34  ;;  %v739_v34 = vld [vmem:[#allocation2 + $0x7b] sm:$0xff] }
 0x10a   : > { %527 = vst.msk [vmem:[#allocation4 + $0x508] sm:$0xff] %vm503_vm3, %v454_v37 }
 0x10d   : > { %652 = vrot.lane.b32.xlu1 %v562_v41, %s7468_s28  ;;  %650 = vrot.lane.b32.xlu0 %v561_v42, %s7468_s28 }
 0x10e   : > { %654 = vrot.lane.b32.xlu2 %v563_v43, %s7468_s28  ;;  %v741_v43 = vld [vmem:[#allocation2 + $0x93] sm:$0xff] }
 0x10f   : > { %v440_v45 = vpop.permute.xlu1 %439  ;;  %v438_v49 = vpop.permute.xlu0 %437 }
 0x110   : > { %520 = vst.msk [vmem:[#allocation4 + $0x380] sm:$0xff] %vm503_vm3, %v440_v45  ;;  %v460_v51 = vpop.permute.xlu2 %459  ;;  %v740_v45 = vld [vmem:[#allocation2 + $0x83] sm:$0xff] }
 0x111   : > { %519 = vst.msk [vmem:[#allocation4 + $0x348] sm:$0xff] %vm503_vm3, %v438_v49  ;;  %v742_v49 = vld [vmem:[#allocation2 + $0x9b] sm:$0xff] }
 0x112   : > { %530 = vst.msk [vmem:[#allocation4 + $0x5b0] sm:$0xff] %vm503_vm3, %v460_v51 }
 0x115   : > { %658 = vrot.lane.b32.xlu1 %v565_v56, %s7468_s28  ;;  %656 = vrot.lane.b32.xlu0 %v564_v57, %s7468_s28 }
 0x116   : > { %660 = vrot.lane.b32.xlu2 %v566_v58, %s7468_s28  ;;  %v744_v58 = vld [vmem:[#allocation2 + $0xb3] sm:$0xff] }
 0x117   : > { %v446_v61 = vpop.permute.xlu1 %445  ;;  %v444_v62 = vpop.permute.xlu0 %443 }
 0x118   : > { %523 = vst.msk [vmem:[#allocation4 + $0x428] sm:$0xff] %vm503_vm3, %v446_v61  ;;  %v466_v2 = vpop.permute.xlu2 %465  ;;  %v743_v61 = vld [vmem:[#allocation2 + $0xab] sm:$0xff] }
 0x119   : > { %522 = vst.msk [vmem:[#allocation4 + $0x3f0] sm:$0xff] %vm503_vm3, %v444_v62  ;;  %v745_v62 = vld [vmem:[#allocation2 + $0xc3] sm:$0xff] }
 0x11a   : > { %533 = vst.msk [vmem:[#allocation4 + $0x658] sm:$0xff] %vm503_vm3, %v466_v2 }
 0x11d   : > { %793 = vrot.lane.b32.xlu1 %v729_v4, %s7469_s29  ;;  %662 = vrot.lane.b32.xlu0 %v567_v6, %s7468_s28 }
 0x11e   : > { %795 = vrot.lane.b32.xlu2 %v730_v7, %s7469_s29  ;;  %v747_v7 = vld [vmem:[#allocation2 + $0xdb] sm:$0xff] }
 0x11f   : > { %v452_v9 = vpop.permute.xlu1 %451  ;;  %v450_v11 = vpop.permute.xlu0 %449 }
 0x120   : > { %526 = vst.msk [vmem:[#allocation4 + $0x4d0] sm:$0xff] %vm503_vm3, %v452_v9  ;;  %v601_v12 = vpop.permute.xlu2 %600  ;;  %v746_v9 = vld [vmem:[#allocation2 + $0xcb] sm:$0xff] }
 0x121   : > { %525 = vst.msk [vmem:[#allocation4 + $0x498] sm:$0xff] %vm503_vm3, %v450_v11  ;;  %v748_v11 = vld [vmem:[#allocation2 + $0xe3] sm:$0xff] }
 0x122   : > { %697 = vst.msk [vmem:[#allocation4] sm:$0xff] %vm696_vm4, %v601_v12 }
 0x125   : > { %799 = vrot.lane.b32.xlu1 %v732_v13, %s7469_s29  ;;  %797 = vrot.lane.b32.xlu0 %v731_v15, %s7469_s29 }
 0x126   : > { %801 = vrot.lane.b32.xlu2 %v733_v16, %s7469_s29  ;;  %v750_v16 = vld [vmem:[#allocation2 + $0xfb] sm:$0xff] }
 0x127   : > { %v458_v18 = vpop.permute.xlu1 %457  ;;  %v456_v20 = vpop.permute.xlu0 %455 }
 0x128   : > { %529 = vst.msk [vmem:[#allocation4 + $0x578] sm:$0xff] %vm503_vm3, %v458_v18  ;;  %v607_v21 = vpop.permute.xlu2 %606  ;;  %v749_v18 = vld [vmem:[#allocation2 + $0xf3] sm:$0xff] }
 0x129   : > { %528 = vst.msk [vmem:[#allocation4 + $0x540] sm:$0xff] %vm503_vm3, %v456_v20  ;;  %v751_v20 = vld [vmem:[#allocation2 + $0x10b] sm:$0xff] }
 0x12a   : > { %700 = vst.msk [vmem:[#allocation4 + $0xa8] sm:$0xff] %vm696_vm4, %v607_v21 }
 0x12d   : > { %805 = vrot.lane.b32.xlu1 %v735_v22, %s7469_s29  ;;  %803 = vrot.lane.b32.xlu0 %v734_v24, %s7469_s29 }
 0x12e   : > { %807 = vrot.lane.b32.xlu2 %v736_v25, %s7469_s29  ;;  %v4461_v25 = vld [vmem:[%s11424_s1 + $0x78] sm:$0xff] }
 0x12f   : > { %v464_v27 = vpop.permute.xlu1 %463  ;;  %v462_v29 = vpop.permute.xlu0 %461  ;;  %4642 = vmatpush.msra.mxu0 %v4461_v25  ;;  %7078 = vmatpush.msra.mxu3 %v4461_v25 }
 0x130   : > { %532 = vst.msk [vmem:[#allocation4 + $0x620] sm:$0xff] %vm503_vm3, %v464_v27  ;;  %v613_v30 = vpop.permute.xlu2 %612  ;;  %v4460_v27 = vld [vmem:[%s11424_s1 + $0x70] sm:$0xff] }
 0x131   : > { %531 = vst.msk [vmem:[#allocation4 + $0x5e8] sm:$0xff] %vm503_vm3, %v462_v29  ;;  %v753_v29 = vld [vmem:[#allocation2 + $0x123] sm:$0xff]  ;;  %4643 = vmatpush.msra.mxu0 %v4460_v27  ;;  %7079 = vmatpush.msra.mxu3 %v4460_v27 }
 0x132   : > { %703 = vst.msk [vmem:[#allocation4 + $0x150] sm:$0xff] %vm696_vm4, %v613_v30  ;;  %v752_v30 = vld [vmem:[#allocation2 + $0x113] sm:$0xff] }
 0x135   : > { %811 = vrot.lane.b32.xlu1 %v738_v31, %s7469_s29  ;;  %809 = vrot.lane.b32.xlu0 %v737_v33, %s7469_s29  ;;  %v4459_v31 = vld [vmem:[%s11424_s1 + $0x68] sm:$0xff] }
 0x136   : > { %813 = vrot.lane.b32.xlu2 %v739_v34, %s7469_s29  ;;  %v754_v33 = vld [vmem:[#allocation2 + $0x12b] sm:$0xff]  ;;  %v4458_v34 = vld [vmem:[%s11424_s1 + $0x60] sm:$0xff]  ;;  %4644 = vmatpush.msra.mxu0 %v4459_v31 }
 0x137   : > { %v470_v37 = vpop.permute.xlu1 %469  ;;  %v468_v41 = vpop.permute.xlu0 %467  ;;  %7080 = vmatpush.msra.mxu3 %v4459_v31 }
 0x138   : > { %535 = vst.msk [vmem:[#allocation4 + $0x6c8] sm:$0xff] %vm503_vm3, %v470_v37  ;;  %v619_v42 = vpop.permute.xlu2 %618  ;;  %4645 = vmatpush.msra.mxu0 %v4458_v34 }
 0x139   : > { %534 = vst.msk [vmem:[#allocation4 + $0x690] sm:$0xff] %vm503_vm3, %v468_v41  ;;  %7081 = vmatpush.msra.mxu3 %v4458_v34 }
 0x13a   : > { %706 = vst.msk [vmem:[#allocation4 + $0x1f8] sm:$0xff] %vm696_vm4, %v619_v42 }
 0x13d   : > { %817 = vrot.lane.b32.xlu1 %v741_v43, %s7469_s29  ;;  %815 = vrot.lane.b32.xlu0 %v740_v45, %s7469_s29  ;;  %v4457_v43 = vld [vmem:[%s11424_s1 + $0x58] sm:$0xff]  ;;  %v4456_v45 = vld [vmem:[%s11424_s1 + $0x50] sm:$0xff] }
 0x13e   : > { %819 = vrot.lane.b32.xlu2 %v742_v49, %s7469_s29  ;;  %v756_v49 = vld [vmem:[#allocation2 + $0x143] sm:$0xff]  ;;  %4646 = vmatpush.msra.mxu0 %v4457_v43 }
 0x13f   : > { %v605_v51 = vpop.permute.xlu1 %604  ;;  %v603_v56 = vpop.permute.xlu0 %602  ;;  %7082 = vmatpush.msra.mxu3 %v4457_v43  ;;  %v1017_v43 = vld [vmem:[#allocation2 + $0x180] sm:$0xff] }
 0x140   : > { %699 = vst.msk [vmem:[#allocation4 + $0x70] sm:$0xff] %vm696_vm4, %v605_v51  ;;  %v625_v57 = vpop.permute.xlu2 %624  ;;  %v755_v51 = vld [vmem:[#allocation2 + $0x13b] sm:$0xff]  ;;  %4647 = vmatpush.msra.mxu0 %v4456_v45 }
 0x141   : > { %698 = vst.msk [vmem:[#allocation4 + $0x38] sm:$0xff] %vm696_vm4, %v603_v56  ;;  %v4455_v56 = vld [vmem:[%s11424_s1 + $0x48] sm:$0xff]  ;;  %7083 = vmatpush.msra.mxu3 %v4456_v45 }
 0x142   : > { %709 = vst.msk [vmem:[#allocation4 + $0x2a0] sm:$0xff] %vm696_vm4, %v625_v57  ;;  %v757_v57 = vld [vmem:[#allocation2 + $0x153] sm:$0xff]  ;;  %4648 = vmatpush.msra.mxu0 %v4455_v56 }
 0x143   : > { %7084 = vmatpush.msra.mxu3 %v4455_v56 }
 0x145   : > { %823 = vrot.lane.b32.xlu1 %v744_v58, %s7469_s29  ;;  %821 = vrot.lane.b32.xlu0 %v743_v61, %s7469_s29  ;;  %v4454_v58 = vld [vmem:[%s11424_s1 + $0x40] sm:$0xff] }
 0x146   : > { %825 = vrot.lane.b32.xlu2 %v745_v62, %s7469_s29  ;;  %4649 = vmatpush.msra.mxu0 %v4454_v58 }
 0x147   : > { %v611_v2 = vpop.permute.xlu1 %610  ;;  %v609_v4 = vpop.permute.xlu0 %608  ;;  %7085 = vmatpush.msra.mxu3 %v4454_v58  ;;  %v1180_v58 = vld [vmem:[#allocation2 + $0x21] sm:$0xff] }
 0x148   : > { %702 = vst.msk [vmem:[#allocation4 + $0x118] sm:$0xff] %vm696_vm4, %v611_v2  ;;  %v631_v6 = vpop.permute.xlu2 %630 }
 0x149   : > { %701 = vst.msk [vmem:[#allocation4 + $0xe0] sm:$0xff] %vm696_vm4, %v609_v4  ;;  %v4453_v4 = vld [vmem:[%s11424_s1 + $0x38] sm:$0xff] }
 0x14a   : > { %712 = vst.msk [vmem:[#allocation4 + $0x348] sm:$0xff] %vm696_vm4, %v631_v6  ;;  %v4452_v6 = vld [vmem:[%s11424_s1 + $0x30] sm:$0xff]  ;;  %4650 = vmatpush.msra.mxu0 %v4453_v4  ;;  %7086 = vmatpush.msra.mxu3 %v4453_v4 }
 0x14c   : > { %4651 = vmatpush.msra.mxu0 %v4452_v6  ;;  %7087 = vmatpush.msra.mxu3 %v4452_v6 }
 0x14d   : > { %829 = vrot.lane.b32.xlu1 %v747_v7, %s7469_s29  ;;  %827 = vrot.lane.b32.xlu0 %v746_v9, %s7469_s29  ;;  %v759_v7 = vld [vmem:[#allocation2 + $0x16b] sm:$0xff]  ;;  %v758_v9 = vld [vmem:[#allocation2 + $0x15b] sm:$0xff] }
 0x14e   : > { %831 = vrot.lane.b32.xlu2 %v748_v11, %s7469_s29  ;;  %v4451_v11 = vld [vmem:[%s11424_s1 + $0x28] sm:$0xff] }
 0x14f   : > { %v617_v12 = vpop.permute.xlu1 %616  ;;  %v615_v13 = vpop.permute.xlu0 %614  ;;  %4652 = vmatpush.msra.mxu0 %v4451_v11  ;;  %7088 = vmatpush.msra.mxu3 %v4451_v11 }
 0x150   : > { %705 = vst.msk [vmem:[#allocation4 + $0x1c0] sm:$0xff] %vm696_vm4, %v617_v12  ;;  %v637_v15 = vpop.permute.xlu2 %636  ;;  %v760_v12 = vld [vmem:[#allocation2 + $0x173] sm:$0xff] }
 0x151   : > { %704 = vst.msk [vmem:[#allocation4 + $0x188] sm:$0xff] %vm696_vm4, %v615_v13  ;;  %v4450_v13 = vld [vmem:[%s11424_s1 + $0x20] sm:$0xff] }
 0x152   : > { %715 = vst.msk [vmem:[#allocation4 + $0x3f0] sm:$0xff] %vm696_vm4, %v637_v15  ;;  %4653 = vmatpush.msra.mxu0 %v4450_v13  ;;  %7089 = vmatpush.msra.mxu3 %v4450_v13  ;;  %v1183_v13 = vld [vmem:[#allocation2 + $0x49] sm:$0xff] }
 0x155   : > { %835 = vrot.lane.b32.xlu1 %v750_v16, %s7469_s29  ;;  %833 = vrot.lane.b32.xlu0 %v749_v18, %s7469_s29 }
 0x156   : > { %837 = vrot.lane.b32.xlu2 %v751_v20, %s7469_s29  ;;  %v4449_v20 = vld [vmem:[%s11424_s1 + $0x18] sm:$0xff] }
 0x157   : > { %v623_v21 = vpop.permute.xlu1 %622  ;;  %v621_v22 = vpop.permute.xlu0 %620  ;;  %4654 = vmatpush.msra.mxu0 %v4449_v20  ;;  %7090 = vmatpush.msra.mxu3 %v4449_v20 }
 0x158   : > { %708 = vst.msk [vmem:[#allocation4 + $0x268] sm:$0xff] %vm696_vm4, %v623_v21  ;;  %v643_v24 = vpop.permute.xlu2 %642  ;;  %v4448_v21 = vld [vmem:[%s11424_s1 + $0x10] sm:$0xff] }
 0x159   : > { %707 = vst.msk [vmem:[#allocation4 + $0x230] sm:$0xff] %vm696_vm4, %v621_v22  ;;  %v4447_v22 = vld [vmem:[%s11424_s1 + $0x8] sm:$0xff]  ;;  %4655 = vmatpush.msra.mxu0 %v4448_v21  ;;  %7091 = vmatpush.msra.mxu3 %v4448_v21 }
 0x15a   : > { %718 = vst.msk [vmem:[#allocation4 + $0x498] sm:$0xff] %vm696_vm4, %v643_v24  ;;  %v4446_v24 = vld [vmem:[%s11424_s1] sm:$0xff] }
 0x15b   : > { %4656 = vmatpush.msra.mxu0 %v4447_v22  ;;  %7092 = vmatpush.msra.mxu3 %v4447_v22 }
 0x15d   : > { %841 = vrot.lane.b32.xlu1 %v753_v29, %s7469_s29  ;;  %839 = vrot.lane.b32.xlu0 %v752_v30, %s7469_s29 }
 0x15e   : > { %843 = vrot.lane.b32.xlu2 %v754_v33, %s7469_s29  ;;  %4657 = vmatpush.msra.mxu0 %v4446_v24 }
 0x15f   : > { %v629_v37 = vpop.permute.xlu1 %628  ;;  %v627_v41 = vpop.permute.xlu0 %626  ;;  %7093 = vmatpush.msra.mxu3 %v4446_v24 }
 0x160   : > { %711 = vst.msk [vmem:[#allocation4 + $0x310] sm:$0xff] %vm696_vm4, %v629_v37  ;;  %v649_v42 = vpop.permute.xlu2 %648 }
 0x161   : > { %710 = vst.msk [vmem:[#allocation4 + $0x2d8] sm:$0xff] %vm696_vm4, %v627_v41 }
 0x162   : > { %721 = vst.msk [vmem:[#allocation4 + $0x540] sm:$0xff] %vm696_vm4, %v649_v42  ;;  %v1018_v42 = vld [vmem:[#allocation2 + $0x188] sm:$0xff] }
 0x165   : > { %847 = vrot.lane.b32.xlu1 %v756_v49, %s7469_s29  ;;  %845 = vrot.lane.b32.xlu0 %v755_v51, %s7469_s29  ;;  %v922_v51 = vld [vmem:[#allocation2 + $0x4] sm:$0xff] }
 0x166   : > { %849 = vrot.lane.b32.xlu2 %v757_v57, %s7469_s29  ;;  %v1181_v57 = vld [vmem:[#allocation2 + $0x31] sm:$0xff]  ;;  %954 = vst.msk [vmem:[#allocation4 + $0x8] sm:$0xff] %vm310_vm2, %v922_v51 }
 0x167   : > { %v635_v61 = vpop.permute.xlu1 %634  ;;  %v633_v62 = vpop.permute.xlu0 %632 }
 0x168   : > { %714 = vst.msk [vmem:[#allocation4 + $0x3b8] sm:$0xff] %vm696_vm4, %v635_v61  ;;  %v655_v2 = vpop.permute.xlu2 %654  ;;  %v1182_v61 = vld [vmem:[#allocation2 + $0x39] sm:$0xff] }
 0x169   : > { %713 = vst.msk [vmem:[#allocation4 + $0x380] sm:$0xff] %vm696_vm4, %v633_v62  ;;  %v8132_v62 = vld [vmem:[#allocation2 + $0x1c] sm:$0xff] }
 0x16a   : > { %724 = vst.msk [vmem:[#allocation4 + $0x5e8] sm:$0xff] %vm696_vm4, %v655_v2  ;;  %v8134_v2 = vld [vmem:[#allocation2 + $0x34] sm:$0xff] }
 0x16b   : > { %956 = vst.msk [vmem:[#allocation4 + $0x78] sm:$0xff] %vm310_vm2, %v8132_v62 }
 0x16c   : > { %958 = vst.msk [vmem:[#allocation4 + $0xe8] sm:$0xff] %vm310_vm2, %v8134_v2 }
 0x16d   : > { %853 = vrot.lane.b32.xlu1 %v759_v7, %s7469_s29  ;;  %851 = vrot.lane.b32.xlu0 %v758_v9, %s7469_s29  ;;  %v8142_v9 = vld [vmem:[#allocation2 + $0x24] sm:$0xff] }
 0x16e   : > { %855 = vrot.lane.b32.xlu2 %v760_v12, %s7469_s29  ;;  %v1184_v12 = vld [vmem:[#allocation2 + $0x51] sm:$0xff]  ;;  %957 = vst.msk [vmem:[#allocation4 + $0xb0] sm:$0xff] %vm310_vm2, %v8142_v9 }
 0x16f   : > { %v641_v15 = vpop.permute.xlu1 %640  ;;  %v639_v16 = vpop.permute.xlu0 %638 }
 0x170   : > { %717 = vst.msk [vmem:[#allocation4 + $0x460] sm:$0xff] %vm696_vm4, %v641_v15  ;;  %v661_v18 = vpop.permute.xlu2 %660  ;;  %v1185_v15 = vld [vmem:[#allocation2 + $0x61] sm:$0xff] }
 0x171   : > { %716 = vst.msk [vmem:[#allocation4 + $0x428] sm:$0xff] %vm696_vm4, %v639_v16  ;;  %v8150_v16 = vld [vmem:[#allocation2 + $0x3c] sm:$0xff] }
 0x172   : > { %727 = vst.msk [vmem:[#allocation4 + $0x690] sm:$0xff] %vm696_vm4, %v661_v18  ;;  %v8152_v18 = vld [vmem:[#allocation2 + $0x54] sm:$0xff] }
 0x173   : > { %959 = vst.msk [vmem:[#allocation4 + $0x120] sm:$0xff] %vm310_vm2, %v8150_v16 }
 0x174   : > { %961 = vst.msk [vmem:[#allocation4 + $0x190] sm:$0xff] %vm310_vm2, %v8152_v18 }
 0x175   : > { %1053 = vrot.lane.b32.xlu1 %v7754_v40, %s7467_s27  ;;  %1051 = vrot.lane.b32.xlu0 %v7742_v35, %s7467_s27 }
 0x176   : > { %1055 = vrot.lane.b32.xlu2 %v7749_v39, %s7467_s27 }
 0x177   : > { %v647_v25 = vpop.permute.xlu1 %646  ;;  %v645_v27 = vpop.permute.xlu0 %644 }
 0x178   : > { %720 = vst.msk [vmem:[#allocation4 + $0x508] sm:$0xff] %vm696_vm4, %v647_v25  ;;  %v796_v40 = vpop.permute.xlu2 %795  ;;  %v8160_v25 = vld [vmem:[#allocation2 + $0x4c] sm:$0xff] }
 0x179   : > { %719 = vst.msk [vmem:[#allocation4 + $0x4d0] sm:$0xff] %vm696_vm4, %v645_v27 }
 0x17a   : > { %891 = vst.msk [vmem:[#allocation4 + $0x38] sm:$0xff] %vm889_vm5, %v796_v40  ;;  %v1187_v40 = vld [vmem:[#allocation2 + $0x79] sm:$0xff] }
 0x17b   : > { %960 = vst.msk [vmem:[#allocation4 + $0x158] sm:$0xff] %vm310_vm2, %v8160_v25 }
 0x17d   : > { %1059 = vrot.lane.b32.xlu1 %v7769_v48, %s7467_s27  ;;  %1057 = vrot.lane.b32.xlu0 %v7762_v46, %s7467_s27 }
 0x17e   : > { %1061 = vrot.lane.b32.xlu2 %v7767_v47, %s7467_s27 }
 0x17f   : > { %v653_v35 = vpop.permute.xlu1 %652  ;;  %v651_v29 = vpop.permute.xlu0 %650 }
 0x180   : > { %723 = vst.msk [vmem:[#allocation4 + $0x5b0] sm:$0xff] %vm696_vm4, %v653_v35  ;;  %v802_v39 = vpop.permute.xlu2 %801  ;;  %v1186_v35 = vld [vmem:[#allocation2 + $0x69] sm:$0xff] }
 0x181   : > { %722 = vst.msk [vmem:[#allocation4 + $0x578] sm:$0xff] %vm696_vm4, %v651_v29  ;;  %v1188_v29 = vld [vmem:[#allocation2 + $0x81] sm:$0xff] }
 0x182   : > { %894 = vst.msk [vmem:[#allocation4 + $0xe0] sm:$0xff] %vm889_vm5, %v802_v39 }
 0x185   : > { %1065 = vrot.lane.b32.xlu1 %v7785_v55, %s7467_s27  ;;  %1063 = vrot.lane.b32.xlu0 %v7778_v53, %s7467_s27 }
 0x186   : > { %1067 = vrot.lane.b32.xlu2 %v7783_v54, %s7467_s27 }
 0x187   : > { %v659_v48 = vpop.permute.xlu1 %658  ;;  %v657_v46 = vpop.permute.xlu0 %656 }
 0x188   : > { %726 = vst.msk [vmem:[#allocation4 + $0x658] sm:$0xff] %vm696_vm4, %v659_v48  ;;  %v808_v47 = vpop.permute.xlu2 %807  ;;  %v8168_v48 = vld [vmem:[#allocation2 + $0x64] sm:$0xff] }
 0x189   : > { %725 = vst.msk [vmem:[#allocation4 + $0x620] sm:$0xff] %vm696_vm4, %v657_v46  ;;  %v4250_v37 = vld [vmem:[#allocation4 + $0xe0] sm:$0xff] }
 0x18a   : > { %897 = vst.msk [vmem:[#allocation4 + $0x188] sm:$0xff] %vm889_vm5, %v808_v47  ;;  %v8170_v46 = vld [vmem:[#allocation2 + $0x7c] sm:$0xff] }
 0x18b   : > { %962 = vst.msk [vmem:[#allocation4 + $0x1c8] sm:$0xff] %vm310_vm2, %v8168_v48 }
 0x18c   : > { %964 = vst.msk [vmem:[#allocation4 + $0x238] sm:$0xff] %vm310_vm2, %v8170_v46 }
 0x18d   : > { %1071 = vrot.lane.b32.xlu1 %v7803_v1, %s7467_s27  ;;  %1069 = vrot.lane.b32.xlu0 %v7794_v60, %s7467_s27 }
 0x18e   : > { %1073 = vrot.lane.b32.xlu2 %v7800_v63, %s7467_s27 }
 0x18f   : > { %v794_v55 = vpop.permute.xlu1 %793  ;;  %v663_v53 = vpop.permute.xlu0 %662 }
 0x190   : > { %890 = vst.msk [vmem:[#allocation4] sm:$0xff] %vm889_vm5, %v794_v55  ;;  %v814_v54 = vpop.permute.xlu2 %813 }
 0x191   : > { %728 = vst.msk [vmem:[#allocation4 + $0x6c8] sm:$0xff] %vm696_vm4, %v663_v53  ;;  %v4271_v7 = vld [vmem:[#allocation4 + $0x188] sm:$0xff] }
 0x192   : > { %900 = vst.msk [vmem:[#allocation4 + $0x230] sm:$0xff] %vm889_vm5, %v814_v54  ;;  %v8178_v54 = vld [vmem:[#allocation2 + $0x6c] sm:$0xff] }
 0x193   : > { %963 = vst.msk [vmem:[#allocation4 + $0x200] sm:$0xff] %vm310_vm2, %v8178_v54 }
 0x195   : > { %1077 = vrot.lane.b32.xlu1 %v7821_v10, %s7467_s27  ;;  %1075 = vrot.lane.b32.xlu0 %v7812_v5, %s7467_s27  ;;  %v4229_v5 = vld [vmem:[#allocation4 + $0x38] sm:$0xff] }
 0x196   : > { %1079 = vrot.lane.b32.xlu2 %v7818_v8, %s7467_s27 }
 0x197   : > { %v800_v1 = vpop.permute.xlu1 %799  ;;  %v798_v60 = vpop.permute.xlu0 %797  ;;  %v4222_v30 = vld [vmem:[#allocation4] sm:$0xff] }
 0x198   : > { %893 = vst.msk [vmem:[#allocation4 + $0xa8] sm:$0xff] %vm889_vm5, %v800_v1  ;;  %4658 = vmatmul.f32.vlgmr.msra.gmra.mxu0 %v4222_v30  ;;  %v820_v63 = vpop.permute.xlu2 %819  ;;  %v1189_v30 = vld [vmem:[#allocation2 + $0x91] sm:$0xff] }
 0x199   : > { %892 = vst.msk [vmem:[#allocation4 + $0x70] sm:$0xff] %vm889_vm5, %v798_v60  ;;  %v1190_v60 = vld [vmem:[#allocation2 + $0x99] sm:$0xff] }
 0x19a   : > { %903 = vst.msk [vmem:[#allocation4 + $0x2d8] sm:$0xff] %vm889_vm5, %v820_v63  ;;  %v1191_v63 = vld [vmem:[#allocation2 + $0xa9] sm:$0xff] }
 0x19d   : > { %1083 = vrot.lane.b32.xlu1 %v7839_v19, %s7467_s27  ;;  %1081 = vrot.lane.b32.xlu0 %v7830_v14, %s7467_s27 }
 0x19e   : > { %1085 = vrot.lane.b32.xlu2 %v7836_v17, %s7467_s27 }
 0x19f   : > { %v806_v10 = vpop.permute.xlu1 %805  ;;  %v804_v31 = vpop.permute.xlu0 %803  ;;  %v4243_v34 = vld [vmem:[#allocation4 + $0xa8] sm:$0xff] }
 0x1a0   : > { %896 = vst.msk [vmem:[#allocation4 + $0x150] sm:$0xff] %vm889_vm5, %v806_v10  ;;  %4661 = vmatmul.f32.gmra.mxu0 %v4229_v5  ;;  %v826_v8 = vpop.permute.xlu2 %825  ;;  %v4236_v33 = vld [vmem:[#allocation4 + $0x70] sm:$0xff]  ;;  %v8186_v5 = vld [vmem:[#allocation2 + $0x84] sm:$0xff]  ;;  %v8188_v10 = vld [vmem:[#allocation2 + $0x9c] sm:$0xff] }
 0x1a1   : > { %895 = vst.msk [vmem:[#allocation4 + $0x118] sm:$0xff] %vm889_vm5, %v804_v31 }
 0x1a2   : > { %906 = vst.msk [vmem:[#allocation4 + $0x380] sm:$0xff] %vm889_vm5, %v826_v8 }
 0x1a3   : > { %965 = vst.msk [vmem:[#allocation4 + $0x270] sm:$0xff] %vm310_vm2, %v8186_v5 }
 0x1a4   : > { %967 = vst.msk [vmem:[#allocation4 + $0x2e0] sm:$0xff] %vm310_vm2, %v8188_v10 }
 0x1a5   : > { %1089 = vrot.lane.b32.xlu1 %v7857_v28, %s7467_s27  ;;  %1087 = vrot.lane.b32.xlu0 %v7848_v23, %s7467_s27 }
 0x1a6   : > { %1091 = vrot.lane.b32.xlu2 %v7854_v26, %s7467_s27 }
 0x1a7   : > { %v812_v14 = vpop.permute.xlu1 %811  ;;  %v810_v19 = vpop.permute.xlu0 %809  ;;  %v4264_v49 = vld [vmem:[#allocation4 + $0x150] sm:$0xff] }
 0x1a8   : > { %899 = vst.msk [vmem:[#allocation4 + $0x1f8] sm:$0xff] %vm889_vm5, %v812_v14  ;;  %4664 = vmatmul.f32.gmra.mxu0 %v4236_v33  ;;  %v832_v17 = vpop.permute.xlu2 %831  ;;  %v4257_v41 = vld [vmem:[#allocation4 + $0x118] sm:$0xff]  ;;  %v4292_v14 = vld [vmem:[#allocation4 + $0x230] sm:$0xff] }
 0x1a9   : > { %898 = vst.msk [vmem:[#allocation4 + $0x1c0] sm:$0xff] %vm889_vm5, %v810_v19  ;;  %v8196_v33 = vld [vmem:[#allocation2 + $0x94] sm:$0xff] }
 0x1aa   : > { %909 = vst.msk [vmem:[#allocation4 + $0x428] sm:$0xff] %vm889_vm5, %v832_v17 }
 0x1ab   : > { %966 = vst.msk [vmem:[#allocation4 + $0x2a8] sm:$0xff] %vm310_vm2, %v8196_v33 }
 0x1ad   : > { %1095 = vrot.lane.b32.xlu1 %v7875_v38, %s7467_s27  ;;  %1093 = vrot.lane.b32.xlu0 %v7866_v32, %s7467_s27 }
 0x1ae   : > { %1097 = vrot.lane.b32.xlu2 %v7872_v36, %s7467_s27 }
 0x1af   : > { %v818_v23 = vpop.permute.xlu1 %817  ;;  %v816_v28 = vpop.permute.xlu0 %815  ;;  %v4285_v53 = vld [vmem:[#allocation4 + $0x1f8] sm:$0xff] }
 0x1b0   : > { %902 = vst.msk [vmem:[#allocation4 + $0x2a0] sm:$0xff] %vm889_vm5, %v818_v23  ;;  %4667 = vmatmul.f32.gmra.mxu0 %v4243_v34  ;;  %v838_v26 = vpop.permute.xlu2 %837  ;;  %v4278_v22 = vld [vmem:[#allocation4 + $0x1c0] sm:$0xff]  ;;  %v1194_v34 = vld [vmem:[#allocation2 + $0xc9] sm:$0xff] }
 0x1b1   : > { %901 = vst.msk [vmem:[#allocation4 + $0x268] sm:$0xff] %vm889_vm5, %v816_v28  ;;  %v1193_v23 = vld [vmem:[#allocation2 + $0xc1] sm:$0xff]  ;;  %v1192_v28 = vld [vmem:[#allocation2 + $0xb1] sm:$0xff] }
 0x1b2   : > { %912 = vst.msk [vmem:[#allocation4 + $0x4d0] sm:$0xff] %vm889_vm5, %v838_v26  ;;  %v8204_v26 = vld [vmem:[#allocation2 + $0xac] sm:$0xff] }
 0x1b3   : > { %968 = vst.msk [vmem:[#allocation4 + $0x318] sm:$0xff] %vm310_vm2, %v8204_v26 }
 0x1b5   : > { %1101 = vrot.lane.b32.xlu1 %v7893_v52, %s7467_s27  ;;  %1099 = vrot.lane.b32.xlu0 %v7884_v44, %s7467_s27 }
 0x1b6   : > { %1103 = vrot.lane.b32.xlu2 %v7890_v50, %s7467_s27 }
 0x1b7   : > { %v824_v32 = vpop.permute.xlu1 %823  ;;  %v822_v38 = vpop.permute.xlu0 %821 }
 0x1b8   : > { %905 = vst.msk [vmem:[#allocation4 + $0x348] sm:$0xff] %vm889_vm5, %v824_v32  ;;  %4670 = vmatmul.f32.gmra.mxu0 %v4250_v37  ;;  %v844_v36 = vpop.permute.xlu2 %843  ;;  %v8206_v32 = vld [vmem:[#allocation2 + $0xc4] sm:$0xff] }
 0x1b9   : > { %904 = vst.msk [vmem:[#allocation4 + $0x310] sm:$0xff] %vm889_vm5, %v822_v38 }
 0x1ba   : > { %915 = vst.msk [vmem:[#allocation4 + $0x578] sm:$0xff] %vm889_vm5, %v844_v36  ;;  %v4299_v36 = vld [vmem:[#allocation4 + $0x268] sm:$0xff] }
 0x1bb   : > { %970 = vst.msk [vmem:[#allocation4 + $0x388] sm:$0xff] %vm310_vm2, %v8206_v32 }
 0x1bd   : > { %1107 = vrot.lane.b32.xlu1 %v7911_v3, %s7467_s27  ;;  %1105 = vrot.lane.b32.xlu0 %v7902_v59, %s7467_s27  ;;  %v1179_v3 = vld [vmem:[#allocation2 + $0x19] sm:$0xff]  ;;  %v923_v59 = vld [vmem:[#allocation2 + $0xc] sm:$0xff] }
 0x1be   : > { %1109 = vrot.lane.b32.xlu2 %v7908_v0, %s7467_s27  ;;  %955 = vst.msk [vmem:[#allocation4 + $0x40] sm:$0xff] %vm310_vm2, %v923_v59  ;;  %v8224_v59 = vld [vmem:[#allocation2 + $0xe4] sm:$0xff] }
 0x1bf   : > { %v830_v44 = vpop.permute.xlu1 %829  ;;  %v828_v52 = vpop.permute.xlu0 %827  ;;  %973 = vst.msk [vmem:[#allocation4 + $0x430] sm:$0xff] %vm310_vm2, %v8224_v59 }
 0x1c0   : > { %908 = vst.msk [vmem:[#allocation4 + $0x3f0] sm:$0xff] %vm889_vm5, %v830_v44  ;;  %4673 = vmatmul.f32.gmra.mxu0 %v4257_v41  ;;  %v850_v50 = vpop.permute.xlu2 %849 }
 0x1c1   : > { %907 = vst.msk [vmem:[#allocation4 + $0x3b8] sm:$0xff] %vm889_vm5, %v828_v52  ;;  %v4397_v39 = vld [vmem:[#allocation4 + $0x578] sm:$0xff] }
 0x1c2   : > { %918 = vst.msk [vmem:[#allocation4 + $0x620] sm:$0xff] %vm889_vm5, %v850_v50  ;;  %v8214_v52 = vld [vmem:[#allocation2 + $0xb4] sm:$0xff]  ;;  %v1196_v50 = vld [vmem:[#allocation2 + $0xe1] sm:$0xff] }
 0x1c3   : > { %969 = vst.msk [vmem:[#allocation4 + $0x350] sm:$0xff] %vm310_vm2, %v8214_v52 }
 0x1c5   : > { %1113 = vrot.lane.b32.xlu1 %v1018_v42, %s7467_s27  ;;  %1111 = vrot.lane.b32.xlu0 %v1017_v43, %s7467_s27  ;;  %v1195_v42 = vld [vmem:[#allocation2 + $0xd9] sm:$0xff]  ;;  %v1197_v43 = vld [vmem:[#allocation2 + $0xf1] sm:$0xff] }
 0x1c6   : > { %1243 = vrot.lane.b32.xlu2 %v1179_v3, %s7468_s28  ;;  %v8222_v3 = vld [vmem:[#allocation2 + $0xcc] sm:$0xff] }
 0x1c7   : > { %v836_v45 = vpop.permute.xlu1 %835  ;;  %v834_v0 = vpop.permute.xlu0 %833  ;;  %971 = vst.msk [vmem:[#allocation4 + $0x3c0] sm:$0xff] %vm310_vm2, %v8222_v3 }
 0x1c8   : > { %911 = vst.msk [vmem:[#allocation4 + $0x498] sm:$0xff] %vm889_vm5, %v836_v45  ;;  %4676 = vmatmul.f32.gmra.mxu0 %v4264_v49  ;;  %v856_v56 = vpop.permute.xlu2 %855  ;;  %v4306_v49 = vld [vmem:[#allocation4 + $0x2a0] sm:$0xff] }
 0x1c9   : > { %910 = vst.msk [vmem:[#allocation4 + $0x460] sm:$0xff] %vm889_vm5, %v834_v0  ;;  %v4418_v51 = vld [vmem:[#allocation4 + $0x620] sm:$0xff] }
 0x1ca   : > { %921 = vst.msk [vmem:[#allocation4 + $0x6c8] sm:$0xff] %vm889_vm5, %v856_v56  ;;  %v8232_v56 = vld [vmem:[#allocation2 + $0xdc] sm:$0xff] }
 0x1cb   : > { %972 = vst.msk [vmem:[#allocation4 + $0x3f8] sm:$0xff] %vm310_vm2, %v8232_v56 }
 0x1cd   : > { %1247 = vrot.lane.b32.xlu1 %v1181_v57, %s7468_s28  ;;  %1245 = vrot.lane.b32.xlu0 %v1180_v58, %s7468_s28  ;;  %v1199_v58 = vld [vmem:[#allocation2 + $0x109] sm:$0xff] }
 0x1ce   : > { %1249 = vrot.lane.b32.xlu2 %v1182_v61, %s7468_s28  ;;  %v1198_v61 = vld [vmem:[#allocation2 + $0xf9] sm:$0xff] }
 0x1cf   : > { %v842_v4 = vpop.permute.xlu1 %841  ;;  %v840_v6 = vpop.permute.xlu0 %839 }
 0x1d0   : > { %914 = vst.msk [vmem:[#allocation4 + $0x540] sm:$0xff] %vm889_vm5, %v842_v4  ;;  %4679 = vmatmul.f32.gmra.mxu0 %v4271_v7  ;;  %v1056_v11 = vpop.permute.xlu2 %1055  ;;  %v1200_v4 = vld [vmem:[#allocation2 + $0x111] sm:$0xff] }
 0x1d1   : > { %913 = vst.msk [vmem:[#allocation4 + $0x508] sm:$0xff] %vm889_vm5, %v840_v6  ;;  %v8240_v6 = vld [vmem:[#allocation2 + $0xf4] sm:$0xff]  ;;  %v8242_v7 = vld [vmem:[#allocation2 + $0x10c] sm:$0xff] }
 0x1d2   : > { %1149 = vst.msk [vmem:[#allocation4 + $0x78] sm:$0xff] %vm503_vm3, %v1056_v11 }
 0x1d3   : > { %974 = vst.msk [vmem:[#allocation4 + $0x468] sm:$0xff] %vm310_vm2, %v8240_v6 }
 0x1d4   : > { %976 = vst.msk [vmem:[#allocation4 + $0x4d8] sm:$0xff] %vm310_vm2, %v8242_v7 }
 0x1d5   : > { %1253 = vrot.lane.b32.xlu1 %v1184_v12, %s7468_s28  ;;  %1251 = vrot.lane.b32.xlu0 %v1183_v13, %s7468_s28  ;;  %v4313_v13 = vld [vmem:[#allocation4 + $0x2d8] sm:$0xff] }
 0x1d6   : > { %1255 = vrot.lane.b32.xlu2 %v1185_v15, %s7468_s28 }
 0x1d7   : > { %v848_v20 = vpop.permute.xlu1 %847  ;;  %v846_v21 = vpop.permute.xlu0 %845  ;;  %v4390_v24 = vld [vmem:[#allocation4 + $0x540] sm:$0xff] }
 0x1d8   : > { %917 = vst.msk [vmem:[#allocation4 + $0x5e8] sm:$0xff] %vm889_vm5, %v848_v20  ;;  %4682 = vmatmul.f32.gmra.mxu0 %v4278_v22  ;;  %4730 = vmatmul.f32.vlgmr.msra.gmra.mxu3 %v4390_v24  ;;  %v1062_v27 = vpop.permute.xlu2 %1061  ;;  %v8250_v20 = vld [vmem:[#allocation2 + $0xfc] sm:$0xff]  ;;  %v1202_v22 = vld [vmem:[#allocation2 + $0x129] sm:$0xff] }
 0x1d9   : > { %916 = vst.msk [vmem:[#allocation4 + $0x5b0] sm:$0xff] %vm889_vm5, %v846_v21  ;;  %v1201_v24 = vld [vmem:[#allocation2 + $0x121] sm:$0xff] }
 0x1da   : > { %1152 = vst.msk [vmem:[#allocation4 + $0x120] sm:$0xff] %vm503_vm3, %v1062_v27  ;;  %v1203_v27 = vld [vmem:[#allocation2 + $0x139] sm:$0xff] }
 0x1db   : > { %975 = vst.msk [vmem:[#allocation4 + $0x4a0] sm:$0xff] %vm310_vm2, %v8250_v20 }
 0x1dd   : > { %1259 = vrot.lane.b32.xlu1 %v1187_v40, %s7468_s28  ;;  %1257 = vrot.lane.b32.xlu0 %v1186_v35, %s7468_s28  ;;  %v8258_v40 = vld [vmem:[#allocation2 + $0x114] sm:$0xff]  ;;  %v8260_v35 = vld [vmem:[#allocation2 + $0x12c] sm:$0xff] }
 0x1de   : > { %1261 = vrot.lane.b32.xlu2 %v1188_v29, %s7468_s28  ;;  %977 = vst.msk [vmem:[#allocation4 + $0x510] sm:$0xff] %vm310_vm2, %v8258_v40 }
 0x1df   : > { %v854_v47 = vpop.permute.xlu1 %853  ;;  %v852_v55 = vpop.permute.xlu0 %851  ;;  %v4411_v44 = vld [vmem:[#allocation4 + $0x5e8] sm:$0xff]  ;;  %979 = vst.msk [vmem:[#allocation4 + $0x580] sm:$0xff] %vm310_vm2, %v8260_v35 }
 0x1e0   : > { %920 = vst.msk [vmem:[#allocation4 + $0x690] sm:$0xff] %vm889_vm5, %v854_v47  ;;  %4685 = vmatmul.f32.gmra.mxu0 %v4285_v53  ;;  %4733 = vmatmul.f32.gmra.mxu3 %v4397_v39  ;;  %v1068_v1 = vpop.permute.xlu2 %1067  ;;  %v4404_v19 = vld [vmem:[#allocation4 + $0x5b0] sm:$0xff]  ;;  %v8268_v53 = vld [vmem:[#allocation2 + $0x124] sm:$0xff] }
 0x1e1   : > { %919 = vst.msk [vmem:[#allocation4 + $0x658] sm:$0xff] %vm889_vm5, %v852_v55  ;;  %v4320_v47 = vld [vmem:[#allocation4 + $0x310] sm:$0xff] }
 0x1e2   : > { %1155 = vst.msk [vmem:[#allocation4 + $0x1c8] sm:$0xff] %vm503_vm3, %v1068_v1 }
 0x1e3   : > { %978 = vst.msk [vmem:[#allocation4 + $0x548] sm:$0xff] %vm310_vm2, %v8268_v53 }
 0x1e5   : > { %1265 = vrot.lane.b32.xlu1 %v1190_v60, %s7468_s28  ;;  %1263 = vrot.lane.b32.xlu0 %v1189_v30, %s7468_s28  ;;  %v1205_v60 = vld [vmem:[#allocation2 + $0x151] sm:$0xff]  ;;  %v1204_v30 = vld [vmem:[#allocation2 + $0x141] sm:$0xff] }
 0x1e6   : > { %1267 = vrot.lane.b32.xlu2 %v1191_v63, %s7468_s28  ;;  %v1206_v63 = vld [vmem:[#allocation2 + $0x159] sm:$0xff] }
 0x1e7   : > { %v1054_v31 = vpop.permute.xlu1 %1053  ;;  %v1052_v8 = vpop.permute.xlu0 %1051  ;;  %v4432_v55 = vld [vmem:[#allocation4 + $0x690] sm:$0xff] }
 0x1e8   : > { %1148 = vst.msk [vmem:[#allocation4 + $0x40] sm:$0xff] %vm503_vm3, %v1054_v31  ;;  %4688 = vmatmul.f32.gmra.mxu0 %v4292_v14  ;;  %4736 = vmatmul.f32.gmra.mxu3 %v4404_v19  ;;  %v1074_v17 = vpop.permute.xlu2 %1073  ;;  %v4425_v15 = vld [vmem:[#allocation4 + $0x658] sm:$0xff] }
 0x1e9   : > { %1147 = vst.msk [vmem:[#allocation4 + $0x8] sm:$0xff] %vm503_vm3, %v1052_v8  ;;  %v8276_v31 = vld [vmem:[#allocation2 + $0x13c] sm:$0xff]  ;;  %v8278_v8 = vld [vmem:[#allocation2 + $0x154] sm:$0xff] }
 0x1ea   : > { %1158 = vst.msk [vmem:[#allocation4 + $0x270] sm:$0xff] %vm503_vm3, %v1074_v17  ;;  %v4327_v17 = vld [vmem:[#allocation4 + $0x348] sm:$0xff] }
 0x1eb   : > { %980 = vst.msk [vmem:[#allocation4 + $0x5b8] sm:$0xff] %vm310_vm2, %v8276_v31 }
 0x1ec   : > { %982 = vst.msk [vmem:[#allocation4 + $0x628] sm:$0xff] %vm310_vm2, %v8278_v8 }
 0x1ed   : > { %1271 = vrot.lane.b32.xlu1 %v1193_v23, %s7468_s28  ;;  %1269 = vrot.lane.b32.xlu0 %v1192_v28, %s7468_s28  ;;  %v4439_v23 = vld [vmem:[#allocation4 + $0x6c8] sm:$0xff] }
 0x1ee   : > { %1273 = vrot.lane.b32.xlu2 %v1194_v34, %s7468_s28  ;;  %v8286_v28 = vld [vmem:[#allocation2 + $0x144] sm:$0xff] }
 0x1ef   : > { %v1060_v38 = vpop.permute.xlu1 %1059  ;;  %v1058_v37 = vpop.permute.xlu0 %1057  ;;  %981 = vst.msk [vmem:[#allocation4 + $0x5f0] sm:$0xff] %vm310_vm2, %v8286_v28 }
 0x1f0   : > { %1151 = vst.msk [vmem:[#allocation4 + $0xe8] sm:$0xff] %vm503_vm3, %v1060_v38  ;;  %4691 = vmatmul.f32.gmra.mxu0 %v4299_v36  ;;  %4739 = vmatmul.f32.gmra.mxu3 %v4411_v44  ;;  %v1080_v41 = vpop.permute.xlu2 %1079  ;;  %v1208_v38 = vld [vmem:[#allocation2 + $0x171] sm:$0xff]  ;;  %v1209_v36 = vld [vmem:[#allocation2 + $0x181] sm:$0xff] }
 0x1f1   : > { %1150 = vst.msk [vmem:[#allocation4 + $0xb0] sm:$0xff] %vm503_vm3, %v1058_v37  ;;  %v1207_v37 = vld [vmem:[#allocation2 + $0x169] sm:$0xff]  ;;  %v8294_v44 = vld [vmem:[#allocation2 + $0x15c] sm:$0xff] }
 0x1f2   : > { %1161 = vst.msk [vmem:[#allocation4 + $0x318] sm:$0xff] %vm503_vm3, %v1080_v41  ;;  %v8296_v41 = vld [vmem:[#allocation2 + $0x174] sm:$0xff] }
 0x1f3   : > { %983 = vst.msk [vmem:[#allocation4 + $0x660] sm:$0xff] %vm310_vm2, %v8294_v44 }
 0x1f4   : > { %985 = vst.msk [vmem:[#allocation4 + $0x6d0] sm:$0xff] %vm310_vm2, %v8296_v41 }
 0x1f5   : > { %1277 = vrot.lane.b32.xlu1 %v1196_v50, %s7468_s28  ;;  %1275 = vrot.lane.b32.xlu0 %v1195_v42, %s7468_s28 }
 0x1f6   : > { %1279 = vrot.lane.b32.xlu2 %v1197_v43, %s7468_s28  ;;  %v4334_v43 = vld [vmem:[#allocation4 + $0x380] sm:$0xff] }
 0x1f7   : > { %v1066_v45 = vpop.permute.xlu1 %1065  ;;  %v1064_v0 = vpop.permute.xlu0 %1063 }
 0x1f8   : > { %1154 = vst.msk [vmem:[#allocation4 + $0x190] sm:$0xff] %vm503_vm3, %v1066_v45  ;;  %4694 = vmatmul.f32.gmra.mxu0 %v4306_v49  ;;  %4742 = vmatmul.f32.gmra.mxu3 %v4418_v51  ;;  %v1086_v57 = vpop.permute.xlu2 %1085  ;;  %v8304_v45 = vld [vmem:[#allocation2 + $0x16c] sm:$0xff]  ;;  %v1371_v49 = vld [vmem:[#allocation2 + $0x1a] sm:$0xff] }
 0x1f9   : > { %1153 = vst.msk [vmem:[#allocation4 + $0x158] sm:$0xff] %vm503_vm3, %v1064_v0  ;;  %v1210_v51 = vld [vmem:[#allocation2 + $0x189] sm:$0xff] }
 0x1fa   : > { %1164 = vst.msk [vmem:[#allocation4 + $0x3c0] sm:$0xff] %vm503_vm3, %v1086_v57  ;;  %v1372_v57 = vld [vmem:[#allocation2 + $0x22] sm:$0xff] }
 0x1fb   : > { %984 = vst.msk [vmem:[#allocation4 + $0x698] sm:$0xff] %vm310_vm2, %v8304_v45 }
 0x1fd   : > { %1283 = vrot.lane.b32.xlu1 %v1199_v58, %s7468_s28  ;;  %1281 = vrot.lane.b32.xlu0 %v1198_v61, %s7468_s28 }
 0x1fe   : > { %1285 = vrot.lane.b32.xlu2 %v1200_v4, %s7468_s28  ;;  %v4341_v4 = vld [vmem:[#allocation4 + $0x3b8] sm:$0xff] }
 0x1ff   : > { %v1072_v11 = vpop.permute.xlu1 %1071  ;;  %v1070_v12 = vpop.permute.xlu0 %1069 }
 0x200   : > { %1157 = vst.msk [vmem:[#allocation4 + $0x238] sm:$0xff] %vm503_vm3, %v1072_v11  ;;  %4697 = vmatmul.f32.gmra.mxu0 %v4313_v13  ;;  %4745 = vmatmul.f32.gmra.mxu3 %v4425_v15  ;;  %v1092_v21 = vpop.permute.xlu2 %1091  ;;  %v1373_v13 = vld [vmem:[#allocation2 + $0x32] sm:$0xff]  ;;  %v1375_v15 = vld [vmem:[#allocation2 + $0x4a] sm:$0xff] }
 0x201   : > { %1156 = vst.msk [vmem:[#allocation4 + $0x200] sm:$0xff] %vm503_vm3, %v1070_v12  ;;  %v1374_v12 = vld [vmem:[#allocation2 + $0x3a] sm:$0xff] }
 0x202   : > { %1167 = vst.msk [vmem:[#allocation4 + $0x468] sm:$0xff] %vm503_vm3, %v1092_v21 }
 0x205   : > { %1289 = vrot.lane.b32.xlu1 %v1202_v22, %s7468_s28  ;;  %1287 = vrot.lane.b32.xlu0 %v1201_v24, %s7468_s28  ;;  %v4348_v24 = vld [vmem:[#allocation4 + $0x3f0] sm:$0xff] }
 0x206   : > { %1291 = vrot.lane.b32.xlu2 %v1203_v27, %s7468_s28 }
 0x207   : > { %v1078_v29 = vpop.permute.xlu1 %1077  ;;  %v1076_v39 = vpop.permute.xlu0 %1075 }
 0x208   : > { %1160 = vst.msk [vmem:[#allocation4 + $0x2e0] sm:$0xff] %vm503_vm3, %v1078_v29  ;;  %4700 = vmatmul.f32.gmra.mxu0 %v4320_v47  ;;  %4748 = vmatmul.f32.gmra.mxu3 %v4432_v55  ;;  %v1098_v1 = vpop.permute.xlu2 %1097  ;;  %v1377_v29 = vld [vmem:[#allocation2 + $0x62] sm:$0xff]  ;;  %v1378_v47 = vld [vmem:[#allocation2 + $0x6a] sm:$0xff] }
 0x209   : > { %1159 = vst.msk [vmem:[#allocation4 + $0x2a8] sm:$0xff] %vm503_vm3, %v1076_v39  ;;  %v1376_v39 = vld [vmem:[#allocation2 + $0x52] sm:$0xff] }
 0x20a   : > { %1170 = vst.msk [vmem:[#allocation4 + $0x510] sm:$0xff] %vm503_vm3, %v1098_v1 }
 0x20d   : > { %1295 = vrot.lane.b32.xlu1 %v1205_v60, %s7468_s28  ;;  %1293 = vrot.lane.b32.xlu0 %v1204_v30, %s7468_s28  ;;  %v4355_v60 = vld [vmem:[#allocation4 + $0x428] sm:$0xff] }
 0x20e   : > { %1297 = vrot.lane.b32.xlu2 %v1206_v63, %s7468_s28  ;;  %v1380_v63 = vld [vmem:[#allocation2 + $0x82] sm:$0xff] }
 0x20f   : > { %v1084_v14 = vpop.permute.xlu1 %1083  ;;  %v1082_v19 = vpop.permute.xlu0 %1081 }
 0x210   : > { %1163 = vst.msk [vmem:[#allocation4 + $0x388] sm:$0xff] %vm503_vm3, %v1084_v14  ;;  %4703 = vmatmul.f32.gmra.mxu0 %v4327_v17  ;;  %4751 = vmatmul.f32.gmra.mxu3 %v4439_v23  ;;  %v1104_v34 = vpop.permute.xlu2 %1103  ;;  %v1379_v14 = vld [vmem:[#allocation2 + $0x7a] sm:$0xff] }
 0x211   : > { %1162 = vst.msk [vmem:[#allocation4 + $0x350] sm:$0xff] %vm503_vm3, %v1082_v19  ;;  %v1381_v19 = vld [vmem:[#allocation2 + $0x92] sm:$0xff] }
 0x212   : > { %1173 = vst.msk [vmem:[#allocation4 + $0x5b8] sm:$0xff] %vm503_vm3, %v1104_v34  ;;  %v4362_v34 = vld [vmem:[#allocation4 + $0x460] sm:$0xff] }
 0x215   : > { %1301 = vrot.lane.b32.xlu1 %v1208_v38, %s7468_s28  ;;  %1299 = vrot.lane.b32.xlu0 %v1207_v37, %s7468_s28  ;;  %v1383_v37 = vld [vmem:[#allocation2 + $0xaa] sm:$0xff] }
 0x216   : > { %1303 = vrot.lane.b32.xlu2 %v1209_v36, %s7468_s28  ;;  %v1382_v36 = vld [vmem:[#allocation2 + $0x9a] sm:$0xff] }
 0x217   : > { %v1090_v50 = vpop.permute.xlu1 %1089  ;;  %v1088_v42 = vpop.permute.xlu0 %1087 }
 0x218   : > { %1166 = vst.msk [vmem:[#allocation4 + $0x430] sm:$0xff] %vm503_vm3, %v1090_v50  ;;  %4706 = vmatmul.f32.gmra.mxu0 %v4334_v43  ;;  %v1110_v0 = vpop.permute.xlu2 %1109  ;;  %v1384_v50 = vld [vmem:[#allocation2 + $0xb2] sm:$0xff] }
 0x219   : > { %1165 = vst.msk [vmem:[#allocation4 + $0x3f8] sm:$0xff] %vm503_vm3, %v1088_v42 }
 0x21a   : > { %1176 = vst.msk [vmem:[#allocation4 + $0x660] sm:$0xff] %vm503_vm3, %v1110_v0  ;;  %v4369_v0 = vld [vmem:[#allocation4 + $0x498] sm:$0xff] }
 0x21d   : > { %1435 = vrot.lane.b32.xlu1 %v1371_v49, %s7469_s29  ;;  %1305 = vrot.lane.b32.xlu0 %v1210_v51, %s7468_s28  ;;  %v1386_v51 = vld [vmem:[#allocation2 + $0xca] sm:$0xff] }
 0x21e   : > { %1437 = vrot.lane.b32.xlu2 %v1372_v57, %s7469_s29  ;;  %v1385_v57 = vld [vmem:[#allocation2 + $0xc2] sm:$0xff] }
 0x21f   : > { %v1096_v58 = vpop.permute.xlu1 %1095  ;;  %v1094_v61 = vpop.permute.xlu0 %1093 }
 0x220   : > { %1169 = vst.msk [vmem:[#allocation4 + $0x4d8] sm:$0xff] %vm503_vm3, %v1096_v58  ;;  %4709 = vmatmul.f32.gmra.mxu0 %v4341_v4  ;;  %v1244_v11 = vpop.permute.xlu2 %1243  ;;  %v1387_v58 = vld [vmem:[#allocation2 + $0xda] sm:$0xff] }
 0x221   : > { %1168 = vst.msk [vmem:[#allocation4 + $0x4a0] sm:$0xff] %vm503_vm3, %v1094_v61 }
 0x222   : > { %1339 = vst.msk [vmem:[#allocation4 + $0x8] sm:$0xff] %vm696_vm4, %v1244_v11  ;;  %v4376_v11 = vld [vmem:[#allocation4 + $0x4d0] sm:$0xff] }
 0x225   : > { %1441 = vrot.lane.b32.xlu1 %v1374_v12, %s7469_s29  ;;  %1439 = vrot.lane.b32.xlu0 %v1373_v13, %s7469_s29  ;;  %v1389_v13 = vld [vmem:[#allocation2 + $0xf2] sm:$0xff] }
 0x226   : > { %1443 = vrot.lane.b32.xlu2 %v1375_v15, %s7469_s29  ;;  %v1388_v15 = vld [vmem:[#allocation2 + $0xe2] sm:$0xff] }
 0x227   : > { %v1102_v21 = vpop.permute.xlu1 %1101  ;;  %v1100_v22 = vpop.permute.xlu0 %1099 }
 0x228   : > { %1172 = vst.msk [vmem:[#allocation4 + $0x580] sm:$0xff] %vm503_vm3, %v1102_v21  ;;  %4712 = vmatmul.f32.gmra.mxu0 %v4348_v24  ;;  %v1250_v27 = vpop.permute.xlu2 %1249  ;;  %v1390_v21 = vld [vmem:[#allocation2 + $0xfa] sm:$0xff] }
 0x229   : > { %1171 = vst.msk [vmem:[#allocation4 + $0x548] sm:$0xff] %vm503_vm3, %v1100_v22 }
 0x22a   : > { %1342 = vst.msk [vmem:[#allocation4 + $0xb0] sm:$0xff] %vm696_vm4, %v1250_v27  ;;  %v4383_v27 = vld [vmem:[#allocation4 + $0x508] sm:$0xff] }
 0x22d   : > { %1447 = vrot.lane.b32.xlu1 %v1377_v29, %s7469_s29  ;;  %1445 = vrot.lane.b32.xlu0 %v1376_v39, %s7469_s29  ;;  %v1392_v39 = vld [vmem:[#allocation2 + $0x112] sm:$0xff] }
 0x22e   : > { %1449 = vrot.lane.b32.xlu2 %v1378_v47, %s7469_s29  ;;  %v1391_v47 = vld [vmem:[#allocation2 + $0x10a] sm:$0xff] }
 0x22f   : > { %v1108_v55 = vpop.permute.xlu1 %1107  ;;  %v1106_v1 = vpop.permute.xlu0 %1105 }
 0x230   : > { %1175 = vst.msk [vmem:[#allocation4 + $0x628] sm:$0xff] %vm503_vm3, %v1108_v55  ;;  %4715 = vmatmul.f32.gmra.mxu0 %v4355_v60  ;;  %v1256_v30 = vpop.permute.xlu2 %1255  ;;  %v1393_v55 = vld [vmem:[#allocation2 + $0x122] sm:$0xff] }
 0x231   : > { %1174 = vst.msk [vmem:[#allocation4 + $0x5f0] sm:$0xff] %vm503_vm3, %v1106_v1 }
 0x232   : > { %1345 = vst.msk [vmem:[#allocation4 + $0x158] sm:$0xff] %vm696_vm4, %v1256_v30 }
 0x235   : > { %1453 = vrot.lane.b32.xlu1 %v1380_v63, %s7469_s29  ;;  %1451 = vrot.lane.b32.xlu0 %v1379_v14, %s7469_s29  ;;  %v4477_v63 = vld [vmem:[%s11424_s1 + $0xf8] sm:$0xff] }
 0x236   : > { %1455 = vrot.lane.b32.xlu2 %v1381_v19, %s7469_s29  ;;  %v1395_v14 = vld [vmem:[#allocation2 + $0x13a] sm:$0xff]  ;;  %v1394_v19 = vld [vmem:[#allocation2 + $0x12a] sm:$0xff]  ;;  %4755 = vmatpush.msra.mxu1 %v4477_v63 }
 0x237   : > { %v1114_v17 = vpop.permute.xlu1 %1113  ;;  %v1112_v23 = vpop.permute.xlu0 %1111  ;;  %7094 = vmatpush.msrb.mxu3 %v4477_v63 }
 0x238   : > { %1178 = vst.msk [vmem:[#allocation4 + $0x6d0] sm:$0xff] %vm503_vm3, %v1114_v17  ;;  %4718 = vmatmul.f32.gmra.mxu0 %v4362_v34  ;;  %v1262_v38 = vpop.permute.xlu2 %1261  ;;  %v4476_v17 = vld [vmem:[%s11424_s1 + $0xf0] sm:$0xff]  ;;  %v1396_v34 = vld [vmem:[#allocation2 + $0x142] sm:$0xff] }
 0x239   : > { %1177 = vst.msk [vmem:[#allocation4 + $0x698] sm:$0xff] %vm503_vm3, %v1112_v23  ;;  %v4475_v23 = vld [vmem:[%s11424_s1 + $0xe8] sm:$0xff]  ;;  %4756 = vmatpush.msra.mxu1 %v4476_v17  ;;  %7095 = vmatpush.msrb.mxu3 %v4476_v17 }
 0x23a   : > { %1348 = vst.msk [vmem:[#allocation4 + $0x200] sm:$0xff] %vm696_vm4, %v1262_v38  ;;  %v4474_v38 = vld [vmem:[%s11424_s1 + $0xe0] sm:$0xff] }
 0x23b   : > { %4757 = vmatpush.msra.mxu1 %v4475_v23  ;;  %7096 = vmatpush.msrb.mxu3 %v4475_v23 }
 0x23d   : > { %1459 = vrot.lane.b32.xlu1 %v1383_v37, %s7469_s29  ;;  %1457 = vrot.lane.b32.xlu0 %v1382_v36, %s7469_s29 }
 0x23e   : > { %1461 = vrot.lane.b32.xlu2 %v1384_v50, %s7469_s29  ;;  %4758 = vmatpush.msra.mxu1 %v4474_v38 }
 0x23f   : > { %v1248_v42 = vpop.permute.xlu1 %1247  ;;  %v1246_v43 = vpop.permute.xlu0 %1245  ;;  %7097 = vmatpush.msrb.mxu3 %v4474_v38 }
 0x240   : > { %1341 = vst.msk [vmem:[#allocation4 + $0x78] sm:$0xff] %vm696_vm4, %v1248_v42  ;;  %4721 = vmatmul.f32.gmra.mxu0 %v4369_v0  ;;  %v1268_v49 = vpop.permute.xlu2 %1267  ;;  %v4473_v42 = vld [vmem:[%s11424_s1 + $0xd8] sm:$0xff] }
 0x241   : > { %1340 = vst.msk [vmem:[#allocation4 + $0x40] sm:$0xff] %vm696_vm4, %v1246_v43  ;;  %v1398_v43 = vld [vmem:[#allocation2 + $0x15a] sm:$0xff]  ;;  %v1397_v0 = vld [vmem:[#allocation2 + $0x152] sm:$0xff]  ;;  %4759 = vmatpush.msra.mxu1 %v4473_v42  ;;  %7098 = vmatpush.msrb.mxu3 %v4473_v42  ;;  %v1657_v42 = vld [vmem:[#allocation2 + $0x184] sm:$0xff] }
 0x242   : > { %1351 = vst.msk [vmem:[#allocation4 + $0x2a8] sm:$0xff] %vm696_vm4, %v1268_v49  ;;  %v4472_v49 = vld [vmem:[%s11424_s1 + $0xd0] sm:$0xff] }
 0x243   : > { %4760 = vmatpush.msra.mxu1 %v4472_v49  ;;  %7099 = vmatpush.msrb.mxu3 %v4472_v49  ;;  %v1563_v49 = vld [vmem:[#allocation2 + $0x1b] sm:$0xff] }
 0x244   : > { %1595 = vst.msk [vmem:[#allocation4 + $0x10] sm:$0xff] %vm310_vm2, %v1563_v49  ;;  %v8620_v49 = vld [vmem:[#allocation2 + $0xfb] sm:$0xff] }
 0x245   : > { %1465 = vrot.lane.b32.xlu1 %v1386_v51, %s7469_s29  ;;  %1463 = vrot.lane.b32.xlu0 %v1385_v57, %s7469_s29  ;;  %v4471_v51 = vld [vmem:[%s11424_s1 + $0xc8] sm:$0xff]  ;;  %1614 = vst.msk [vmem:[#allocation4 + $0x438] sm:$0xff] %vm310_vm2, %v8620_v49 }
 0x246   : > { %1467 = vrot.lane.b32.xlu2 %v1387_v58, %s7469_s29  ;;  %v1399_v57 = vld [vmem:[#allocation2 + $0x16a] sm:$0xff]  ;;  %v4470_v58 = vld [vmem:[%s11424_s1 + $0xc0] sm:$0xff]  ;;  %4761 = vmatpush.msra.mxu1 %v4471_v51 }
 0x247   : > { %v1254_v61 = vpop.permute.xlu1 %1253  ;;  %v1252_v4 = vpop.permute.xlu0 %1251  ;;  %7100 = vmatpush.msrb.mxu3 %v4471_v51 }
 0x248   : > { %1344 = vst.msk [vmem:[#allocation4 + $0x120] sm:$0xff] %vm696_vm4, %v1254_v61  ;;  %4724 = vmatmul.f32.gmra.mxu0 %v4376_v11  ;;  %v1274_v12 = vpop.permute.xlu2 %1273  ;;  %4762 = vmatpush.msra.mxu1 %v4470_v58 }
 0x249   : > { %1343 = vst.msk [vmem:[#allocation4 + $0xe8] sm:$0xff] %vm696_vm4, %v1252_v4  ;;  %7101 = vmatpush.msrb.mxu3 %v4470_v58  ;;  %v1821_v58 = vld [vmem:[#allocation2 + $0x38] sm:$0xff] }
 0x24a   : > { %1354 = vst.msk [vmem:[#allocation4 + $0x350] sm:$0xff] %vm696_vm4, %v1274_v12  ;;  %v4469_v12 = vld [vmem:[%s11424_s1 + $0xb8] sm:$0xff] }
 0x24b   : > { %4763 = vmatpush.msra.mxu1 %v4469_v12  ;;  %7102 = vmatpush.msrb.mxu3 %v4469_v12 }
 0x24d   : > { %1471 = vrot.lane.b32.xlu1 %v1389_v13, %s7469_s29  ;;  %1469 = vrot.lane.b32.xlu0 %v1388_v15, %s7469_s29  ;;  %v1401_v13 = vld [vmem:[#allocation2 + $0x182] sm:$0xff]  ;;  %v1400_v15 = vld [vmem:[#allocation2 + $0x172] sm:$0xff] }
 0x24e   : > { %1473 = vrot.lane.b32.xlu2 %v1390_v21, %s7469_s29  ;;  %v4468_v21 = vld [vmem:[%s11424_s1 + $0xb0] sm:$0xff] }
 0x24f   : > { %v1260_v22 = vpop.permute.xlu1 %1259  ;;  %v1258_v24 = vpop.permute.xlu0 %1257  ;;  %4764 = vmatpush.msra.mxu1 %v4468_v21  ;;  %7103 = vmatpush.msrb.mxu3 %v4468_v21  ;;  %v8534_v21 = vld [vmem:[#allocation2 + $0x3b] sm:$0xff] }
 0x250   : > { %1347 = vst.msk [vmem:[#allocation4 + $0x1c8] sm:$0xff] %vm696_vm4, %v1260_v22  ;;  %4727 = vmatmul.f32.gmra.mxu0 %v4383_v27  ;;  %v1280_v29 = vpop.permute.xlu2 %1279  ;;  %v4467_v22 = vld [vmem:[%s11424_s1 + $0xa8] sm:$0xff]  ;;  %v4466_v27 = vld [vmem:[%s11424_s1 + $0xa0] sm:$0xff] }
 0x251   : > { %1346 = vst.msk [vmem:[#allocation4 + $0x190] sm:$0xff] %vm696_vm4, %v1258_v24  ;;  %v1402_v24 = vld [vmem:[#allocation2 + $0x18a] sm:$0xff]  ;;  %4765 = vmatpush.msra.mxu1 %v4467_v22  ;;  %7104 = vmatpush.msrb.mxu3 %v4467_v22 }
 0x252   : > { %1357 = vst.msk [vmem:[#allocation4 + $0x3f8] sm:$0xff] %vm696_vm4, %v1280_v29 }
 0x253   : > { %4766 = vmatpush.msra.mxu1 %v4466_v27  ;;  %7105 = vmatpush.msrb.mxu3 %v4466_v27  ;;  %v1824_v27 = vld [vmem:[#allocation2 + $0x60] sm:$0xff]  ;;  %1598 = vst.msk [vmem:[#allocation4 + $0xb8] sm:$0xff] %vm310_vm2, %v8534_v21 }
 0x255   : > { %1477 = vrot.lane.b32.xlu1 %v1392_v39, %s7469_s29  ;;  %1475 = vrot.lane.b32.xlu0 %v1391_v47, %s7469_s29 }
 0x256   : > { %1479 = vrot.lane.b32.xlu2 %v1393_v55, %s7469_s29  ;;  %v4465_v55 = vld [vmem:[%s11424_s1 + $0x98] sm:$0xff] }
 0x257   : > { %v1266_v1 = vpop.permute.xlu1 %1265  ;;  %v1264_v60 = vpop.permute.xlu0 %1263  ;;  %4767 = vmatpush.msra.mxu1 %v4465_v55  ;;  %7106 = vmatpush.msrb.mxu3 %v4465_v55 }
 0x258   : > { %1350 = vst.msk [vmem:[#allocation4 + $0x270] sm:$0xff] %vm696_vm4, %v1266_v1  ;;  %v1286_v30 = vpop.permute.xlu2 %1285  ;;  %v4464_v1 = vld [vmem:[%s11424_s1 + $0x90] sm:$0xff] }
 0x259   : > { %1349 = vst.msk [vmem:[#allocation4 + $0x238] sm:$0xff] %vm696_vm4, %v1264_v60  ;;  %v4463_v60 = vld [vmem:[%s11424_s1 + $0x88] sm:$0xff]  ;;  %4768 = vmatpush.msra.mxu1 %v4464_v1  ;;  %7107 = vmatpush.msrb.mxu3 %v4464_v1 }
 0x25a   : > { %1360 = vst.msk [vmem:[#allocation4 + $0x4a0] sm:$0xff] %vm696_vm4, %v1286_v30  ;;  %v4462_v30 = vld [vmem:[%s11424_s1 + $0x80] sm:$0xff] }
 0x25b   : > { %4769 = vmatpush.msra.mxu1 %v4463_v60  ;;  %7108 = vmatpush.msrb.mxu3 %v4463_v60 }
 0x25d   : > { %1483 = vrot.lane.b32.xlu1 %v1395_v14, %s7469_s29  ;;  %1481 = vrot.lane.b32.xlu0 %v1394_v19, %s7469_s29 }
 0x25e   : > { %1485 = vrot.lane.b32.xlu2 %v1396_v34, %s7469_s29  ;;  %4770 = vmatpush.msra.mxu1 %v4462_v30 }
 0x25f   : > { %v1272_v37 = vpop.permute.xlu1 %1271  ;;  %v1270_v36 = vpop.permute.xlu0 %1269  ;;  %7109 = vmatpush.msrb.mxu3 %v4462_v30 }
 0x260   : > { %1353 = vst.msk [vmem:[#allocation4 + $0x318] sm:$0xff] %vm696_vm4, %v1272_v37  ;;  %v1292_v50 = vpop.permute.xlu2 %1291 }
 0x261   : > { %1352 = vst.msk [vmem:[#allocation4 + $0x2e0] sm:$0xff] %vm696_vm4, %v1270_v36 }
 0x262   : > { %1363 = vst.msk [vmem:[#allocation4 + $0x548] sm:$0xff] %vm696_vm4, %v1292_v50  ;;  %v1658_v50 = vld [vmem:[#allocation2 + $0x18c] sm:$0xff] }
 0x265   : > { %1489 = vrot.lane.b32.xlu1 %v1398_v43, %s7469_s29  ;;  %1487 = vrot.lane.b32.xlu0 %v1397_v0, %s7469_s29 }
 0x266   : > { %1491 = vrot.lane.b32.xlu2 %v1399_v57, %s7469_s29  ;;  %v1822_v57 = vld [vmem:[#allocation2 + $0x48] sm:$0xff] }
 0x267   : > { %v1278_v61 = vpop.permute.xlu1 %1277  ;;  %v1276_v4 = vpop.permute.xlu0 %1275 }
 0x268   : > { %1356 = vst.msk [vmem:[#allocation4 + $0x3c0] sm:$0xff] %vm696_vm4, %v1278_v61  ;;  %v1298_v11 = vpop.permute.xlu2 %1297  ;;  %v1823_v61 = vld [vmem:[#allocation2 + $0x50] sm:$0xff] }
 0x269   : > { %1355 = vst.msk [vmem:[#allocation4 + $0x388] sm:$0xff] %vm696_vm4, %v1276_v4  ;;  %v8524_v4 = vld [vmem:[#allocation2 + $0x33] sm:$0xff] }
 0x26a   : > { %1366 = vst.msk [vmem:[#allocation4 + $0x5f0] sm:$0xff] %vm696_vm4, %v1298_v11  ;;  %v8526_v11 = vld [vmem:[#allocation2 + $0x4b] sm:$0xff] }
 0x26b   : > { %1597 = vst.msk [vmem:[#allocation4 + $0x80] sm:$0xff] %vm310_vm2, %v8524_v4 }
 0x26c   : > { %1599 = vst.msk [vmem:[#allocation4 + $0xf0] sm:$0xff] %vm310_vm2, %v8526_v11 }
 0x26d   : > { %1495 = vrot.lane.b32.xlu1 %v1401_v13, %s7469_s29  ;;  %1493 = vrot.lane.b32.xlu0 %v1400_v15, %s7469_s29 }
 0x26e   : > { %1497 = vrot.lane.b32.xlu2 %v1402_v24, %s7469_s29  ;;  %v1825_v24 = vld [vmem:[#allocation2 + $0x68] sm:$0xff] }
 0x26f   : > { %v1284_v29 = vpop.permute.xlu1 %1283  ;;  %v1282_v39 = vpop.permute.xlu0 %1281 }
 0x270   : > { %1359 = vst.msk [vmem:[#allocation4 + $0x468] sm:$0xff] %vm696_vm4, %v1284_v29  ;;  %v1304_v47 = vpop.permute.xlu2 %1303  ;;  %v1826_v29 = vld [vmem:[#allocation2 + $0x78] sm:$0xff] }
 0x271   : > { %1358 = vst.msk [vmem:[#allocation4 + $0x430] sm:$0xff] %vm696_vm4, %v1282_v39  ;;  %v8542_v39 = vld [vmem:[#allocation2 + $0x53] sm:$0xff] }
 0x272   : > { %1369 = vst.msk [vmem:[#allocation4 + $0x698] sm:$0xff] %vm696_vm4, %v1304_v47  ;;  %v8544_v47 = vld [vmem:[#allocation2 + $0x6b] sm:$0xff] }
 0x273   : > { %1600 = vst.msk [vmem:[#allocation4 + $0x128] sm:$0xff] %vm310_vm2, %v8542_v39 }
 0x274   : > { %1602 = vst.msk [vmem:[#allocation4 + $0x198] sm:$0xff] %vm310_vm2, %v8544_v47 }
 0x275   : > { %1693 = vrot.lane.b32.xlu1 %v8142_v9, %s7467_s27  ;;  %1691 = vrot.lane.b32.xlu0 %v8132_v62, %s7467_s27 }
 0x276   : > { %1695 = vrot.lane.b32.xlu2 %v8134_v2, %s7467_s27 }
 0x277   : > { %v1290_v63 = vpop.permute.xlu1 %1289  ;;  %v1288_v14 = vpop.permute.xlu0 %1287 }
 0x278   : > { %1362 = vst.msk [vmem:[#allocation4 + $0x510] sm:$0xff] %vm696_vm4, %v1290_v63  ;;  %v1438_v9 = vpop.permute.xlu2 %1437  ;;  %v8552_v63 = vld [vmem:[#allocation2 + $0x63] sm:$0xff] }
 0x279   : > { %1361 = vst.msk [vmem:[#allocation4 + $0x4d8] sm:$0xff] %vm696_vm4, %v1288_v14 }
 0x27a   : > { %1532 = vst.msk [vmem:[#allocation4 + $0x40] sm:$0xff] %vm889_vm5, %v1438_v9  ;;  %v1828_v9 = vld [vmem:[#allocation2 + $0x90] sm:$0xff] }
 0x27b   : > { %1601 = vst.msk [vmem:[#allocation4 + $0x160] sm:$0xff] %vm310_vm2, %v8552_v63 }
 0x27d   : > { %1699 = vrot.lane.b32.xlu1 %v8160_v25, %s7467_s27  ;;  %1697 = vrot.lane.b32.xlu0 %v8150_v16, %s7467_s27 }
 0x27e   : > { %1701 = vrot.lane.b32.xlu2 %v8152_v18, %s7467_s27 }
 0x27f   : > { %v1296_v62 = vpop.permute.xlu1 %1295  ;;  %v1294_v19 = vpop.permute.xlu0 %1293 }
 0x280   : > { %1365 = vst.msk [vmem:[#allocation4 + $0x5b8] sm:$0xff] %vm696_vm4, %v1296_v62  ;;  %v1444_v2 = vpop.permute.xlu2 %1443  ;;  %v1827_v62 = vld [vmem:[#allocation2 + $0x80] sm:$0xff] }
 0x281   : > { %1364 = vst.msk [vmem:[#allocation4 + $0x580] sm:$0xff] %vm696_vm4, %v1294_v19  ;;  %v1829_v19 = vld [vmem:[#allocation2 + $0x98] sm:$0xff] }
 0x282   : > { %1535 = vst.msk [vmem:[#allocation4 + $0xe8] sm:$0xff] %vm889_vm5, %v1444_v2 }
 0x285   : > { %1705 = vrot.lane.b32.xlu1 %v8178_v54, %s7467_s27  ;;  %1703 = vrot.lane.b32.xlu0 %v8168_v48, %s7467_s27 }
 0x286   : > { %1707 = vrot.lane.b32.xlu2 %v8170_v46, %s7467_s27 }
 0x287   : > { %v1302_v25 = vpop.permute.xlu1 %1301  ;;  %v1300_v16 = vpop.permute.xlu0 %1299 }
 0x288   : > { %1368 = vst.msk [vmem:[#allocation4 + $0x660] sm:$0xff] %vm696_vm4, %v1302_v25  ;;  %v1450_v18 = vpop.permute.xlu2 %1449  ;;  %v8560_v25 = vld [vmem:[#allocation2 + $0x7b] sm:$0xff] }
 0x289   : > { %1367 = vst.msk [vmem:[#allocation4 + $0x628] sm:$0xff] %vm696_vm4, %v1300_v16  ;;  %v4251_v37 = vld [vmem:[#allocation4 + $0xe8] sm:$0xff]  ;;  %v8562_v16 = vld [vmem:[#allocation2 + $0x93] sm:$0xff] }
 0x28a   : > { %1538 = vst.msk [vmem:[#allocation4 + $0x190] sm:$0xff] %vm889_vm5, %v1450_v18 }
 0x28b   : > { %1603 = vst.msk [vmem:[#allocation4 + $0x1d0] sm:$0xff] %vm310_vm2, %v8560_v25 }
 0x28c   : > { %1605 = vst.msk [vmem:[#allocation4 + $0x240] sm:$0xff] %vm310_vm2, %v8562_v16 }
 0x28d   : > { %1711 = vrot.lane.b32.xlu1 %v8196_v33, %s7467_s27  ;;  %1709 = vrot.lane.b32.xlu0 %v8186_v5, %s7467_s27 }
 0x28e   : > { %1713 = vrot.lane.b32.xlu2 %v8188_v10, %s7467_s27 }
 0x28f   : > { %v1436_v54 = vpop.permute.xlu1 %1435  ;;  %v1306_v48 = vpop.permute.xlu0 %1305 }
 0x290   : > { %1531 = vst.msk [vmem:[#allocation4 + $0x8] sm:$0xff] %vm889_vm5, %v1436_v54  ;;  %v1456_v46 = vpop.permute.xlu2 %1455 }
 0x291   : > { %1370 = vst.msk [vmem:[#allocation4 + $0x6d0] sm:$0xff] %vm696_vm4, %v1306_v48  ;;  %v4272_v15 = vld [vmem:[#allocation4 + $0x190] sm:$0xff] }
 0x292   : > { %1541 = vst.msk [vmem:[#allocation4 + $0x238] sm:$0xff] %vm889_vm5, %v1456_v46  ;;  %v8570_v46 = vld [vmem:[#allocation2 + $0x83] sm:$0xff] }
 0x293   : > { %1604 = vst.msk [vmem:[#allocation4 + $0x208] sm:$0xff] %vm310_vm2, %v8570_v46 }
 0x295   : > { %1717 = vrot.lane.b32.xlu1 %v8214_v52, %s7467_s27  ;;  %1715 = vrot.lane.b32.xlu0 %v8204_v26, %s7467_s27  ;;  %v4230_v26 = vld [vmem:[#allocation4 + $0x40] sm:$0xff] }
 0x296   : > { %1719 = vrot.lane.b32.xlu2 %v8206_v32, %s7467_s27 }
 0x297   : > { %v1442_v33 = vpop.permute.xlu1 %1441  ;;  %v1440_v5 = vpop.permute.xlu0 %1439  ;;  %v4223_v17 = vld [vmem:[#allocation4 + $0x8] sm:$0xff] }
 0x298   : > { %1534 = vst.msk [vmem:[#allocation4 + $0xb0] sm:$0xff] %vm889_vm5, %v1442_v33  ;;  %4771 = vmatmul.f32.vlgmr.msra.gmra.mxu1 %v4223_v17  ;;  %v1462_v10 = vpop.permute.xlu2 %1461  ;;  %v1830_v17 = vld [vmem:[#allocation2 + $0xa8] sm:$0xff] }
 0x299   : > { %1533 = vst.msk [vmem:[#allocation4 + $0x78] sm:$0xff] %vm889_vm5, %v1440_v5  ;;  %v1831_v5 = vld [vmem:[#allocation2 + $0xb0] sm:$0xff] }
 0x29a   : > { %1544 = vst.msk [vmem:[#allocation4 + $0x2e0] sm:$0xff] %vm889_vm5, %v1462_v10  ;;  %v1832_v10 = vld [vmem:[#allocation2 + $0xc0] sm:$0xff] }
 0x29d   : > { %1723 = vrot.lane.b32.xlu1 %v8232_v56, %s7467_s27  ;;  %1721 = vrot.lane.b32.xlu0 %v8222_v3, %s7467_s27 }
 0x29e   : > { %1725 = vrot.lane.b32.xlu2 %v8224_v59, %s7467_s27 }
 0x29f   : > { %v1448_v52 = vpop.permute.xlu1 %1447  ;;  %v1446_v23 = vpop.permute.xlu0 %1445  ;;  %v4244_v38 = vld [vmem:[#allocation4 + $0xb0] sm:$0xff] }
 0x2a0   : > { %1537 = vst.msk [vmem:[#allocation4 + $0x158] sm:$0xff] %vm889_vm5, %v1448_v52  ;;  %4774 = vmatmul.f32.gmra.mxu1 %v4230_v26  ;;  %v1468_v32 = vpop.permute.xlu2 %1467  ;;  %v4237_v34 = vld [vmem:[#allocation4 + $0x78] sm:$0xff] }
 0x2a1   : > { %1536 = vst.msk [vmem:[#allocation4 + $0x120] sm:$0xff] %vm889_vm5, %v1446_v23  ;;  %v8578_v26 = vld [vmem:[#allocation2 + $0x9b] sm:$0xff]  ;;  %v8580_v52 = vld [vmem:[#allocation2 + $0xb3] sm:$0xff] }
 0x2a2   : > { %1547 = vst.msk [vmem:[#allocation4 + $0x388] sm:$0xff] %vm889_vm5, %v1468_v32 }
 0x2a3   : > { %1606 = vst.msk [vmem:[#allocation4 + $0x278] sm:$0xff] %vm310_vm2, %v8578_v26 }
 0x2a4   : > { %1608 = vst.msk [vmem:[#allocation4 + $0x2e8] sm:$0xff] %vm310_vm2, %v8580_v52 }
 0x2a5   : > { %1729 = vrot.lane.b32.xlu1 %v8250_v20, %s7467_s27  ;;  %1727 = vrot.lane.b32.xlu0 %v8240_v6, %s7467_s27 }
 0x2a6   : > { %1731 = vrot.lane.b32.xlu2 %v8242_v7, %s7467_s27 }
 0x2a7   : > { %v1454_v3 = vpop.permute.xlu1 %1453  ;;  %v1452_v56 = vpop.permute.xlu0 %1451  ;;  %v4265_v0 = vld [vmem:[#allocation4 + $0x158] sm:$0xff] }
 0x2a8   : > { %1540 = vst.msk [vmem:[#allocation4 + $0x200] sm:$0xff] %vm889_vm5, %v1454_v3  ;;  %4777 = vmatmul.f32.gmra.mxu1 %v4237_v34  ;;  %v1474_v59 = vpop.permute.xlu2 %1473  ;;  %v4258_v36 = vld [vmem:[#allocation4 + $0x120] sm:$0xff]  ;;  %v4293_v3 = vld [vmem:[#allocation4 + $0x238] sm:$0xff]  ;;  %v8588_v34 = vld [vmem:[#allocation2 + $0xab] sm:$0xff] }
 0x2a9   : > { %1539 = vst.msk [vmem:[#allocation4 + $0x1c8] sm:$0xff] %vm889_vm5, %v1452_v56 }
 0x2aa   : > { %1550 = vst.msk [vmem:[#allocation4 + $0x430] sm:$0xff] %vm889_vm5, %v1474_v59 }
 0x2ab   : > { %1607 = vst.msk [vmem:[#allocation4 + $0x2b0] sm:$0xff] %vm310_vm2, %v8588_v34 }
 0x2ad   : > { %1735 = vrot.lane.b32.xlu1 %v8268_v53, %s7467_s27  ;;  %1733 = vrot.lane.b32.xlu0 %v8258_v40, %s7467_s27 }
 0x2ae   : > { %1737 = vrot.lane.b32.xlu2 %v8260_v35, %s7467_s27 }
 0x2af   : > { %v1460_v6 = vpop.permute.xlu1 %1459  ;;  %v1458_v20 = vpop.permute.xlu0 %1457  ;;  %v4286_v48 = vld [vmem:[#allocation4 + $0x200] sm:$0xff] }
 0x2b0   : > { %1543 = vst.msk [vmem:[#allocation4 + $0x2a8] sm:$0xff] %vm889_vm5, %v1460_v6  ;;  %4780 = vmatmul.f32.gmra.mxu1 %v4244_v38  ;;  %v1480_v7 = vpop.permute.xlu2 %1479  ;;  %v4279_v60 = vld [vmem:[#allocation4 + $0x1c8] sm:$0xff]  ;;  %v1834_v6 = vld [vmem:[#allocation2 + $0xd8] sm:$0xff]  ;;  %v1835_v38 = vld [vmem:[#allocation2 + $0xe0] sm:$0xff] }
 0x2b1   : > { %1542 = vst.msk [vmem:[#allocation4 + $0x270] sm:$0xff] %vm889_vm5, %v1458_v20  ;;  %v1833_v20 = vld [vmem:[#allocation2 + $0xc8] sm:$0xff] }
 0x2b2   : > { %1553 = vst.msk [vmem:[#allocation4 + $0x4d8] sm:$0xff] %vm889_vm5, %v1480_v7  ;;  %v8596_v7 = vld [vmem:[#allocation2 + $0xc3] sm:$0xff] }
 0x2b3   : > { %1609 = vst.msk [vmem:[#allocation4 + $0x320] sm:$0xff] %vm310_vm2, %v8596_v7 }
 0x2b5   : > { %1741 = vrot.lane.b32.xlu1 %v8286_v28, %s7467_s27  ;;  %1739 = vrot.lane.b32.xlu0 %v8276_v31, %s7467_s27 }
 0x2b6   : > { %1743 = vrot.lane.b32.xlu2 %v8278_v8, %s7467_s27 }
 0x2b7   : > { %v1466_v40 = vpop.permute.xlu1 %1465  ;;  %v1464_v53 = vpop.permute.xlu0 %1463 }
 0x2b8   : > { %1546 = vst.msk [vmem:[#allocation4 + $0x350] sm:$0xff] %vm889_vm5, %v1466_v40  ;;  %4783 = vmatmul.f32.gmra.mxu1 %v4251_v37  ;;  %v1486_v35 = vpop.permute.xlu2 %1485  ;;  %v8598_v40 = vld [vmem:[#allocation2 + $0xdb] sm:$0xff] }
 0x2b9   : > { %1545 = vst.msk [vmem:[#allocation4 + $0x318] sm:$0xff] %vm889_vm5, %v1464_v53 }
 0x2ba   : > { %1556 = vst.msk [vmem:[#allocation4 + $0x580] sm:$0xff] %vm889_vm5, %v1486_v35  ;;  %v4300_v35 = vld [vmem:[#allocation4 + $0x270] sm:$0xff] }
 0x2bb   : > { %1611 = vst.msk [vmem:[#allocation4 + $0x390] sm:$0xff] %vm310_vm2, %v8598_v40 }
 0x2bd   : > { %1747 = vrot.lane.b32.xlu1 %v8304_v45, %s7467_s27  ;;  %1745 = vrot.lane.b32.xlu0 %v8294_v44, %s7467_s27  ;;  %v1820_v45 = vld [vmem:[#allocation2 + $0x30] sm:$0xff]  ;;  %v1564_v44 = vld [vmem:[#allocation2 + $0x23] sm:$0xff] }
 0x2be   : > { %1749 = vrot.lane.b32.xlu2 %v8296_v41, %s7467_s27  ;;  %1596 = vst.msk [vmem:[#allocation4 + $0x48] sm:$0xff] %vm310_vm2, %v1564_v44 }
 0x2bf   : > { %v1472_v31 = vpop.permute.xlu1 %1471  ;;  %v1470_v28 = vpop.permute.xlu0 %1469 }
 0x2c0   : > { %1549 = vst.msk [vmem:[#allocation4 + $0x3f8] sm:$0xff] %vm889_vm5, %v1472_v31  ;;  %4786 = vmatmul.f32.gmra.mxu1 %v4258_v36  ;;  %v1492_v8 = vpop.permute.xlu2 %1491 }
 0x2c1   : > { %1548 = vst.msk [vmem:[#allocation4 + $0x3c0] sm:$0xff] %vm889_vm5, %v1470_v28  ;;  %v4398_v2 = vld [vmem:[#allocation4 + $0x580] sm:$0xff]  ;;  %v8606_v28 = vld [vmem:[#allocation2 + $0xcb] sm:$0xff] }
 0x2c2   : > { %1559 = vst.msk [vmem:[#allocation4 + $0x628] sm:$0xff] %vm889_vm5, %v1492_v8  ;;  %v1837_v8 = vld [vmem:[#allocation2 + $0xf8] sm:$0xff] }
 0x2c3   : > { %1610 = vst.msk [vmem:[#allocation4 + $0x358] sm:$0xff] %vm310_vm2, %v8606_v28 }
 0x2c5   : > { %1753 = vrot.lane.b32.xlu1 %v1658_v50, %s7467_s27  ;;  %1751 = vrot.lane.b32.xlu0 %v1657_v42, %s7467_s27  ;;  %v1836_v50 = vld [vmem:[#allocation2 + $0xf0] sm:$0xff]  ;;  %v1838_v42 = vld [vmem:[#allocation2 + $0x108] sm:$0xff] }
 0x2c6   : > { %1884 = vrot.lane.b32.xlu2 %v1820_v45, %s7468_s28  ;;  %v8614_v45 = vld [vmem:[#allocation2 + $0xe3] sm:$0xff] }
 0x2c7   : > { %v1478_v43 = vpop.permute.xlu1 %1477  ;;  %v1476_v41 = vpop.permute.xlu0 %1475  ;;  %1612 = vst.msk [vmem:[#allocation4 + $0x3c8] sm:$0xff] %vm310_vm2, %v8614_v45 }
 0x2c8   : > { %1552 = vst.msk [vmem:[#allocation4 + $0x4a0] sm:$0xff] %vm889_vm5, %v1478_v43  ;;  %4789 = vmatmul.f32.gmra.mxu1 %v4265_v0  ;;  %v1498_v51 = vpop.permute.xlu2 %1497 }
 0x2c9   : > { %1551 = vst.msk [vmem:[#allocation4 + $0x468] sm:$0xff] %vm889_vm5, %v1476_v41  ;;  %v4307_v41 = vld [vmem:[#allocation4 + $0x2a8] sm:$0xff] }
 0x2ca   : > { %1562 = vst.msk [vmem:[#allocation4 + $0x6d0] sm:$0xff] %vm889_vm5, %v1498_v51  ;;  %v4419_v0 = vld [vmem:[#allocation4 + $0x628] sm:$0xff] }
 0x2cd   : > { %1888 = vrot.lane.b32.xlu1 %v1822_v57, %s7468_s28  ;;  %1886 = vrot.lane.b32.xlu0 %v1821_v58, %s7468_s28  ;;  %v8623_v57 = vld [vmem:[#allocation2 + $0xf3] sm:$0xff]  ;;  %v1840_v58 = vld [vmem:[#allocation2 + $0x120] sm:$0xff] }
 0x2ce   : > { %1890 = vrot.lane.b32.xlu2 %v1823_v61, %s7468_s28  ;;  %v1839_v61 = vld [vmem:[#allocation2 + $0x110] sm:$0xff]  ;;  %1613 = vst.msk [vmem:[#allocation4 + $0x400] sm:$0xff] %vm310_vm2, %v8623_v57 }
 0x2cf   : > { %v1484_v12 = vpop.permute.xlu1 %1483  ;;  %v1482_v13 = vpop.permute.xlu0 %1481 }
 0x2d0   : > { %1555 = vst.msk [vmem:[#allocation4 + $0x548] sm:$0xff] %vm889_vm5, %v1484_v12  ;;  %4792 = vmatmul.f32.gmra.mxu1 %v4272_v15  ;;  %v1696_v22 = vpop.permute.xlu2 %1695  ;;  %v1841_v12 = vld [vmem:[#allocation2 + $0x128] sm:$0xff] }
 0x2d1   : > { %1554 = vst.msk [vmem:[#allocation4 + $0x510] sm:$0xff] %vm889_vm5, %v1482_v13  ;;  %v8632_v13 = vld [vmem:[#allocation2 + $0x10b] sm:$0xff] }
 0x2d2   : > { %1789 = vst.msk [vmem:[#allocation4 + $0x80] sm:$0xff] %vm503_vm3, %v1696_v22 }
 0x2d3   : > { %1615 = vst.msk [vmem:[#allocation4 + $0x470] sm:$0xff] %vm310_vm2, %v8632_v13 }
 0x2d5   : > { %1894 = vrot.lane.b32.xlu1 %v1825_v24, %s7468_s28  ;;  %1892 = vrot.lane.b32.xlu0 %v1824_v27, %s7468_s28  ;;  %v4314_v24 = vld [vmem:[#allocation4 + $0x2e0] sm:$0xff] }
 0x2d6   : > { %1896 = vrot.lane.b32.xlu2 %v1826_v29, %s7468_s28  ;;  %v8638_v29 = vld [vmem:[#allocation2 + $0x123] sm:$0xff] }
 0x2d7   : > { %v1490_v55 = vpop.permute.xlu1 %1489  ;;  %v1488_v1 = vpop.permute.xlu0 %1487  ;;  %v4391_v30 = vld [vmem:[#allocation4 + $0x548] sm:$0xff]  ;;  %1617 = vst.msk [vmem:[#allocation4 + $0x4e0] sm:$0xff] %vm310_vm2, %v8638_v29 }
 0x2d8   : > { %1558 = vst.msk [vmem:[#allocation4 + $0x5f0] sm:$0xff] %vm889_vm5, %v1490_v55  ;;  %4795 = vmatmul.f32.gmra.mxu1 %v4279_v60  ;;  %4843 = vmatmul.f32.vlgmr.msrb.gmra.mxu3 %v4391_v30  ;;  %v1702_v14 = vpop.permute.xlu2 %1701  ;;  %v1843_v60 = vld [vmem:[#allocation2 + $0x140] sm:$0xff]  ;;  %v1842_v30 = vld [vmem:[#allocation2 + $0x138] sm:$0xff] }
 0x2d9   : > { %1557 = vst.msk [vmem:[#allocation4 + $0x5b8] sm:$0xff] %vm889_vm5, %v1488_v1  ;;  %v8641_v1 = vld [vmem:[#allocation2 + $0x113] sm:$0xff] }
 0x2da   : > { %1792 = vst.msk [vmem:[#allocation4 + $0x128] sm:$0xff] %vm503_vm3, %v1702_v14  ;;  %v1844_v14 = vld [vmem:[#allocation2 + $0x150] sm:$0xff] }
 0x2db   : > { %1616 = vst.msk [vmem:[#allocation4 + $0x4a8] sm:$0xff] %vm310_vm2, %v8641_v1 }
 0x2dd   : > { %1900 = vrot.lane.b32.xlu1 %v1828_v9, %s7468_s28  ;;  %1898 = vrot.lane.b32.xlu0 %v1827_v62, %s7468_s28  ;;  %v8650_v9 = vld [vmem:[#allocation2 + $0x12b] sm:$0xff] }
 0x2de   : > { %1902 = vrot.lane.b32.xlu2 %v1829_v19, %s7468_s28  ;;  %1618 = vst.msk [vmem:[#allocation4 + $0x518] sm:$0xff] %vm310_vm2, %v8650_v9 }
 0x2df   : > { %v1496_v18 = vpop.permute.xlu1 %1495  ;;  %v1494_v54 = vpop.permute.xlu0 %1493  ;;  %v4412_v31 = vld [vmem:[#allocation4 + $0x5f0] sm:$0xff] }
 0x2e0   : > { %1561 = vst.msk [vmem:[#allocation4 + $0x698] sm:$0xff] %vm889_vm5, %v1496_v18  ;;  %4798 = vmatmul.f32.gmra.mxu1 %v4286_v48  ;;  %4846 = vmatmul.f32.gmra.mxu3 %v4398_v2  ;;  %v1708_v33 = vpop.permute.xlu2 %1707  ;;  %v4405_v56 = vld [vmem:[#allocation4 + $0x5b8] sm:$0xff] }
 0x2e1   : > { %1560 = vst.msk [vmem:[#allocation4 + $0x660] sm:$0xff] %vm889_vm5, %v1494_v54  ;;  %v4321_v2 = vld [vmem:[#allocation4 + $0x318] sm:$0xff]  ;;  %v8656_v54 = vld [vmem:[#allocation2 + $0x143] sm:$0xff] }
 0x2e2   : > { %1795 = vst.msk [vmem:[#allocation4 + $0x1d0] sm:$0xff] %vm503_vm3, %v1708_v33  ;;  %v8659_v33 = vld [vmem:[#allocation2 + $0x13b] sm:$0xff] }
 0x2e3   : > { %1620 = vst.msk [vmem:[#allocation4 + $0x588] sm:$0xff] %vm310_vm2, %v8656_v54 }
 0x2e4   : > { %1619 = vst.msk [vmem:[#allocation4 + $0x550] sm:$0xff] %vm310_vm2, %v8659_v33 }
 0x2e5   : > { %1906 = vrot.lane.b32.xlu1 %v1831_v5, %s7468_s28  ;;  %1904 = vrot.lane.b32.xlu0 %v1830_v17, %s7468_s28  ;;  %v1846_v5 = vld [vmem:[#allocation2 + $0x168] sm:$0xff]  ;;  %v1845_v17 = vld [vmem:[#allocation2 + $0x158] sm:$0xff] }
 0x2e6   : > { %1908 = vrot.lane.b32.xlu2 %v1832_v10, %s7468_s28  ;;  %v1847_v10 = vld [vmem:[#allocation2 + $0x170] sm:$0xff] }
 0x2e7   : > { %v1694_v23 = vpop.permute.xlu1 %1693  ;;  %v1692_v32 = vpop.permute.xlu0 %1691  ;;  %v4433_v18 = vld [vmem:[#allocation4 + $0x698] sm:$0xff] }
 0x2e8   : > { %1788 = vst.msk [vmem:[#allocation4 + $0x48] sm:$0xff] %vm503_vm3, %v1694_v23  ;;  %4801 = vmatmul.f32.gmra.mxu1 %v4293_v3  ;;  %4849 = vmatmul.f32.gmra.mxu3 %v4405_v56  ;;  %v1714_v59 = vpop.permute.xlu2 %1713  ;;  %v4426_v27 = vld [vmem:[#allocation4 + $0x660] sm:$0xff]  ;;  %v8668_v23 = vld [vmem:[#allocation2 + $0x153] sm:$0xff] }
 0x2e9   : > { %1787 = vst.msk [vmem:[#allocation4 + $0x10] sm:$0xff] %vm503_vm3, %v1692_v32  ;;  %v4328_v56 = vld [vmem:[#allocation4 + $0x350] sm:$0xff] }
 0x2ea   : > { %1798 = vst.msk [vmem:[#allocation4 + $0x278] sm:$0xff] %vm503_vm3, %v1714_v59  ;;  %v4440_v59 = vld [vmem:[#allocation4 + $0x6d0] sm:$0xff] }
 0x2eb   : > { %1621 = vst.msk [vmem:[#allocation4 + $0x5c0] sm:$0xff] %vm310_vm2, %v8668_v23 }
 0x2ed   : > { %1912 = vrot.lane.b32.xlu1 %v1834_v6, %s7468_s28  ;;  %1910 = vrot.lane.b32.xlu0 %v1833_v20, %s7468_s28  ;;  %v8674_v6 = vld [vmem:[#allocation2 + $0x16b] sm:$0xff] }
 0x2ee   : > { %1914 = vrot.lane.b32.xlu2 %v1835_v38, %s7468_s28  ;;  %v8677_v38 = vld [vmem:[#allocation2 + $0x15b] sm:$0xff]  ;;  %1623 = vst.msk [vmem:[#allocation4 + $0x630] sm:$0xff] %vm310_vm2, %v8674_v6 }
 0x2ef   : > { %v1700_v53 = vpop.permute.xlu1 %1699  ;;  %v1698_v37 = vpop.permute.xlu0 %1697  ;;  %1622 = vst.msk [vmem:[#allocation4 + $0x5f8] sm:$0xff] %vm310_vm2, %v8677_v38 }
 0x2f0   : > { %1791 = vst.msk [vmem:[#allocation4 + $0xf0] sm:$0xff] %vm503_vm3, %v1700_v53  ;;  %4804 = vmatmul.f32.gmra.mxu1 %v4300_v35  ;;  %4852 = vmatmul.f32.gmra.mxu3 %v4412_v31  ;;  %v1720_v36 = vpop.permute.xlu2 %1719  ;;  %v1849_v53 = vld [vmem:[#allocation2 + $0x188] sm:$0xff]  ;;  %v1850_v35 = vld [vmem:[#allocation2 + $0x198] sm:$0xff] }
 0x2f1   : > { %1790 = vst.msk [vmem:[#allocation4 + $0xb8] sm:$0xff] %vm503_vm3, %v1698_v37  ;;  %v1848_v37 = vld [vmem:[#allocation2 + $0x180] sm:$0xff]  ;;  %v8686_v31 = vld [vmem:[#allocation2 + $0x173] sm:$0xff] }
 0x2f2   : > { %1801 = vst.msk [vmem:[#allocation4 + $0x320] sm:$0xff] %vm503_vm3, %v1720_v36 }
 0x2f3   : > { %1624 = vst.msk [vmem:[#allocation4 + $0x668] sm:$0xff] %vm310_vm2, %v8686_v31 }
 0x2f5   : > { %1918 = vrot.lane.b32.xlu1 %v1837_v8, %s7468_s28  ;;  %1916 = vrot.lane.b32.xlu0 %v1836_v50, %s7468_s28  ;;  %v4335_v50 = vld [vmem:[#allocation4 + $0x388] sm:$0xff] }
 0x2f6   : > { %1920 = vrot.lane.b32.xlu2 %v1838_v42, %s7468_s28  ;;  %v8692_v42 = vld [vmem:[#allocation2 + $0x18b] sm:$0xff] }
 0x2f7   : > { %v1706_v44 = vpop.permute.xlu1 %1705  ;;  %v1704_v43 = vpop.permute.xlu0 %1703  ;;  %1626 = vst.msk [vmem:[#allocation4 + $0x6d8] sm:$0xff] %vm310_vm2, %v8692_v42 }
 0x2f8   : > { %1794 = vst.msk [vmem:[#allocation4 + $0x198] sm:$0xff] %vm503_vm3, %v1706_v44  ;;  %4807 = vmatmul.f32.gmra.mxu1 %v4307_v41  ;;  %4855 = vmatmul.f32.gmra.mxu3 %v4419_v0  ;;  %v1726_v51 = vpop.permute.xlu2 %1725  ;;  %v2012_v41 = vld [vmem:[#allocation2 + $0x31] sm:$0xff]  ;;  %v1851_v0 = vld [vmem:[#allocation2 + $0x1a0] sm:$0xff] }
 0x2f9   : > { %1793 = vst.msk [vmem:[#allocation4 + $0x160] sm:$0xff] %vm503_vm3, %v1704_v43  ;;  %v8695_v43 = vld [vmem:[#allocation2 + $0x183] sm:$0xff] }
 0x2fa   : > { %1804 = vst.msk [vmem:[#allocation4 + $0x3c8] sm:$0xff] %vm503_vm3, %v1726_v51  ;;  %v2013_v51 = vld [vmem:[#allocation2 + $0x39] sm:$0xff] }
 0x2fb   : > { %1625 = vst.msk [vmem:[#allocation4 + $0x6a0] sm:$0xff] %vm310_vm2, %v8695_v43 }
 0x2fd   : > { %1924 = vrot.lane.b32.xlu1 %v1840_v58, %s7468_s28  ;;  %1922 = vrot.lane.b32.xlu0 %v1839_v61, %s7468_s28 }
 0x2fe   : > { %1926 = vrot.lane.b32.xlu2 %v1841_v12, %s7468_s28  ;;  %v4342_v12 = vld [vmem:[#allocation4 + $0x3c0] sm:$0xff] }
 0x2ff   : > { %v1712_v15 = vpop.permute.xlu1 %1711  ;;  %v1710_v22 = vpop.permute.xlu0 %1709 }
 0x300   : > { %1797 = vst.msk [vmem:[#allocation4 + $0x240] sm:$0xff] %vm503_vm3, %v1712_v15  ;;  %4810 = vmatmul.f32.gmra.mxu1 %v4314_v24  ;;  %4858 = vmatmul.f32.gmra.mxu3 %v4426_v27  ;;  %v1732_v55 = vpop.permute.xlu2 %1731  ;;  %v2014_v24 = vld [vmem:[#allocation2 + $0x49] sm:$0xff]  ;;  %v2016_v27 = vld [vmem:[#allocation2 + $0x61] sm:$0xff] }
 0x301   : > { %1796 = vst.msk [vmem:[#allocation4 + $0x208] sm:$0xff] %vm503_vm3, %v1710_v22  ;;  %v2015_v22 = vld [vmem:[#allocation2 + $0x51] sm:$0xff] }
 0x302   : > { %1807 = vst.msk [vmem:[#allocation4 + $0x470] sm:$0xff] %vm503_vm3, %v1732_v55 }
 0x305   : > { %1930 = vrot.lane.b32.xlu1 %v1843_v60, %s7468_s28  ;;  %1928 = vrot.lane.b32.xlu0 %v1842_v30, %s7468_s28  ;;  %v4349_v30 = vld [vmem:[#allocation4 + $0x3f8] sm:$0xff] }
 0x306   : > { %1932 = vrot.lane.b32.xlu2 %v1844_v14, %s7468_s28 }
 0x307   : > { %v1718_v62 = vpop.permute.xlu1 %1717  ;;  %v1716_v19 = vpop.permute.xlu0 %1715 }
 0x308   : > { %1800 = vst.msk [vmem:[#allocation4 + $0x2e8] sm:$0xff] %vm503_vm3, %v1718_v62  ;;  %4813 = vmatmul.f32.gmra.mxu1 %v4321_v2  ;;  %4861 = vmatmul.f32.gmra.mxu3 %v4433_v18  ;;  %v1738_v48 = vpop.permute.xlu2 %1737  ;;  %v2018_v62 = vld [vmem:[#allocation2 + $0x79] sm:$0xff]  ;;  %v2019_v2 = vld [vmem:[#allocation2 + $0x81] sm:$0xff] }
 0x309   : > { %1799 = vst.msk [vmem:[#allocation4 + $0x2b0] sm:$0xff] %vm503_vm3, %v1716_v19  ;;  %v2017_v19 = vld [vmem:[#allocation2 + $0x69] sm:$0xff] }
 0x30a   : > { %1810 = vst.msk [vmem:[#allocation4 + $0x518] sm:$0xff] %vm503_vm3, %v1738_v48 }
 0x30d   : > { %1936 = vrot.lane.b32.xlu1 %v1846_v5, %s7468_s28  ;;  %1934 = vrot.lane.b32.xlu0 %v1845_v17, %s7468_s28  ;;  %v4356_v5 = vld [vmem:[#allocation4 + $0x430] sm:$0xff] }
 0x30e   : > { %1938 = vrot.lane.b32.xlu2 %v1847_v10, %s7468_s28  ;;  %v2021_v10 = vld [vmem:[#allocation2 + $0x99] sm:$0xff] }
 0x30f   : > { %v1724_v32 = vpop.permute.xlu1 %1723  ;;  %v1722_v3 = vpop.permute.xlu0 %1721 }
 0x310   : > { %1803 = vst.msk [vmem:[#allocation4 + $0x390] sm:$0xff] %vm503_vm3, %v1724_v32  ;;  %4816 = vmatmul.f32.gmra.mxu1 %v4328_v56  ;;  %4864 = vmatmul.f32.gmra.mxu3 %v4440_v59  ;;  %v1744_v20 = vpop.permute.xlu2 %1743  ;;  %v2020_v32 = vld [vmem:[#allocation2 + $0x91] sm:$0xff] }
 0x311   : > { %1802 = vst.msk [vmem:[#allocation4 + $0x358] sm:$0xff] %vm503_vm3, %v1722_v3  ;;  %v2022_v3 = vld [vmem:[#allocation2 + $0xa9] sm:$0xff] }
 0x312   : > { %1813 = vst.msk [vmem:[#allocation4 + $0x5c0] sm:$0xff] %vm503_vm3, %v1744_v20  ;;  %v4363_v20 = vld [vmem:[#allocation4 + $0x468] sm:$0xff] }
 0x315   : > { %1942 = vrot.lane.b32.xlu1 %v1849_v53, %s7468_s28  ;;  %1940 = vrot.lane.b32.xlu0 %v1848_v37, %s7468_s28  ;;  %v2024_v37 = vld [vmem:[#allocation2 + $0xc1] sm:$0xff] }
 0x316   : > { %1944 = vrot.lane.b32.xlu2 %v1850_v35, %s7468_s28  ;;  %v2023_v35 = vld [vmem:[#allocation2 + $0xb1] sm:$0xff] }
 0x317   : > { %v1730_v36 = vpop.permute.xlu1 %1729  ;;  %v1728_v8 = vpop.permute.xlu0 %1727 }
 0x318   : > { %1806 = vst.msk [vmem:[#allocation4 + $0x438] sm:$0xff] %vm503_vm3, %v1730_v36  ;;  %4819 = vmatmul.f32.gmra.mxu1 %v4335_v50  ;;  %v1750_v44 = vpop.permute.xlu2 %1749  ;;  %v2025_v36 = vld [vmem:[#allocation2 + $0xc9] sm:$0xff] }
 0x319   : > { %1805 = vst.msk [vmem:[#allocation4 + $0x400] sm:$0xff] %vm503_vm3, %v1728_v8 }
 0x31a   : > { %1816 = vst.msk [vmem:[#allocation4 + $0x668] sm:$0xff] %vm503_vm3, %v1750_v44  ;;  %v4370_v44 = vld [vmem:[#allocation4 + $0x4a0] sm:$0xff] }
 0x31d   : > { %2076 = vrot.lane.b32.xlu1 %v2012_v41, %s7469_s29  ;;  %1946 = vrot.lane.b32.xlu0 %v1851_v0, %s7468_s28  ;;  %v2027_v0 = vld [vmem:[#allocation2 + $0xe1] sm:$0xff] }
 0x31e   : > { %2078 = vrot.lane.b32.xlu2 %v2013_v51, %s7469_s29  ;;  %v2026_v51 = vld [vmem:[#allocation2 + $0xd9] sm:$0xff] }
 0x31f   : > { %v1736_v58 = vpop.permute.xlu1 %1735  ;;  %v1734_v61 = vpop.permute.xlu0 %1733 }
 0x320   : > { %1809 = vst.msk [vmem:[#allocation4 + $0x4e0] sm:$0xff] %vm503_vm3, %v1736_v58  ;;  %4822 = vmatmul.f32.gmra.mxu1 %v4342_v12  ;;  %v1885_v15 = vpop.permute.xlu2 %1884  ;;  %v2028_v58 = vld [vmem:[#allocation2 + $0xf1] sm:$0xff] }
 0x321   : > { %1808 = vst.msk [vmem:[#allocation4 + $0x4a8] sm:$0xff] %vm503_vm3, %v1734_v61 }
 0x322   : > { %1980 = vst.msk [vmem:[#allocation4 + $0x10] sm:$0xff] %vm696_vm4, %v1885_v15  ;;  %v4377_v15 = vld [vmem:[#allocation4 + $0x4d8] sm:$0xff] }
 0x325   : > { %2082 = vrot.lane.b32.xlu1 %v2015_v22, %s7469_s29  ;;  %2080 = vrot.lane.b32.xlu0 %v2014_v24, %s7469_s29  ;;  %v2030_v24 = vld [vmem:[#allocation2 + $0x109] sm:$0xff] }
 0x326   : > { %2084 = vrot.lane.b32.xlu2 %v2016_v27, %s7469_s29  ;;  %v2029_v27 = vld [vmem:[#allocation2 + $0xf9] sm:$0xff] }
 0x327   : > { %v1742_v55 = vpop.permute.xlu1 %1741  ;;  %v1740_v60 = vpop.permute.xlu0 %1739 }
 0x328   : > { %1812 = vst.msk [vmem:[#allocation4 + $0x588] sm:$0xff] %vm503_vm3, %v1742_v55  ;;  %4825 = vmatmul.f32.gmra.mxu1 %v4349_v30  ;;  %v1891_v14 = vpop.permute.xlu2 %1890  ;;  %v2031_v55 = vld [vmem:[#allocation2 + $0x111] sm:$0xff] }
 0x329   : > { %1811 = vst.msk [vmem:[#allocation4 + $0x550] sm:$0xff] %vm503_vm3, %v1740_v60 }
 0x32a   : > { %1983 = vst.msk [vmem:[#allocation4 + $0xb8] sm:$0xff] %vm696_vm4, %v1891_v14  ;;  %v4384_v14 = vld [vmem:[#allocation4 + $0x510] sm:$0xff] }
 0x32d   : > { %2088 = vrot.lane.b32.xlu1 %v2018_v62, %s7469_s29  ;;  %2086 = vrot.lane.b32.xlu0 %v2017_v19, %s7469_s29  ;;  %v2033_v19 = vld [vmem:[#allocation2 + $0x129] sm:$0xff] }
 0x32e   : > { %2090 = vrot.lane.b32.xlu2 %v2019_v2, %s7469_s29  ;;  %v2032_v2 = vld [vmem:[#allocation2 + $0x121] sm:$0xff] }
 0x32f   : > { %v1748_v18 = vpop.permute.xlu1 %1747  ;;  %v1746_v48 = vpop.permute.xlu0 %1745 }
 0x330   : > { %1815 = vst.msk [vmem:[#allocation4 + $0x630] sm:$0xff] %vm503_vm3, %v1748_v18  ;;  %4828 = vmatmul.f32.gmra.mxu1 %v4356_v5  ;;  %v1897_v17 = vpop.permute.xlu2 %1896  ;;  %v2034_v18 = vld [vmem:[#allocation2 + $0x139] sm:$0xff] }
 0x331   : > { %1814 = vst.msk [vmem:[#allocation4 + $0x5f8] sm:$0xff] %vm503_vm3, %v1746_v48 }
 0x332   : > { %1986 = vst.msk [vmem:[#allocation4 + $0x160] sm:$0xff] %vm696_vm4, %v1897_v17 }
 0x335   : > { %2094 = vrot.lane.b32.xlu1 %v2021_v10, %s7469_s29  ;;  %2092 = vrot.lane.b32.xlu0 %v2020_v32, %s7469_s29  ;;  %v4493_v10 = vld [vmem:[%s11424_s1 + $0x178] sm:$0xff] }
 0x336   : > { %2096 = vrot.lane.b32.xlu2 %v2022_v3, %s7469_s29  ;;  %v2036_v32 = vld [vmem:[#allocation2 + $0x151] sm:$0xff]  ;;  %v2035_v3 = vld [vmem:[#allocation2 + $0x141] sm:$0xff]  ;;  %4868 = vmatpush.msra.mxu2 %v4493_v10 }
 0x337   : > { %v1754_v56 = vpop.permute.xlu1 %1753  ;;  %v1752_v59 = vpop.permute.xlu0 %1751  ;;  %7110 = vmatpush.msra.mxu3 %v4493_v10 }
 0x338   : > { %1818 = vst.msk [vmem:[#allocation4 + $0x6d8] sm:$0xff] %vm503_vm3, %v1754_v56  ;;  %4831 = vmatmul.f32.gmra.mxu1 %v4363_v20  ;;  %v1903_v53 = vpop.permute.xlu2 %1902  ;;  %v4492_v56 = vld [vmem:[%s11424_s1 + $0x170] sm:$0xff]  ;;  %v4491_v20 = vld [vmem:[%s11424_s1 + $0x168] sm:$0xff] }
 0x339   : > { %1817 = vst.msk [vmem:[#allocation4 + $0x6a0] sm:$0xff] %vm503_vm3, %v1752_v59  ;;  %4869 = vmatpush.msra.mxu2 %v4492_v56  ;;  %v2037_v59 = vld [vmem:[#allocation2 + $0x159] sm:$0xff]  ;;  %7111 = vmatpush.msra.mxu3 %v4492_v56 }
 0x33a   : > { %1989 = vst.msk [vmem:[#allocation4 + $0x208] sm:$0xff] %vm696_vm4, %v1903_v53  ;;  %v4490_v53 = vld [vmem:[%s11424_s1 + $0x160] sm:$0xff] }
 0x33b   : > { %4870 = vmatpush.msra.mxu2 %v4491_v20  ;;  %7112 = vmatpush.msra.mxu3 %v4491_v20 }
 0x33d   : > { %2100 = vrot.lane.b32.xlu1 %v2024_v37, %s7469_s29  ;;  %2098 = vrot.lane.b32.xlu0 %v2023_v35, %s7469_s29 }
 0x33e   : > { %2102 = vrot.lane.b32.xlu2 %v2025_v36, %s7469_s29  ;;  %4871 = vmatpush.msra.mxu2 %v4490_v53 }
 0x33f   : > { %v1889_v8 = vpop.permute.xlu1 %1888  ;;  %v1887_v50 = vpop.permute.xlu0 %1886  ;;  %7113 = vmatpush.msra.mxu3 %v4490_v53 }
 0x340   : > { %1982 = vst.msk [vmem:[#allocation4 + $0x80] sm:$0xff] %vm696_vm4, %v1889_v8  ;;  %4834 = vmatmul.f32.gmra.mxu1 %v4370_v44  ;;  %v1909_v41 = vpop.permute.xlu2 %1908  ;;  %v4489_v8 = vld [vmem:[%s11424_s1 + $0x158] sm:$0xff]  ;;  %v2038_v44 = vld [vmem:[#allocation2 + $0x169] sm:$0xff] }
 0x341   : > { %1981 = vst.msk [vmem:[#allocation4 + $0x48] sm:$0xff] %vm696_vm4, %v1887_v50  ;;  %v2039_v50 = vld [vmem:[#allocation2 + $0x171] sm:$0xff]  ;;  %4872 = vmatpush.msra.mxu2 %v4489_v8  ;;  %7114 = vmatpush.msra.mxu3 %v4489_v8  ;;  %v2298_v8 = vld [vmem:[#allocation2 + $0x19b] sm:$0xff] }
 0x342   : > { %1992 = vst.msk [vmem:[#allocation4 + $0x2b0] sm:$0xff] %vm696_vm4, %v1909_v41  ;;  %v4488_v41 = vld [vmem:[%s11424_s1 + $0x150] sm:$0xff] }
 0x343   : > { %4873 = vmatpush.msra.mxu2 %v4488_v41  ;;  %7115 = vmatpush.msra.mxu3 %v4488_v41  ;;  %v2204_v41 = vld [vmem:[#allocation2 + $0x32] sm:$0xff] }
 0x344   : > { %2236 = vst.msk [vmem:[#allocation4 + $0x18] sm:$0xff] %vm310_vm2, %v2204_v41 }
 0x345   : > { %2106 = vrot.lane.b32.xlu1 %v2027_v0, %s7469_s29  ;;  %2104 = vrot.lane.b32.xlu0 %v2026_v51, %s7469_s29  ;;  %v2040_v0 = vld [vmem:[#allocation2 + $0x181] sm:$0xff] }
 0x346   : > { %2108 = vrot.lane.b32.xlu2 %v2028_v58, %s7469_s29  ;;  %v4487_v51 = vld [vmem:[%s11424_s1 + $0x148] sm:$0xff]  ;;  %v4486_v58 = vld [vmem:[%s11424_s1 + $0x140] sm:$0xff] }
 0x347   : > { %v1895_v61 = vpop.permute.xlu1 %1894  ;;  %v1893_v12 = vpop.permute.xlu0 %1892  ;;  %4874 = vmatpush.msra.mxu2 %v4487_v51  ;;  %7116 = vmatpush.msra.mxu3 %v4487_v51  ;;  %v2462_v51 = vld [vmem:[#allocation2 + $0x4c] sm:$0xff] }
 0x348   : > { %1985 = vst.msk [vmem:[#allocation4 + $0x128] sm:$0xff] %vm696_vm4, %v1895_v61  ;;  %4837 = vmatmul.f32.gmra.mxu1 %v4377_v15  ;;  %v1915_v22 = vpop.permute.xlu2 %1914 }
 0x349   : > { %1984 = vst.msk [vmem:[#allocation4 + $0xf0] sm:$0xff] %vm696_vm4, %v1893_v12  ;;  %4875 = vmatpush.msra.mxu2 %v4486_v58  ;;  %7117 = vmatpush.msra.mxu3 %v4486_v58  ;;  %v2461_v58 = vld [vmem:[#allocation2 + $0x3c] sm:$0xff] }
 0x34a   : > { %1995 = vst.msk [vmem:[#allocation4 + $0x358] sm:$0xff] %vm696_vm4, %v1915_v22  ;;  %v4485_v22 = vld [vmem:[%s11424_s1 + $0x138] sm:$0xff] }
 0x34b   : > { %4876 = vmatpush.msra.mxu2 %v4485_v22  ;;  %7118 = vmatpush.msra.mxu3 %v4485_v22 }
 0x34d   : > { %2112 = vrot.lane.b32.xlu1 %v2030_v24, %s7469_s29  ;;  %2110 = vrot.lane.b32.xlu0 %v2029_v27, %s7469_s29  ;;  %v2042_v24 = vld [vmem:[#allocation2 + $0x199] sm:$0xff]  ;;  %v2041_v27 = vld [vmem:[#allocation2 + $0x189] sm:$0xff] }
 0x34e   : > { %2114 = vrot.lane.b32.xlu2 %v2031_v55, %s7469_s29  ;;  %v4484_v55 = vld [vmem:[%s11424_s1 + $0x130] sm:$0xff] }
 0x34f   : > { %v1901_v60 = vpop.permute.xlu1 %1900  ;;  %v1899_v30 = vpop.permute.xlu0 %1898  ;;  %4877 = vmatpush.msra.mxu2 %v4484_v55  ;;  %7119 = vmatpush.msra.mxu3 %v4484_v55  ;;  %v8926_v55 = vld [vmem:[#allocation2 + $0x52] sm:$0xff] }
 0x350   : > { %1988 = vst.msk [vmem:[#allocation4 + $0x1d0] sm:$0xff] %vm696_vm4, %v1901_v60  ;;  %4840 = vmatmul.f32.gmra.mxu1 %v4384_v14  ;;  %v1921_v62 = vpop.permute.xlu2 %1920  ;;  %v2043_v60 = vld [vmem:[#allocation2 + $0x1a1] sm:$0xff] }
 0x351   : > { %1987 = vst.msk [vmem:[#allocation4 + $0x198] sm:$0xff] %vm696_vm4, %v1899_v30  ;;  %v4483_v30 = vld [vmem:[%s11424_s1 + $0x128] sm:$0xff]  ;;  %v4482_v14 = vld [vmem:[%s11424_s1 + $0x120] sm:$0xff] }
 0x352   : > { %1998 = vst.msk [vmem:[#allocation4 + $0x400] sm:$0xff] %vm696_vm4, %v1921_v62  ;;  %4878 = vmatpush.msra.mxu2 %v4483_v30  ;;  %7120 = vmatpush.msra.mxu3 %v4483_v30  ;;  %v2465_v30 = vld [vmem:[#allocation2 + $0x6c] sm:$0xff] }
 0x353   : > { %2239 = vst.msk [vmem:[#allocation4 + $0xc0] sm:$0xff] %vm310_vm2, %v8926_v55 }
 0x354   : > { %4879 = vmatpush.msra.mxu2 %v4482_v14  ;;  %7121 = vmatpush.msra.mxu3 %v4482_v14  ;;  %v2464_v14 = vld [vmem:[#allocation2 + $0x64] sm:$0xff] }
 0x355   : > { %2118 = vrot.lane.b32.xlu1 %v2033_v19, %s7469_s29  ;;  %2116 = vrot.lane.b32.xlu0 %v2032_v2, %s7469_s29 }
 0x356   : > { %2120 = vrot.lane.b32.xlu2 %v2034_v18, %s7469_s29  ;;  %v4481_v18 = vld [vmem:[%s11424_s1 + $0x118] sm:$0xff] }
 0x357   : > { %v1907_v48 = vpop.permute.xlu1 %1906  ;;  %v1905_v5 = vpop.permute.xlu0 %1904  ;;  %4880 = vmatpush.msra.mxu2 %v4481_v18  ;;  %7122 = vmatpush.msra.mxu3 %v4481_v18 }
 0x358   : > { %1991 = vst.msk [vmem:[#allocation4 + $0x278] sm:$0xff] %vm696_vm4, %v1907_v48  ;;  %v1927_v17 = vpop.permute.xlu2 %1926  ;;  %v4480_v48 = vld [vmem:[%s11424_s1 + $0x110] sm:$0xff] }
 0x359   : > { %1990 = vst.msk [vmem:[#allocation4 + $0x240] sm:$0xff] %vm696_vm4, %v1905_v5  ;;  %4881 = vmatpush.msra.mxu2 %v4480_v48  ;;  %v4479_v5 = vld [vmem:[%s11424_s1 + $0x108] sm:$0xff]  ;;  %7123 = vmatpush.msra.mxu3 %v4480_v48 }
 0x35a   : > { %2001 = vst.msk [vmem:[#allocation4 + $0x4a8] sm:$0xff] %vm696_vm4, %v1927_v17  ;;  %v4478_v17 = vld [vmem:[%s11424_s1 + $0x100] sm:$0xff] }
 0x35b   : > { %4882 = vmatpush.msra.mxu2 %v4479_v5  ;;  %7124 = vmatpush.msra.mxu3 %v4479_v5 }
 0x35d   : > { %2124 = vrot.lane.b32.xlu1 %v2036_v32, %s7469_s29  ;;  %2122 = vrot.lane.b32.xlu0 %v2035_v3, %s7469_s29 }
 0x35e   : > { %2126 = vrot.lane.b32.xlu2 %v2037_v59, %s7469_s29  ;;  %4883 = vmatpush.msra.mxu2 %v4478_v17 }
 0x35f   : > { %v1913_v37 = vpop.permute.xlu1 %1912  ;;  %v1911_v35 = vpop.permute.xlu0 %1910  ;;  %7125 = vmatpush.msra.mxu3 %v4478_v17 }
 0x360   : > { %1994 = vst.msk [vmem:[#allocation4 + $0x320] sm:$0xff] %vm696_vm4, %v1913_v37  ;;  %v1933_v36 = vpop.permute.xlu2 %1932 }
 0x361   : > { %1993 = vst.msk [vmem:[#allocation4 + $0x2e8] sm:$0xff] %vm696_vm4, %v1911_v35 }
 0x362   : > { %2004 = vst.msk [vmem:[#allocation4 + $0x550] sm:$0xff] %vm696_vm4, %v1933_v36  ;;  %v2299_v36 = vld [vmem:[#allocation2 + $0x1a3] sm:$0xff] }
 0x365   : > { %2130 = vrot.lane.b32.xlu1 %v2039_v50, %s7469_s29  ;;  %2128 = vrot.lane.b32.xlu0 %v2038_v44, %s7469_s29 }
 0x366   : > { %2132 = vrot.lane.b32.xlu2 %v2040_v0, %s7469_s29 }
 0x367   : > { %v1919_v61 = vpop.permute.xlu1 %1918  ;;  %v1917_v12 = vpop.permute.xlu0 %1916 }
 0x368   : > { %1997 = vst.msk [vmem:[#allocation4 + $0x3c8] sm:$0xff] %vm696_vm4, %v1919_v61  ;;  %v1939_v15 = vpop.permute.xlu2 %1938  ;;  %v2463_v61 = vld [vmem:[#allocation2 + $0x54] sm:$0xff] }
 0x369   : > { %1996 = vst.msk [vmem:[#allocation4 + $0x390] sm:$0xff] %vm696_vm4, %v1917_v12  ;;  %v8916_v12 = vld [vmem:[#allocation2 + $0x4a] sm:$0xff] }
 0x36a   : > { %2007 = vst.msk [vmem:[#allocation4 + $0x5f8] sm:$0xff] %vm696_vm4, %v1939_v15  ;;  %v8918_v15 = vld [vmem:[#allocation2 + $0x62] sm:$0xff] }
 0x36b   : > { %2238 = vst.msk [vmem:[#allocation4 + $0x88] sm:$0xff] %vm310_vm2, %v8916_v12 }
 0x36c   : > { %2240 = vst.msk [vmem:[#allocation4 + $0xf8] sm:$0xff] %vm310_vm2, %v8918_v15 }
 0x36d   : > { %2136 = vrot.lane.b32.xlu1 %v2042_v24, %s7469_s29  ;;  %2134 = vrot.lane.b32.xlu0 %v2041_v27, %s7469_s29 }
 0x36e   : > { %2138 = vrot.lane.b32.xlu2 %v2043_v60, %s7469_s29 }
 0x36f   : > { %v1925_v62 = vpop.permute.xlu1 %1924  ;;  %v1923_v19 = vpop.permute.xlu0 %1922 }
 0x370   : > { %2000 = vst.msk [vmem:[#allocation4 + $0x470] sm:$0xff] %vm696_vm4, %v1925_v62  ;;  %v1945_v2 = vpop.permute.xlu2 %1944  ;;  %v2466_v62 = vld [vmem:[#allocation2 + $0x7c] sm:$0xff] }
 0x371   : > { %1999 = vst.msk [vmem:[#allocation4 + $0x438] sm:$0xff] %vm696_vm4, %v1923_v19  ;;  %v8934_v19 = vld [vmem:[#allocation2 + $0x6a] sm:$0xff] }
 0x372   : > { %2010 = vst.msk [vmem:[#allocation4 + $0x6a0] sm:$0xff] %vm696_vm4, %v1945_v2  ;;  %v8936_v2 = vld [vmem:[#allocation2 + $0x82] sm:$0xff] }
 0x373   : > { %2241 = vst.msk [vmem:[#allocation4 + $0x130] sm:$0xff] %vm310_vm2, %v8934_v19 }
 0x374   : > { %2243 = vst.msk [vmem:[#allocation4 + $0x1a0] sm:$0xff] %vm310_vm2, %v8936_v2 }
 0x375   : > { %2334 = vrot.lane.b32.xlu1 %v8534_v21, %s7467_s27  ;;  %2332 = vrot.lane.b32.xlu0 %v8524_v4, %s7467_s27 }
 0x376   : > { %2336 = vrot.lane.b32.xlu2 %v8526_v11, %s7467_s27 }
 0x377   : > { %v1931_v10 = vpop.permute.xlu1 %1930  ;;  %v1929_v32 = vpop.permute.xlu0 %1928 }
 0x378   : > { %2003 = vst.msk [vmem:[#allocation4 + $0x518] sm:$0xff] %vm696_vm4, %v1931_v10  ;;  %v2079_v21 = vpop.permute.xlu2 %2078  ;;  %v8944_v10 = vld [vmem:[#allocation2 + $0x7a] sm:$0xff] }
 0x379   : > { %2002 = vst.msk [vmem:[#allocation4 + $0x4e0] sm:$0xff] %vm696_vm4, %v1929_v32 }
 0x37a   : > { %2173 = vst.msk [vmem:[#allocation4 + $0x48] sm:$0xff] %vm889_vm5, %v2079_v21  ;;  %v2468_v21 = vld [vmem:[#allocation2 + $0x94] sm:$0xff] }
 0x37b   : > { %2242 = vst.msk [vmem:[#allocation4 + $0x168] sm:$0xff] %vm310_vm2, %v8944_v10 }
 0x37d   : > { %2340 = vrot.lane.b32.xlu1 %v8552_v63, %s7467_s27  ;;  %2338 = vrot.lane.b32.xlu0 %v8542_v39, %s7467_s27 }
 0x37e   : > { %2342 = vrot.lane.b32.xlu2 %v8544_v47, %s7467_s27 }
 0x37f   : > { %v1937_v4 = vpop.permute.xlu1 %1936  ;;  %v1935_v3 = vpop.permute.xlu0 %1934 }
 0x380   : > { %2006 = vst.msk [vmem:[#allocation4 + $0x5c0] sm:$0xff] %vm696_vm4, %v1937_v4  ;;  %v2085_v11 = vpop.permute.xlu2 %2084  ;;  %v2467_v4 = vld [vmem:[#allocation2 + $0x84] sm:$0xff] }
 0x381   : > { %2005 = vst.msk [vmem:[#allocation4 + $0x588] sm:$0xff] %vm696_vm4, %v1935_v3  ;;  %v2469_v3 = vld [vmem:[#allocation2 + $0x9c] sm:$0xff] }
 0x382   : > { %2176 = vst.msk [vmem:[#allocation4 + $0xf0] sm:$0xff] %vm889_vm5, %v2085_v11 }
 0x385   : > { %2346 = vrot.lane.b32.xlu1 %v8570_v46, %s7467_s27  ;;  %2344 = vrot.lane.b32.xlu0 %v8560_v25, %s7467_s27 }
 0x386   : > { %2348 = vrot.lane.b32.xlu2 %v8562_v16, %s7467_s27 }
 0x387   : > { %v1943_v63 = vpop.permute.xlu1 %1942  ;;  %v1941_v39 = vpop.permute.xlu0 %1940 }
 0x388   : > { %2009 = vst.msk [vmem:[#allocation4 + $0x668] sm:$0xff] %vm696_vm4, %v1943_v63  ;;  %v2091_v47 = vpop.permute.xlu2 %2090  ;;  %v8952_v63 = vld [vmem:[#allocation2 + $0x92] sm:$0xff] }
 0x389   : > { %2008 = vst.msk [vmem:[#allocation4 + $0x630] sm:$0xff] %vm696_vm4, %v1941_v39  ;;  %v4252_v37 = vld [vmem:[#allocation4 + $0xf0] sm:$0xff] }
 0x38a   : > { %2179 = vst.msk [vmem:[#allocation4 + $0x198] sm:$0xff] %vm889_vm5, %v2091_v47  ;;  %v8954_v39 = vld [vmem:[#allocation2 + $0xaa] sm:$0xff] }
 0x38b   : > { %2244 = vst.msk [vmem:[#allocation4 + $0x1d8] sm:$0xff] %vm310_vm2, %v8952_v63 }
 0x38c   : > { %2246 = vst.msk [vmem:[#allocation4 + $0x248] sm:$0xff] %vm310_vm2, %v8954_v39 }
 0x38d   : > { %2352 = vrot.lane.b32.xlu1 %v8588_v34, %s7467_s27  ;;  %2350 = vrot.lane.b32.xlu0 %v8578_v26, %s7467_s27 }
 0x38e   : > { %2354 = vrot.lane.b32.xlu2 %v8580_v52, %s7467_s27 }
 0x38f   : > { %v2077_v46 = vpop.permute.xlu1 %2076  ;;  %v1947_v25 = vpop.permute.xlu0 %1946 }
 0x390   : > { %2172 = vst.msk [vmem:[#allocation4 + $0x10] sm:$0xff] %vm889_vm5, %v2077_v46  ;;  %v2097_v16 = vpop.permute.xlu2 %2096 }
 0x391   : > { %2011 = vst.msk [vmem:[#allocation4 + $0x6d8] sm:$0xff] %vm696_vm4, %v1947_v25  ;;  %v4273_v27 = vld [vmem:[#allocation4 + $0x198] sm:$0xff] }
 0x392   : > { %2182 = vst.msk [vmem:[#allocation4 + $0x240] sm:$0xff] %vm889_vm5, %v2097_v16  ;;  %v8962_v16 = vld [vmem:[#allocation2 + $0x9a] sm:$0xff] }
 0x393   : > { %2245 = vst.msk [vmem:[#allocation4 + $0x210] sm:$0xff] %vm310_vm2, %v8962_v16 }
 0x395   : > { %2358 = vrot.lane.b32.xlu1 %v8606_v28, %s7467_s27  ;;  %2356 = vrot.lane.b32.xlu0 %v8596_v7, %s7467_s27  ;;  %v4231_v7 = vld [vmem:[#allocation4 + $0x48] sm:$0xff] }
 0x396   : > { %2360 = vrot.lane.b32.xlu2 %v8598_v40, %s7467_s27 }
 0x397   : > { %v2083_v34 = vpop.permute.xlu1 %2082  ;;  %v2081_v26 = vpop.permute.xlu0 %2080  ;;  %v4224_v56 = vld [vmem:[#allocation4 + $0x10] sm:$0xff] }
 0x398   : > { %2175 = vst.msk [vmem:[#allocation4 + $0xb8] sm:$0xff] %vm889_vm5, %v2083_v34  ;;  %4884 = vmatmul.f32.vlgmr.msra.gmra.mxu2 %v4224_v56  ;;  %v2103_v52 = vpop.permute.xlu2 %2102  ;;  %v2470_v56 = vld [vmem:[#allocation2 + $0xac] sm:$0xff] }
 0x399   : > { %2174 = vst.msk [vmem:[#allocation4 + $0x80] sm:$0xff] %vm889_vm5, %v2081_v26  ;;  %v2471_v26 = vld [vmem:[#allocation2 + $0xb4] sm:$0xff] }
 0x39a   : > { %2185 = vst.msk [vmem:[#allocation4 + $0x2e8] sm:$0xff] %vm889_vm5, %v2103_v52  ;;  %v2472_v52 = vld [vmem:[#allocation2 + $0xc4] sm:$0xff] }
 0x39d   : > { %2364 = vrot.lane.b32.xlu1 %v8623_v57, %s7467_s27  ;;  %2362 = vrot.lane.b32.xlu0 %v8614_v45, %s7467_s27 }
 0x39e   : > { %2366 = vrot.lane.b32.xlu2 %v8620_v49, %s7467_s27 }
 0x39f   : > { %v2089_v28 = vpop.permute.xlu1 %2088  ;;  %v2087_v59 = vpop.permute.xlu0 %2086  ;;  %v4245_v53 = vld [vmem:[#allocation4 + $0xb8] sm:$0xff] }
 0x3a0   : > { %2178 = vst.msk [vmem:[#allocation4 + $0x160] sm:$0xff] %vm889_vm5, %v2089_v28  ;;  %4887 = vmatmul.f32.gmra.mxu2 %v4231_v7  ;;  %v2109_v40 = vpop.permute.xlu2 %2108  ;;  %v4238_v20 = vld [vmem:[#allocation4 + $0x80] sm:$0xff]  ;;  %v8970_v7 = vld [vmem:[#allocation2 + $0xb2] sm:$0xff]  ;;  %v8972_v28 = vld [vmem:[#allocation2 + $0xca] sm:$0xff] }
 0x3a1   : > { %2177 = vst.msk [vmem:[#allocation4 + $0x128] sm:$0xff] %vm889_vm5, %v2087_v59 }
 0x3a2   : > { %2188 = vst.msk [vmem:[#allocation4 + $0x390] sm:$0xff] %vm889_vm5, %v2109_v40 }
 0x3a3   : > { %2247 = vst.msk [vmem:[#allocation4 + $0x280] sm:$0xff] %vm310_vm2, %v8970_v7 }
 0x3a4   : > { %2249 = vst.msk [vmem:[#allocation4 + $0x2f0] sm:$0xff] %vm310_vm2, %v8972_v28 }
 0x3a5   : > { %2370 = vrot.lane.b32.xlu1 %v8641_v1, %s7467_s27  ;;  %2368 = vrot.lane.b32.xlu0 %v8632_v13, %s7467_s27 }
 0x3a6   : > { %2372 = vrot.lane.b32.xlu2 %v8638_v29, %s7467_s27 }
 0x3a7   : > { %v2095_v45 = vpop.permute.xlu1 %2094  ;;  %v2093_v57 = vpop.permute.xlu0 %2092  ;;  %v4266_v44 = vld [vmem:[#allocation4 + $0x160] sm:$0xff] }
 0x3a8   : > { %2181 = vst.msk [vmem:[#allocation4 + $0x208] sm:$0xff] %vm889_vm5, %v2095_v45  ;;  %4890 = vmatmul.f32.gmra.mxu2 %v4238_v20  ;;  %v2115_v49 = vpop.permute.xlu2 %2114  ;;  %v4259_v35 = vld [vmem:[#allocation4 + $0x128] sm:$0xff]  ;;  %v4294_v45 = vld [vmem:[#allocation4 + $0x240] sm:$0xff] }
 0x3a9   : > { %2180 = vst.msk [vmem:[#allocation4 + $0x1d0] sm:$0xff] %vm889_vm5, %v2093_v57  ;;  %v8980_v20 = vld [vmem:[#allocation2 + $0xc2] sm:$0xff] }
 0x3aa   : > { %2191 = vst.msk [vmem:[#allocation4 + $0x438] sm:$0xff] %vm889_vm5, %v2115_v49 }
 0x3ab   : > { %2248 = vst.msk [vmem:[#allocation4 + $0x2b8] sm:$0xff] %vm310_vm2, %v8980_v20 }
 0x3ad   : > { %2376 = vrot.lane.b32.xlu1 %v8659_v33, %s7467_s27  ;;  %2374 = vrot.lane.b32.xlu0 %v8650_v9, %s7467_s27 }
 0x3ae   : > { %2378 = vrot.lane.b32.xlu2 %v8656_v54, %s7467_s27 }
 0x3af   : > { %v2101_v13 = vpop.permute.xlu1 %2100  ;;  %v2099_v1 = vpop.permute.xlu0 %2098  ;;  %v4287_v25 = vld [vmem:[#allocation4 + $0x208] sm:$0xff] }
 0x3b0   : > { %2184 = vst.msk [vmem:[#allocation4 + $0x2b0] sm:$0xff] %vm889_vm5, %v2101_v13  ;;  %4893 = vmatmul.f32.gmra.mxu2 %v4245_v53  ;;  %v2121_v29 = vpop.permute.xlu2 %2120  ;;  %v4280_v5 = vld [vmem:[#allocation4 + $0x1d0] sm:$0xff]  ;;  %v2474_v13 = vld [vmem:[#allocation2 + $0xdc] sm:$0xff]  ;;  %v2475_v53 = vld [vmem:[#allocation2 + $0xe4] sm:$0xff] }
 0x3b1   : > { %2183 = vst.msk [vmem:[#allocation4 + $0x278] sm:$0xff] %vm889_vm5, %v2099_v1  ;;  %v2473_v1 = vld [vmem:[#allocation2 + $0xcc] sm:$0xff] }
 0x3b2   : > { %2194 = vst.msk [vmem:[#allocation4 + $0x4e0] sm:$0xff] %vm889_vm5, %v2121_v29  ;;  %v8988_v29 = vld [vmem:[#allocation2 + $0xda] sm:$0xff] }
 0x3b3   : > { %2250 = vst.msk [vmem:[#allocation4 + $0x328] sm:$0xff] %vm310_vm2, %v8988_v29 }
 0x3b5   : > { %2382 = vrot.lane.b32.xlu1 %v8677_v38, %s7467_s27  ;;  %2380 = vrot.lane.b32.xlu0 %v8668_v23, %s7467_s27 }
 0x3b6   : > { %2384 = vrot.lane.b32.xlu2 %v8674_v6, %s7467_s27 }
 0x3b7   : > { %v2107_v9 = vpop.permute.xlu1 %2106  ;;  %v2105_v33 = vpop.permute.xlu0 %2104 }
 0x3b8   : > { %2187 = vst.msk [vmem:[#allocation4 + $0x358] sm:$0xff] %vm889_vm5, %v2107_v9  ;;  %4896 = vmatmul.f32.gmra.mxu2 %v4252_v37  ;;  %v2127_v54 = vpop.permute.xlu2 %2126  ;;  %v8990_v9 = vld [vmem:[#allocation2 + $0xf2] sm:$0xff] }
 0x3b9   : > { %2186 = vst.msk [vmem:[#allocation4 + $0x320] sm:$0xff] %vm889_vm5, %v2105_v33 }
 0x3ba   : > { %2197 = vst.msk [vmem:[#allocation4 + $0x588] sm:$0xff] %vm889_vm5, %v2127_v54  ;;  %v4301_v54 = vld [vmem:[#allocation4 + $0x278] sm:$0xff] }
 0x3bb   : > { %2252 = vst.msk [vmem:[#allocation4 + $0x398] sm:$0xff] %vm310_vm2, %v8990_v9 }
 0x3bd   : > { %2388 = vrot.lane.b32.xlu1 %v8695_v43, %s7467_s27  ;;  %2386 = vrot.lane.b32.xlu0 %v8686_v31, %s7467_s27  ;;  %v2460_v43 = vld [vmem:[#allocation2 + $0x34] sm:$0xff] }
 0x3be   : > { %2390 = vrot.lane.b32.xlu2 %v8692_v42, %s7467_s27  ;;  %v2205_v31 = vld [vmem:[#allocation2 + $0x3a] sm:$0xff] }
 0x3bf   : > { %v2113_v23 = vpop.permute.xlu1 %2112  ;;  %v2111_v38 = vpop.permute.xlu0 %2110  ;;  %2237 = vst.msk [vmem:[#allocation4 + $0x50] sm:$0xff] %vm310_vm2, %v2205_v31  ;;  %v9008_v31 = vld [vmem:[#allocation2 + $0x112] sm:$0xff] }
 0x3c0   : > { %2190 = vst.msk [vmem:[#allocation4 + $0x400] sm:$0xff] %vm889_vm5, %v2113_v23  ;;  %4899 = vmatmul.f32.gmra.mxu2 %v4259_v35  ;;  %v2133_v6 = vpop.permute.xlu2 %2132 }
 0x3c1   : > { %2189 = vst.msk [vmem:[#allocation4 + $0x3c8] sm:$0xff] %vm889_vm5, %v2111_v38  ;;  %v4399_v11 = vld [vmem:[#allocation4 + $0x588] sm:$0xff] }
 0x3c2   : > { %2200 = vst.msk [vmem:[#allocation4 + $0x630] sm:$0xff] %vm889_vm5, %v2133_v6  ;;  %v8998_v38 = vld [vmem:[#allocation2 + $0xe2] sm:$0xff] }
 0x3c3   : > { %v2477_v6 = vld [vmem:[#allocation2 + $0xfc] sm:$0xff]  ;;  %2251 = vst.msk [vmem:[#allocation4 + $0x360] sm:$0xff] %vm310_vm2, %v8998_v38 }
 0x3c4   : > { %2255 = vst.msk [vmem:[#allocation4 + $0x440] sm:$0xff] %vm310_vm2, %v9008_v31 }
 0x3c5   : > { %2394 = vrot.lane.b32.xlu1 %v2299_v36, %s7467_s27  ;;  %2392 = vrot.lane.b32.xlu0 %v2298_v8, %s7467_s27  ;;  %v2476_v36 = vld [vmem:[#allocation2 + $0xf4] sm:$0xff]  ;;  %v2478_v8 = vld [vmem:[#allocation2 + $0x10c] sm:$0xff] }
 0x3c6   : > { %2524 = vrot.lane.b32.xlu2 %v2460_v43, %s7468_s28  ;;  %v9006_v43 = vld [vmem:[#allocation2 + $0xfa] sm:$0xff] }
 0x3c7   : > { %v2119_v50 = vpop.permute.xlu1 %2118  ;;  %v2117_v42 = vpop.permute.xlu0 %2116  ;;  %2253 = vst.msk [vmem:[#allocation4 + $0x3d0] sm:$0xff] %vm310_vm2, %v9006_v43 }
 0x3c8   : > { %2193 = vst.msk [vmem:[#allocation4 + $0x4a8] sm:$0xff] %vm889_vm5, %v2119_v50  ;;  %4902 = vmatmul.f32.gmra.mxu2 %v4266_v44  ;;  %v2139_v0 = vpop.permute.xlu2 %2138  ;;  %v4308_v44 = vld [vmem:[#allocation4 + $0x2b0] sm:$0xff] }
 0x3c9   : > { %2192 = vst.msk [vmem:[#allocation4 + $0x470] sm:$0xff] %vm889_vm5, %v2117_v42  ;;  %v4420_v41 = vld [vmem:[#allocation4 + $0x630] sm:$0xff] }
 0x3ca   : > { %2203 = vst.msk [vmem:[#allocation4 + $0x6d8] sm:$0xff] %vm889_vm5, %v2139_v0  ;;  %v9016_v0 = vld [vmem:[#allocation2 + $0x10a] sm:$0xff] }
 0x3cb   : > { %2254 = vst.msk [vmem:[#allocation4 + $0x408] sm:$0xff] %vm310_vm2, %v9016_v0 }
 0x3cd   : > { %2528 = vrot.lane.b32.xlu1 %v2462_v51, %s7468_s28  ;;  %2526 = vrot.lane.b32.xlu0 %v2461_v58, %s7468_s28  ;;  %v2480_v58 = vld [vmem:[#allocation2 + $0x124] sm:$0xff] }
 0x3ce   : > { %2530 = vrot.lane.b32.xlu2 %v2463_v61, %s7468_s28  ;;  %v2479_v61 = vld [vmem:[#allocation2 + $0x114] sm:$0xff] }
 0x3cf   : > { %v2125_v22 = vpop.permute.xlu1 %2124  ;;  %v2123_v24 = vpop.permute.xlu0 %2122 }
 0x3d0   : > { %2196 = vst.msk [vmem:[#allocation4 + $0x550] sm:$0xff] %vm889_vm5, %v2125_v22  ;;  %4905 = vmatmul.f32.gmra.mxu2 %v4273_v27  ;;  %v2337_v60 = vpop.permute.xlu2 %2336  ;;  %v2481_v22 = vld [vmem:[#allocation2 + $0x12c] sm:$0xff]  ;;  %v9026_v27 = vld [vmem:[#allocation2 + $0x13a] sm:$0xff] }
 0x3d1   : > { %2195 = vst.msk [vmem:[#allocation4 + $0x518] sm:$0xff] %vm889_vm5, %v2123_v24  ;;  %v9024_v24 = vld [vmem:[#allocation2 + $0x122] sm:$0xff] }
 0x3d2   : > { %2430 = vst.msk [vmem:[#allocation4 + $0x88] sm:$0xff] %vm503_vm3, %v2337_v60 }
 0x3d3   : > { %2256 = vst.msk [vmem:[#allocation4 + $0x478] sm:$0xff] %vm310_vm2, %v9024_v24 }
 0x3d4   : > { %2258 = vst.msk [vmem:[#allocation4 + $0x4e8] sm:$0xff] %vm310_vm2, %v9026_v27 }
 0x3d5   : > { %2534 = vrot.lane.b32.xlu1 %v2465_v30, %s7468_s28  ;;  %2532 = vrot.lane.b32.xlu0 %v2464_v14, %s7468_s28  ;;  %v4315_v14 = vld [vmem:[#allocation4 + $0x2e8] sm:$0xff] }
 0x3d6   : > { %2536 = vrot.lane.b32.xlu2 %v2466_v62, %s7468_s28 }
 0x3d7   : > { %v2131_v18 = vpop.permute.xlu1 %2130  ;;  %v2129_v48 = vpop.permute.xlu0 %2128  ;;  %v4392_v17 = vld [vmem:[#allocation4 + $0x550] sm:$0xff] }
 0x3d8   : > { %2199 = vst.msk [vmem:[#allocation4 + $0x5f8] sm:$0xff] %vm889_vm5, %v2131_v18  ;;  %4908 = vmatmul.f32.gmra.mxu2 %v4280_v5  ;;  %4956 = vmatmul.f32.vlgmr.msra.gmra.mxu3 %v4392_v17  ;;  %v2343_v32 = vpop.permute.xlu2 %2342  ;;  %v9034_v18 = vld [vmem:[#allocation2 + $0x12a] sm:$0xff]  ;;  %v2482_v17 = vld [vmem:[#allocation2 + $0x13c] sm:$0xff] }
 0x3d9   : > { %2198 = vst.msk [vmem:[#allocation4 + $0x5c0] sm:$0xff] %vm889_vm5, %v2129_v48  ;;  %v2483_v5 = vld [vmem:[#allocation2 + $0x144] sm:$0xff] }
 0x3da   : > { %2433 = vst.msk [vmem:[#allocation4 + $0x130] sm:$0xff] %vm503_vm3, %v2343_v32  ;;  %v2484_v32 = vld [vmem:[#allocation2 + $0x154] sm:$0xff] }
 0x3db   : > { %2257 = vst.msk [vmem:[#allocation4 + $0x4b0] sm:$0xff] %vm310_vm2, %v9034_v18 }
 0x3dd   : > { %2540 = vrot.lane.b32.xlu1 %v2468_v21, %s7468_s28  ;;  %2538 = vrot.lane.b32.xlu0 %v2467_v4, %s7468_s28  ;;  %v9042_v21 = vld [vmem:[#allocation2 + $0x142] sm:$0xff]  ;;  %v9044_v4 = vld [vmem:[#allocation2 + $0x15a] sm:$0xff] }
 0x3de   : > { %2542 = vrot.lane.b32.xlu2 %v2469_v3, %s7468_s28  ;;  %2259 = vst.msk [vmem:[#allocation4 + $0x520] sm:$0xff] %vm310_vm2, %v9042_v21 }
 0x3df   : > { %v2137_v47 = vpop.permute.xlu1 %2136  ;;  %v2135_v46 = vpop.permute.xlu0 %2134  ;;  %v4413_v23 = vld [vmem:[#allocation4 + $0x5f8] sm:$0xff]  ;;  %2261 = vst.msk [vmem:[#allocation4 + $0x590] sm:$0xff] %vm310_vm2, %v9044_v4 }
 0x3e0   : > { %2202 = vst.msk [vmem:[#allocation4 + $0x6a0] sm:$0xff] %vm889_vm5, %v2137_v47  ;;  %4911 = vmatmul.f32.gmra.mxu2 %v4287_v25  ;;  %4959 = vmatmul.f32.gmra.mxu3 %v4399_v11  ;;  %v2349_v34 = vpop.permute.xlu2 %2348  ;;  %v4406_v57 = vld [vmem:[#allocation4 + $0x5c0] sm:$0xff]  ;;  %v9052_v25 = vld [vmem:[#allocation2 + $0x152] sm:$0xff] }
 0x3e1   : > { %2201 = vst.msk [vmem:[#allocation4 + $0x668] sm:$0xff] %vm889_vm5, %v2135_v46  ;;  %v4322_v47 = vld [vmem:[#allocation4 + $0x320] sm:$0xff] }
 0x3e2   : > { %2436 = vst.msk [vmem:[#allocation4 + $0x1d8] sm:$0xff] %vm503_vm3, %v2349_v34 }
 0x3e3   : > { %2260 = vst.msk [vmem:[#allocation4 + $0x558] sm:$0xff] %vm310_vm2, %v9052_v25 }
 0x3e5   : > { %2546 = vrot.lane.b32.xlu1 %v2471_v26, %s7468_s28  ;;  %2544 = vrot.lane.b32.xlu0 %v2470_v56, %s7468_s28  ;;  %v2486_v26 = vld [vmem:[#allocation2 + $0x16c] sm:$0xff]  ;;  %v2485_v56 = vld [vmem:[#allocation2 + $0x15c] sm:$0xff] }
 0x3e6   : > { %2548 = vrot.lane.b32.xlu2 %v2472_v52, %s7468_s28  ;;  %v2487_v52 = vld [vmem:[#allocation2 + $0x174] sm:$0xff] }
 0x3e7   : > { %v2335_v59 = vpop.permute.xlu1 %2334  ;;  %v2333_v40 = vpop.permute.xlu0 %2332  ;;  %v4434_v46 = vld [vmem:[#allocation4 + $0x6a0] sm:$0xff] }
 0x3e8   : > { %2429 = vst.msk [vmem:[#allocation4 + $0x50] sm:$0xff] %vm503_vm3, %v2335_v59  ;;  %4914 = vmatmul.f32.gmra.mxu2 %v4294_v45  ;;  %4962 = vmatmul.f32.gmra.mxu3 %v4406_v57  ;;  %v2355_v49 = vpop.permute.xlu2 %2354  ;;  %v4427_v62 = vld [vmem:[#allocation4 + $0x668] sm:$0xff] }
 0x3e9   : > { %2428 = vst.msk [vmem:[#allocation4 + $0x18] sm:$0xff] %vm503_vm3, %v2333_v40  ;;  %v9060_v59 = vld [vmem:[#allocation2 + $0x16a] sm:$0xff]  ;;  %v9062_v40 = vld [vmem:[#allocation2 + $0x182] sm:$0xff] }
 0x3ea   : > { %2439 = vst.msk [vmem:[#allocation4 + $0x280] sm:$0xff] %vm503_vm3, %v2355_v49  ;;  %v4329_v49 = vld [vmem:[#allocation4 + $0x358] sm:$0xff] }
 0x3eb   : > { %2262 = vst.msk [vmem:[#allocation4 + $0x5c8] sm:$0xff] %vm310_vm2, %v9060_v59 }
 0x3ec   : > { %2264 = vst.msk [vmem:[#allocation4 + $0x638] sm:$0xff] %vm310_vm2, %v9062_v40 }
 0x3ed   : > { %2552 = vrot.lane.b32.xlu1 %v2474_v13, %s7468_s28  ;;  %2550 = vrot.lane.b32.xlu0 %v2473_v1, %s7468_s28  ;;  %v4441_v13 = vld [vmem:[#allocation4 + $0x6d8] sm:$0xff] }
 0x3ee   : > { %2554 = vrot.lane.b32.xlu2 %v2475_v53, %s7468_s28  ;;  %v9070_v1 = vld [vmem:[#allocation2 + $0x172] sm:$0xff] }
 0x3ef   : > { %v2341_v33 = vpop.permute.xlu1 %2340  ;;  %v2339_v37 = vpop.permute.xlu0 %2338  ;;  %2263 = vst.msk [vmem:[#allocation4 + $0x600] sm:$0xff] %vm310_vm2, %v9070_v1 }
 0x3f0   : > { %2432 = vst.msk [vmem:[#allocation4 + $0xf8] sm:$0xff] %vm503_vm3, %v2341_v33  ;;  %4917 = vmatmul.f32.gmra.mxu2 %v4301_v54  ;;  %4965 = vmatmul.f32.gmra.mxu3 %v4413_v23  ;;  %v2361_v35 = vpop.permute.xlu2 %2360  ;;  %v2489_v33 = vld [vmem:[#allocation2 + $0x18c] sm:$0xff]  ;;  %v2490_v54 = vld [vmem:[#allocation2 + $0x19c] sm:$0xff] }
 0x3f1   : > { %2431 = vst.msk [vmem:[#allocation4 + $0xc0] sm:$0xff] %vm503_vm3, %v2339_v37  ;;  %v2488_v37 = vld [vmem:[#allocation2 + $0x184] sm:$0xff] }
 0x3f2   : > { %2442 = vst.msk [vmem:[#allocation4 + $0x328] sm:$0xff] %vm503_vm3, %v2361_v35  ;;  %v9078_v23 = vld [vmem:[#allocation2 + $0x18a] sm:$0xff]  ;;  %v9080_v35 = vld [vmem:[#allocation2 + $0x1a2] sm:$0xff] }
 0x3f3   : > { %2265 = vst.msk [vmem:[#allocation4 + $0x670] sm:$0xff] %vm310_vm2, %v9078_v23 }
 0x3f4   : > { %2267 = vst.msk [vmem:[#allocation4 + $0x6e0] sm:$0xff] %vm310_vm2, %v9080_v35 }
 0x3f5   : > { %2558 = vrot.lane.b32.xlu1 %v2477_v6, %s7468_s28  ;;  %2556 = vrot.lane.b32.xlu0 %v2476_v36, %s7468_s28 }
 0x3f6   : > { %2560 = vrot.lane.b32.xlu2 %v2478_v8, %s7468_s28  ;;  %v4336_v8 = vld [vmem:[#allocation4 + $0x390] sm:$0xff] }
 0x3f7   : > { %v2347_v50 = vpop.permute.xlu1 %2346  ;;  %v2345_v42 = vpop.permute.xlu0 %2344 }
 0x3f8   : > { %2435 = vst.msk [vmem:[#allocation4 + $0x1a0] sm:$0xff] %vm503_vm3, %v2347_v50  ;;  %4920 = vmatmul.f32.gmra.mxu2 %v4308_v44  ;;  %4968 = vmatmul.f32.gmra.mxu3 %v4420_v41  ;;  %v2367_v51 = vpop.permute.xlu2 %2366  ;;  %v9088_v50 = vld [vmem:[#allocation2 + $0x19a] sm:$0xff]  ;;  %v2653_v44 = vld [vmem:[#allocation2 + $0x48] sm:$0xff] }
 0x3f9   : > { %2434 = vst.msk [vmem:[#allocation4 + $0x168] sm:$0xff] %vm503_vm3, %v2345_v42  ;;  %v2491_v41 = vld [vmem:[#allocation2 + $0x1a4] sm:$0xff] }
 0x3fa   : > { %2445 = vst.msk [vmem:[#allocation4 + $0x3d0] sm:$0xff] %vm503_vm3, %v2367_v51  ;;  %v2654_v51 = vld [vmem:[#allocation2 + $0x50] sm:$0xff] }
 0x3fb   : > { %2266 = vst.msk [vmem:[#allocation4 + $0x6a8] sm:$0xff] %vm310_vm2, %v9088_v50 }
 0x3fd   : > { %2564 = vrot.lane.b32.xlu1 %v2480_v58, %s7468_s28  ;;  %2562 = vrot.lane.b32.xlu0 %v2479_v61, %s7468_s28 }
 0x3fe   : > { %2566 = vrot.lane.b32.xlu2 %v2481_v22, %s7468_s28  ;;  %v4343_v22 = vld [vmem:[#allocation4 + $0x3c8] sm:$0xff] }
 0x3ff   : > { %v2353_v60 = vpop.permute.xlu1 %2352  ;;  %v2351_v30 = vpop.permute.xlu0 %2350 }
 0x400   : > { %2438 = vst.msk [vmem:[#allocation4 + $0x248] sm:$0xff] %vm503_vm3, %v2353_v60  ;;  %4923 = vmatmul.f32.gmra.mxu2 %v4315_v14  ;;  %4971 = vmatmul.f32.gmra.mxu3 %v4427_v62  ;;  %v2373_v48 = vpop.permute.xlu2 %2372  ;;  %v2655_v14 = vld [vmem:[#allocation2 + $0x60] sm:$0xff]  ;;  %v2657_v62 = vld [vmem:[#allocation2 + $0x78] sm:$0xff] }
 0x401   : > { %2437 = vst.msk [vmem:[#allocation4 + $0x210] sm:$0xff] %vm503_vm3, %v2351_v30  ;;  %v2656_v30 = vld [vmem:[#allocation2 + $0x68] sm:$0xff] }
 0x402   : > { %2448 = vst.msk [vmem:[#allocation4 + $0x478] sm:$0xff] %vm503_vm3, %v2373_v48 }
 0x405   : > { %2570 = vrot.lane.b32.xlu1 %v2483_v5, %s7468_s28  ;;  %2568 = vrot.lane.b32.xlu0 %v2482_v17, %s7468_s28  ;;  %v4350_v17 = vld [vmem:[#allocation4 + $0x400] sm:$0xff] }
 0x406   : > { %2572 = vrot.lane.b32.xlu2 %v2484_v32, %s7468_s28 }
 0x407   : > { %v2359_v3 = vpop.permute.xlu1 %2358  ;;  %v2357_v11 = vpop.permute.xlu0 %2356 }
 0x408   : > { %2441 = vst.msk [vmem:[#allocation4 + $0x2f0] sm:$0xff] %vm503_vm3, %v2359_v3  ;;  %4926 = vmatmul.f32.gmra.mxu2 %v4322_v47  ;;  %4974 = vmatmul.f32.gmra.mxu3 %v4434_v46  ;;  %v2379_v34 = vpop.permute.xlu2 %2378  ;;  %v2659_v3 = vld [vmem:[#allocation2 + $0x90] sm:$0xff]  ;;  %v2660_v47 = vld [vmem:[#allocation2 + $0x98] sm:$0xff] }
 0x409   : > { %2440 = vst.msk [vmem:[#allocation4 + $0x2b8] sm:$0xff] %vm503_vm3, %v2357_v11  ;;  %v2658_v11 = vld [vmem:[#allocation2 + $0x80] sm:$0xff] }
 0x40a   : > { %2451 = vst.msk [vmem:[#allocation4 + $0x520] sm:$0xff] %vm503_vm3, %v2379_v34 }
 0x40d   : > { %2576 = vrot.lane.b32.xlu1 %v2486_v26, %s7468_s28  ;;  %2574 = vrot.lane.b32.xlu0 %v2485_v56, %s7468_s28  ;;  %v4357_v26 = vld [vmem:[#allocation4 + $0x438] sm:$0xff] }
 0x40e   : > { %2578 = vrot.lane.b32.xlu2 %v2487_v52, %s7468_s28  ;;  %v2662_v52 = vld [vmem:[#allocation2 + $0xb0] sm:$0xff] }
 0x40f   : > { %v2365_v45 = vpop.permute.xlu1 %2364  ;;  %v2363_v57 = vpop.permute.xlu0 %2362 }
 0x410   : > { %2444 = vst.msk [vmem:[#allocation4 + $0x398] sm:$0xff] %vm503_vm3, %v2365_v45  ;;  %4929 = vmatmul.f32.gmra.mxu2 %v4329_v49  ;;  %4977 = vmatmul.f32.gmra.mxu3 %v4441_v13  ;;  %v2385_v53 = vpop.permute.xlu2 %2384  ;;  %v2661_v45 = vld [vmem:[#allocation2 + $0xa8] sm:$0xff] }
 0x411   : > { %2443 = vst.msk [vmem:[#allocation4 + $0x360] sm:$0xff] %vm503_vm3, %v2363_v57  ;;  %v2663_v57 = vld [vmem:[#allocation2 + $0xc0] sm:$0xff] }
 0x412   : > { %2454 = vst.msk [vmem:[#allocation4 + $0x5c8] sm:$0xff] %vm503_vm3, %v2385_v53  ;;  %v4364_v53 = vld [vmem:[#allocation4 + $0x470] sm:$0xff] }
 0x415   : > { %2582 = vrot.lane.b32.xlu1 %v2489_v33, %s7468_s28  ;;  %2580 = vrot.lane.b32.xlu0 %v2488_v37, %s7468_s28  ;;  %v2665_v37 = vld [vmem:[#allocation2 + $0xd8] sm:$0xff] }
 0x416   : > { %2584 = vrot.lane.b32.xlu2 %v2490_v54, %s7468_s28  ;;  %v2664_v54 = vld [vmem:[#allocation2 + $0xc8] sm:$0xff] }
 0x417   : > { %v2371_v6 = vpop.permute.xlu1 %2370  ;;  %v2369_v36 = vpop.permute.xlu0 %2368 }
 0x418   : > { %2447 = vst.msk [vmem:[#allocation4 + $0x440] sm:$0xff] %vm503_vm3, %v2371_v6  ;;  %4932 = vmatmul.f32.gmra.mxu2 %v4336_v8  ;;  %v2391_v42 = vpop.permute.xlu2 %2390  ;;  %v2666_v6 = vld [vmem:[#allocation2 + $0xe0] sm:$0xff] }
 0x419   : > { %2446 = vst.msk [vmem:[#allocation4 + $0x408] sm:$0xff] %vm503_vm3, %v2369_v36 }
 0x41a   : > { %2457 = vst.msk [vmem:[#allocation4 + $0x670] sm:$0xff] %vm503_vm3, %v2391_v42  ;;  %v4371_v42 = vld [vmem:[#allocation4 + $0x4a8] sm:$0xff] }
 0x41d   : > { %2717 = vrot.lane.b32.xlu1 %v2653_v44, %s7469_s29  ;;  %2586 = vrot.lane.b32.xlu0 %v2491_v41, %s7468_s28  ;;  %v2668_v41 = vld [vmem:[#allocation2 + $0xf8] sm:$0xff] }
 0x41e   : > { %2719 = vrot.lane.b32.xlu2 %v2654_v51, %s7469_s29  ;;  %v2667_v51 = vld [vmem:[#allocation2 + $0xf0] sm:$0xff] }
 0x41f   : > { %v2377_v58 = vpop.permute.xlu1 %2376  ;;  %v2375_v61 = vpop.permute.xlu0 %2374 }
 0x420   : > { %2450 = vst.msk [vmem:[#allocation4 + $0x4e8] sm:$0xff] %vm503_vm3, %v2377_v58  ;;  %4935 = vmatmul.f32.gmra.mxu2 %v4343_v22  ;;  %v2525_v60 = vpop.permute.xlu2 %2524  ;;  %v2669_v58 = vld [vmem:[#allocation2 + $0x108] sm:$0xff] }
 0x421   : > { %2449 = vst.msk [vmem:[#allocation4 + $0x4b0] sm:$0xff] %vm503_vm3, %v2375_v61 }
 0x422   : > { %2620 = vst.msk [vmem:[#allocation4 + $0x18] sm:$0xff] %vm696_vm4, %v2525_v60  ;;  %v4378_v60 = vld [vmem:[#allocation4 + $0x4e0] sm:$0xff] }
 0x425   : > { %2723 = vrot.lane.b32.xlu1 %v2656_v30, %s7469_s29  ;;  %2721 = vrot.lane.b32.xlu0 %v2655_v14, %s7469_s29  ;;  %v2671_v14 = vld [vmem:[#allocation2 + $0x120] sm:$0xff] }
 0x426   : > { %2725 = vrot.lane.b32.xlu2 %v2657_v62, %s7469_s29  ;;  %v2670_v62 = vld [vmem:[#allocation2 + $0x110] sm:$0xff] }
 0x427   : > { %v2383_v48 = vpop.permute.xlu1 %2382  ;;  %v2381_v5 = vpop.permute.xlu0 %2380 }
 0x428   : > { %2453 = vst.msk [vmem:[#allocation4 + $0x590] sm:$0xff] %vm503_vm3, %v2383_v48  ;;  %4938 = vmatmul.f32.gmra.mxu2 %v4350_v17  ;;  %v2531_v32 = vpop.permute.xlu2 %2530  ;;  %v2672_v48 = vld [vmem:[#allocation2 + $0x128] sm:$0xff] }
 0x429   : > { %2452 = vst.msk [vmem:[#allocation4 + $0x558] sm:$0xff] %vm503_vm3, %v2381_v5 }
 0x42a   : > { %2623 = vst.msk [vmem:[#allocation4 + $0xc0] sm:$0xff] %vm696_vm4, %v2531_v32  ;;  %v4385_v32 = vld [vmem:[#allocation4 + $0x518] sm:$0xff] }
 0x42d   : > { %2729 = vrot.lane.b32.xlu1 %v2659_v3, %s7469_s29  ;;  %2727 = vrot.lane.b32.xlu0 %v2658_v11, %s7469_s29  ;;  %v2674_v11 = vld [vmem:[#allocation2 + $0x140] sm:$0xff] }
 0x42e   : > { %2731 = vrot.lane.b32.xlu2 %v2660_v47, %s7469_s29  ;;  %v2673_v47 = vld [vmem:[#allocation2 + $0x138] sm:$0xff] }
 0x42f   : > { %v2389_v46 = vpop.permute.xlu1 %2388  ;;  %v2387_v34 = vpop.permute.xlu0 %2386 }
 0x430   : > { %2456 = vst.msk [vmem:[#allocation4 + $0x638] sm:$0xff] %vm503_vm3, %v2389_v46  ;;  %4941 = vmatmul.f32.gmra.mxu2 %v4357_v26  ;;  %v2537_v56 = vpop.permute.xlu2 %2536  ;;  %v2675_v46 = vld [vmem:[#allocation2 + $0x150] sm:$0xff] }
 0x431   : > { %2455 = vst.msk [vmem:[#allocation4 + $0x600] sm:$0xff] %vm503_vm3, %v2387_v34 }
 0x432   : > { %2626 = vst.msk [vmem:[#allocation4 + $0x168] sm:$0xff] %vm696_vm4, %v2537_v56 }
 0x435   : > { %2735 = vrot.lane.b32.xlu1 %v2662_v52, %s7469_s29  ;;  %2733 = vrot.lane.b32.xlu0 %v2661_v45, %s7469_s29  ;;  %v4509_v52 = vld [vmem:[%s11424_s1 + $0x1f8] sm:$0xff]  ;;  %v2677_v45 = vld [vmem:[#allocation2 + $0x168] sm:$0xff] }
 0x436   : > { %2737 = vrot.lane.b32.xlu2 %v2663_v57, %s7469_s29  ;;  %v2676_v57 = vld [vmem:[#allocation2 + $0x158] sm:$0xff]  ;;  %4981 = vmatpush.msrb.mxu3 %v4509_v52 }
 0x437   : > { %v2395_v49 = vpop.permute.xlu1 %2394  ;;  %v2393_v13 = vpop.permute.xlu0 %2392 }
 0x438   : > { %2459 = vst.msk [vmem:[#allocation4 + $0x6e0] sm:$0xff] %vm503_vm3, %v2395_v49  ;;  %4944 = vmatmul.f32.gmra.mxu2 %v4364_v53  ;;  %v2543_v33 = vpop.permute.xlu2 %2542  ;;  %v4508_v49 = vld [vmem:[%s11424_s1 + $0x1f0] sm:$0xff]  ;;  %v4507_v53 = vld [vmem:[%s11424_s1 + $0x1e8] sm:$0xff] }
 0x439   : > { %2458 = vst.msk [vmem:[#allocation4 + $0x6a8] sm:$0xff] %vm503_vm3, %v2393_v13  ;;  %4982 = vmatpush.msrb.mxu3 %v4508_v49  ;;  %v2678_v13 = vld [vmem:[#allocation2 + $0x170] sm:$0xff] }
 0x43a   : > { %2629 = vst.msk [vmem:[#allocation4 + $0x210] sm:$0xff] %vm696_vm4, %v2543_v33 }
 0x43b   : > { %4983 = vmatpush.msrb.mxu3 %v4507_v53 }
 0x43d   : > { %2741 = vrot.lane.b32.xlu1 %v2665_v37, %s7469_s29  ;;  %2739 = vrot.lane.b32.xlu0 %v2664_v54, %s7469_s29  ;;  %v4506_v54 = vld [vmem:[%s11424_s1 + $0x1e0] sm:$0xff] }
 0x43e   : > { %2743 = vrot.lane.b32.xlu2 %v2666_v6, %s7469_s29  ;;  %v9157_v6 = vpop.f32.mrf.mxu3  ;;  %4984 = vmatpush.msrb.mxu3 %v4506_v54 }
 0x43f   : > { %v2529_v36 = vpop.permute.xlu1 %2528  ;;  %v2527_v8 = vpop.permute.xlu0 %2526  ;;  %11460 = vst [vmem:[#allocation5_spill] sm:$0xff] %v9157_v6 }
 0x440   : > { %2622 = vst.msk [vmem:[#allocation4 + $0x88] sm:$0xff] %vm696_vm4, %v2529_v36  ;;  %4947 = vmatmul.f32.gmra.mxu2 %v4371_v42  ;;  %v2549_v44 = vpop.permute.xlu2 %2548  ;;  %v2680_v42 = vld [vmem:[#allocation2 + $0x188] sm:$0xff] }
 0x441   : > { %2621 = vst.msk [vmem:[#allocation4 + $0x50] sm:$0xff] %vm696_vm4, %v2527_v8  ;;  %v4505_v8 = vld [vmem:[%s11424_s1 + $0x1d8] sm:$0xff] }
 0x442   : > { %2632 = vst.msk [vmem:[#allocation4 + $0x2b8] sm:$0xff] %vm696_vm4, %v2549_v44  ;;  %v2679_v44 = vld [vmem:[#allocation2 + $0x180] sm:$0xff]  ;;  %4985 = vmatpush.msrb.mxu3 %v4505_v8 }
 0x445   : > { %2747 = vrot.lane.b32.xlu1 %v2668_v41, %s7469_s29  ;;  %2745 = vrot.lane.b32.xlu0 %v2667_v51, %s7469_s29  ;;  %v4504_v41 = vld [vmem:[%s11424_s1 + $0x1d0] sm:$0xff]  ;;  %v2681_v51 = vld [vmem:[#allocation2 + $0x198] sm:$0xff] }
 0x446   : > { %2749 = vrot.lane.b32.xlu2 %v2669_v58, %s7469_s29  ;;  %4986 = vmatpush.msrb.mxu3 %v4504_v41  ;;  %v4503_v58 = vld [vmem:[%s11424_s1 + $0x1c8] sm:$0xff] }
 0x447   : > { %v2535_v61 = vpop.permute.xlu1 %2534  ;;  %v2533_v22 = vpop.permute.xlu0 %2532 }
 0x448   : > { %2625 = vst.msk [vmem:[#allocation4 + $0x130] sm:$0xff] %vm696_vm4, %v2535_v61  ;;  %4950 = vmatmul.f32.gmra.mxu2 %v4378_v60  ;;  %v2555_v30 = vpop.permute.xlu2 %2554  ;;  %4987 = vmatpush.msrb.mxu3 %v4503_v58  ;;  %v4502_v60 = vld [vmem:[%s11424_s1 + $0x1c0] sm:$0xff] }
 0x449   : > { %2624 = vst.msk [vmem:[#allocation4 + $0xf8] sm:$0xff] %vm696_vm4, %v2533_v22 }
 0x44a   : > { %2635 = vst.msk [vmem:[#allocation4 + $0x360] sm:$0xff] %vm696_vm4, %v2555_v30  ;;  %4988 = vmatpush.msrb.mxu3 %v4502_v60 }
 0x44d   : > { %2753 = vrot.lane.b32.xlu1 %v2671_v14, %s7469_s29  ;;  %2751 = vrot.lane.b32.xlu0 %v2670_v62, %s7469_s29  ;;  %v4501_v14 = vld [vmem:[%s11424_s1 + $0x1b8] sm:$0xff]  ;;  %v9182_v62 = vpop.f32.mrf.mxu3 }
 0x44e   : > { %2755 = vrot.lane.b32.xlu2 %v2672_v48, %s7469_s29  ;;  %11461 = vst [vmem:[#allocation6_spill] sm:$0xff] %v9182_v62  ;;  %v2683_v48 = vld [vmem:[#allocation2 + $0x1b0] sm:$0xff]  ;;  %4989 = vmatpush.msrb.mxu3 %v4501_v14  ;;  %v2940_v14 = vld [vmem:[#allocation2 + $0x1ba] sm:$0xff] }
 0x44f   : > { %v2541_v5 = vpop.permute.xlu1 %2540  ;;  %v2539_v17 = vpop.permute.xlu0 %2538 }
 0x450   : > { %2628 = vst.msk [vmem:[#allocation4 + $0x1d8] sm:$0xff] %vm696_vm4, %v2541_v5  ;;  %4953 = vmatmul.f32.gmra.mxu2 %v4385_v32  ;;  %v2561_v3 = vpop.permute.xlu2 %2560  ;;  %v2682_v5 = vld [vmem:[#allocation2 + $0x1a0] sm:$0xff]  ;;  %v2684_v32 = vld [vmem:[#allocation2 + $0x1b8] sm:$0xff] }
 0x451   : > { %2627 = vst.msk [vmem:[#allocation4 + $0x1a0] sm:$0xff] %vm696_vm4, %v2539_v17  ;;  %v4500_v17 = vld [vmem:[%s11424_s1 + $0x1b0] sm:$0xff] }
 0x452   : > { %2638 = vst.msk [vmem:[#allocation4 + $0x408] sm:$0xff] %vm696_vm4, %v2561_v3  ;;  %4990 = vmatpush.msrb.mxu3 %v4500_v17  ;;  %v4499_v3 = vld [vmem:[%s11424_s1 + $0x1a8] sm:$0xff] }
 0x454   : > { %4991 = vmatpush.msrb.mxu3 %v4499_v3 }
 0x455   : > { %2759 = vrot.lane.b32.xlu1 %v2674_v11, %s7469_s29  ;;  %2757 = vrot.lane.b32.xlu0 %v2673_v47, %s7469_s29  ;;  %v9206_v52 = vpop.f32.mrf.mxu3 }
 0x456   : > { %2761 = vrot.lane.b32.xlu2 %v2675_v46, %s7469_s29  ;;  %v4498_v46 = vld [vmem:[%s11424_s1 + $0x1a0] sm:$0xff]  ;;  %11462 = vst [vmem:[#allocation7_spill] sm:$0xff] %v9206_v52 }
 0x457   : > { %v2547_v34 = vpop.permute.xlu1 %2546  ;;  %v2545_v26 = vpop.permute.xlu0 %2544  ;;  %4992 = vmatpush.msrb.mxu3 %v4498_v46 }
 0x458   : > { %2631 = vst.msk [vmem:[#allocation4 + $0x280] sm:$0xff] %vm696_vm4, %v2547_v34  ;;  %v2567_v56 = vpop.permute.xlu2 %2566 }
 0x459   : > { %2630 = vst.msk [vmem:[#allocation4 + $0x248] sm:$0xff] %vm696_vm4, %v2545_v26  ;;  %v4497_v26 = vld [vmem:[%s11424_s1 + $0x198] sm:$0xff] }
 0x45a   : > { %2641 = vst.msk [vmem:[#allocation4 + $0x4b0] sm:$0xff] %vm696_vm4, %v2567_v56  ;;  %4993 = vmatpush.msrb.mxu3 %v4497_v26  ;;  %v4496_v56 = vld [vmem:[%s11424_s1 + $0x190] sm:$0xff]  ;;  %v9332_v26 = vld [vmem:[#allocation2 + $0x61] sm:$0xff] }
 0x45b   : > { %2879 = vst.msk [vmem:[#allocation4 + $0x90] sm:$0xff] %vm310_vm2, %v9332_v26 }
 0x45c   : > { %4994 = vmatpush.msrb.mxu3 %v4496_v56  ;;  %v9334_v56 = vld [vmem:[#allocation2 + $0x79] sm:$0xff] }
 0x45d   : > { %2765 = vrot.lane.b32.xlu1 %v2677_v45, %s7469_s29  ;;  %2763 = vrot.lane.b32.xlu0 %v2676_v57, %s7469_s29  ;;  %v4495_v45 = vld [vmem:[%s11424_s1 + $0x188] sm:$0xff]  ;;  %2881 = vst.msk [vmem:[#allocation4 + $0x100] sm:$0xff] %vm310_vm2, %v9334_v56 }
 0x45e   : > { %2767 = vrot.lane.b32.xlu2 %v2678_v13, %s7469_s29  ;;  %4995 = vmatpush.msrb.mxu3 %v4495_v45  ;;  %v4494_v13 = vld [vmem:[%s11424_s1 + $0x180] sm:$0xff] }
 0x45f   : > { %v2553_v33 = vpop.permute.xlu1 %2552  ;;  %v2551_v37 = vpop.permute.xlu0 %2550 }
 0x460   : > { %2634 = vst.msk [vmem:[#allocation4 + $0x328] sm:$0xff] %vm696_vm4, %v2553_v33  ;;  %v2573_v36 = vpop.permute.xlu2 %2572  ;;  %4996 = vmatpush.msrb.mxu3 %v4494_v13  ;;  %v9342_v13 = vld [vmem:[#allocation2 + $0x69] sm:$0xff] }
 0x461   : > { %2633 = vst.msk [vmem:[#allocation4 + $0x2f0] sm:$0xff] %vm696_vm4, %v2551_v37 }
 0x462   : > { %2644 = vst.msk [vmem:[#allocation4 + $0x558] sm:$0xff] %vm696_vm4, %v2573_v36 }
 0x463   : > { %2880 = vst.msk [vmem:[#allocation4 + $0xc8] sm:$0xff] %vm310_vm2, %v9342_v13 }
 0x465   : > { %2771 = vrot.lane.b32.xlu1 %v2680_v42, %s7469_s29  ;;  %2769 = vrot.lane.b32.xlu0 %v2679_v44, %s7469_s29 }
 0x466   : > { %2773 = vrot.lane.b32.xlu2 %v2681_v51, %s7469_s29 }
 0x467   : > { %v2559_v61 = vpop.permute.xlu1 %2558  ;;  %v2557_v22 = vpop.permute.xlu0 %2556 }
 0x468   : > { %2637 = vst.msk [vmem:[#allocation4 + $0x3d0] sm:$0xff] %vm696_vm4, %v2559_v61  ;;  %v2579_v30 = vpop.permute.xlu2 %2578 }
 0x469   : > { %2636 = vst.msk [vmem:[#allocation4 + $0x398] sm:$0xff] %vm696_vm4, %v2557_v22 }
 0x46a   : > { %2647 = vst.msk [vmem:[#allocation4 + $0x600] sm:$0xff] %vm696_vm4, %v2579_v30 }
 0x46d   : > { %2777 = vrot.lane.b32.xlu1 %v2683_v48, %s7469_s29  ;;  %2775 = vrot.lane.b32.xlu0 %v2682_v5, %s7469_s29  ;;  %v2939_v48 = vld [vmem:[#allocation2 + $0x1b2] sm:$0xff] }
 0x46e   : > { %2779 = vrot.lane.b32.xlu2 %v2684_v32, %s7469_s29  ;;  %v2845_v32 = vld [vmem:[#allocation2 + $0x49] sm:$0xff] }
 0x46f   : > { %v2565_v11 = vpop.permute.xlu1 %2564  ;;  %v2563_v47 = vpop.permute.xlu0 %2562  ;;  %2877 = vst.msk [vmem:[#allocation4 + $0x20] sm:$0xff] %vm310_vm2, %v2845_v32 }
 0x470   : > { %2640 = vst.msk [vmem:[#allocation4 + $0x478] sm:$0xff] %vm696_vm4, %v2565_v11  ;;  %v2585_v34 = vpop.permute.xlu2 %2584  ;;  %v3103_v11 = vld [vmem:[#allocation2 + $0x63] sm:$0xff] }
 0x471   : > { %2639 = vst.msk [vmem:[#allocation4 + $0x440] sm:$0xff] %vm696_vm4, %v2563_v47  ;;  %v3102_v47 = vld [vmem:[#allocation2 + $0x53] sm:$0xff] }
 0x472   : > { %2650 = vst.msk [vmem:[#allocation4 + $0x6a8] sm:$0xff] %vm696_vm4, %v2585_v34  ;;  %v3104_v34 = vld [vmem:[#allocation2 + $0x6b] sm:$0xff] }
 0x475   : > { %2975 = vrot.lane.b32.xlu1 %v8926_v55, %s7467_s27  ;;  %2973 = vrot.lane.b32.xlu0 %v8916_v12, %s7467_s27  ;;  %v9227_v55 = vpop.f32.mrf.mxu3 }
 0x476   : > { %2977 = vrot.lane.b32.xlu2 %v8918_v15, %s7467_s27  ;;  %11463 = vst [vmem:[#allocation8_spill] sm:$0xff] %v9227_v55 }
 0x477   : > { %v2571_v57 = vpop.permute.xlu1 %2570  ;;  %v2569_v49 = vpop.permute.xlu0 %2568 }
 0x478   : > { %2643 = vst.msk [vmem:[#allocation4 + $0x520] sm:$0xff] %vm696_vm4, %v2571_v57  ;;  %v2720_v12 = vpop.permute.xlu2 %2719 }
 0x479   : > { %2642 = vst.msk [vmem:[#allocation4 + $0x4e8] sm:$0xff] %vm696_vm4, %v2569_v49 }
 0x47a   : > { %2814 = vst.msk [vmem:[#allocation4 + $0x50] sm:$0xff] %vm889_vm5, %v2720_v12 }
 0x47d   : > { %2981 = vrot.lane.b32.xlu1 %v8944_v10, %s7467_s27  ;;  %2979 = vrot.lane.b32.xlu0 %v8934_v19, %s7467_s27  ;;  %v9240_v37 = vpop.f32.mrf.mxu3 }
 0x47e   : > { %2983 = vrot.lane.b32.xlu2 %v8936_v2, %s7467_s27  ;;  %11464 = vst [vmem:[#allocation9_spill] sm:$0xff] %v9240_v37  ;;  %v3756_v37 = vld [vmem:[#allocation2 + $0x10a] sm:$0xff] }
 0x47f   : > { %v2577_v15 = vpop.permute.xlu1 %2576  ;;  %v2575_v53 = vpop.permute.xlu0 %2574 }
 0x480   : > { %2646 = vst.msk [vmem:[#allocation4 + $0x5c8] sm:$0xff] %vm696_vm4, %v2577_v15  ;;  %v2726_v33 = vpop.permute.xlu2 %2725  ;;  %v3106_v15 = vld [vmem:[#allocation2 + $0x83] sm:$0xff] }
 0x481   : > { %2645 = vst.msk [vmem:[#allocation4 + $0x590] sm:$0xff] %vm696_vm4, %v2575_v53  ;;  %v3105_v53 = vld [vmem:[#allocation2 + $0x7b] sm:$0xff] }
 0x482   : > { %2817 = vst.msk [vmem:[#allocation4 + $0xf8] sm:$0xff] %vm889_vm5, %v2726_v33  ;;  %v3107_v33 = vld [vmem:[#allocation2 + $0x93] sm:$0xff] }
 0x485   : > { %2987 = vrot.lane.b32.xlu1 %v8962_v16, %s7467_s27  ;;  %2985 = vrot.lane.b32.xlu0 %v8952_v63, %s7467_s27  ;;  %v9253_v54 = vpop.f32.mrf.mxu3 }
 0x486   : > { %2989 = vrot.lane.b32.xlu2 %v8954_v39, %s7467_s27  ;;  %11465 = vst [vmem:[#allocation10_spill] sm:$0xff] %v9253_v54 }
 0x487   : > { %v2583_v19 = vpop.permute.xlu1 %2582  ;;  %v2581_v10 = vpop.permute.xlu0 %2580 }
 0x488   : > { %2649 = vst.msk [vmem:[#allocation4 + $0x670] sm:$0xff] %vm696_vm4, %v2583_v19  ;;  %v2732_v2 = vpop.permute.xlu2 %2731  ;;  %v9350_v19 = vld [vmem:[#allocation2 + $0x81] sm:$0xff] }
 0x489   : > { %2648 = vst.msk [vmem:[#allocation4 + $0x638] sm:$0xff] %vm696_vm4, %v2581_v10  ;;  %v4253_v61 = vld [vmem:[#allocation4 + $0xf8] sm:$0xff] }
 0x48a   : > { %2820 = vst.msk [vmem:[#allocation4 + $0x1a0] sm:$0xff] %vm889_vm5, %v2732_v2  ;;  %v9352_v10 = vld [vmem:[#allocation2 + $0x99] sm:$0xff] }
 0x48b   : > { %2882 = vst.msk [vmem:[#allocation4 + $0x138] sm:$0xff] %vm310_vm2, %v9350_v19 }
 0x48c   : > { %2884 = vst.msk [vmem:[#allocation4 + $0x1a8] sm:$0xff] %vm310_vm2, %v9352_v10 }
 0x48d   : > { %2993 = vrot.lane.b32.xlu1 %v8980_v20, %s7467_s27  ;;  %2991 = vrot.lane.b32.xlu0 %v8970_v7, %s7467_s27  ;;  %v9265_v8 = vpop.f32.mrf.mxu3 }
 0x48e   : > { %2995 = vrot.lane.b32.xlu2 %v8972_v28, %s7467_s27  ;;  %11466 = vst [vmem:[#allocation11_spill] sm:$0xff] %v9265_v8 }
 0x48f   : > { %v2718_v63 = vpop.permute.xlu1 %2717  ;;  %v2587_v16 = vpop.permute.xlu0 %2586 }
 0x490   : > { %2813 = vst.msk [vmem:[#allocation4 + $0x18] sm:$0xff] %vm889_vm5, %v2718_v63  ;;  %v2738_v39 = vpop.permute.xlu2 %2737 }
 0x491   : > { %2651 = vst.msk [vmem:[#allocation4 + $0x6e0] sm:$0xff] %vm696_vm4, %v2587_v16  ;;  %v4274_v49 = vld [vmem:[#allocation4 + $0x1a0] sm:$0xff] }
 0x492   : > { %2823 = vst.msk [vmem:[#allocation4 + $0x248] sm:$0xff] %vm889_vm5, %v2738_v39 }
 0x495   : > { %2999 = vrot.lane.b32.xlu1 %v8998_v38, %s7467_s27  ;;  %2997 = vrot.lane.b32.xlu0 %v8988_v29, %s7467_s27  ;;  %v4232_v29 = vld [vmem:[#allocation4 + $0x50] sm:$0xff] }
 0x496   : > { %3001 = vrot.lane.b32.xlu2 %v8990_v9, %s7467_s27 }
 0x497   : > { %v2724_v7 = vpop.permute.xlu1 %2723  ;;  %v2722_v20 = vpop.permute.xlu0 %2721  ;;  %v4225_v36 = vld [vmem:[#allocation4 + $0x18] sm:$0xff] }
 0x498   : > { %2816 = vst.msk [vmem:[#allocation4 + $0xc0] sm:$0xff] %vm889_vm5, %v2724_v7  ;;  %4997 = vmatmul.f32.vlgmr.msrb.gmra.mxu3 %v4225_v36  ;;  %v2744_v28 = vpop.permute.xlu2 %2743  ;;  %v9362_v7 = vld [vmem:[#allocation2 + $0x91] sm:$0xff] }
 0x499   : > { %2815 = vst.msk [vmem:[#allocation4 + $0x88] sm:$0xff] %vm889_vm5, %v2722_v20  ;;  %v3109_v36 = vld [vmem:[#allocation2 + $0xab] sm:$0xff] }
 0x49a   : > { %2826 = vst.msk [vmem:[#allocation4 + $0x2f0] sm:$0xff] %vm889_vm5, %v2744_v28  ;;  %v3108_v28 = vld [vmem:[#allocation2 + $0x9b] sm:$0xff] }
 0x49b   : > { %2883 = vst.msk [vmem:[#allocation4 + $0x170] sm:$0xff] %vm310_vm2, %v9362_v7 }
 0x49d   : > { %3005 = vrot.lane.b32.xlu1 %v9016_v0, %s7467_s27  ;;  %3003 = vrot.lane.b32.xlu0 %v9006_v43, %s7467_s27  ;;  %v9280_v43 = vpop.f32.mrf.mxu3 }
 0x49e   : > { %3007 = vrot.lane.b32.xlu2 %v9008_v31, %s7467_s27  ;;  %11467 = vst [vmem:[#allocation12_spill] sm:$0xff] %v9280_v43 }
 0x49f   : > { %v2730_v38 = vpop.permute.xlu1 %2729  ;;  %v2728_v42 = vpop.permute.xlu0 %2727  ;;  %v4246_v58 = vld [vmem:[#allocation4 + $0xc0] sm:$0xff] }
 0x4a0   : > { %2819 = vst.msk [vmem:[#allocation4 + $0x168] sm:$0xff] %vm889_vm5, %v2730_v38  ;;  %5000 = vmatmul.f32.gmra.mxu3 %v4232_v29  ;;  %v2750_v9 = vpop.permute.xlu2 %2749  ;;  %v4239_v41 = vld [vmem:[#allocation4 + $0x88] sm:$0xff]  ;;  %v3110_v29 = vld [vmem:[#allocation2 + $0xb3] sm:$0xff] }
 0x4a1   : > { %2818 = vst.msk [vmem:[#allocation4 + $0x130] sm:$0xff] %vm889_vm5, %v2728_v42  ;;  %v9370_v38 = vld [vmem:[#allocation2 + $0xa9] sm:$0xff]  ;;  %v9372_v42 = vld [vmem:[#allocation2 + $0xc1] sm:$0xff] }
 0x4a2   : > { %2829 = vst.msk [vmem:[#allocation4 + $0x398] sm:$0xff] %vm889_vm5, %v2750_v9 }
 0x4a3   : > { %2885 = vst.msk [vmem:[#allocation4 + $0x1e0] sm:$0xff] %vm310_vm2, %v9370_v38 }
 0x4a4   : > { %2887 = vst.msk [vmem:[#allocation4 + $0x250] sm:$0xff] %vm310_vm2, %v9372_v42 }
 0x4a5   : > { %3011 = vrot.lane.b32.xlu1 %v9034_v18, %s7467_s27  ;;  %3009 = vrot.lane.b32.xlu0 %v9024_v24, %s7467_s27  ;;  %v9291_v24 = vpop.f32.mrf.mxu3 }
 0x4a6   : > { %3013 = vrot.lane.b32.xlu2 %v9026_v27, %s7467_s27  ;;  %11468 = vst [vmem:[#allocation13_spill] sm:$0xff] %v9291_v24  ;;  %v3763_v24 = vld [vmem:[#allocation2 + $0x15a] sm:$0xff] }
 0x4a7   : > { %v2736_v0 = vpop.permute.xlu1 %2735  ;;  %v2734_v44 = vpop.permute.xlu0 %2733  ;;  %v4267_v17 = vld [vmem:[#allocation4 + $0x168] sm:$0xff] }
 0x4a8   : > { %2822 = vst.msk [vmem:[#allocation4 + $0x210] sm:$0xff] %vm889_vm5, %v2736_v0  ;;  %5003 = vmatmul.f32.gmra.mxu3 %v4239_v41  ;;  %v2756_v31 = vpop.permute.xlu2 %2755  ;;  %v4260_v60 = vld [vmem:[#allocation4 + $0x130] sm:$0xff] }
 0x4a9   : > { %2821 = vst.msk [vmem:[#allocation4 + $0x1d8] sm:$0xff] %vm889_vm5, %v2734_v44 }
 0x4aa   : > { %2832 = vst.msk [vmem:[#allocation4 + $0x440] sm:$0xff] %vm889_vm5, %v2756_v31  ;;  %v9382_v31 = vld [vmem:[#allocation2 + $0xb1] sm:$0xff] }
 0x4ab   : > { %2886 = vst.msk [vmem:[#allocation4 + $0x218] sm:$0xff] %vm310_vm2, %v9382_v31 }
 0x4ad   : > { %3017 = vrot.lane.b32.xlu1 %v9052_v25, %s7467_s27  ;;  %3015 = vrot.lane.b32.xlu0 %v9042_v21, %s7467_s27 }
 0x4ae   : > { %3019 = vrot.lane.b32.xlu2 %v9044_v4, %s7467_s27  ;;  %v9304_v4 = vpop.f32.mrf.mxu3 }
 0x4af   : > { %v2742_v18 = vpop.permute.xlu1 %2741  ;;  %v2740_v51 = vpop.permute.xlu0 %2739  ;;  %11469 = vst [vmem:[#allocation14_spill] sm:$0xff] %v9304_v4  ;;  %v4288_v44 = vld [vmem:[#allocation4 + $0x210] sm:$0xff]  ;;  %v4128_v4 = vld [vmem:[#allocation2 + $0x7c] sm:$0xff] }
 0x4b0   : > { %2825 = vst.msk [vmem:[#allocation4 + $0x2b8] sm:$0xff] %vm889_vm5, %v2742_v18  ;;  %5006 = vmatmul.f32.gmra.mxu3 %v4246_v58  ;;  %v2762_v27 = vpop.permute.xlu2 %2761  ;;  %v4281_v39 = vld [vmem:[#allocation4 + $0x1d8] sm:$0xff]  ;;  %v3111_v58 = vld [vmem:[#allocation2 + $0xc3] sm:$0xff] }
 0x4b1   : > { %2824 = vst.msk [vmem:[#allocation4 + $0x280] sm:$0xff] %vm889_vm5, %v2740_v51  ;;  %v3112_v51 = vld [vmem:[#allocation2 + $0xcb] sm:$0xff] }
 0x4b2   : > { %2835 = vst.msk [vmem:[#allocation4 + $0x4e8] sm:$0xff] %vm889_vm5, %v2762_v27  ;;  %v3113_v27 = vld [vmem:[#allocation2 + $0xdb] sm:$0xff] }
 0x4b3   : > { %4160 = vst.msk [vmem:[#allocation4 + $0xa0] sm:$0xff] %vm310_vm2, %v4128_v4 }
 0x4b5   : > { %3023 = vrot.lane.b32.xlu1 %v9070_v1, %s7467_s27  ;;  %3021 = vrot.lane.b32.xlu0 %v9060_v59, %s7467_s27 }
 0x4b6   : > { %3025 = vrot.lane.b32.xlu2 %v9062_v40, %s7467_s27  ;;  %v9317_v30 = vpop.f32.mrf.mxu3 }
 0x4b7   : > { %v2748_v21 = vpop.permute.xlu1 %2747  ;;  %v2746_v25 = vpop.permute.xlu0 %2745  ;;  %11470 = vst [vmem:[#allocation15_spill] sm:$0xff] %v9317_v30 }
 0x4b8   : > { %2828 = vst.msk [vmem:[#allocation4 + $0x360] sm:$0xff] %vm889_vm5, %v2748_v21  ;;  %5009 = vmatmul.f32.gmra.mxu3 %v4253_v61  ;;  %v2768_v22 = vpop.permute.xlu2 %2767  ;;  %v9390_v21 = vld [vmem:[#allocation2 + $0xc9] sm:$0xff]  ;;  %v4302_v32 = vld [vmem:[#allocation4 + $0x280] sm:$0xff] }
 0x4b9   : > { %2827 = vst.msk [vmem:[#allocation4 + $0x328] sm:$0xff] %vm889_vm5, %v2746_v25  ;;  %v9392_v25 = vld [vmem:[#allocation2 + $0xe1] sm:$0xff] }
 0x4ba   : > { %2838 = vst.msk [vmem:[#allocation4 + $0x590] sm:$0xff] %vm889_vm5, %v2768_v22  ;;  %v4242_v62 = vld [vmem:[#allocation4 + $0xa0] sm:$0xff] }
 0x4bb   : > { %2888 = vst.msk [vmem:[#allocation4 + $0x288] sm:$0xff] %vm310_vm2, %v9390_v21 }
 0x4bc   : > { %2890 = vst.msk [vmem:[#allocation4 + $0x2f8] sm:$0xff] %vm310_vm2, %v9392_v25 }
 0x4bd   : > { %3029 = vrot.lane.b32.xlu1 %v9088_v50, %s7467_s27  ;;  %3027 = vrot.lane.b32.xlu0 %v9078_v23, %s7467_s27  ;;  %v3101_v50 = vld [vmem:[#allocation2 + $0x4b] sm:$0xff] }
 0x4be   : > { %3031 = vrot.lane.b32.xlu2 %v9080_v35, %s7467_s27  ;;  %v2846_v23 = vld [vmem:[#allocation2 + $0x51] sm:$0xff]  ;;  %v9328_v46 = vpop.f32.mrf.mxu3 }
 0x4bf   : > { %v2754_v59 = vpop.permute.xlu1 %2753  ;;  %v2752_v1 = vpop.permute.xlu0 %2751  ;;  %2878 = vst.msk [vmem:[#allocation4 + $0x58] sm:$0xff] %vm310_vm2, %v2846_v23  ;;  %v9410_v23 = vld [vmem:[#allocation2 + $0xf1] sm:$0xff] }
 0x4c0   : > { %2831 = vst.msk [vmem:[#allocation4 + $0x408] sm:$0xff] %vm889_vm5, %v2754_v59  ;;  %5012 = vmatmul.f32.gmra.mxu3 %v4260_v60  ;;  %v2774_v40 = vpop.permute.xlu2 %2773  ;;  %v4295_v59 = vld [vmem:[#allocation4 + $0x248] sm:$0xff] }
 0x4c1   : > { %2830 = vst.msk [vmem:[#allocation4 + $0x3d0] sm:$0xff] %vm889_vm5, %v2752_v1  ;;  %v9400_v1 = vld [vmem:[#allocation2 + $0xd9] sm:$0xff]  ;;  %v4400_v43 = vld [vmem:[#allocation4 + $0x590] sm:$0xff] }
 0x4c2   : > { %2841 = vst.msk [vmem:[#allocation4 + $0x638] sm:$0xff] %vm889_vm5, %v2774_v40 }
 0x4c3   : > { %11471 = vst [vmem:[#allocation16_spill] sm:$0xff] %v9328_v46  ;;  %v3758_v46 = vld [vmem:[#allocation2 + $0x122] sm:$0xff] }
 0x4c4   : > { %2889 = vst.msk [vmem:[#allocation4 + $0x2c0] sm:$0xff] %vm310_vm2, %v9400_v1 }
 0x4c5   : > { %3035 = vrot.lane.b32.xlu1 %v2940_v14, %s7467_s27  ;;  %3033 = vrot.lane.b32.xlu0 %v2939_v48, %s7467_s27  ;;  %v3115_v14 = vld [vmem:[#allocation2 + $0xf3] sm:$0xff]  ;;  %v3114_v48 = vld [vmem:[#allocation2 + $0xe3] sm:$0xff]  ;;  %2891 = vst.msk [vmem:[#allocation4 + $0x330] sm:$0xff] %vm310_vm2, %v9410_v23 }
 0x4c6   : > { %3165 = vrot.lane.b32.xlu2 %v3101_v50, %s7468_s28  ;;  %v9354_v2 = vpop.f32.mrf.mxu3  ;;  %v3116_v50 = vld [vmem:[#allocation2 + $0xfb] sm:$0xff] }
 0x4c7   : > { %v2760_v35 = vpop.permute.xlu1 %2759  ;;  %v2758_v5 = vpop.permute.xlu0 %2757  ;;  %11472 = vst [vmem:[#allocation17_spill] sm:$0xff] %v9354_v2 }
 0x4c8   : > { %2834 = vst.msk [vmem:[#allocation4 + $0x4b0] sm:$0xff] %vm889_vm5, %v2760_v35  ;;  %5015 = vmatmul.f32.gmra.mxu3 %v4267_v17  ;;  %v2780_v3 = vpop.permute.xlu2 %2779  ;;  %v9412_v35 = vld [vmem:[#allocation2 + $0x109] sm:$0xff] }
 0x4c9   : > { %2833 = vst.msk [vmem:[#allocation4 + $0x478] sm:$0xff] %vm889_vm5, %v2758_v5 }
 0x4ca   : > { %2844 = vst.msk [vmem:[#allocation4 + $0x6e0] sm:$0xff] %vm889_vm5, %v2780_v3  ;;  %v9420_v3 = vld [vmem:[#allocation2 + $0xf9] sm:$0xff] }
 0x4cb   : > { %2893 = vst.msk [vmem:[#allocation4 + $0x3a0] sm:$0xff] %vm310_vm2, %v9412_v35 }
 0x4cc   : > { %2892 = vst.msk [vmem:[#allocation4 + $0x368] sm:$0xff] %vm310_vm2, %v9420_v3 }
 0x4cd   : > { %3169 = vrot.lane.b32.xlu1 %v3103_v11, %s7468_s28  ;;  %3167 = vrot.lane.b32.xlu0 %v3102_v47, %s7468_s28  ;;  %v3118_v47 = vld [vmem:[#allocation2 + $0x113] sm:$0xff] }
 0x4ce   : > { %3171 = vrot.lane.b32.xlu2 %v3104_v34, %s7468_s28  ;;  %v9379_v41 = vpop.f32.mrf.mxu3  ;;  %v3117_v34 = vld [vmem:[#allocation2 + $0x10b] sm:$0xff] }
 0x4cf   : > { %v2766_v45 = vpop.permute.xlu1 %2765  ;;  %v2764_v57 = vpop.permute.xlu0 %2763  ;;  %11473 = vst [vmem:[#allocation18_spill] sm:$0xff] %v9379_v41 }
 0x4d0   : > { %2837 = vst.msk [vmem:[#allocation4 + $0x558] sm:$0xff] %vm889_vm5, %v2766_v45  ;;  %5018 = vmatmul.f32.gmra.mxu3 %v4274_v49  ;;  %v2978_v12 = vpop.permute.xlu2 %2977  ;;  %v9430_v49 = vld [vmem:[#allocation2 + $0x111] sm:$0xff] }
 0x4d1   : > { %2836 = vst.msk [vmem:[#allocation4 + $0x520] sm:$0xff] %vm889_vm5, %v2764_v57  ;;  %v3119_v57 = vld [vmem:[#allocation2 + $0x123] sm:$0xff] }
 0x4d2   : > { %3071 = vst.msk [vmem:[#allocation4 + $0x90] sm:$0xff] %vm503_vm3, %v2978_v12  ;;  %v9432_v12 = vld [vmem:[#allocation2 + $0x129] sm:$0xff] }
 0x4d3   : > { %2894 = vst.msk [vmem:[#allocation4 + $0x3d8] sm:$0xff] %vm310_vm2, %v9430_v49 }
 0x4d4   : > { %2896 = vst.msk [vmem:[#allocation4 + $0x448] sm:$0xff] %vm310_vm2, %v9432_v12 }
 0x4d5   : > { %3175 = vrot.lane.b32.xlu1 %v3106_v15, %s7468_s28  ;;  %3173 = vrot.lane.b32.xlu0 %v3105_v53, %s7468_s28 }
 0x4d6   : > { %3177 = vrot.lane.b32.xlu2 %v3107_v33, %s7468_s28  ;;  %v9403_v40 = vpop.f32.mrf.mxu3  ;;  %v4309_v33 = vld [vmem:[#allocation4 + $0x2b8] sm:$0xff] }
 0x4d7   : > { %v2772_v63 = vpop.permute.xlu1 %2771  ;;  %v2770_v16 = vpop.permute.xlu0 %2769  ;;  %11474 = vst [vmem:[#allocation19_spill] sm:$0xff] %v9403_v40  ;;  %v3322_v40 = vld [vmem:[#allocation2 + $0x1a4] sm:$0xff] }
 0x4d8   : > { %2840 = vst.msk [vmem:[#allocation4 + $0x600] sm:$0xff] %vm889_vm5, %v2772_v63  ;;  %5021 = vmatmul.f32.gmra.mxu3 %v4281_v39  ;;  %v2984_v20 = vpop.permute.xlu2 %2983  ;;  %v9440_v63 = vld [vmem:[#allocation2 + $0x121] sm:$0xff] }
 0x4d9   : > { %2839 = vst.msk [vmem:[#allocation4 + $0x5c8] sm:$0xff] %vm889_vm5, %v2770_v16  ;;  %v3121_v39 = vld [vmem:[#allocation2 + $0x13b] sm:$0xff] }
 0x4da   : > { %3074 = vst.msk [vmem:[#allocation4 + $0x138] sm:$0xff] %vm503_vm3, %v2984_v20  ;;  %v3120_v20 = vld [vmem:[#allocation2 + $0x12b] sm:$0xff] }
 0x4db   : > { %2895 = vst.msk [vmem:[#allocation4 + $0x410] sm:$0xff] %vm310_vm2, %v9440_v63 }
 0x4dd   : > { %3181 = vrot.lane.b32.xlu1 %v3109_v36, %s7468_s28  ;;  %3179 = vrot.lane.b32.xlu0 %v3108_v28, %s7468_s28  ;;  %v3122_v28 = vld [vmem:[#allocation2 + $0x143] sm:$0xff] }
 0x4de   : > { %3183 = vrot.lane.b32.xlu2 %v3110_v29, %s7468_s28  ;;  %v9426_v45 = vpop.f32.mrf.mxu3  ;;  %v9450_v29 = vld [vmem:[#allocation2 + $0x139] sm:$0xff] }
 0x4df   : > { %v2778_v9 = vpop.permute.xlu1 %2777  ;;  %v2776_v0 = vpop.permute.xlu0 %2775  ;;  %11475 = vst [vmem:[#allocation20_spill] sm:$0xff] %v9426_v45 }
 0x4e0   : > { %2843 = vst.msk [vmem:[#allocation4 + $0x6a8] sm:$0xff] %vm889_vm5, %v2778_v9  ;;  %5024 = vmatmul.f32.gmra.mxu3 %v4288_v44  ;;  %v2990_v18 = vpop.permute.xlu2 %2989  ;;  %v9452_v9 = vld [vmem:[#allocation2 + $0x151] sm:$0xff] }
 0x4e1   : > { %2842 = vst.msk [vmem:[#allocation4 + $0x670] sm:$0xff] %vm889_vm5, %v2776_v0 }
 0x4e2   : > { %3077 = vst.msk [vmem:[#allocation4 + $0x1e0] sm:$0xff] %vm503_vm3, %v2990_v18  ;;  %v4316_v18 = vld [vmem:[#allocation4 + $0x2f0] sm:$0xff] }
 0x4e3   : > { %2897 = vst.msk [vmem:[#allocation4 + $0x480] sm:$0xff] %vm310_vm2, %v9450_v29 }
 0x4e4   : > { %2899 = vst.msk [vmem:[#allocation4 + $0x4f0] sm:$0xff] %vm310_vm2, %v9452_v9 }
 0x4e5   : > { %3187 = vrot.lane.b32.xlu1 %v3112_v51, %s7468_s28  ;;  %3185 = vrot.lane.b32.xlu0 %v3111_v58, %s7468_s28  ;;  %v9460_v51 = vld [vmem:[#allocation2 + $0x141] sm:$0xff] }
 0x4e6   : > { %3189 = vrot.lane.b32.xlu2 %v3113_v27, %s7468_s28  ;;  %v9446_v36 = vpop.f32.mrf.mxu3  ;;  %v3124_v27 = vld [vmem:[#allocation2 + $0x15b] sm:$0xff]  ;;  %2898 = vst.msk [vmem:[#allocation4 + $0x4b8] sm:$0xff] %vm310_vm2, %v9460_v51 }
 0x4e7   : > { %v2976_v61 = vpop.permute.xlu1 %2975  ;;  %v2974_v22 = vpop.permute.xlu0 %2973  ;;  %11476 = vst [vmem:[#allocation21_spill] sm:$0xff] %v9446_v36 }
 0x4e8   : > { %3070 = vst.msk [vmem:[#allocation4 + $0x58] sm:$0xff] %vm503_vm3, %v2976_v61  ;;  %5027 = vmatmul.f32.gmra.mxu3 %v4295_v59  ;;  %v2996_v60 = vpop.permute.xlu2 %2995  ;;  %v3123_v61 = vld [vmem:[#allocation2 + $0x153] sm:$0xff] }
 0x4e9   : > { %3069 = vst.msk [vmem:[#allocation4 + $0x20] sm:$0xff] %vm503_vm3, %v2974_v22  ;;  %v3125_v22 = vld [vmem:[#allocation2 + $0x16b] sm:$0xff]  ;;  %v9468_v59 = vld [vmem:[#allocation2 + $0x159] sm:$0xff] }
 0x4ea   : > { %3080 = vst.msk [vmem:[#allocation4 + $0x288] sm:$0xff] %vm503_vm3, %v2996_v60  ;;  %v9470_v60 = vld [vmem:[#allocation2 + $0x171] sm:$0xff] }
 0x4eb   : > { %2900 = vst.msk [vmem:[#allocation4 + $0x528] sm:$0xff] %vm310_vm2, %v9468_v59 }
 0x4ec   : > { %2902 = vst.msk [vmem:[#allocation4 + $0x598] sm:$0xff] %vm310_vm2, %v9470_v60 }
 0x4ed   : > { %3193 = vrot.lane.b32.xlu1 %v3115_v14, %s7468_s28  ;;  %3191 = vrot.lane.b32.xlu0 %v3114_v48, %s7468_s28 }
 0x4ee   : > { %3195 = vrot.lane.b32.xlu2 %v3116_v50, %s7468_s28  ;;  %v9472_v14 = vpop.f32.mrf.mxu3 }
 0x4ef   : > { %v2982_v5 = vpop.permute.xlu1 %2981  ;;  %v2980_v17 = vpop.permute.xlu0 %2979  ;;  %11477 = vst [vmem:[#allocation22_spill] sm:$0xff] %v9472_v14 }
 0x4f0   : > { %3073 = vst.msk [vmem:[#allocation4 + $0x100] sm:$0xff] %vm503_vm3, %v2982_v5  ;;  %5030 = vmatmul.f32.gmra.mxu3 %v4302_v32  ;;  %v3002_v11 = vpop.permute.xlu2 %3001  ;;  %v4323_v5 = vld [vmem:[#allocation4 + $0x328] sm:$0xff] }
 0x4f1   : > { %3072 = vst.msk [vmem:[#allocation4 + $0xc8] sm:$0xff] %vm503_vm3, %v2980_v17  ;;  %v9480_v17 = vld [vmem:[#allocation2 + $0x169] sm:$0xff] }
 0x4f2   : > { %3083 = vst.msk [vmem:[#allocation4 + $0x330] sm:$0xff] %vm503_vm3, %v3002_v11  ;;  %v3127_v11 = vld [vmem:[#allocation2 + $0x183] sm:$0xff] }
 0x4f3   : > { %2901 = vst.msk [vmem:[#allocation4 + $0x560] sm:$0xff] %vm310_vm2, %v9480_v17 }
 0x4f5   : > { %3199 = vrot.lane.b32.xlu1 %v3118_v47, %s7468_s28  ;;  %3197 = vrot.lane.b32.xlu0 %v3117_v34, %s7468_s28  ;;  %v3126_v47 = vld [vmem:[#allocation2 + $0x173] sm:$0xff]  ;;  %v3128_v34 = vld [vmem:[#allocation2 + $0x18b] sm:$0xff] }
 0x4f6   : > { %3201 = vrot.lane.b32.xlu2 %v3119_v57, %s7468_s28  ;;  %v9488_v57 = vld [vmem:[#allocation2 + $0x181] sm:$0xff] }
 0x4f7   : > { %v2988_v15 = vpop.permute.xlu1 %2987  ;;  %v2986_v53 = vpop.permute.xlu0 %2985  ;;  %2903 = vst.msk [vmem:[#allocation4 + $0x5d0] sm:$0xff] %vm310_vm2, %v9488_v57 }
 0x4f8   : > { %3076 = vst.msk [vmem:[#allocation4 + $0x1a8] sm:$0xff] %vm503_vm3, %v2988_v15  ;;  %5033 = vmatmul.f32.gmra.mxu3 %v4309_v33  ;;  %v3008_v16 = vpop.permute.xlu2 %3007  ;;  %v9490_v15 = vld [vmem:[#allocation2 + $0x199] sm:$0xff] }
 0x4f9   : > { %3075 = vst.msk [vmem:[#allocation4 + $0x170] sm:$0xff] %vm503_vm3, %v2986_v53 }
 0x4fa   : > { %3086 = vst.msk [vmem:[#allocation4 + $0x3d8] sm:$0xff] %vm503_vm3, %v3008_v16  ;;  %v4330_v16 = vld [vmem:[#allocation4 + $0x360] sm:$0xff] }
 0x4fb   : > { %2905 = vst.msk [vmem:[#allocation4 + $0x640] sm:$0xff] %vm310_vm2, %v9490_v15 }
 0x4fd   : > { %3205 = vrot.lane.b32.xlu1 %v3121_v39, %s7468_s28  ;;  %3203 = vrot.lane.b32.xlu0 %v3120_v20, %s7468_s28  ;;  %v9497_v39 = vpop.f32.mrf.mxu3  ;;  %v9500_v20 = vld [vmem:[#allocation2 + $0x189] sm:$0xff] }
 0x4fe   : > { %3207 = vrot.lane.b32.xlu2 %v3122_v28, %s7468_s28  ;;  %11478 = vst [vmem:[#allocation23_spill] sm:$0xff] %v9497_v39 }
 0x4ff   : > { %v2994_v0 = vpop.permute.xlu1 %2993  ;;  %v2992_v44 = vpop.permute.xlu0 %2991  ;;  %2904 = vst.msk [vmem:[#allocation4 + $0x608] sm:$0xff] %vm310_vm2, %v9500_v20 }
 0x500   : > { %3079 = vst.msk [vmem:[#allocation4 + $0x250] sm:$0xff] %vm503_vm3, %v2994_v0  ;;  %5036 = vmatmul.f32.gmra.mxu3 %v4316_v18  ;;  %v3014_v58 = vpop.permute.xlu2 %3013  ;;  %v3130_v0 = vld [vmem:[#allocation2 + $0x1a3] sm:$0xff]  ;;  %v3131_v18 = vld [vmem:[#allocation2 + $0x1b3] sm:$0xff] }
 0x501   : > { %3078 = vst.msk [vmem:[#allocation4 + $0x218] sm:$0xff] %vm503_vm3, %v2992_v44  ;;  %v3129_v44 = vld [vmem:[#allocation2 + $0x19b] sm:$0xff] }
 0x502   : > { %3089 = vst.msk [vmem:[#allocation4 + $0x480] sm:$0xff] %vm503_vm3, %v3014_v58  ;;  %v9508_v58 = vld [vmem:[#allocation2 + $0x1a1] sm:$0xff] }
 0x503   : > { %2906 = vst.msk [vmem:[#allocation4 + $0x678] sm:$0xff] %vm310_vm2, %v9508_v58 }
 0x505   : > { %3211 = vrot.lane.b32.xlu1 %v3124_v27, %s7468_s28  ;;  %3209 = vrot.lane.b32.xlu0 %v3123_v61, %s7468_s28  ;;  %v9510_v27 = vld [vmem:[#allocation2 + $0x1b9] sm:$0xff] }
 0x506   : > { %3213 = vrot.lane.b32.xlu2 %v3125_v22, %s7468_s28  ;;  %2908 = vst.msk [vmem:[#allocation4 + $0x6e8] sm:$0xff] %vm310_vm2, %v9510_v27 }
 0x507   : > { %v3000_v48 = vpop.permute.xlu1 %2999  ;;  %v2998_v50 = vpop.permute.xlu0 %2997 }
 0x508   : > { %3082 = vst.msk [vmem:[#allocation4 + $0x2f8] sm:$0xff] %vm503_vm3, %v3000_v48  ;;  %5039 = vmatmul.f32.gmra.mxu3 %v4323_v5  ;;  %v3020_v32 = vpop.permute.xlu2 %3019  ;;  %v4337_v48 = vld [vmem:[#allocation4 + $0x398] sm:$0xff] }
 0x509   : > { %3081 = vst.msk [vmem:[#allocation4 + $0x2c0] sm:$0xff] %vm503_vm3, %v2998_v50  ;;  %v9518_v50 = vld [vmem:[#allocation2 + $0x1b1] sm:$0xff] }
 0x50a   : > { %3092 = vst.msk [vmem:[#allocation4 + $0x528] sm:$0xff] %vm503_vm3, %v3020_v32  ;;  %v9521_v32 = vpop.f32.mrf.mxu3 }
 0x50b   : > { %11479 = vst [vmem:[#allocation24_spill] sm:$0xff] %v9521_v32 }
 0x50c   : > { %2907 = vst.msk [vmem:[#allocation4 + $0x6b0] sm:$0xff] %vm310_vm2, %v9518_v50 }
 0x50d   : > { %3217 = vrot.lane.b32.xlu1 %v3127_v11, %s7468_s28  ;;  %3215 = vrot.lane.b32.xlu0 %v3126_v47, %s7468_s28  ;;  %v3293_v11 = vld [vmem:[#allocation2 + $0x4c] sm:$0xff]  ;;  %v3132_v47 = vld [vmem:[#allocation2 + $0x1bb] sm:$0xff] }
 0x50e   : > { %3219 = vrot.lane.b32.xlu2 %v3128_v34, %s7468_s28  ;;  %v3294_v34 = vld [vmem:[#allocation2 + $0x54] sm:$0xff] }
 0x50f   : > { %v3006_v53 = vpop.permute.xlu1 %3005  ;;  %v3004_v33 = vpop.permute.xlu0 %3003 }
 0x510   : > { %3085 = vst.msk [vmem:[#allocation4 + $0x3a0] sm:$0xff] %vm503_vm3, %v3006_v53  ;;  %5042 = vmatmul.f32.gmra.mxu3 %v4330_v16  ;;  %v3026_v28 = vpop.permute.xlu2 %3025  ;;  %v4344_v16 = vld [vmem:[#allocation4 + $0x3d0] sm:$0xff] }
 0x511   : > { %3084 = vst.msk [vmem:[#allocation4 + $0x368] sm:$0xff] %vm503_vm3, %v3004_v33 }
 0x512   : > { %3095 = vst.msk [vmem:[#allocation4 + $0x5d0] sm:$0xff] %vm503_vm3, %v3026_v28 }
 0x515   : > { %3223 = vrot.lane.b32.xlu1 %v3130_v0, %s7468_s28  ;;  %3221 = vrot.lane.b32.xlu0 %v3129_v44, %s7468_s28  ;;  %v3295_v0 = vld [vmem:[#allocation2 + $0x64] sm:$0xff]  ;;  %v3296_v44 = vld [vmem:[#allocation2 + $0x6c] sm:$0xff] }
 0x516   : > { %3225 = vrot.lane.b32.xlu2 %v3131_v18, %s7468_s28  ;;  %v9532_v18 = vpop.f32.mrf.mxu3 }
 0x517   : > { %v3012_v61 = vpop.permute.xlu1 %3011  ;;  %v3010_v22 = vpop.permute.xlu0 %3009  ;;  %11480 = vst [vmem:[#allocation25_spill] sm:$0xff] %v9532_v18  ;;  %v3943_v18 = vld [vmem:[#allocation2 + $0xcb] sm:$0xff] }
 0x518   : > { %3088 = vst.msk [vmem:[#allocation4 + $0x448] sm:$0xff] %vm503_vm3, %v3012_v61  ;;  %5045 = vmatmul.f32.gmra.mxu3 %v4337_v48  ;;  %v3032_v5 = vpop.permute.xlu2 %3031  ;;  %v3297_v61 = vld [vmem:[#allocation2 + $0x7c] sm:$0xff] }
 0x519   : > { %3087 = vst.msk [vmem:[#allocation4 + $0x410] sm:$0xff] %vm503_vm3, %v3010_v22 }
 0x51a   : > { %3098 = vst.msk [vmem:[#allocation4 + $0x678] sm:$0xff] %vm503_vm3, %v3032_v5  ;;  %v4351_v5 = vld [vmem:[#allocation4 + $0x408] sm:$0xff] }
 0x51d   : > { %3357 = vrot.lane.b32.xlu1 %v3293_v11, %s7469_s29  ;;  %3227 = vrot.lane.b32.xlu0 %v3132_v47, %s7468_s28  ;;  %v3298_v47 = vld [vmem:[#allocation2 + $0x84] sm:$0xff] }
 0x51e   : > { %3359 = vrot.lane.b32.xlu2 %v3294_v34, %s7469_s29  ;;  %v3299_v34 = vld [vmem:[#allocation2 + $0x94] sm:$0xff] }
 0x51f   : > { %v3018_v53 = vpop.permute.xlu1 %3017  ;;  %v3016_v33 = vpop.permute.xlu0 %3015 }
 0x520   : > { %3091 = vst.msk [vmem:[#allocation4 + $0x4f0] sm:$0xff] %vm503_vm3, %v3018_v53  ;;  %5048 = vmatmul.f32.gmra.mxu3 %v4344_v16  ;;  %v3166_v28 = vpop.permute.xlu2 %3165  ;;  %v3300_v53 = vld [vmem:[#allocation2 + $0x9c] sm:$0xff] }
 0x521   : > { %3090 = vst.msk [vmem:[#allocation4 + $0x4b8] sm:$0xff] %vm503_vm3, %v3016_v33  ;;  %v9542_v33 = vpop.f32.mrf.mxu3 }
 0x522   : > { %3261 = vst.msk [vmem:[#allocation4 + $0x20] sm:$0xff] %vm696_vm4, %v3166_v28 }
 0x523   : > { %11481 = vst [vmem:[#allocation26_spill] sm:$0xff] %v9542_v33  ;;  %v3753_v33 = vld [vmem:[#allocation2 + $0xe2] sm:$0xff] }
 0x525   : > { %3361 = vrot.lane.b32.xlu0 %v3295_v0, %s7469_s29  ;;  %3363 = vrot.lane.b32.xlu1 %v3296_v44, %s7469_s29  ;;  %v4358_v0 = vld [vmem:[#allocation4 + $0x440] sm:$0xff] }
 0x526   : > { %3365 = vrot.lane.b32.xlu2 %v3297_v61, %s7469_s29  ;;  %v3301_v61 = vld [vmem:[#allocation2 + $0xac] sm:$0xff] }
 0x527   : > { %v3024_v22 = vpop.permute.xlu1 %3023  ;;  %v3022_v48 = vpop.permute.xlu0 %3021 }
 0x528   : > { %3094 = vst.msk [vmem:[#allocation4 + $0x598] sm:$0xff] %vm503_vm3, %v3024_v22  ;;  %5051 = vmatmul.f32.gmra.mxu3 %v4351_v5  ;;  %v3172_v11 = vpop.permute.xlu2 %3171  ;;  %v3302_v22 = vld [vmem:[#allocation2 + $0xb4] sm:$0xff] }
 0x529   : > { %3093 = vst.msk [vmem:[#allocation4 + $0x560] sm:$0xff] %vm503_vm3, %v3022_v48  ;;  %v3303_v48 = vld [vmem:[#allocation2 + $0xc4] sm:$0xff] }
 0x52a   : > { %3264 = vst.msk [vmem:[#allocation4 + $0xc8] sm:$0xff] %vm696_vm4, %v3172_v11 }
 0x52d   : > { %3367 = vrot.lane.b32.xlu0 %v3298_v47, %s7469_s29  ;;  %3369 = vrot.lane.b32.xlu1 %v3299_v34, %s7469_s29  ;;  %v4365_v47 = vld [vmem:[#allocation4 + $0x478] sm:$0xff]  ;;  %v9551_v34 = vpop.f32.mrf.mxu3 }
 0x52e   : > { %3371 = vrot.lane.b32.xlu2 %v3300_v53, %s7469_s29  ;;  %11482 = vst [vmem:[#allocation27_spill] sm:$0xff] %v9551_v34  ;;  %v3320_v34 = vld [vmem:[#allocation2 + $0x18c] sm:$0xff] }
 0x52f   : > { %v3030_v16 = vpop.permute.xlu1 %3029  ;;  %v3028_v28 = vpop.permute.xlu0 %3027 }
 0x530   : > { %3097 = vst.msk [vmem:[#allocation4 + $0x640] sm:$0xff] %vm503_vm3, %v3030_v16  ;;  %5054 = vmatmul.f32.gmra.mxu3 %v4358_v0  ;;  %v3178_v44 = vpop.permute.xlu2 %3177  ;;  %v3304_v16 = vld [vmem:[#allocation2 + $0xcc] sm:$0xff]  ;;  %v3306_v0 = vld [vmem:[#allocation2 + $0xe4] sm:$0xff] }
 0x531   : > { %3096 = vst.msk [vmem:[#allocation4 + $0x608] sm:$0xff] %vm503_vm3, %v3028_v28  ;;  %v3305_v28 = vld [vmem:[#allocation2 + $0xdc] sm:$0xff] }
 0x532   : > { %3267 = vst.msk [vmem:[#allocation4 + $0x170] sm:$0xff] %vm696_vm4, %v3178_v44 }
 0x535   : > { %3373 = vrot.lane.b32.xlu0 %v3301_v61, %s7469_s29  ;;  %3375 = vrot.lane.b32.xlu1 %v3302_v22, %s7469_s29  ;;  %v4372_v22 = vld [vmem:[#allocation4 + $0x4b0] sm:$0xff] }
 0x536   : > { %3377 = vrot.lane.b32.xlu2 %v3303_v48, %s7469_s29 }
 0x537   : > { %v3036_v5 = vpop.permute.xlu1 %3035  ;;  %v3034_v11 = vpop.permute.xlu0 %3033 }
 0x538   : > { %3100 = vst.msk [vmem:[#allocation4 + $0x6e8] sm:$0xff] %vm503_vm3, %v3036_v5  ;;  %5057 = vmatmul.f32.gmra.mxu3 %v4365_v47  ;;  %v3184_v53 = vpop.permute.xlu2 %3183  ;;  %v9561_v5 = vpop.f32.mrf.mxu3  ;;  %v3308_v47 = vld [vmem:[#allocation2 + $0xfc] sm:$0xff] }
 0x539   : > { %3099 = vst.msk [vmem:[#allocation4 + $0x6b0] sm:$0xff] %vm503_vm3, %v3034_v11  ;;  %v3307_v11 = vld [vmem:[#allocation2 + $0xf4] sm:$0xff] }
 0x53a   : > { %3270 = vst.msk [vmem:[#allocation4 + $0x218] sm:$0xff] %vm696_vm4, %v3184_v53  ;;  %v3309_v53 = vld [vmem:[#allocation2 + $0x10c] sm:$0xff] }
 0x53b   : > { %11483 = vst [vmem:[#allocation28_spill] sm:$0xff] %v9561_v5 }
 0x53d   : > { %3379 = vrot.lane.b32.xlu0 %v3304_v16, %s7469_s29  ;;  %3381 = vrot.lane.b32.xlu1 %v3305_v28, %s7469_s29 }
 0x53e   : > { %3383 = vrot.lane.b32.xlu2 %v3306_v0, %s7469_s29  ;;  %v4379_v0 = vld [vmem:[#allocation4 + $0x4e8] sm:$0xff] }
 0x53f   : > { %v3170_v44 = vpop.permute.xlu1 %3169  ;;  %v3168_v61 = vpop.permute.xlu0 %3167 }
 0x540   : > { %3263 = vst.msk [vmem:[#allocation4 + $0x90] sm:$0xff] %vm696_vm4, %v3170_v44  ;;  %5060 = vmatmul.f32.gmra.mxu3 %v4372_v22  ;;  %v3190_v48 = vpop.permute.xlu2 %3189  ;;  %v3310_v22 = vld [vmem:[#allocation2 + $0x114] sm:$0xff] }
 0x541   : > { %3262 = vst.msk [vmem:[#allocation4 + $0x58] sm:$0xff] %vm696_vm4, %v3168_v61  ;;  %v9569_v61 = vpop.f32.mrf.mxu3 }
 0x542   : > { %3273 = vst.msk [vmem:[#allocation4 + $0x2c0] sm:$0xff] %vm696_vm4, %v3190_v48  ;;  %v3311_v48 = vld [vmem:[#allocation2 + $0x124] sm:$0xff] }
 0x545   : > { %3385 = vrot.lane.b32.xlu0 %v3307_v11, %s7469_s29  ;;  %3387 = vrot.lane.b32.xlu1 %v3308_v47, %s7469_s29  ;;  %v3312_v11 = vld [vmem:[#allocation2 + $0x12c] sm:$0xff] }
 0x546   : > { %3389 = vrot.lane.b32.xlu2 %v3309_v53, %s7469_s29  ;;  %v4386_v53 = vld [vmem:[#allocation4 + $0x520] sm:$0xff] }
 0x547   : > { %v3176_v16 = vpop.permute.xlu1 %3175  ;;  %v3174_v28 = vpop.permute.xlu0 %3173 }
 0x548   : > { %3266 = vst.msk [vmem:[#allocation4 + $0x138] sm:$0xff] %vm696_vm4, %v3176_v16  ;;  %5063 = vmatmul.f32.gmra.mxu3 %v4379_v0  ;;  %v3196_v44 = vpop.permute.xlu2 %3195  ;;  %v3314_v0 = vld [vmem:[#allocation2 + $0x144] sm:$0xff] }
 0x549   : > { %3265 = vst.msk [vmem:[#allocation4 + $0x100] sm:$0xff] %vm696_vm4, %v3174_v28  ;;  %v3313_v28 = vld [vmem:[#allocation2 + $0x13c] sm:$0xff] }
 0x54a   : > { %3276 = vst.msk [vmem:[#allocation4 + $0x368] sm:$0xff] %vm696_vm4, %v3196_v44  ;;  %v9578_v44 = vpop.f32.mrf.mxu3 }
 0x54d   : > { %3391 = vrot.lane.b32.xlu0 %v3310_v22, %s7469_s29  ;;  %3393 = vrot.lane.b32.xlu1 %v3311_v48, %s7469_s29  ;;  %v3315_v22 = vld [vmem:[#allocation2 + $0x154] sm:$0xff] }
 0x54e   : > { %3395 = vrot.lane.b32.xlu2 %v3312_v11, %s7469_s29  ;;  %v4393_v11 = vld [vmem:[#allocation4 + $0x558] sm:$0xff] }
 0x54f   : > { %v3182_v47 = vpop.permute.xlu1 %3181  ;;  %v3180_v5 = vpop.permute.xlu0 %3179 }
 0x550   : > { %3269 = vst.msk [vmem:[#allocation4 + $0x1e0] sm:$0xff] %vm696_vm4, %v3182_v47  ;;  %5066 = vmatmul.f32.gmra.mxu3 %v4386_v53  ;;  %v3202_v16 = vpop.permute.xlu2 %3201  ;;  %v4525_v47 = vld [vmem:[%s11424_s1 + $0x278] sm:$0xff] }
 0x551   : > { %3268 = vst.msk [vmem:[#allocation4 + $0x1a8] sm:$0xff] %vm696_vm4, %v3180_v5  ;;  %v3316_v53 = vld [vmem:[#allocation2 + $0x15c] sm:$0xff]  ;;  %5094 = vmatpush.msrb.mxu0 %v4525_v47 }
 0x552   : > { %3279 = vst.msk [vmem:[#allocation4 + $0x410] sm:$0xff] %vm696_vm4, %v3202_v16  ;;  %v3317_v16 = vld [vmem:[#allocation2 + $0x16c] sm:$0xff] }
 0x555   : > { %3397 = vrot.lane.b32.xlu0 %v3313_v28, %s7469_s29  ;;  %3399 = vrot.lane.b32.xlu1 %v3314_v0, %s7469_s29  ;;  %v4524_v28 = vld [vmem:[%s11424_s1 + $0x270] sm:$0xff]  ;;  %v9592_v0 = vpop.f32.mrf.mxu0 }
 0x556   : > { %3401 = vrot.lane.b32.xlu2 %v3315_v22, %s7469_s29  ;;  %5095 = vmatpush.msrb.mxu0 %v4524_v28  ;;  %v3318_v22 = vld [vmem:[#allocation2 + $0x174] sm:$0xff] }
 0x557   : > { %v3188_v48 = vpop.permute.xlu1 %3187  ;;  %v3186_v45 = vpop.permute.xlu0 %3185 }
 0x558   : > { %3272 = vst.msk [vmem:[#allocation4 + $0x288] sm:$0xff] %vm696_vm4, %v3188_v48  ;;  %5069 = vmatmul.f32.gmra.mxu3 %v4393_v11  ;;  %v3208_v5 = vpop.permute.xlu2 %3207  ;;  %v4523_v48 = vld [vmem:[%s11424_s1 + $0x268] sm:$0xff]  ;;  %v4522_v11 = vld [vmem:[%s11424_s1 + $0x260] sm:$0xff] }
 0x559   : > { %3271 = vst.msk [vmem:[#allocation4 + $0x250] sm:$0xff] %vm696_vm4, %v3186_v45  ;;  %v4545_v45 = vld [vmem:[%s11424_s1 + $0x318] sm:$0xff]  ;;  %5096 = vmatpush.msrb.mxu0 %v4523_v48  ;;  %v3319_v48 = vld [vmem:[#allocation2 + $0x184] sm:$0xff] }
 0x55a   : > { %3282 = vst.msk [vmem:[#allocation4 + $0x4b8] sm:$0xff] %vm696_vm4, %v3208_v5  ;;  %v9605_v5 = vpop.f32.mrf.mxu3  ;;  %5332 = vmatpush.msrb.mxu2 %v4545_v45  ;;  %v4521_v45 = vld [vmem:[%s11424_s1 + $0x258] sm:$0xff] }
 0x55b   : > { %5097 = vmatpush.msrb.mxu0 %v4522_v11  ;;  %v4519_v11 = vld [vmem:[%s11424_s1 + $0x248] sm:$0xff] }
 0x55d   : > { %3403 = vrot.lane.b32.xlu0 %v3316_v53, %s7469_s29  ;;  %3405 = vrot.lane.b32.xlu1 %v3317_v16, %s7469_s29  ;;  %v4541_v16 = vld [vmem:[%s11424_s1 + $0x2f8] sm:$0xff] }
 0x55e   : > { %3407 = vrot.lane.b32.xlu2 %v3318_v22, %s7469_s29  ;;  %5207 = vmatpush.msrb.mxu1 %v4541_v16  ;;  %v3321_v22 = vld [vmem:[#allocation2 + $0x19c] sm:$0xff] }
 0x55f   : > { %v3194_v47 = vpop.permute.xlu1 %3193  ;;  %v3192_v28 = vpop.permute.xlu0 %3191  ;;  %5098 = vmatpush.msrb.mxu0 %v4521_v45  ;;  %v4407_v45 = vld [vmem:[#allocation4 + $0x5c8] sm:$0xff] }
 0x560   : > { %3275 = vst.msk [vmem:[#allocation4 + $0x330] sm:$0xff] %vm696_vm4, %v3194_v47  ;;  %5072 = vmatmul.f32.gmra.mxu3 %v4400_v43  ;;  %v3214_v53 = vpop.permute.xlu2 %3213  ;;  %v4520_v43 = vld [vmem:[%s11424_s1 + $0x250] sm:$0xff]  ;;  %v4518_v47 = vld [vmem:[%s11424_s1 + $0x240] sm:$0xff] }
 0x561   : > { %3274 = vst.msk [vmem:[#allocation4 + $0x2f8] sm:$0xff] %vm696_vm4, %v3192_v28  ;;  %5099 = vmatpush.msrb.mxu0 %v4520_v43  ;;  %v9628_v28 = vpop.f32.mrf.mxu0 }
 0x562   : > { %3285 = vst.msk [vmem:[#allocation4 + $0x560] sm:$0xff] %vm696_vm4, %v3214_v53  ;;  %v9631_v43 = vpop.f32.mrf.mxu3 }
 0x563   : > { %5100 = vmatpush.msrb.mxu0 %v4519_v11  ;;  %v3323_v11 = vld [vmem:[#allocation2 + $0x1b4] sm:$0xff] }
 0x565   : > { %3409 = vrot.lane.b32.xlu0 %v3319_v48, %s7469_s29  ;;  %3411 = vrot.lane.b32.xlu1 %v3320_v34, %s7469_s29  ;;  %v4517_v48 = vld [vmem:[%s11424_s1 + $0x238] sm:$0xff] }
 0x566   : > { %3413 = vrot.lane.b32.xlu2 %v3321_v22, %s7469_s29  ;;  %5101 = vmatpush.msrb.mxu0 %v4518_v47  ;;  %v4516_v22 = vld [vmem:[%s11424_s1 + $0x230] sm:$0xff] }
 0x567   : > { %v3200_v53 = vpop.permute.xlu1 %3199  ;;  %v3198_v16 = vpop.permute.xlu0 %3197  ;;  %v4540_v47 = vld [vmem:[%s11424_s1 + $0x2f0] sm:$0xff] }
 0x568   : > { %3278 = vst.msk [vmem:[#allocation4 + $0x3d8] sm:$0xff] %vm696_vm4, %v3200_v53  ;;  %5075 = vmatmul.f32.gmra.mxu3 %v4407_v45  ;;  %v3220_v34 = vpop.permute.xlu2 %3219  ;;  %5102 = vmatpush.msrb.mxu0 %v4517_v48  ;;  %v3324_v53 = vld [vmem:[#allocation2 + $0x1bc] sm:$0xff] }
 0x569   : > { %3277 = vst.msk [vmem:[#allocation4 + $0x3a0] sm:$0xff] %vm696_vm4, %v3198_v16  ;;  %v4515_v16 = vld [vmem:[%s11424_s1 + $0x228] sm:$0xff]  ;;  %v4514_v45 = vld [vmem:[%s11424_s1 + $0x220] sm:$0xff]  ;;  %5208 = vmatpush.msrb.mxu1 %v4540_v47  ;;  %v9654_v8 = vpop.f32.mrf.mxu0 }
 0x56a   : > { %3288 = vst.msk [vmem:[#allocation4 + $0x608] sm:$0xff] %vm696_vm4, %v3220_v34  ;;  %5103 = vmatpush.msrb.mxu0 %v4516_v22  ;;  %v4414_v22 = vld [vmem:[#allocation4 + $0x600] sm:$0xff]  ;;  %v9661_v47 = vpop.f32.mrf.mxu3 }
 0x56c   : > { %5104 = vmatpush.msrb.mxu0 %v4515_v16  ;;  %v4511_v16 = vld [vmem:[%s11424_s1 + $0x208] sm:$0xff] }
 0x56d   : > { %3415 = vrot.lane.b32.xlu0 %v3322_v40, %s7469_s29  ;;  %3417 = vrot.lane.b32.xlu1 %v3323_v11, %s7469_s29  ;;  %v4513_v11 = vld [vmem:[%s11424_s1 + $0x218] sm:$0xff] }
 0x56e   : > { %3419 = vrot.lane.b32.xlu2 %v3324_v53, %s7469_s29  ;;  %5105 = vmatpush.msrb.mxu0 %v4514_v45  ;;  %v4512_v53 = vld [vmem:[%s11424_s1 + $0x210] sm:$0xff]  ;;  %v4510_v45 = vld [vmem:[%s11424_s1 + $0x200] sm:$0xff] }
 0x56f   : > { %v3206_v34 = vpop.permute.xlu1 %3205  ;;  %v3204_v48 = vpop.permute.xlu0 %3203 }
 0x570   : > { %3281 = vst.msk [vmem:[#allocation4 + $0x480] sm:$0xff] %vm696_vm4, %v3206_v34  ;;  %5078 = vmatmul.f32.gmra.mxu3 %v4414_v22  ;;  %v3226_v40 = vpop.permute.xlu2 %3225  ;;  %5106 = vmatpush.msrb.mxu0 %v4513_v11  ;;  %v4421_v22 = vld [vmem:[#allocation4 + $0x638] sm:$0xff] }
 0x571   : > { %3280 = vst.msk [vmem:[#allocation4 + $0x448] sm:$0xff] %vm696_vm4, %v3204_v48 }
 0x572   : > { %3291 = vst.msk [vmem:[#allocation4 + $0x6b0] sm:$0xff] %vm696_vm4, %v3226_v40  ;;  %5107 = vmatpush.msrb.mxu0 %v4512_v53  ;;  %v9684_v40 = vpop.f32.mrf.mxu0  ;;  %v9687_v11 = vpop.f32.mrf.mxu3 }
 0x574   : > { %5108 = vmatpush.msrb.mxu0 %v4511_v16  ;;  %v4428_v16 = vld [vmem:[#allocation4 + $0x670] sm:$0xff] }
 0x575   : > { %3614 = vrot.lane.b32.xlu0 %v9332_v26, %s7467_s27  ;;  %3616 = vrot.lane.b32.xlu1 %v9342_v13, %s7467_s27  ;;  %v4539_v26 = vld [vmem:[%s11424_s1 + $0x2e8] sm:$0xff] }
 0x576   : > { %3618 = vrot.lane.b32.xlu2 %v9334_v56, %s7467_s27  ;;  %5109 = vmatpush.msrb.mxu0 %v4510_v45 }
 0x577   : > { %v3212_v34 = vpop.permute.xlu1 %3211  ;;  %v3210_v48 = vpop.permute.xlu0 %3209  ;;  %5209 = vmatpush.msrb.mxu1 %v4539_v26 }
 0x578   : > { %3284 = vst.msk [vmem:[#allocation4 + $0x528] sm:$0xff] %vm696_vm4, %v3212_v34  ;;  %5081 = vmatmul.f32.gmra.mxu3 %v4421_v22  ;;  %v3360_v13 = vpop.permute.xlu2 %3359  ;;  %v4435_v22 = vld [vmem:[#allocation4 + $0x6a8] sm:$0xff] }
 0x579   : > { %3283 = vst.msk [vmem:[#allocation4 + $0x4f0] sm:$0xff] %vm696_vm4, %v3210_v48 }
 0x57a   : > { %3454 = vst.msk [vmem:[#allocation4 + $0x58] sm:$0xff] %vm889_vm5, %v3360_v13  ;;  %v9698_v34 = vpop.f32.mrf.mxu0 }
 0x57d   : > { %3620 = vrot.lane.b32.xlu0 %v9350_v19, %s7467_s27  ;;  %3622 = vrot.lane.b32.xlu1 %v9362_v7, %s7467_s27  ;;  %v4538_v19 = vld [vmem:[%s11424_s1 + $0x2e0] sm:$0xff] }
 0x57e   : > { %3624 = vrot.lane.b32.xlu2 %v9352_v10, %s7467_s27  ;;  %v9707_v10 = vpop.f32.mrf.mxu3  ;;  %5210 = vmatpush.msrb.mxu1 %v4538_v19 }
 0x57f   : > { %v3218_v56 = vpop.permute.xlu1 %3217  ;;  %v3216_v53 = vpop.permute.xlu0 %3215 }
 0x580   : > { %3287 = vst.msk [vmem:[#allocation4 + $0x5d0] sm:$0xff] %vm696_vm4, %v3218_v56  ;;  %5084 = vmatmul.f32.gmra.mxu3 %v4428_v16  ;;  %v3366_v45 = vpop.permute.xlu2 %3365  ;;  %v4442_v56 = vld [vmem:[#allocation4 + $0x6e0] sm:$0xff] }
 0x581   : > { %3286 = vst.msk [vmem:[#allocation4 + $0x598] sm:$0xff] %vm696_vm4, %v3216_v53 }
 0x582   : > { %3457 = vst.msk [vmem:[#allocation4 + $0x100] sm:$0xff] %vm889_vm5, %v3366_v45 }
 0x585   : > { %3626 = vrot.lane.b32.xlu0 %v9370_v38, %s7467_s27  ;;  %3628 = vrot.lane.b32.xlu1 %v9382_v31, %s7467_s27  ;;  %v4544_v38 = vld [vmem:[%s11424_s1 + $0x310] sm:$0xff]  ;;  %v9721_v31 = vpop.f32.mrf.mxu0 }
 0x586   : > { %3630 = vrot.lane.b32.xlu2 %v9372_v42, %s7467_s27  ;;  %5333 = vmatpush.msrb.mxu2 %v4544_v38  ;;  %v9725_v53 = vpop.f32.mrf.mxu3 }
 0x587   : > { %v3224_v7 = vpop.permute.xlu1 %3223  ;;  %v3222_v48 = vpop.permute.xlu0 %3221 }
 0x588   : > { %3290 = vst.msk [vmem:[#allocation4 + $0x678] sm:$0xff] %vm696_vm4, %v3224_v7  ;;  %5087 = vmatmul.f32.gmra.mxu3 %v4435_v22  ;;  %v3372_v26 = vpop.permute.xlu2 %3371 }
 0x589   : > { %3289 = vst.msk [vmem:[#allocation4 + $0x640] sm:$0xff] %vm696_vm4, %v3222_v48 }
 0x58a   : > { %3460 = vst.msk [vmem:[#allocation4 + $0x1a8] sm:$0xff] %vm889_vm5, %v3372_v26 }
 0x58d   : > { %3632 = vrot.lane.b32.xlu0 %v9390_v21, %s7467_s27  ;;  %3634 = vrot.lane.b32.xlu1 %v9400_v1, %s7467_s27  ;;  %v4537_v21 = vld [vmem:[%s11424_s1 + $0x2d8] sm:$0xff]  ;;  %v9739_v19 = vpop.f32.mrf.mxu0 }
 0x58e   : > { %3636 = vrot.lane.b32.xlu2 %v9392_v25, %s7467_s27  ;;  %5211 = vmatpush.msrb.mxu1 %v4537_v21  ;;  %v9780_v21 = vpop.f32.mrf.mxu2 }
 0x58f   : > { %v3358_v42 = vpop.permute.xlu1 %3357  ;;  %v3228_v13 = vpop.permute.xlu0 %3227 }
 0x590   : > { %3453 = vst.msk [vmem:[#allocation4 + $0x20] sm:$0xff] %vm889_vm5, %v3358_v42  ;;  %5090 = vmatmul.f32.gmra.mxu3 %v4442_v56  ;;  %v3378_v1 = vpop.permute.xlu2 %3377 }
 0x591   : > { %3292 = vst.msk [vmem:[#allocation4 + $0x6e8] sm:$0xff] %vm696_vm4, %v3228_v13 }
 0x592   : > { %3463 = vst.msk [vmem:[#allocation4 + $0x250] sm:$0xff] %vm889_vm5, %v3378_v1  ;;  %v4254_v1 = vld [vmem:[#allocation4 + $0x100] sm:$0xff] }
 0x595   : > { %3638 = vrot.lane.b32.xlu0 %v9410_v23, %s7467_s27  ;;  %3640 = vrot.lane.b32.xlu1 %v9420_v3, %s7467_s27  ;;  %v4536_v23 = vld [vmem:[%s11424_s1 + $0x2d0] sm:$0xff]  ;;  %v4233_v3 = vld [vmem:[#allocation4 + $0x58] sm:$0xff]  ;;  %v9755_v26 = vpop.f32.mrf.mxu0 }
 0x596   : > { %3642 = vrot.lane.b32.xlu2 %v9412_v35, %s7467_s27  ;;  %5212 = vmatpush.msrb.mxu1 %v4536_v23 }
 0x597   : > { %v3362_v25 = vpop.permute.xlu0 %3361  ;;  %v4226_v16 = vld [vmem:[#allocation4 + $0x20] sm:$0xff]  ;;  %v3364_v45 = vpop.permute.xlu1 %3363 }
 0x598   : > { %3455 = vst.msk [vmem:[#allocation4 + $0x90] sm:$0xff] %vm889_vm5, %v3362_v25  ;;  %5110 = vmatmul.f32.vlgmr.msrb.gmra.mxu0 %v4226_v16  ;;  %v3384_v7 = vpop.permute.xlu2 %3383 }
 0x599   : > { %3456 = vst.msk [vmem:[#allocation4 + $0xc8] sm:$0xff] %vm889_vm5, %v3364_v45  ;;  %v3742_v45 = vld [vmem:[#allocation2 + $0x62] sm:$0xff] }
 0x59a   : > { %3466 = vst.msk [vmem:[#allocation4 + $0x2f8] sm:$0xff] %vm889_vm5, %v3384_v7 }
 0x59d   : > { %3644 = vrot.lane.b32.xlu0 %v9430_v49, %s7467_s27  ;;  %3646 = vrot.lane.b32.xlu1 %v9440_v63, %s7467_s27 }
 0x59e   : > { %3648 = vrot.lane.b32.xlu2 %v9432_v12, %s7467_s27  ;;  %v4535_v12 = vld [vmem:[%s11424_s1 + $0x2c8] sm:$0xff] }
 0x59f   : > { %v3368_v35 = vpop.permute.xlu0 %3367  ;;  %v3370_v48 = vpop.permute.xlu1 %3369  ;;  %v4240_v63 = vld [vmem:[#allocation4 + $0x90] sm:$0xff]  ;;  %5213 = vmatpush.msrb.mxu1 %v4535_v12 }
 0x5a0   : > { %3458 = vst.msk [vmem:[#allocation4 + $0x138] sm:$0xff] %vm889_vm5, %v3368_v35  ;;  %5113 = vmatmul.f32.gmra.mxu0 %v4233_v3  ;;  %v3390_v22 = vpop.permute.xlu2 %3389  ;;  %v4533_v35 = vld [vmem:[%s11424_s1 + $0x2b8] sm:$0xff] }
 0x5a1   : > { %3459 = vst.msk [vmem:[#allocation4 + $0x170] sm:$0xff] %vm889_vm5, %v3370_v48  ;;  %v3743_v48 = vld [vmem:[#allocation2 + $0x6a] sm:$0xff] }
 0x5a2   : > { %3469 = vst.msk [vmem:[#allocation4 + $0x3a0] sm:$0xff] %vm889_vm5, %v3390_v22  ;;  %v3486_v22 = vld [vmem:[#allocation2 + $0x60] sm:$0xff] }
 0x5a3   : > { %3518 = vst.msk [vmem:[#allocation4 + $0x28] sm:$0xff] %vm310_vm2, %v3486_v22  ;;  %v3490_v22 = vld [vmem:[#allocation2 + $0x90] sm:$0xff] }
 0x5a4   : > { %3522 = vst.msk [vmem:[#allocation4 + $0x108] sm:$0xff] %vm310_vm2, %v3490_v22 }
 0x5a5   : > { %3650 = vrot.lane.b32.xlu0 %v9450_v29, %s7467_s27  ;;  %3652 = vrot.lane.b32.xlu1 %v9460_v51, %s7467_s27  ;;  %v9770_v29 = vpop.f32.mrf.mxu0  ;;  %v4247_v51 = vld [vmem:[#allocation4 + $0xc8] sm:$0xff] }
 0x5a6   : > { %3654 = vrot.lane.b32.xlu2 %v9452_v9, %s7467_s27 }
 0x5a7   : > { %v3374_v49 = vpop.permute.xlu0 %3373  ;;  %v3376_v38 = vpop.permute.xlu1 %3375  ;;  %v4261_v7 = vld [vmem:[#allocation4 + $0x138] sm:$0xff] }
 0x5a8   : > { %3461 = vst.msk [vmem:[#allocation4 + $0x1e0] sm:$0xff] %vm889_vm5, %v3374_v49  ;;  %5116 = vmatmul.f32.gmra.mxu0 %v4240_v63  ;;  %v3396_v42 = vpop.permute.xlu2 %3395 }
 0x5a9   : > { %3462 = vst.msk [vmem:[#allocation4 + $0x218] sm:$0xff] %vm889_vm5, %v3376_v38  ;;  %v4268_v38 = vld [vmem:[#allocation4 + $0x170] sm:$0xff] }
 0x5aa   : > { %3472 = vst.msk [vmem:[#allocation4 + $0x448] sm:$0xff] %vm889_vm5, %v3396_v42 }
 0x5ad   : > { %3656 = vrot.lane.b32.xlu0 %v9468_v59, %s7467_s27  ;;  %3658 = vrot.lane.b32.xlu1 %v9480_v17, %s7467_s27  ;;  %v4534_v59 = vld [vmem:[%s11424_s1 + $0x2c0] sm:$0xff] }
 0x5ae   : > { %3660 = vrot.lane.b32.xlu2 %v9470_v60, %s7467_s27  ;;  %v9790_v60 = vpop.f32.mrf.mxu0  ;;  %5214 = vmatpush.msrb.mxu1 %v4534_v59  ;;  %v3488_v59 = vld [vmem:[#allocation2 + $0x78] sm:$0xff] }
 0x5af   : > { %v3380_v9 = vpop.permute.xlu0 %3379  ;;  %v3382_v13 = vpop.permute.xlu1 %3381  ;;  %3520 = vst.msk [vmem:[#allocation4 + $0x98] sm:$0xff] %vm310_vm2, %v3488_v59  ;;  %v3746_v59 = vld [vmem:[#allocation2 + $0x92] sm:$0xff] }
 0x5b0   : > { %3464 = vst.msk [vmem:[#allocation4 + $0x288] sm:$0xff] %vm889_vm5, %v3380_v9  ;;  %5119 = vmatmul.f32.gmra.mxu0 %v4247_v51  ;;  %v3402_v56 = vpop.permute.xlu2 %3401  ;;  %5215 = vmatpush.msrb.mxu1 %v4533_v35  ;;  %v3935_v51 = vld [vmem:[#allocation2 + $0x6b] sm:$0xff] }
 0x5b1   : > { %3465 = vst.msk [vmem:[#allocation4 + $0x2c0] sm:$0xff] %vm889_vm5, %v3382_v13  ;;  %v4532_v13 = vld [vmem:[%s11424_s1 + $0x2b0] sm:$0xff] }
 0x5b2   : > { %3475 = vst.msk [vmem:[#allocation4 + $0x4f0] sm:$0xff] %vm889_vm5, %v3402_v56  ;;  %v3936_v56 = vld [vmem:[#allocation2 + $0x7b] sm:$0xff]  ;;  %5216 = vmatpush.msrb.mxu1 %v4532_v13  ;;  %v3580_v35 = vld [vmem:[#allocation2 + $0x1c9] sm:$0xff] }
 0x5b5   : > { %3662 = vrot.lane.b32.xlu0 %v9488_v57, %s7467_s27  ;;  %3664 = vrot.lane.b32.xlu1 %v9500_v20, %s7467_s27  ;;  %v9797_v57 = vpop.f32.mrf.mxu2  ;;  %v4543_v20 = vld [vmem:[%s11424_s1 + $0x308] sm:$0xff] }
 0x5b6   : > { %3666 = vrot.lane.b32.xlu2 %v9490_v15, %s7467_s27  ;;  %5334 = vmatpush.msrb.mxu2 %v4543_v20  ;;  %v9807_v3 = vpop.f32.mrf.mxu0 }
 0x5b7   : > { %v3386_v17 = vpop.permute.xlu0 %3385  ;;  %v3388_v25 = vpop.permute.xlu1 %3387 }
 0x5b8   : > { %3467 = vst.msk [vmem:[#allocation4 + $0x330] sm:$0xff] %vm889_vm5, %v3386_v17  ;;  %5122 = vmatmul.f32.gmra.mxu0 %v4254_v1  ;;  %v3408_v16 = vpop.permute.xlu2 %3407  ;;  %v3487_v17 = vld [vmem:[#allocation2 + $0x68] sm:$0xff]  ;;  %v9832_v1 = vpop.f32.mrf.mxu1 }
 0x5b9   : > { %3468 = vst.msk [vmem:[#allocation4 + $0x368] sm:$0xff] %vm889_vm5, %v3388_v25 }
 0x5ba   : > { %3478 = vst.msk [vmem:[#allocation4 + $0x598] sm:$0xff] %vm889_vm5, %v3408_v16  ;;  %v4275_v16 = vld [vmem:[#allocation4 + $0x1a8] sm:$0xff] }
 0x5bb   : > { %3519 = vst.msk [vmem:[#allocation4 + $0x60] sm:$0xff] %vm310_vm2, %v3487_v17  ;;  %v3581_v17 = vld [vmem:[#allocation2 + $0x1d1] sm:$0xff] }
 0x5bd   : > { %3668 = vrot.lane.b32.xlu0 %v9508_v58, %s7467_s27  ;;  %3670 = vrot.lane.b32.xlu1 %v9518_v50, %s7467_s27  ;;  %v3934_v50 = vld [vmem:[#allocation2 + $0x63] sm:$0xff]  ;;  %v9818_v49 = vpop.f32.mrf.mxu2 }
 0x5be   : > { %3806 = vrot.lane.b32.xlu2 %v3742_v45, %s7468_s28  ;;  %v9824_v9 = vpop.f32.mrf.mxu0 }
 0x5bf   : > { %v3392_v15 = vpop.permute.xlu0 %3391  ;;  %v3394_v23 = vpop.permute.xlu1 %3393 }
 0x5c0   : > { %3470 = vst.msk [vmem:[#allocation4 + $0x3d8] sm:$0xff] %vm889_vm5, %v3392_v15  ;;  %5125 = vmatmul.f32.gmra.mxu0 %v4261_v7  ;;  %v3414_v58 = vpop.permute.xlu2 %3413  ;;  %v3489_v15 = vld [vmem:[#allocation2 + $0x80] sm:$0xff] }
 0x5c1   : > { %3471 = vst.msk [vmem:[#allocation4 + $0x410] sm:$0xff] %vm889_vm5, %v3394_v23  ;;  %v3745_v23 = vld [vmem:[#allocation2 + $0x82] sm:$0xff] }
 0x5c2   : > { %3481 = vst.msk [vmem:[#allocation4 + $0x640] sm:$0xff] %vm889_vm5, %v3414_v58 }
 0x5c3   : > { %3521 = vst.msk [vmem:[#allocation4 + $0xd0] sm:$0xff] %vm310_vm2, %v3489_v15 }
 0x5c5   : > { %3998 = vrot.lane.b32.xlu0 %v3934_v50, %s7469_s29  ;;  %3672 = vrot.lane.b32.xlu1 %v9510_v27, %s7467_s27  ;;  %v3744_v27 = vld [vmem:[#allocation2 + $0x7a] sm:$0xff]  ;;  %v9837_v45 = vpop.f32.mrf.mxu2  ;;  %v3937_v50 = vld [vmem:[#allocation2 + $0x83] sm:$0xff] }
 0x5c6   : > { %3808 = vrot.lane.b32.xlu2 %v3743_v48, %s7468_s28  ;;  %v9843_v58 = vpop.f32.mrf.mxu0  ;;  %v3491_v48 = vld [vmem:[#allocation2 + $0x98] sm:$0xff] }
 0x5c7   : > { %v3398_v63 = vpop.permute.xlu0 %3397  ;;  %v3400_v12 = vpop.permute.xlu1 %3399  ;;  %11484 = vst [vmem:[#allocation29_spill] sm:$0xff] %v9843_v58 }
 0x5c8   : > { %3473 = vst.msk [vmem:[#allocation4 + $0x480] sm:$0xff] %vm889_vm5, %v3398_v63  ;;  %5128 = vmatmul.f32.gmra.mxu0 %v4268_v38  ;;  %v3420_v42 = vpop.permute.xlu2 %3419  ;;  %v3492_v63 = vld [vmem:[#allocation2 + $0xa8] sm:$0xff] }
 0x5c9   : > { %3474 = vst.msk [vmem:[#allocation4 + $0x4b8] sm:$0xff] %vm889_vm5, %v3400_v12  ;;  %v4282_v12 = vld [vmem:[#allocation4 + $0x1e0] sm:$0xff] }
 0x5ca   : > { %3484 = vst.msk [vmem:[#allocation4 + $0x6e8] sm:$0xff] %vm889_vm5, %v3420_v42 }
 0x5cb   : > { %3523 = vst.msk [vmem:[#allocation4 + $0x140] sm:$0xff] %vm310_vm2, %v3491_v48 }
 0x5cc   : > { %3524 = vst.msk [vmem:[#allocation4 + $0x178] sm:$0xff] %vm310_vm2, %v3492_v63  ;;  %v3747_v63 = vld [vmem:[#allocation2 + $0x9a] sm:$0xff] }
 0x5cd   : > { %4000 = vrot.lane.b32.xlu0 %v3935_v51, %s7469_s29  ;;  %3810 = vrot.lane.b32.xlu1 %v3744_v27, %s7468_s28  ;;  %v9851_v51 = vpop.f32.mrf.mxu1  ;;  %v4531_v27 = vld [vmem:[%s11424_s1 + $0x2a8] sm:$0xff] }
 0x5ce   : > { %4002 = vrot.lane.b32.xlu2 %v3936_v56, %s7469_s29  ;;  %5217 = vmatpush.msrb.mxu1 %v4531_v27  ;;  %v9858_v56 = vpop.f32.mrf.mxu2  ;;  %v9863_v15 = vpop.f32.mrf.mxu0  ;;  %v3497_v27 = vld [vmem:[#allocation2 + $0xe0] sm:$0xff] }
 0x5cf   : > { %v3404_v25 = vpop.permute.xlu0 %3403  ;;  %v3406_v20 = vpop.permute.xlu1 %3405  ;;  %11485 = vst [vmem:[#allocation30_spill] sm:$0xff] %v9863_v15 }
 0x5d0   : > { %3476 = vst.msk [vmem:[#allocation4 + $0x528] sm:$0xff] %vm889_vm5, %v3404_v25  ;;  %5131 = vmatmul.f32.gmra.mxu0 %v4275_v16  ;;  %v3619_v7 = vpop.permute.xlu2 %3618  ;;  %v3938_v25 = vld [vmem:[#allocation2 + $0x93] sm:$0xff]  ;;  %v3494_v16 = vld [vmem:[#allocation2 + $0xc0] sm:$0xff] }
 0x5d1   : > { %3477 = vst.msk [vmem:[#allocation4 + $0x560] sm:$0xff] %vm889_vm5, %v3406_v20  ;;  %v3493_v20 = vld [vmem:[#allocation2 + $0xb0] sm:$0xff] }
 0x5d2   : > { %3712 = vst.msk [vmem:[#allocation4 + $0x98] sm:$0xff] %vm503_vm3, %v3619_v7 }
 0x5d3   : > { %3526 = vst.msk [vmem:[#allocation4 + $0x1e8] sm:$0xff] %vm310_vm2, %v3494_v16 }
 0x5d4   : > { %3525 = vst.msk [vmem:[#allocation4 + $0x1b0] sm:$0xff] %vm310_vm2, %v3493_v20  ;;  %v3498_v20 = vld [vmem:[#allocation2 + $0xf0] sm:$0xff] }
 0x5d5   : > { %3812 = vrot.lane.b32.xlu1 %v3745_v23, %s7468_s28  ;;  %3674 = vrot.lane.b32.xlu0 %v3580_v35, %s7467_s27  ;;  %v4289_v23 = vld [vmem:[#allocation4 + $0x218] sm:$0xff]  ;;  %v9870_v22 = vpop.f32.mrf.mxu1  ;;  %3529 = vst.msk [vmem:[#allocation4 + $0x290] sm:$0xff] %vm310_vm2, %v3497_v27 }
 0x5d6   : > { %4004 = vrot.lane.b32.xlu2 %v3937_v50, %s7469_s29  ;;  %v3495_v50 = vld [vmem:[#allocation2 + $0xc8] sm:$0xff]  ;;  %v9883_v16 = vpop.f32.mrf.mxu0  ;;  %3530 = vst.msk [vmem:[#allocation4 + $0x2c8] sm:$0xff] %vm310_vm2, %v3498_v20  ;;  %v4529_v20 = vld [vmem:[%s11424_s1 + $0x298] sm:$0xff] }
 0x5d7   : > { %v3410_v38 = vpop.permute.xlu0 %3409  ;;  %v3412_v42 = vpop.permute.xlu1 %3411  ;;  %3527 = vst.msk [vmem:[#allocation4 + $0x220] sm:$0xff] %vm310_vm2, %v3495_v50 }
 0x5d8   : > { %3479 = vst.msk [vmem:[#allocation4 + $0x5d0] sm:$0xff] %vm889_vm5, %v3410_v38  ;;  %5134 = vmatmul.f32.gmra.mxu0 %v4282_v12  ;;  %v3625_v13 = vpop.permute.xlu2 %3624  ;;  %v3939_v38 = vld [vmem:[#allocation2 + $0x9b] sm:$0xff]  ;;  %v9874_v12 = vpop.f32.mrf.mxu2 }
 0x5d9   : > { %3480 = vst.msk [vmem:[#allocation4 + $0x608] sm:$0xff] %vm889_vm5, %v3412_v42  ;;  %v4530_v42 = vld [vmem:[%s11424_s1 + $0x2a0] sm:$0xff] }
 0x5da   : > { %3715 = vst.msk [vmem:[#allocation4 + $0x140] sm:$0xff] %vm503_vm3, %v3625_v13  ;;  %v3496_v13 = vld [vmem:[#allocation2 + $0xd8] sm:$0xff]  ;;  %5218 = vmatpush.msrb.mxu1 %v4530_v42 }
 0x5db   : > { %3528 = vst.msk [vmem:[#allocation4 + $0x258] sm:$0xff] %vm310_vm2, %v3496_v13  ;;  %v3499_v42 = vld [vmem:[#allocation2 + $0xf8] sm:$0xff] }
 0x5dc   : > { %11486 = vst [vmem:[#allocation31_spill] sm:$0xff] %v9883_v16  ;;  %5219 = vmatpush.msrb.mxu1 %v4529_v20 }
 0x5dd   : > { %3814 = vrot.lane.b32.xlu1 %v3746_v59, %s7468_s28  ;;  %3676 = vrot.lane.b32.xlu0 %v3581_v17, %s7467_s27  ;;  %v4296_v17 = vld [vmem:[#allocation4 + $0x250] sm:$0xff]  ;;  %v9889_v50 = vpop.f32.mrf.mxu1  ;;  %3531 = vst.msk [vmem:[#allocation4 + $0x300] sm:$0xff] %vm310_vm2, %v3499_v42  ;;  %v3503_v42 = vld [vmem:[#allocation2 + $0x128] sm:$0xff] }
 0x5de   : > { %4006 = vrot.lane.b32.xlu2 %v3938_v25, %s7469_s29  ;;  %3535 = vst.msk [vmem:[#allocation4 + $0x3e0] sm:$0xff] %vm310_vm2, %v3503_v42  ;;  %v3752_v42 = vld [vmem:[#allocation2 + $0xda] sm:$0xff] }
 0x5df   : > { %v3416_v7 = vpop.permute.xlu0 %3415  ;;  %v3418_v35 = vpop.permute.xlu1 %3417 }
 0x5e0   : > { %3482 = vst.msk [vmem:[#allocation4 + $0x678] sm:$0xff] %vm889_vm5, %v3416_v7  ;;  %5137 = vmatmul.f32.gmra.mxu0 %v4289_v23  ;;  %v3631_v48 = vpop.permute.xlu2 %3630  ;;  %v3940_v23 = vld [vmem:[#allocation2 + $0xab] sm:$0xff]  ;;  %v9896_v27 = vpop.f32.mrf.mxu2 }
 0x5e1   : > { %3483 = vst.msk [vmem:[#allocation4 + $0x6b0] sm:$0xff] %vm889_vm5, %v3418_v35  ;;  %v3749_v35 = vld [vmem:[#allocation2 + $0xb2] sm:$0xff] }
 0x5e2   : > { %3718 = vst.msk [vmem:[#allocation4 + $0x1e8] sm:$0xff] %vm503_vm3, %v3631_v48  ;;  %v4542_v48 = vld [vmem:[%s11424_s1 + $0x300] sm:$0xff] }
 0x5e3   : > { %5335 = vmatpush.msrb.mxu2 %v4542_v48  ;;  %v3751_v48 = vld [vmem:[#allocation2 + $0xca] sm:$0xff] }
 0x5e5   : > { %3816 = vrot.lane.b32.xlu0 %v3747_v63, %s7468_s28  ;;  %4008 = vrot.lane.b32.xlu1 %v3939_v38, %s7469_s29  ;;  %v3748_v63 = vld [vmem:[#allocation2 + $0xaa] sm:$0xff] }
 0x5e6   : > { %v3500_v38 = vld [vmem:[#allocation2 + $0x108] sm:$0xff]  ;;  %3818 = vrot.lane.b32.xlu2 %v3748_v63, %s7468_s28 }
 0x5e7   : > { %v3615_v59 = vpop.permute.xlu0 %3614  ;;  %v3617_v25 = vpop.permute.xlu1 %3616  ;;  %3532 = vst.msk [vmem:[#allocation4 + $0x338] sm:$0xff] %vm310_vm2, %v3500_v38  ;;  %v3750_v63 = vld [vmem:[#allocation2 + $0xc2] sm:$0xff] }
 0x5e8   : > { %3710 = vst.msk [vmem:[#allocation4 + $0x28] sm:$0xff] %vm503_vm3, %v3615_v59  ;;  %5140 = vmatmul.f32.gmra.mxu0 %v4296_v17  ;;  %v3637_v7 = vpop.permute.xlu2 %3636  ;;  %v4303_v59 = vld [vmem:[#allocation4 + $0x288] sm:$0xff]  ;;  %v9912_v38 = vpop.f32.mrf.mxu1 }
 0x5e9   : > { %3711 = vst.msk [vmem:[#allocation4 + $0x60] sm:$0xff] %vm503_vm3, %v3617_v25  ;;  %v3501_v25 = vld [vmem:[#allocation2 + $0x110] sm:$0xff]  ;;  %v9916_v20 = vpop.f32.mrf.mxu2 }
 0x5ea   : > { %3721 = vst.msk [vmem:[#allocation4 + $0x290] sm:$0xff] %vm503_vm3, %v3637_v7 }
 0x5eb   : > { %3533 = vst.msk [vmem:[#allocation4 + $0x370] sm:$0xff] %vm310_vm2, %v3501_v25  ;;  %v3502_v25 = vld [vmem:[#allocation2 + $0x120] sm:$0xff] }
 0x5ec   : > { %3534 = vst.msk [vmem:[#allocation4 + $0x3a8] sm:$0xff] %vm310_vm2, %v3502_v25  ;;  %v3505_v25 = vld [vmem:[#allocation2 + $0x140] sm:$0xff] }
 0x5ed   : > { %4010 = vrot.lane.b32.xlu0 %v3940_v23, %s7469_s29  ;;  %3820 = vrot.lane.b32.xlu1 %v3749_v35, %s7468_s28  ;;  %v9906_v23 = vpop.f32.mrf.mxu0  ;;  %v3941_v35 = vld [vmem:[#allocation2 + $0xb3] sm:$0xff]  ;;  %3537 = vst.msk [vmem:[#allocation4 + $0x450] sm:$0xff] %vm310_vm2, %v3505_v25  ;;  %v3508_v25 = vld [vmem:[#allocation2 + $0x168] sm:$0xff] }
 0x5ee   : > { %11487 = vst [vmem:[#allocation32_spill] sm:$0xff] %v9906_v23  ;;  %3822 = vrot.lane.b32.xlu2 %v3750_v63, %s7468_s28  ;;  %v3942_v63 = vld [vmem:[#allocation2 + $0xc3] sm:$0xff] }
 0x5ef   : > { %v3621_v13 = vpop.permute.xlu0 %3620  ;;  %v3623_v17 = vpop.permute.xlu1 %3622  ;;  %3540 = vst.msk [vmem:[#allocation4 + $0x4f8] sm:$0xff] %vm310_vm2, %v3508_v25  ;;  %v3511_v25 = vld [vmem:[#allocation2 + $0x188] sm:$0xff] }
 0x5f0   : > { %3713 = vst.msk [vmem:[#allocation4 + $0xd0] sm:$0xff] %vm503_vm3, %v3621_v13  ;;  %5143 = vmatmul.f32.gmra.mxu0 %v4303_v59  ;;  %v3643_v7 = vpop.permute.xlu2 %3642  ;;  %v4310_v59 = vld [vmem:[#allocation4 + $0x2c0] sm:$0xff] }
 0x5f1   : > { %3714 = vst.msk [vmem:[#allocation4 + $0x108] sm:$0xff] %vm503_vm3, %v3623_v17  ;;  %v9936_v54 = vpop.f32.mrf.mxu2 }
 0x5f2   : > { %3724 = vst.msk [vmem:[#allocation4 + $0x338] sm:$0xff] %vm503_vm3, %v3643_v7  ;;  %v4528_v7 = vld [vmem:[%s11424_s1 + $0x290] sm:$0xff] }
 0x5f3   : > { %5220 = vmatpush.msrb.mxu1 %v4528_v7  ;;  %3543 = vst.msk [vmem:[#allocation4 + $0x5a0] sm:$0xff] %vm310_vm2, %v3511_v25 }
 0x5f5   : > { %4012 = vrot.lane.b32.xlu0 %v3941_v35, %s7469_s29  ;;  %3824 = vrot.lane.b32.xlu1 %v3751_v48, %s7468_s28  ;;  %v3504_v48 = vld [vmem:[#allocation2 + $0x138] sm:$0xff]  ;;  %v9925_v41 = vpop.f32.mrf.mxu0 }
 0x5f6   : > { %11488 = vst [vmem:[#allocation33_spill] sm:$0xff] %v9925_v41  ;;  %3826 = vrot.lane.b32.xlu2 %v3752_v42, %s7468_s28  ;;  %v3754_v42 = vld [vmem:[#allocation2 + $0xf2] sm:$0xff] }
 0x5f7   : > { %v3627_v13 = vpop.permute.xlu0 %3626  ;;  %v3629_v17 = vpop.permute.xlu1 %3628  ;;  %3536 = vst.msk [vmem:[#allocation4 + $0x418] sm:$0xff] %vm310_vm2, %v3504_v48  ;;  %v4132_v41 = vld [vmem:[#allocation2 + $0xac] sm:$0xff] }
 0x5f8   : > { %3716 = vst.msk [vmem:[#allocation4 + $0x178] sm:$0xff] %vm503_vm3, %v3627_v13  ;;  %5146 = vmatmul.f32.gmra.mxu0 %v4310_v59  ;;  %v3649_v35 = vpop.permute.xlu2 %3648  ;;  %v3506_v13 = vld [vmem:[#allocation2 + $0x150] sm:$0xff] }
 0x5f9   : > { %3717 = vst.msk [vmem:[#allocation4 + $0x1b0] sm:$0xff] %vm503_vm3, %v3629_v17  ;;  %v4317_v17 = vld [vmem:[#allocation4 + $0x2f8] sm:$0xff] }
 0x5fa   : > { %3727 = vst.msk [vmem:[#allocation4 + $0x3e0] sm:$0xff] %vm503_vm3, %v3649_v35  ;;  %v9932_v35 = vpop.f32.mrf.mxu1 }
 0x5fb   : > { %3538 = vst.msk [vmem:[#allocation4 + $0x488] sm:$0xff] %vm310_vm2, %v3506_v13 }
 0x5fc   : > { %4164 = vst.msk [vmem:[#allocation4 + $0x180] sm:$0xff] %vm310_vm2, %v4132_v41 }
 0x5fd   : > { %4014 = vrot.lane.b32.xlu0 %v3942_v63, %s7469_s29  ;;  %3828 = vrot.lane.b32.xlu1 %v3753_v33, %s7468_s28  ;;  %v3507_v63 = vld [vmem:[#allocation2 + $0x158] sm:$0xff]  ;;  %v9943_v13 = vpop.f32.mrf.mxu0 }
 0x5fe   : > { %v3755_v33 = vld [vmem:[#allocation2 + $0xfa] sm:$0xff]  ;;  %3539 = vst.msk [vmem:[#allocation4 + $0x4c0] sm:$0xff] %vm310_vm2, %v3507_v63  ;;  %4016 = vrot.lane.b32.xlu2 %v3943_v18, %s7469_s29 }
 0x5ff   : > { %v3633_v59 = vpop.permute.xlu0 %3632  ;;  %v3635_v7 = vpop.permute.xlu1 %3634  ;;  %11489 = vst [vmem:[#allocation34_spill] sm:$0xff] %v9943_v13  ;;  %v3767_v13 = vld [vmem:[#allocation2 + $0x18a] sm:$0xff] }
 0x600   : > { %3719 = vst.msk [vmem:[#allocation4 + $0x220] sm:$0xff] %vm503_vm3, %v3633_v59  ;;  %5149 = vmatmul.f32.gmra.mxu0 %v4317_v17  ;;  %v3655_v48 = vpop.permute.xlu2 %3654  ;;  %v3509_v59 = vld [vmem:[#allocation2 + $0x170] sm:$0xff] }
 0x601   : > { %3720 = vst.msk [vmem:[#allocation4 + $0x258] sm:$0xff] %vm503_vm3, %v3635_v7  ;;  %v4324_v7 = vld [vmem:[#allocation4 + $0x330] sm:$0xff] }
 0x602   : > { %3730 = vst.msk [vmem:[#allocation4 + $0x488] sm:$0xff] %vm503_vm3, %v3655_v48  ;;  %v4527_v48 = vld [vmem:[%s11424_s1 + $0x288] sm:$0xff]  ;;  %v9952_v18 = vpop.f32.mrf.mxu1 }
 0x603   : > { %3541 = vst.msk [vmem:[#allocation4 + $0x530] sm:$0xff] %vm310_vm2, %v3509_v59  ;;  %5221 = vmatpush.msrb.mxu1 %v4527_v48  ;;  %v3944_v59 = vld [vmem:[#allocation2 + $0xdb] sm:$0xff]  ;;  %v4331_v48 = vld [vmem:[#allocation4 + $0x368] sm:$0xff] }
 0x604   : > { %v4270_v23 = vld [vmem:[#allocation4 + $0x180] sm:$0xff] }
 0x605   : > { %3832 = vrot.lane.b32.xlu1 %v3755_v33, %s7468_s28  ;;  %3830 = vrot.lane.b32.xlu0 %v3754_v42, %s7468_s28  ;;  %v3510_v33 = vld [vmem:[#allocation2 + $0x180] sm:$0xff]  ;;  %v3757_v42 = vld [vmem:[#allocation2 + $0x112] sm:$0xff] }
 0x606   : > { %3542 = vst.msk [vmem:[#allocation4 + $0x568] sm:$0xff] %vm310_vm2, %v3510_v33  ;;  %4018 = vrot.lane.b32.xlu2 %v3944_v59, %s7469_s29  ;;  %v4526_v33 = vld [vmem:[%s11424_s1 + $0x280] sm:$0xff]  ;;  %v3946_v59 = vld [vmem:[#allocation2 + $0xf3] sm:$0xff] }
 0x607   : > { %v3639_v17 = vpop.permute.xlu0 %3638  ;;  %v3641_v2 = vpop.permute.xlu1 %3640  ;;  %5222 = vmatpush.msrb.mxu1 %v4526_v33 }
 0x608   : > { %3722 = vst.msk [vmem:[#allocation4 + $0x2c8] sm:$0xff] %vm503_vm3, %v3639_v17  ;;  %5152 = vmatmul.f32.gmra.mxu0 %v4324_v7  ;;  %v3661_v63 = vpop.permute.xlu2 %3660  ;;  %v9956_v17 = vpop.f32.mrf.mxu2 }
 0x609   : > { %3723 = vst.msk [vmem:[#allocation4 + $0x300] sm:$0xff] %vm503_vm3, %v3641_v2  ;;  %v3512_v2 = vld [vmem:[#allocation2 + $0x198] sm:$0xff] }
 0x60a   : > { %3733 = vst.msk [vmem:[#allocation4 + $0x530] sm:$0xff] %vm503_vm3, %v3661_v63  ;;  %v9963_v63 = vpop.f32.mrf.mxu0  ;;  %v9972_v55 = vpop.f32.mrf.mxu1 }
 0x60b   : > { %3544 = vst.msk [vmem:[#allocation4 + $0x5d8] sm:$0xff] %vm310_vm2, %v3512_v2  ;;  %v3945_v2 = vld [vmem:[#allocation2 + $0xe3] sm:$0xff] }
 0x60c   : > { %11490 = vst [vmem:[#allocation35_spill] sm:$0xff] %v9963_v63  ;;  %v4131_v63 = vld [vmem:[#allocation2 + $0x9c] sm:$0xff] }
 0x60d   : > { %3836 = vrot.lane.b32.xlu1 %v3757_v42, %s7468_s28  ;;  %3834 = vrot.lane.b32.xlu0 %v3756_v37, %s7468_s28  ;;  %v3513_v42 = vld [vmem:[#allocation2 + $0x1a0] sm:$0xff]  ;;  %4163 = vst.msk [vmem:[#allocation4 + $0x148] sm:$0xff] %vm310_vm2, %v4131_v63  ;;  %v3770_v63 = vld [vmem:[#allocation2 + $0x1b2] sm:$0xff] }
 0x60e   : > { %3545 = vst.msk [vmem:[#allocation4 + $0x610] sm:$0xff] %vm310_vm2, %v3513_v42  ;;  %4020 = vrot.lane.b32.xlu2 %v3945_v2, %s7469_s29  ;;  %v4127_v2 = vld [vmem:[#allocation2 + $0x6c] sm:$0xff] }
 0x60f   : > { %v3645_v7 = vpop.permute.xlu0 %3644  ;;  %v3647_v32 = vpop.permute.xlu1 %3646  ;;  %4159 = vst.msk [vmem:[#allocation4 + $0x68] sm:$0xff] %vm310_vm2, %v4127_v2  ;;  %v3762_v2 = vld [vmem:[#allocation2 + $0x152] sm:$0xff] }
 0x610   : > { %3725 = vst.msk [vmem:[#allocation4 + $0x370] sm:$0xff] %vm503_vm3, %v3645_v7  ;;  %5155 = vmatmul.f32.gmra.mxu0 %v4331_v48  ;;  %v3667_v37 = vpop.permute.xlu2 %3666  ;;  %v4126_v7 = vld [vmem:[#allocation2 + $0x64] sm:$0xff]  ;;  %v3514_v48 = vld [vmem:[#allocation2 + $0x1b0] sm:$0xff] }
 0x611   : > { %3726 = vst.msk [vmem:[#allocation4 + $0x3a8] sm:$0xff] %vm503_vm3, %v3647_v32  ;;  %v9978_v32 = vpop.f32.mrf.mxu2 }
 0x612   : > { %3736 = vst.msk [vmem:[#allocation4 + $0x5d8] sm:$0xff] %vm503_vm3, %v3667_v37  ;;  %v4338_v37 = vld [vmem:[#allocation4 + $0x3a0] sm:$0xff] }
 0x613   : > { %4158 = vst.msk [vmem:[#allocation4 + $0x30] sm:$0xff] %vm310_vm2, %v4126_v7  ;;  %v3760_v7 = vld [vmem:[#allocation2 + $0x13a] sm:$0xff] }
 0x614   : > { %3546 = vst.msk [vmem:[#allocation4 + $0x648] sm:$0xff] %vm310_vm2, %v3514_v48  ;;  %v9990_v48 = vpop.f32.mrf.mxu1 }
 0x615   : > { %4022 = vrot.lane.b32.xlu1 %v3946_v59, %s7469_s29  ;;  %3838 = vrot.lane.b32.xlu0 %v3758_v46, %s7468_s28  ;;  %v9984_v59 = vpop.f32.mrf.mxu0  ;;  %v3947_v46 = vld [vmem:[#allocation2 + $0xfb] sm:$0xff] }
 0x616   : > { %11491 = vst [vmem:[#allocation36_spill] sm:$0xff] %v9984_v59  ;;  %v4235_v14 = vld [vmem:[#allocation4 + $0x68] sm:$0xff]  ;;  %v3765_v59 = vld [vmem:[#allocation2 + $0x172] sm:$0xff] }
 0x617   : > { %v3651_v33 = vpop.permute.xlu0 %3650  ;;  %v3653_v25 = vpop.permute.xlu1 %3652 }
 0x618   : > { %3728 = vst.msk [vmem:[#allocation4 + $0x418] sm:$0xff] %vm503_vm3, %v3651_v33  ;;  %5158 = vmatmul.f32.gmra.mxu0 %v4338_v37  ;;  %v3807_v42 = vpop.permute.xlu2 %3806  ;;  %v3515_v33 = vld [vmem:[#allocation2 + $0x1b8] sm:$0xff] }
 0x619   : > { %3729 = vst.msk [vmem:[#allocation4 + $0x450] sm:$0xff] %vm503_vm3, %v3653_v25  ;;  %v4345_v25 = vld [vmem:[#allocation4 + $0x3d8] sm:$0xff]  ;;  %v9994_v52 = vpop.f32.mrf.mxu2 }
 0x61a   : > { %3902 = vst.msk [vmem:[#allocation4 + $0x28] sm:$0xff] %vm696_vm4, %v3807_v42  ;;  %v4228_v39 = vld [vmem:[#allocation4 + $0x30] sm:$0xff] }
 0x61b   : > { %7012 = vmatmul.msk.f32.vlgmr.msrb.gmra.mxu2 %vm310_vm2, %v4228_v39  ;;  %3547 = vst.msk [vmem:[#allocation4 + $0x680] sm:$0xff] %vm310_vm2, %v3515_v33  ;;  %v3759_v42 = vld [vmem:[#allocation2 + $0x12a] sm:$0xff] }
 0x61c   : > { %11492 = vst [vmem:[#allocation37_spill] sm:$0xff] %v9994_v52  ;;  %3840 = vrot.lane.b32.xlu2 %v3759_v42, %s7468_s28  ;;  %v4352_v33 = vld [vmem:[#allocation4 + $0x410] sm:$0xff]  ;;  %v3761_v42 = vld [vmem:[#allocation2 + $0x142] sm:$0xff] }
 0x61d   : > { %4024 = vrot.lane.b32.xlu1 %v3947_v46, %s7469_s29  ;;  %3842 = vrot.lane.b32.xlu0 %v3760_v7, %s7468_s28  ;;  %v3948_v7 = vld [vmem:[#allocation2 + $0x10b] sm:$0xff]  ;;  %v10000_v39 = vpop.f32.mrf.mxu0 }
 0x61e   : > { %11493 = vst [vmem:[#allocation38_spill] sm:$0xff] %v10000_v39 }
 0x61f   : > { %v3657_v37 = vpop.permute.xlu0 %3656  ;;  %v3659_v30 = vpop.permute.xlu1 %3658 }
 0x620   : > { %3731 = vst.msk [vmem:[#allocation4 + $0x4c0] sm:$0xff] %vm503_vm3, %v3657_v37  ;;  %5161 = vmatmul.f32.gmra.mxu0 %v4345_v25  ;;  %v3809_v46 = vpop.permute.xlu2 %3808  ;;  %v10006_v25 = vpop.f32.mrf.mxu1 }
 0x621   : > { %3732 = vst.msk [vmem:[#allocation4 + $0x4f8] sm:$0xff] %vm503_vm3, %v3659_v30 }
 0x622   : > { %3903 = vst.msk [vmem:[#allocation4 + $0x60] sm:$0xff] %vm696_vm4, %v3809_v46  ;;  %v10011_v46 = vpop.f32.mrf.mxu2 }
 0x623   : > { %7013 = vmatmul.msk.f32.gmra.mxu2 %vm310_vm2, %v4235_v14  ;;  %11494 = vst [vmem:[#allocation39_spill] sm:$0xff] %v10011_v46  ;;  %v4129_v14 = vld [vmem:[#allocation2 + $0x84] sm:$0xff] }
 0x624   : > { %3844 = vrot.lane.b32.xlu2 %v3761_v42, %s7468_s28  ;;  %4161 = vst.msk [vmem:[#allocation4 + $0xd8] sm:$0xff] %vm310_vm2, %v4129_v14  ;;  %v4359_v42 = vld [vmem:[#allocation4 + $0x448] sm:$0xff] }
 0x625   : > { %4026 = vrot.lane.b32.xlu1 %v3948_v7, %s7469_s29  ;;  %3846 = vrot.lane.b32.xlu0 %v3762_v2, %s7468_s28  ;;  %v3949_v7 = vld [vmem:[#allocation2 + $0x113] sm:$0xff]  ;;  %v3764_v2 = vld [vmem:[#allocation2 + $0x16a] sm:$0xff]  ;;  %v3766_v14 = vld [vmem:[#allocation2 + $0x182] sm:$0xff] }
 0x627   : > { %v3663_v30 = vpop.permute.xlu0 %3662  ;;  %v3665_v37 = vpop.permute.xlu1 %3664 }
 0x628   : > { %3734 = vst.msk [vmem:[#allocation4 + $0x568] sm:$0xff] %vm503_vm3, %v3663_v30  ;;  %5164 = vmatmul.f32.gmra.mxu0 %v4352_v33  ;;  %v4003_v4 = vpop.permute.xlu2 %4002  ;;  %v10016_v30 = vpop.f32.mrf.mxu0  ;;  %v3516_v33 = vld [vmem:[#allocation2 + $0x1c8] sm:$0xff] }
 0x629   : > { %3735 = vst.msk [vmem:[#allocation4 + $0x5a0] sm:$0xff] %vm503_vm3, %v3665_v37 }
 0x62a   : > { %11495 = vst [vmem:[#allocation40_spill] sm:$0xff] %v10016_v30  ;;  %v10025_v6 = vpop.f32.mrf.mxu2  ;;  %v4130_v30 = vld [vmem:[#allocation2 + $0x94] sm:$0xff] }
 0x62b   : > { %7014 = vmatmul.msk.f32.gmra.mxu2 %vm310_vm2, %v4242_v62  ;;  %3548 = vst.msk [vmem:[#allocation4 + $0x6b8] sm:$0xff] %vm310_vm2, %v3516_v33  ;;  %v4249_v62 = vld [vmem:[#allocation4 + $0xd8] sm:$0xff] }
 0x62c   : > { %3848 = vrot.lane.b32.xlu2 %v3763_v24, %s7468_s28  ;;  %11496 = vst [vmem:[#allocation41_spill] sm:$0xff] %v10025_v6  ;;  %v4366_v24 = vld [vmem:[#allocation4 + $0x480] sm:$0xff] }
 0x62d   : > { %4028 = vrot.lane.b32.xlu0 %v3949_v7, %s7469_s29  ;;  %3850 = vrot.lane.b32.xlu1 %v3764_v2, %s7468_s28  ;;  %v10023_v7 = vpop.f32.mrf.mxu1  ;;  %v3950_v2 = vld [vmem:[#allocation2 + $0x123] sm:$0xff]  ;;  %4162 = vst.msk [vmem:[#allocation4 + $0x110] sm:$0xff] %vm310_vm2, %v4130_v30  ;;  %v3951_v30 = vld [vmem:[#allocation2 + $0x12b] sm:$0xff] }
 0x62f   : > { %v3669_v37 = vpop.permute.xlu0 %3668  ;;  %v3671_v36 = vpop.permute.xlu1 %3670 }
 0x630   : > { %3737 = vst.msk [vmem:[#allocation4 + $0x610] sm:$0xff] %vm503_vm3, %v3669_v37  ;;  %5167 = vmatmul.f32.gmra.mxu0 %v4359_v42  ;;  %v4005_v33 = vpop.permute.xlu2 %4004  ;;  %v10032_v39 = vpop.f32.mrf.mxu0 }
 0x631   : > { %3738 = vst.msk [vmem:[#allocation4 + $0x648] sm:$0xff] %vm503_vm3, %v3671_v36  ;;  %v3517_v36 = vld [vmem:[#allocation2 + $0x1d0] sm:$0xff] }
 0x632   : > { %3549 = vst.msk [vmem:[#allocation4 + $0x6f0] sm:$0xff] %vm310_vm2, %v3517_v36  ;;  %v10042_v36 = vpop.f32.mrf.mxu2 }
 0x633   : > { %7015 = vmatmul.msk.f32.gmra.mxu2 %vm310_vm2, %v4249_v62  ;;  %11497 = vst [vmem:[#allocation42_spill] sm:$0xff] %v10032_v39 }
 0x634   : > { %3852 = vrot.lane.b32.xlu2 %v3765_v59, %s7468_s28  ;;  %v4256_v62 = vld [vmem:[#allocation4 + $0x110] sm:$0xff]  ;;  %11498 = vst [vmem:[#allocation43_spill] sm:$0xff] %v10042_v36 }
 0x635   : > { %4030 = vrot.lane.b32.xlu0 %v3950_v2, %s7469_s29  ;;  %3854 = vrot.lane.b32.xlu1 %v3766_v14, %s7468_s28  ;;  %v3768_v2 = vld [vmem:[#allocation2 + $0x19a] sm:$0xff]  ;;  %v10037_v14 = vpop.f32.mrf.mxu1 }
 0x637   : > { %v3999_v37 = vpop.permute.xlu0 %3998  ;;  %v3673_v42 = vpop.permute.xlu1 %3672 }
 0x638   : > { %4094 = vst.msk [vmem:[#allocation4 + $0x28] sm:$0xff] %vm889_vm5, %v3999_v37  ;;  %5170 = vmatmul.f32.gmra.mxu0 %v4366_v24  ;;  %v4373_v24 = vld [vmem:[#allocation4 + $0x4b8] sm:$0xff]  ;;  %v4007_v39 = vpop.permute.xlu2 %4006 }
 0x639   : > { %3739 = vst.msk [vmem:[#allocation4 + $0x680] sm:$0xff] %vm503_vm3, %v3673_v42 }
 0x63b   : > { %7016 = vmatmul.msk.f32.gmra.mxu2 %vm310_vm2, %v4256_v62  ;;  %v4263_v62 = vld [vmem:[#allocation4 + $0x148] sm:$0xff] }
 0x63c   : > { %3856 = vrot.lane.b32.xlu2 %v3767_v13, %s7468_s28 }
 0x63d   : > { %4032 = vrot.lane.b32.xlu0 %v3951_v30, %s7469_s29  ;;  %3858 = vrot.lane.b32.xlu1 %v3768_v2, %s7468_s28  ;;  %v10048_v30 = vpop.f32.mrf.mxu0  ;;  %v3769_v2 = vld [vmem:[#allocation2 + $0x1a2] sm:$0xff] }
 0x63e   : > { %11499 = vst [vmem:[#allocation44_spill] sm:$0xff] %v10048_v30  ;;  %v10057_v30 = vpop.f32.mrf.mxu2 }
 0x63f   : > { %v4001_v37 = vpop.permute.xlu0 %4000  ;;  %v4227_v42 = vld [vmem:[#allocation4 + $0x28] sm:$0xff]  ;;  %v3811_v59 = vpop.permute.xlu1 %3810  ;;  %11501 = vst [vmem:[#allocation46_spill] sm:$0xff] %v10057_v30  ;;  %v4133_v30 = vld [vmem:[#allocation2 + $0xb4] sm:$0xff] }
 0x640   : > { %4095 = vst.msk [vmem:[#allocation4 + $0x60] sm:$0xff] %vm889_vm5, %v4001_v37  ;;  %5173 = vmatmul.f32.gmra.mxu0 %v4373_v24  ;;  %5223 = vmatmul.f32.vlgmr.msrb.gmra.mxu1 %v4227_v42  ;;  %v10054_v37 = vpop.f32.mrf.mxu1  ;;  %v4380_v24 = vld [vmem:[#allocation4 + $0x4f0] sm:$0xff] }
 0x641   : > { %3904 = vst.msk [vmem:[#allocation4 + $0x98] sm:$0xff] %vm696_vm4, %v3811_v59 }
 0x642   : > { %4096 = vst.msk [vmem:[#allocation4 + $0x98] sm:$0xff] %vm889_vm5, %v4003_v4  ;;  %v3819_v4 = vpop.permute.xlu2 %3818 }
 0x643   : > { %11500 = vst [vmem:[#allocation45_spill] sm:$0xff] %v10054_v37  ;;  %7017 = vmatmul.msk.f32.gmra.mxu2 %vm310_vm2, %v4263_v62  ;;  %v3771_v62 = vld [vmem:[#allocation2 + $0x1ba] sm:$0xff] }
 0x644   : > { %3908 = vst.msk [vmem:[#allocation4 + $0x178] sm:$0xff] %vm696_vm4, %v3819_v4  ;;  %v3953_v4 = vld [vmem:[#allocation2 + $0x143] sm:$0xff] }
 0x645   : > { %3862 = vrot.lane.b32.xlu1 %v3770_v63, %s7468_s28  ;;  %3860 = vrot.lane.b32.xlu0 %v3769_v2, %s7468_s28  ;;  %v3952_v63 = vld [vmem:[#allocation2 + $0x13b] sm:$0xff]  ;;  %v10062_v41 = vpop.f32.mrf.mxu0  ;;  %v3772_v2 = vld [vmem:[#allocation2 + $0x1ca] sm:$0xff]  ;;  %4165 = vst.msk [vmem:[#allocation4 + $0x1b8] sm:$0xff] %vm310_vm2, %v4133_v30  ;;  %v3773_v30 = vld [vmem:[#allocation2 + $0x1d2] sm:$0xff] }
 0x646   : > { %4034 = vrot.lane.b32.xlu2 %v3952_v63, %s7469_s29 }
 0x647   : > { %v4234_v13 = vld [vmem:[#allocation4 + $0x60] sm:$0xff]  ;;  %v3813_v42 = vpop.permute.xlu1 %3812  ;;  %v3675_v59 = vpop.permute.xlu0 %3674 }
 0x648   : > { %5176 = vmatmul.f32.gmra.mxu0 %v4380_v24  ;;  %5226 = vmatmul.f32.gmra.mxu1 %v4234_v13  ;;  %3905 = vst.msk [vmem:[#allocation4 + $0xd0] sm:$0xff] %vm696_vm4, %v3813_v42  ;;  %v4387_v13 = vld [vmem:[#allocation4 + $0x528] sm:$0xff]  ;;  %v10070_v63 = vpop.f32.mrf.mxu1 }
 0x649   : > { %3740 = vst.msk [vmem:[#allocation4 + $0x6b8] sm:$0xff] %vm503_vm3, %v3675_v59  ;;  %v4241_v24 = vld [vmem:[#allocation4 + $0x98] sm:$0xff] }
 0x64a   : > { %4097 = vst.msk [vmem:[#allocation4 + $0xd0] sm:$0xff] %vm889_vm5, %v4005_v33  ;;  %v3823_v33 = vpop.permute.xlu2 %3822 }
 0x64b   : > { %7018 = vmatmul.msk.f32.gmra.mxu2 %vm310_vm2, %v4270_v23  ;;  %11502 = vst [vmem:[#allocation47_spill] sm:$0xff] %v10070_v63  ;;  %v3955_v23 = vld [vmem:[#allocation2 + $0x15b] sm:$0xff] }
 0x64c   : > { %3910 = vst.msk [vmem:[#allocation4 + $0x1e8] sm:$0xff] %vm696_vm4, %v3823_v33 }
 0x64d   : > { %3866 = vrot.lane.b32.xlu1 %v3772_v2, %s7468_s28  ;;  %3864 = vrot.lane.b32.xlu0 %v3771_v62, %s7468_s28  ;;  %v10075_v2 = vpop.f32.mrf.mxu2  ;;  %v10079_v62 = vpop.f32.mrf.mxu0 }
 0x64e   : > { %4036 = vrot.lane.b32.xlu2 %v3953_v4, %s7469_s29  ;;  %11503 = vst [vmem:[#allocation48_spill] sm:$0xff] %v10075_v2  ;;  %v3954_v4 = vld [vmem:[#allocation2 + $0x153] sm:$0xff] }
 0x64f   : > { %v3815_v42 = vpop.permute.xlu1 %3814  ;;  %v3677_v59 = vpop.permute.xlu0 %3676  ;;  %v4135_v2 = vld [vmem:[#allocation2 + $0xcc] sm:$0xff] }
 0x650   : > { %5179 = vmatmul.f32.gmra.mxu0 %v4387_v13  ;;  %5229 = vmatmul.f32.gmra.mxu1 %v4241_v24  ;;  %3906 = vst.msk [vmem:[#allocation4 + $0x108] sm:$0xff] %vm696_vm4, %v3815_v42  ;;  %v4277_v13 = vld [vmem:[#allocation4 + $0x1b8] sm:$0xff]  ;;  %v4134_v24 = vld [vmem:[#allocation2 + $0xc4] sm:$0xff] }
 0x651   : > { %3741 = vst.msk [vmem:[#allocation4 + $0x6f0] sm:$0xff] %vm503_vm3, %v3677_v59  ;;  %v4248_v36 = vld [vmem:[#allocation4 + $0xd0] sm:$0xff]  ;;  %v4394_v42 = vld [vmem:[#allocation4 + $0x560] sm:$0xff] }
 0x652   : > { %4098 = vst.msk [vmem:[#allocation4 + $0x108] sm:$0xff] %vm889_vm5, %v4007_v39  ;;  %v3827_v33 = vpop.permute.xlu2 %3826 }
 0x653   : > { %4166 = vst.msk [vmem:[#allocation4 + $0x1f0] sm:$0xff] %vm310_vm2, %v4134_v24  ;;  %7019 = vmatmul.msk.f32.gmra.mxu2 %vm310_vm2, %v4277_v13 }
 0x654   : > { %3912 = vst.msk [vmem:[#allocation4 + $0x258] sm:$0xff] %vm696_vm4, %v3827_v33 }
 0x655   : > { %4040 = vrot.lane.b32.xlu1 %v3955_v23, %s7469_s29  ;;  %3868 = vrot.lane.b32.xlu0 %v3773_v30, %s7468_s28  ;;  %v10088_v23 = vpop.f32.mrf.mxu1  ;;  %v3957_v30 = vld [vmem:[#allocation2 + $0x173] sm:$0xff]  ;;  %v10091_v24 = vpop.f32.mrf.mxu2  ;;  %4167 = vst.msk [vmem:[#allocation4 + $0x228] sm:$0xff] %vm310_vm2, %v4135_v2 }
 0x656   : > { %4038 = vrot.lane.b32.xlu2 %v3954_v4, %s7469_s29  ;;  %11504 = vst [vmem:[#allocation49_spill] sm:$0xff] %v10088_v23  ;;  %v3958_v4 = vld [vmem:[#allocation2 + $0x183] sm:$0xff] }
 0x657   : > { %v3817_v59 = vpop.permute.xlu0 %3816  ;;  %v4009_v39 = vpop.permute.xlu1 %4008  ;;  %11505 = vst [vmem:[#allocation50_spill] sm:$0xff] %v10091_v24  ;;  %v4136_v24 = vld [vmem:[#allocation2 + $0xdc] sm:$0xff] }
 0x658   : > { %5182 = vmatmul.f32.gmra.mxu0 %v4394_v42  ;;  %5232 = vmatmul.f32.gmra.mxu1 %v4248_v36  ;;  %3907 = vst.msk [vmem:[#allocation4 + $0x140] sm:$0xff] %vm696_vm4, %v3817_v59  ;;  %v10095_v36 = vpop.f32.mrf.mxu0  ;;  %v4401_v42 = vld [vmem:[#allocation4 + $0x598] sm:$0xff] }
 0x659   : > { %4099 = vst.msk [vmem:[#allocation4 + $0x140] sm:$0xff] %vm889_vm5, %v4009_v39  ;;  %v4255_v16 = vld [vmem:[#allocation4 + $0x108] sm:$0xff] }
 0x65a   : > { %v4284_v13 = vld [vmem:[#allocation4 + $0x1f0] sm:$0xff]  ;;  %v4017_v33 = vpop.permute.xlu2 %4016  ;;  %4168 = vst.msk [vmem:[#allocation4 + $0x260] sm:$0xff] %vm310_vm2, %v4136_v24 }
 0x65b   : > { %7020 = vmatmul.msk.f32.gmra.mxu2 %vm310_vm2, %v4284_v13 }
 0x65c   : > { %v4291_v2 = vld [vmem:[#allocation4 + $0x228] sm:$0xff] }
 0x65d   : > { %4044 = vrot.lane.b32.xlu0 %v3957_v30, %s7469_s29  ;;  %4046 = vrot.lane.b32.xlu1 %v3958_v4, %s7469_s29  ;;  %v10101_v30 = vpop.f32.mrf.mxu1  ;;  %v10104_v13 = vpop.f32.mrf.mxu2  ;;  %v3956_v4 = vld [vmem:[#allocation2 + $0x16b] sm:$0xff] }
 0x65e   : > { %11506 = vst [vmem:[#allocation51_spill] sm:$0xff] %v10101_v30  ;;  %4042 = vrot.lane.b32.xlu2 %v3956_v4, %s7469_s29 }
 0x65f   : > { %v4011_v59 = vpop.permute.xlu0 %4010  ;;  %v3821_v39 = vpop.permute.xlu1 %3820  ;;  %11507 = vst [vmem:[#allocation52_spill] sm:$0xff] %v10104_v13 }
 0x660   : > { %5185 = vmatmul.f32.gmra.mxu0 %v4401_v42  ;;  %5235 = vmatmul.f32.gmra.mxu1 %v4255_v16  ;;  %4100 = vst.msk [vmem:[#allocation4 + $0x178] sm:$0xff] %vm889_vm5, %v4011_v59  ;;  %v4262_v23 = vld [vmem:[#allocation4 + $0x140] sm:$0xff]  ;;  %v4408_v16 = vld [vmem:[#allocation4 + $0x5d0] sm:$0xff]  ;;  %v10107_v6 = vpop.f32.mrf.mxu0 }
 0x661   : > { %3909 = vst.msk [vmem:[#allocation4 + $0x1b0] sm:$0xff] %vm696_vm4, %v3821_v39  ;;  %v4298_v24 = vld [vmem:[#allocation4 + $0x260] sm:$0xff] }
 0x662   : > { %v4019_v39 = vpop.permute.xlu2 %4018 }
 0x663   : > { %7021 = vmatmul.msk.f32.gmra.mxu2 %vm310_vm2, %v4291_v2  ;;  %4104 = vst.msk [vmem:[#allocation4 + $0x258] sm:$0xff] %vm889_vm5, %v4019_v39  ;;  %v4137_v2 = vld [vmem:[#allocation2 + $0xe4] sm:$0xff] }
 0x664   : > { %4169 = vst.msk [vmem:[#allocation4 + $0x298] sm:$0xff] %vm310_vm2, %v4137_v2 }
 0x665   : > { %v10115_v30 = vpop.f32.mrf.mxu1  ;;  %v10118_v63 = vpop.f32.mrf.mxu2 }
 0x666   : > { %11508 = vst [vmem:[#allocation53_spill] sm:$0xff] %v10115_v30 }
 0x667   : > { %v4013_v42 = vpop.permute.xlu0 %4012  ;;  %v3825_v59 = vpop.permute.xlu1 %3824  ;;  %v4269_v13 = vld [vmem:[#allocation4 + $0x178] sm:$0xff]  ;;  %11509 = vst [vmem:[#allocation54_spill] sm:$0xff] %v10118_v63 }
 0x668   : > { %5188 = vmatmul.f32.gmra.mxu0 %v4408_v16  ;;  %5238 = vmatmul.f32.gmra.mxu1 %v4262_v23  ;;  %4101 = vst.msk [vmem:[#allocation4 + $0x1b0] sm:$0xff] %vm889_vm5, %v4013_v42  ;;  %v4415_v23 = vld [vmem:[#allocation4 + $0x608] sm:$0xff]  ;;  %v10123_v39 = vpop.f32.mrf.mxu0 }
 0x669   : > { %3911 = vst.msk [vmem:[#allocation4 + $0x220] sm:$0xff] %vm696_vm4, %v3825_v59  ;;  %v3960_v59 = vld [vmem:[#allocation2 + $0x19b] sm:$0xff] }
 0x66a   : > { %4103 = vst.msk [vmem:[#allocation4 + $0x220] sm:$0xff] %vm889_vm5, %v4017_v33  ;;  %v4021_v33 = vpop.permute.xlu2 %4020  ;;  %4050 = vrot.lane.b32.xlu0 %v3960_v59, %s7469_s29 }
 0x66b   : > { %7022 = vmatmul.msk.f32.gmra.mxu2 %vm310_vm2, %v4298_v24  ;;  %v4305_v4 = vld [vmem:[#allocation4 + $0x298] sm:$0xff] }
 0x66c   : > { %v4138_v24 = vld [vmem:[#allocation2 + $0xf4] sm:$0xff] }
 0x66d   : > { %4170 = vst.msk [vmem:[#allocation4 + $0x2d0] sm:$0xff] %vm310_vm2, %v4138_v24  ;;  %v10128_v63 = vpop.f32.mrf.mxu1 }
 0x66e   : > { %11510 = vst [vmem:[#allocation55_spill] sm:$0xff] %v10128_v63 }
 0x66f   : > { %v4015_v16 = vpop.permute.xlu0 %4014  ;;  %v3829_v42 = vpop.permute.xlu1 %3828  ;;  %v4276_v2 = vld [vmem:[#allocation4 + $0x1b0] sm:$0xff] }
 0x670   : > { %5191 = vmatmul.f32.gmra.mxu0 %v4415_v23  ;;  %5241 = vmatmul.f32.gmra.mxu1 %v4269_v13  ;;  %4102 = vst.msk [vmem:[#allocation4 + $0x1e8] sm:$0xff] %vm889_vm5, %v4015_v16  ;;  %v4422_v13 = vld [vmem:[#allocation4 + $0x640] sm:$0xff]  ;;  %v10135_v59 = vpop.f32.mrf.mxu0 }
 0x671   : > { %3913 = vst.msk [vmem:[#allocation4 + $0x290] sm:$0xff] %vm696_vm4, %v3829_v42  ;;  %v3961_v42 = vld [vmem:[#allocation2 + $0x1a3] sm:$0xff] }
 0x672   : > { %4105 = vst.msk [vmem:[#allocation4 + $0x290] sm:$0xff] %vm889_vm5, %v4021_v33  ;;  %4052 = vrot.lane.b32.xlu1 %v3961_v42, %s7469_s29  ;;  %v10133_v33 = vpop.f32.mrf.mxu2  ;;  %v4290_v15 = vld [vmem:[#allocation4 + $0x220] sm:$0xff] }
 0x673   : > { %7023 = vmatmul.msk.f32.gmra.mxu2 %vm310_vm2, %v4305_v4  ;;  %11511 = vst [vmem:[#allocation56_spill] sm:$0xff] %v10133_v33  ;;  %v4139_v4 = vld [vmem:[#allocation2 + $0xfc] sm:$0xff]  ;;  %v4140_v33 = vld [vmem:[#allocation2 + $0x10c] sm:$0xff] }
 0x674   : > { %v4312_v24 = vld [vmem:[#allocation4 + $0x2d0] sm:$0xff]  ;;  %4171 = vst.msk [vmem:[#allocation4 + $0x308] sm:$0xff] %vm310_vm2, %v4139_v4 }
 0x675   : > { %v10143_v42 = vpop.f32.mrf.mxu1  ;;  %4172 = vst.msk [vmem:[#allocation4 + $0x340] sm:$0xff] %vm310_vm2, %v4140_v33 }
 0x676   : > { %11512 = vst [vmem:[#allocation57_spill] sm:$0xff] %v10143_v42 }
 0x677   : > { %v3833_v23 = vpop.permute.xlu1 %3832  ;;  %v3831_v16 = vpop.permute.xlu0 %3830  ;;  %v4283_v30 = vld [vmem:[#allocation4 + $0x1e8] sm:$0xff] }
 0x678   : > { %5194 = vmatmul.f32.gmra.mxu0 %v4422_v13  ;;  %5244 = vmatmul.f32.gmra.mxu1 %v4276_v2  ;;  %3915 = vst.msk [vmem:[#allocation4 + $0x300] sm:$0xff] %vm696_vm4, %v3833_v23  ;;  %v3841_v13 = vpop.permute.xlu2 %3840  ;;  %v4429_v2 = vld [vmem:[#allocation4 + $0x678] sm:$0xff]  ;;  %v10148_v46 = vpop.f32.mrf.mxu0 }
 0x679   : > { %3914 = vst.msk [vmem:[#allocation4 + $0x2c8] sm:$0xff] %vm696_vm4, %v3831_v16  ;;  %v3959_v16 = vld [vmem:[#allocation2 + $0x18b] sm:$0xff] }
 0x67a   : > { %3919 = vst.msk [vmem:[#allocation4 + $0x3e0] sm:$0xff] %vm696_vm4, %v3841_v13  ;;  %4048 = vrot.lane.b32.xlu2 %v3959_v16, %s7469_s29  ;;  %v10145_v4 = vpop.f32.mrf.mxu2 }
 0x67b   : > { %7024 = vmatmul.msk.f32.gmra.mxu2 %vm310_vm2, %v4312_v24  ;;  %11513 = vst [vmem:[#allocation58_spill] sm:$0xff] %v10145_v4  ;;  %v4319_v24 = vld [vmem:[#allocation4 + $0x308] sm:$0xff]  ;;  %v4141_v4 = vld [vmem:[#allocation2 + $0x114] sm:$0xff] }
 0x67c   : > { %v4326_v16 = vld [vmem:[#allocation4 + $0x340] sm:$0xff]  ;;  %4173 = vst.msk [vmem:[#allocation4 + $0x378] sm:$0xff] %vm310_vm2, %v4141_v4 }
 0x67d   : > { %v10155_v33 = vpop.f32.mrf.mxu1 }
 0x67e   : > { %11514 = vst [vmem:[#allocation59_spill] sm:$0xff] %v10155_v33 }
 0x67f   : > { %v3837_v63 = vpop.permute.xlu1 %3836  ;;  %v3835_v23 = vpop.permute.xlu0 %3834 }
 0x680   : > { %5197 = vmatmul.f32.gmra.mxu0 %v4429_v2  ;;  %5247 = vmatmul.f32.gmra.mxu1 %v4283_v30  ;;  %3917 = vst.msk [vmem:[#allocation4 + $0x370] sm:$0xff] %vm696_vm4, %v3837_v63  ;;  %v3845_v30 = vpop.permute.xlu2 %3844  ;;  %v4436_v63 = vld [vmem:[#allocation4 + $0x6b0] sm:$0xff] }
 0x681   : > { %3916 = vst.msk [vmem:[#allocation4 + $0x338] sm:$0xff] %vm696_vm4, %v3835_v23  ;;  %v3963_v23 = vld [vmem:[#allocation2 + $0x1bb] sm:$0xff] }
 0x682   : > { %3921 = vst.msk [vmem:[#allocation4 + $0x450] sm:$0xff] %vm696_vm4, %v3845_v30  ;;  %4056 = vrot.lane.b32.xlu0 %v3963_v23, %s7469_s29  ;;  %v10158_v42 = vpop.f32.mrf.mxu2  ;;  %v3964_v23 = vld [vmem:[#allocation2 + $0x1cb] sm:$0xff] }
 0x683   : > { %7025 = vmatmul.msk.f32.gmra.mxu2 %vm310_vm2, %v4319_v24  ;;  %v4297_v24 = vld [vmem:[#allocation4 + $0x258] sm:$0xff]  ;;  %11515 = vst [vmem:[#allocation60_spill] sm:$0xff] %v10158_v42  ;;  %4058 = vrot.lane.b32.xlu1 %v3964_v23, %s7469_s29  ;;  %v4142_v42 = vld [vmem:[#allocation2 + $0x124] sm:$0xff] }
 0x684   : > { %v4333_v4 = vld [vmem:[#allocation4 + $0x378] sm:$0xff]  ;;  %4174 = vst.msk [vmem:[#allocation4 + $0x3b0] sm:$0xff] %vm310_vm2, %v4142_v42 }
 0x685   : > { %v10168_v33 = vpop.f32.mrf.mxu1 }
 0x686   : > { %11516 = vst [vmem:[#allocation61_spill] sm:$0xff] %v10168_v33 }
 0x687   : > { %v4023_v13 = vpop.permute.xlu1 %4022  ;;  %v3839_v2 = vpop.permute.xlu0 %3838 }
 0x688   : > { %5200 = vmatmul.f32.gmra.mxu0 %v4436_v63  ;;  %5250 = vmatmul.f32.gmra.mxu1 %v4290_v15  ;;  %4106 = vst.msk [vmem:[#allocation4 + $0x2c8] sm:$0xff] %vm889_vm5, %v4023_v13  ;;  %v3849_v30 = vpop.permute.xlu2 %3848  ;;  %v4443_v15 = vld [vmem:[#allocation4 + $0x6e8] sm:$0xff] }
 0x689   : > { %3918 = vst.msk [vmem:[#allocation4 + $0x3a8] sm:$0xff] %vm696_vm4, %v3839_v2  ;;  %v10162_v2 = vpop.f32.mrf.mxu0 }
 0x68a   : > { %3923 = vst.msk [vmem:[#allocation4 + $0x4c0] sm:$0xff] %vm696_vm4, %v3849_v30 }
 0x68b   : > { %7026 = vmatmul.msk.f32.gmra.mxu2 %vm310_vm2, %v4326_v16  ;;  %v4304_v16 = vld [vmem:[#allocation4 + $0x290] sm:$0xff] }
 0x68c   : > { %v4340_v42 = vld [vmem:[#allocation4 + $0x3b0] sm:$0xff] }
 0x68f   : > { %v4025_v63 = vpop.permute.xlu1 %4024  ;;  %v3843_v13 = vpop.permute.xlu0 %3842  ;;  %v4311_v23 = vld [vmem:[#allocation4 + $0x2c8] sm:$0xff] }
 0x690   : > { %5203 = vmatmul.f32.gmra.mxu0 %v4443_v15  ;;  %5253 = vmatmul.f32.gmra.mxu1 %v4297_v24  ;;  %4107 = vst.msk [vmem:[#allocation4 + $0x300] sm:$0xff] %vm889_vm5, %v4025_v63  ;;  %v3853_v30 = vpop.permute.xlu2 %3852  ;;  %v3962_v24 = vld [vmem:[#allocation2 + $0x1b3] sm:$0xff]  ;;  %v10173_v63 = vpop.f32.mrf.mxu2 }
 0x691   : > { %3920 = vst.msk [vmem:[#allocation4 + $0x418] sm:$0xff] %vm696_vm4, %v3843_v13  ;;  %4054 = vrot.lane.b32.xlu2 %v3962_v24, %s7469_s29  ;;  %v4143_v13 = vld [vmem:[#allocation2 + $0x12c] sm:$0xff]  ;;  %v4144_v24 = vld [vmem:[#allocation2 + $0x13c] sm:$0xff] }
 0x692   : > { %3925 = vst.msk [vmem:[#allocation4 + $0x530] sm:$0xff] %vm696_vm4, %v3853_v30 }
 0x693   : > { %7027 = vmatmul.msk.f32.gmra.mxu2 %vm310_vm2, %v4333_v4  ;;  %11517 = vst [vmem:[#allocation62_spill] sm:$0xff] %v10173_v63 }
 0x694   : > { %4175 = vst.msk [vmem:[#allocation4 + $0x3e8] sm:$0xff] %vm310_vm2, %v4143_v13 }
 0x695   : > { %4176 = vst.msk [vmem:[#allocation4 + $0x420] sm:$0xff] %vm310_vm2, %v4144_v24 }
 0x697   : > { %v4027_v37 = vpop.permute.xlu1 %4026  ;;  %v3847_v15 = vpop.permute.xlu0 %3846  ;;  %v4318_v63 = vld [vmem:[#allocation4 + $0x300] sm:$0xff] }
 0x698   : > { %5256 = vmatmul.f32.gmra.mxu1 %v4304_v16  ;;  %4108 = vst.msk [vmem:[#allocation4 + $0x338] sm:$0xff] %vm889_vm5, %v4027_v37  ;;  %v3857_v4 = vpop.permute.xlu2 %3856  ;;  %v10181_v37 = vpop.f32.mrf.mxu1 }
 0x699   : > { %3922 = vst.msk [vmem:[#allocation4 + $0x488] sm:$0xff] %vm696_vm4, %v3847_v15 }
 0x69a   : > { %3927 = vst.msk [vmem:[#allocation4 + $0x5a0] sm:$0xff] %vm696_vm4, %v3857_v4 }
 0x69b   : > { %7028 = vmatmul.msk.f32.gmra.mxu2 %vm310_vm2, %v4340_v42  ;;  %11518 = vst [vmem:[#allocation63_spill] sm:$0xff] %v10181_v37  ;;  %v4347_v15 = vld [vmem:[#allocation4 + $0x3e8] sm:$0xff] }
 0x69c   : > { %v4145_v37 = vld [vmem:[#allocation2 + $0x144] sm:$0xff] }
 0x69d   : > { %4177 = vst.msk [vmem:[#allocation4 + $0x458] sm:$0xff] %vm310_vm2, %v4145_v37  ;;  %v3965_v37 = vld [vmem:[#allocation2 + $0x1d3] sm:$0xff] }
 0x69e   : > { %v5337_v16 = vpop.f32.mrf.mxu2  ;;  %4060 = vrot.lane.b32.xlu2 %v3965_v37, %s7469_s29 }
 0x69f   : > { %v4029_v33 = vpop.permute.xlu0 %4028  ;;  %v3851_v30 = vpop.permute.xlu1 %3850  ;;  %v4325_v58 = vld [vmem:[#allocation4 + $0x338] sm:$0xff] }
 0x6a0   : > { %5259 = vmatmul.f32.gmra.mxu1 %v4311_v23  ;;  %4109 = vst.msk [vmem:[#allocation4 + $0x370] sm:$0xff] %vm889_vm5, %v4029_v33  ;;  %v4035_v23 = vpop.permute.xlu2 %4034  ;;  %v10191_v4 = vpop.f32.mrf.mxu1 }
 0x6a1   : > { %3924 = vst.msk [vmem:[#allocation4 + $0x4f8] sm:$0xff] %vm696_vm4, %v3851_v30  ;;  %v4354_v30 = vld [vmem:[#allocation4 + $0x420] sm:$0xff] }
 0x6a2   : > { %4112 = vst.msk [vmem:[#allocation4 + $0x418] sm:$0xff] %vm889_vm5, %v4035_v23  ;;  %v4146_v23 = vld [vmem:[#allocation2 + $0x154] sm:$0xff] }
 0x6a3   : > { %7029 = vmatmul.msk.f32.gmra.mxu2 %vm310_vm2, %v4347_v15  ;;  %11519 = vst [vmem:[#allocation64_spill] sm:$0xff] %v10191_v4 }
 0x6a4   : > { %4178 = vst.msk [vmem:[#allocation4 + $0x490] sm:$0xff] %vm310_vm2, %v4146_v23 }
 0x6a6   : > { %v10188_v33 = vpop.f32.mrf.mxu2 }
 0x6a7   : > { %v4031_v42 = vpop.permute.xlu0 %4030  ;;  %v3855_v13 = vpop.permute.xlu1 %3854  ;;  %v4332_v52 = vld [vmem:[#allocation4 + $0x370] sm:$0xff] }
 0x6a8   : > { %5262 = vmatmul.f32.gmra.mxu1 %v4318_v63  ;;  %4110 = vst.msk [vmem:[#allocation4 + $0x3a8] sm:$0xff] %vm889_vm5, %v4031_v42  ;;  %v4037_v24 = vpop.permute.xlu2 %4036  ;;  %v10200_v4 = vpop.f32.mrf.mxu1 }
 0x6a9   : > { %3926 = vst.msk [vmem:[#allocation4 + $0x568] sm:$0xff] %vm696_vm4, %v3855_v13  ;;  %v4361_v13 = vld [vmem:[#allocation4 + $0x458] sm:$0xff] }
 0x6aa   : > { %4113 = vst.msk [vmem:[#allocation4 + $0x450] sm:$0xff] %vm889_vm5, %v4037_v24 }
 0x6ab   : > { %7030 = vmatmul.msk.f32.gmra.mxu2 %vm310_vm2, %v4354_v30  ;;  %11520 = vst [vmem:[#allocation65_spill] sm:$0xff] %v10200_v4 }
 0x6ae   : > { %v10197_v42 = vpop.f32.mrf.mxu2 }
 0x6af   : > { %v4033_v15 = vpop.permute.xlu0 %4032  ;;  %v3859_v63 = vpop.permute.xlu1 %3858 }
 0x6b0   : > { %5265 = vmatmul.f32.gmra.mxu1 %v4325_v58  ;;  %4111 = vst.msk [vmem:[#allocation4 + $0x3e0] sm:$0xff] %vm889_vm5, %v4033_v15  ;;  %v4773_v58 = vadd.f32 %v9832_v1, %v9592_v0  ;;  %v4368_v1 = vld [vmem:[#allocation4 + $0x490] sm:$0xff] }
 0x6b1   : > { %3928 = vst.msk [vmem:[#allocation4 + $0x5d8] sm:$0xff] %vm696_vm4, %v3859_v63  ;;  %v4039_v63 = vpop.permute.xlu2 %4038 }
 0x6b2   : > { %v4886_v15 = vadd.f32 %v9780_v21, %v4773_v58  ;;  %4114 = vst.msk [vmem:[#allocation4 + $0x488] sm:$0xff] %vm889_vm5, %v4039_v63  ;;  %v4339_v21 = vld [vmem:[#allocation4 + $0x3a8] sm:$0xff] }
 0x6b3   : > { %7031 = vmatmul.msk.f32.gmra.mxu2 %vm310_vm2, %v4361_v13  ;;  %v4147_v13 = vld [vmem:[#allocation2 + $0x15c] sm:$0xff] }
 0x6b4   : > { %v4999_v23 = vadd.f32 %v9569_v61, %v4886_v15  ;;  %4179 = vst.msk [vmem:[#allocation4 + $0x4c8] sm:$0xff] %vm310_vm2, %v4147_v13 }
 0x6b6   : > { %v10210_v4 = vpop.f32.mrf.mxu2  ;;  %v5112_v0 = vadd.f32 %v10062_v41, %v4999_v23 }
 0x6b7   : > { %v3863_v30 = vpop.permute.xlu1 %3862  ;;  %v3861_v24 = vpop.permute.xlu0 %3860  ;;  %v4346_v13 = vld [vmem:[#allocation4 + $0x3e0] sm:$0xff] }
 0x6b8   : > { %5268 = vmatmul.f32.gmra.mxu1 %v4332_v52  ;;  %3930 = vst.msk [vmem:[#allocation4 + $0x648] sm:$0xff] %vm696_vm4, %v3863_v30  ;;  %v4776_v52 = vadd.f32 %v9851_v51, %v9628_v28  ;;  %v4190_v30 = vld [vmem:[%s7518_s23] sm:$0xff] }
 0x6b9   : > { %3929 = vst.msk [vmem:[#allocation4 + $0x610] sm:$0xff] %vm696_vm4, %v3861_v24 }
 0x6ba   : > { %v4889_v61 = vadd.f32 %v9797_v57, %v4776_v52  ;;  %v4148_v57 = vld [vmem:[#allocation2 + $0x16c] sm:$0xff] }
 0x6bb   : > { %7032 = vmatmul.msk.f32.gmra.mxu2 %vm310_vm2, %v4368_v1  ;;  %v4375_v1 = vld [vmem:[#allocation4 + $0x4c8] sm:$0xff]  ;;  %4180 = vst.msk [vmem:[#allocation4 + $0x500] sm:$0xff] %vm310_vm2, %v4148_v57 }
 0x6bc   : > { %v5002_v23 = vadd.f32 %v9578_v44, %v4889_v61  ;;  %v10234_v44 = vpop.f32.mrf.mxu3  ;;  %v4191_v52 = vld [vmem:[%s7518_s23 + $0x8] sm:$0xff] }
 0x6bd   : > { %v5224_v37 = vpop.f32.mrf.mxu1 }
 0x6be   : > { %v5225_v58 = vadd.f32 %v5224_v37, %v5112_v0  ;;  %v10223_v24 = vpop.f32.mrf.mxu2  ;;  %v5115_v51 = vadd.f32 %v10079_v62, %v5002_v23  ;;  %v4779_v37 = vadd.f32 %v9870_v22, %v9654_v8 }
 0x6bf   : > { %v3867_v63 = vpop.permute.xlu1 %3866  ;;  %v3865_v41 = vpop.permute.xlu0 %3864 }
 0x6c0   : > { %v5338_v15 = vadd.f32 %v5337_v16, %v5225_v58  ;;  %5271 = vmatmul.f32.gmra.mxu1 %v4339_v21  ;;  %3932 = vst.msk [vmem:[#allocation4 + $0x6b8] sm:$0xff] %vm696_vm4, %v3867_v63  ;;  %v4892_v62 = vadd.f32 %v9818_v49, %v4779_v37  ;;  %v4043_v63 = vpop.permute.xlu2 %4042 }
 0x6c1   : > { %3931 = vst.msk [vmem:[#allocation4 + $0x680] sm:$0xff] %vm696_vm4, %v3865_v41 }
 0x6c2   : > { %v10226_v28 = vadd.f32 %v5338_v15, %v4190_v30  ;;  %4116 = vst.msk [vmem:[#allocation4 + $0x4f8] sm:$0xff] %vm889_vm5, %v4043_v63  ;;  %v5005_v22 = vadd.f32 %v9605_v5, %v4892_v62  ;;  %v10244_v15 = vpop.f32.mrf.mxu0  ;;  %v4782_v5 = vadd.f32 %v9889_v50, %v9684_v40 }
 0x6c3   : > { %7033 = vmatmul.msk.f32.gmra.mxu2 %vm310_vm2, %v4375_v1 }
 0x6c4   : > { %v7044_v0 = vmul.f32 -1.442695, %v10226_v28  ;;  %v4895_v37 = vadd.f32 %v9837_v45, %v4782_v5  ;;  %v10265_v40 = vpop.f32.mrf.mxu3 }
 0x6c5   : > { %v5227_v16 = vpop.f32.mrf.mxu1 }
 0x6c6   : > { %7170 = vpow2.f32 %v7044_v0  ;;  %v5228_v21 = vadd.f32 %v5227_v16, %v5115_v51  ;;  %v10241_v8 = vpop.f32.mrf.mxu2  ;;  %v4382_v51 = vld [vmem:[#allocation4 + $0x500] sm:$0xff]  ;;  %v4149_v0 = vld [vmem:[#allocation2 + $0x174] sm:$0xff]  ;;  %v5008_v62 = vadd.f32 %v9631_v43, %v4895_v37 }
 0x6c7   : > { %v4041_v58 = vpop.permute.xlu1 %4040  ;;  %v3869_v61 = vpop.permute.xlu0 %3868  ;;  %v4353_v16 = vld [vmem:[#allocation4 + $0x418] sm:$0xff]  ;;  %4181 = vst.msk [vmem:[#allocation4 + $0x538] sm:$0xff] %vm310_vm2, %v4149_v0 }
 0x6c8   : > { %v5341_v30 = vadd.f32 %v10188_v33, %v5228_v21  ;;  %5274 = vmatmul.f32.gmra.mxu1 %v4346_v13  ;;  %4115 = vst.msk [vmem:[#allocation4 + $0x4c0] sm:$0xff] %vm889_vm5, %v4041_v58  ;;  %v5118_v33 = vadd.f32 %v10095_v36, %v5005_v22  ;;  %v4192_v36 = vld [vmem:[%s7518_s23 + $0x10] sm:$0xff]  ;;  %v5121_v63 = vadd.f32 %v10107_v6, %v5008_v62 }
 0x6c9   : > { %3933 = vst.msk [vmem:[#allocation4 + $0x6f0] sm:$0xff] %vm696_vm4, %v3869_v61 }
 0x6ca   : > { %v10246_v41 = vadd.f32 %v5341_v30, %v4191_v52  ;;  %v10270_v61 = vpop.f32.mrf.mxu0 }
 0x6cb   : > { %7034 = vmatmul.msk.f32.gmra.mxu2 %vm310_vm2, %v4382_v51  ;;  %v4150_v51 = vld [vmem:[#allocation2 + $0x184] sm:$0xff] }
 0x6cc   : > { %v7171_v49 = vpop.eup %7170  ;;  %v7045_v23 = vmul.f32 -1.442695, %v10246_v41  ;;  %4182 = vst.msk [vmem:[#allocation4 + $0x570] sm:$0xff] %vm310_vm2, %v4150_v51 }
 0x6cd   : > { %v10251_v1 = vadd.f32 1.0, %v7171_v49  ;;  %v5230_v57 = vpop.f32.mrf.mxu1  ;;  %v4785_v49 = vadd.f32 %v9912_v38, %v9698_v34 }
 0x6ce   : > { %7172 = vpow2.f32 %v7045_v23  ;;  %v5231_v13 = vadd.f32 %v5230_v57, %v5118_v33  ;;  %v10262_v58 = vpop.f32.mrf.mxu2  ;;  %v4360_v23 = vld [vmem:[#allocation4 + $0x450] sm:$0xff] }
 0x6cf   : > { %7174 = vrcp.f32 %v10251_v1  ;;  %v4045_v52 = vpop.permute.xlu0 %4044  ;;  %v4898_v6 = vadd.f32 %v9858_v56, %v4785_v49  ;;  %v4047_v5 = vpop.permute.xlu1 %4046  ;;  %v5602_v56 = vand.u32 2147483647, %v10251_v1  ;;  %vm5598_vm7 = vweird.f32 %v10251_v1 }
 0x6d0   : > { %v5344_v21 = vadd.f32 %v10197_v42, %v5231_v13  ;;  %5277 = vmatmul.f32.gmra.mxu1 %v4353_v16  ;;  %4117 = vst.msk [vmem:[#allocation4 + $0x530] sm:$0xff] %vm889_vm5, %v4045_v52  ;;  %v4389_v42 = vld [vmem:[#allocation4 + $0x538] sm:$0xff]  ;;  %v4788_v49 = vadd.f32 %v9932_v35, %v9721_v31  ;;  %v4194_v31 = vld [vmem:[%s7518_s23 + $0x20] sm:$0xff] }
 0x6d1   : > { %v4193_v16 = vld [vmem:[%s7518_s23 + $0x18] sm:$0xff]  ;;  %v5011_v13 = vadd.f32 %v9661_v47, %v4898_v6  ;;  %4118 = vst.msk [vmem:[#allocation4 + $0x568] sm:$0xff] %vm889_vm5, %v4047_v5  ;;  %v4367_v47 = vld [vmem:[#allocation4 + $0x488] sm:$0xff]  ;;  %vm5603_vm9 = vcmp.eq.f32.partialorder %v5602_v56, 8.507059e+37 }
 0x6d2   : > { %v10267_v50 = vadd.f32 %v5344_v21, %v4192_v36  ;;  %v5604_v36 = vand.u32 2147483648, %v10251_v1 }
 0x6d3   : > { %7035 = vmatmul.msk.f32.gmra.mxu2 %vm310_vm2, %v4389_v42 }
 0x6d4   : > { %v7173_v30 = vpop.eup %7172  ;;  %v7046_v45 = vmul.f32 -1.442695, %v10267_v50  ;;  %v5605_v51 = vor.u32 1.1754944e-38, %v5604_v36  ;;  %v4049_v5 = vpop.permute.xlu2 %4048 }
 0x6d5   : > { %v7175_v22 = vpop.eup %7174  ;;  %v10275_v33 = vadd.f32 1.0, %v7173_v30  ;;  %v5233_v43 = vpop.f32.mrf.mxu1  ;;  %4119 = vst.msk [vmem:[#allocation4 + $0x5a0] sm:$0xff] %vm889_vm5, %v4049_v5 }
 0x6d6   : > { %7176 = vpow2.f32 %v7046_v45  ;;  %v5234_v0 = vadd.f32 %v5233_v43, %v5121_v63  ;;  %v5594_v57 = vmul.f32 %v7175_v22, %v10251_v1  ;;  %v10287_v37 = vpop.f32.mrf.mxu2  ;;  %vm5599_vm6 = vweird.f32 %v7175_v22  ;;  %v10292_v30 = vpop.f32.mrf.mxu3 }
 0x6d7   : > { %7178 = vrcp.f32 %v10275_v33  ;;  %vm5600_vm8 = vmor %vm5598_vm7, %vm5599_vm6  ;;  %v5619_v56 = vand.u32 2147483648, %v10275_v33  ;;  %vm5613_vm11 = vweird.f32 %v10275_v33 }
 0x6d8   : > { %v5347_v34 = vadd.f32 %v10210_v4, %v5234_v0  ;;  %5280 = vmatmul.f32.gmra.mxu1 %v4360_v23  ;;  %v5595_v38 = vsub.f32 1.0, %v5594_v57  ;;  %v5124_v4 = vadd.f32 %v10123_v39, %v5011_v13  ;;  %v4396_v0 = vld [vmem:[#allocation4 + $0x570] sm:$0xff]  ;;  %v10303_v39 = vpop.f32.mrf.mxu0 }
 0x6d9   : > { %v4151_v57 = vld [vmem:[#allocation2 + $0x18c] sm:$0xff] }
 0x6da   : > { %v10289_v21 = vadd.f32 %v5347_v34, %v4193_v16  ;;  %v5596_v52 = vmul.f32 %v7175_v22, %v5595_v38  ;;  %4183 = vst.msk [vmem:[#allocation4 + $0x5a8] sm:$0xff] %vm310_vm2, %v4151_v57  ;;  %v4901_v34 = vadd.f32 %v9874_v12, %v4788_v49  ;;  %v4152_v57 = vld [vmem:[#allocation2 + $0x19c] sm:$0xff] }
 0x6db   : > { %7036 = vmatmul.msk.f32.gmra.mxu2 %vm310_vm2, %v4396_v0  ;;  %4184 = vst.msk [vmem:[#allocation4 + $0x5e0] sm:$0xff] %vm310_vm2, %v4152_v57 }
 0x6dc   : > { %v7177_v62 = vpop.eup %7176  ;;  %v7047_v63 = vmul.f32 -1.442695, %v10289_v21  ;;  %v5597_v45 = vadd.f32 %v7175_v22, %v5596_v52  ;;  %v5014_v36 = vadd.f32 %v9687_v11, %v4901_v34  ;;  %v4791_v11 = vadd.f32 %v9952_v18, %v9739_v19 }
 0x6dd   : > { %v10297_v42 = vpop.eup %7178  ;;  %v10301_v43 = vadd.f32 1.0, %v7177_v62  ;;  %v5236_v23 = vpop.f32.mrf.mxu1 }
 0x6de   : > { %7180 = vpow2.f32 %v7047_v63  ;;  %v5237_v6 = vadd.f32 %v5236_v23, %v5124_v4  ;;  %v5601_v16 = vsel %vm5600_vm8, %v7175_v22, %v5597_v45  ;;  %v5609_v1 = vmul.f32 %v10297_v42, %v10275_v33  ;;  %v10317_v13 = vpop.f32.mrf.mxu2  ;;  %v4374_v23 = vld [vmem:[#allocation4 + $0x4c0] sm:$0xff] }
 0x6df   : > { %7182 = vrcp.f32 %v10301_v43  ;;  %v10309_v35 = vsel %vm5603_vm9, %v5605_v51, %v5601_v16  ;;  %vm5614_vm10 = vweird.f32 %v10297_v42  ;;  %v5127_v4 = vadd.f32 %v10135_v59, %v5014_v36  ;;  %v4051_v36 = vpop.permute.xlu0 %4050 }
 0x6e0   : > { %v5350_v38 = vadd.f32 %v10223_v24, %v5237_v6  ;;  %5283 = vmatmul.f32.gmra.mxu1 %v4367_v47  ;;  %6169 = vrot.lane.b32.xlu0 %v10309_v35, %s7469_s29  ;;  %v5610_v22 = vsub.f32 1.0, %v5609_v1  ;;  %v5617_v24 = vand.u32 2147483647, %v10275_v33  ;;  %v10335_v6 = vpop.f32.mrf.mxu3  ;;  %vm5615_vm12 = vmor %vm5613_vm11, %vm5614_vm10  ;;  %v5620_v16 = vor.u32 1.1754944e-38, %v5619_v56  ;;  %v4195_v33 = vld [vmem:[%s7518_s23 + $0x28] sm:$0xff]  ;;  %v10346_v1 = vpop.f32.mrf.mxu0  ;;  %4120 = vst.msk [vmem:[#allocation4 + $0x5d8] sm:$0xff] %vm889_vm5, %v4051_v36 }
 0x6e1   : > { %v4403_v0 = vld [vmem:[#allocation4 + $0x5a8] sm:$0xff]  ;;  %v4904_v18 = vadd.f32 %v9896_v27, %v4791_v11  ;;  %v5634_v27 = vand.u32 2147483648, %v10301_v43  ;;  %vm5628_vm15 = vweird.f32 %v10301_v43 }
 0x6e2   : > { %v10320_v52 = vadd.f32 %v5350_v38, %v4194_v31  ;;  %v5611_v12 = vmul.f32 %v10297_v42, %v5610_v22  ;;  %vm5618_vm13 = vcmp.eq.f32.partialorder %v5617_v24, 8.507059e+37  ;;  %v4410_v57 = vld [vmem:[#allocation4 + $0x5e0] sm:$0xff] }
 0x6e3   : > { %7037 = vmatmul.msk.f32.gmra.mxu2 %vm310_vm2, %v4403_v0  ;;  %v5017_v5 = vadd.f32 %v9707_v10, %v4904_v18  ;;  %v5635_v0 = vor.u32 1.1754944e-38, %v5634_v27 }
 0x6e4   : > { %v7181_v62 = vpop.eup %7180  ;;  %v7048_v63 = vmul.f32 -1.442695, %v10320_v52  ;;  %v5612_v51 = vadd.f32 %v10297_v42, %v5611_v12 }
 0x6e5   : > { %v7183_v47 = vpop.eup %7182  ;;  %v10331_v45 = vadd.f32 1.0, %v7181_v62  ;;  %v5239_v49 = vpop.f32.mrf.mxu1  ;;  %v5130_v62 = vadd.f32 %v10148_v46, %v5017_v5 }
 0x6e6   : > { %7184 = vpow2.f32 %v7048_v63  ;;  %v5240_v59 = vadd.f32 %v5239_v49, %v5127_v4  ;;  %v5624_v19 = vmul.f32 %v7183_v47, %v10301_v43  ;;  %v5616_v31 = vsel %vm5615_vm12, %v10297_v42, %v5612_v51  ;;  %v10355_v56 = vpop.f32.mrf.mxu2  ;;  %v4381_v4 = vld [vmem:[#allocation4 + $0x4f8] sm:$0xff] }
 0x6e7   : > { %7186 = vrcp.f32 %v10331_v45  ;;  %v10349_v38 = vsel %vm5618_vm13, %v5620_v16, %v5616_v31  ;;  %vm5629_vm14 = vweird.f32 %v7183_v47  ;;  %v4794_v49 = vadd.f32 %v9972_v55, %v9755_v26  ;;  %v4053_v31 = vpop.permute.xlu1 %4052 }
 0x6e8   : > { %v5353_v34 = vadd.f32 %v10241_v8, %v5240_v59  ;;  %5286 = vmatmul.f32.gmra.mxu1 %v4374_v23  ;;  %v5625_v22 = vsub.f32 1.0, %v5624_v19  ;;  %6171 = vrot.lane.b32.xlu1 %v10349_v38, %s7469_s29  ;;  %v5632_v8 = vand.u32 2147483647, %v10301_v43  ;;  %vm5630_vm0 = vmor %vm5628_vm15, %vm5629_vm14  ;;  %v4153_v59 = vld [vmem:[#allocation2 + $0x1a4] sm:$0xff]  ;;  %v4196_v43 = vld [vmem:[%s7518_s23 + $0x30] sm:$0xff]  ;;  %v10376_v18 = vpop.f32.mrf.mxu3  ;;  %v10384_v5 = vpop.f32.mrf.mxu0  ;;  %4121 = vst.msk [vmem:[#allocation4 + $0x610] sm:$0xff] %vm889_vm5, %v4053_v31  ;;  %vm5643_vm4 = vweird.f32 %v10331_v45 }
 0x6e9   : > { %4185 = vst.msk [vmem:[#allocation4 + $0x618] sm:$0xff] %vm310_vm2, %v4153_v59  ;;  %v4907_v26 = vadd.f32 %v9916_v20, %v4794_v49  ;;  %v5649_v20 = vand.u32 2147483648, %v10331_v45 }
 0x6ea   : > { %v10357_v42 = vadd.f32 %v5353_v34, %v4195_v33  ;;  %v5626_v12 = vmul.f32 %v7183_v47, %v5625_v22  ;;  %vm5633_vm1 = vcmp.eq.f32.partialorder %v5632_v8, 8.507059e+37 }
 0x6eb   : > { %7038 = vmatmul.msk.f32.gmra.mxu2 %vm310_vm2, %v4410_v57  ;;  %v5020_v22 = vadd.f32 %v9725_v53, %v4907_v26  ;;  %v4797_v53 = vadd.f32 %v9990_v48, %v9770_v29  ;;  %v4197_v48 = vld [vmem:[%s7518_s23 + $0x38] sm:$0xff] }
 0x6ec   : > { %v7185_v24 = vpop.eup %7184  ;;  %v7049_v10 = vmul.f32 -1.442695, %v10357_v42  ;;  %v5627_v63 = vadd.f32 %v7183_v47, %v5626_v12 }
 0x6ed   : > { %v7187_v11 = vpop.eup %7186  ;;  %v10366_v23 = vadd.f32 1.0, %v7185_v24  ;;  %v5242_v51 = vpop.f32.mrf.mxu1  ;;  %v5133_v8 = vadd.f32 %v10162_v2, %v5020_v22  ;;  %v5650_v2 = vor.u32 1.1754944e-38, %v5649_v20  ;;  %v4910_v29 = vadd.f32 %v9936_v54, %v4797_v53 }
 0x6ee   : > { %7188 = vpow2.f32 %v7049_v10  ;;  %v5243_v46 = vadd.f32 %v5242_v51, %v5130_v62  ;;  %v5631_v16 = vsel %vm5630_vm0, %v7183_v47, %v5627_v63  ;;  %v5639_v55 = vmul.f32 %v7187_v11, %v10331_v45  ;;  %v10381_v34 = vpop.f32.mrf.mxu2  ;;  %v4388_v63 = vld [vmem:[#allocation4 + $0x530] sm:$0xff] }
 0x6ef   : > { %7190 = vrcp.f32 %v10366_v23  ;;  %v10372_v19 = vsel %vm5633_vm1, %v5635_v0, %v5631_v16  ;;  %vm5644_vm3 = vweird.f32 %v7187_v11  ;;  %v4154_v0 = vld [vmem:[#allocation2 + $0x1b4] sm:$0xff]  ;;  %v5664_v26 = vand.u32 2147483648, %v10366_v23 }
 0x6f0   : > { %v5356_v33 = vadd.f32 %v10262_v58, %v5243_v46  ;;  %5289 = vmatmul.f32.gmra.mxu1 %v4381_v4  ;;  %6173 = vrot.lane.b32.xlu2 %v10372_v19, %s7469_s29  ;;  %v5640_v47 = vsub.f32 1.0, %v5639_v55  ;;  %v5647_v58 = vand.u32 2147483647, %v10331_v45  ;;  %v4417_v51 = vld [vmem:[#allocation4 + $0x618] sm:$0xff]  ;;  %vm5645_vm6 = vmor %vm5643_vm4, %vm5644_vm3  ;;  %4186 = vst.msk [vmem:[#allocation4 + $0x650] sm:$0xff] %vm310_vm2, %v4154_v0  ;;  %v5023_v55 = vadd.f32 %v10234_v44, %v4910_v29  ;;  %v10418_v31 = vpop.f32.mrf.mxu3  ;;  %v10421_v20 = vpop.f32.mrf.mxu0 }
 0x6f1   : > { %vm5658_vm9 = vweird.f32 %v10366_v23 }
 0x6f2   : > { %v10386_v27 = vadd.f32 %v5356_v33, %v4196_v43  ;;  %v5641_v36 = vmul.f32 %v7187_v11, %v5640_v47  ;;  %vm5648_vm7 = vcmp.eq.f32.partialorder %v5647_v58, 8.507059e+37  ;;  %v4055_v33 = vpop.permute.xlu2 %4054  ;;  %v5136_v44 = vadd.f32 %v10244_v15, %v5023_v55  ;;  %v4395_v58 = vld [vmem:[#allocation4 + $0x568] sm:$0xff] }
 0x6f3   : > { %7039 = vmatmul.msk.f32.gmra.mxu2 %vm310_vm2, %v4417_v51  ;;  %4122 = vst.msk [vmem:[#allocation4 + $0x648] sm:$0xff] %vm889_vm5, %v4055_v33 }
 0x6f4   : > { %v7189_v12 = vpop.eup %7188  ;;  %v7050_v24 = vmul.f32 -1.442695, %v10386_v27  ;;  %v5642_v49 = vadd.f32 %v7187_v11, %v5641_v36 }
 0x6f5   : > { %v7191_v62 = vpop.eup %7190  ;;  %v10395_v10 = vadd.f32 1.0, %v7189_v12  ;;  %v5245_v4 = vpop.f32.mrf.mxu1 }
 0x6f6   : > { %7192 = vpow2.f32 %v7050_v24  ;;  %v5246_v57 = vadd.f32 %v5245_v4, %v5133_v8  ;;  %v5654_v59 = vmul.f32 %v7191_v62, %v10366_v23  ;;  %v5646_v46 = vsel %vm5645_vm6, %v7187_v11, %v5642_v49  ;;  %v10412_v54 = vpop.f32.mrf.mxu2  ;;  %v4155_v49 = vld [vmem:[#allocation2 + $0x1bc] sm:$0xff] }
 0x6f7   : > { %7194 = vrcp.f32 %v10395_v10  ;;  %v10406_v16 = vsel %vm5648_vm7, %v5650_v2, %v5646_v46  ;;  %vm5659_vm8 = vweird.f32 %v7191_v62  ;;  %v4800_v24 = vadd.f32 %v10006_v25, %v9790_v60  ;;  %v4424_v15 = vld [vmem:[#allocation4 + $0x650] sm:$0xff]  ;;  %4187 = vst.msk [vmem:[#allocation4 + $0x688] sm:$0xff] %vm310_vm2, %v4155_v49 }
 0x6f8   : > { %v5359_v45 = vadd.f32 %v10287_v37, %v5246_v57  ;;  %5292 = vmatmul.f32.gmra.mxu1 %v4388_v63  ;;  %v5655_v43 = vsub.f32 1.0, %v5654_v59  ;;  %6175 = vrot.lane.b32.xlu0 %v10406_v16, %s7469_s29  ;;  %v5662_v37 = vand.u32 2147483647, %v10366_v23  ;;  %vm5660_vm10 = vmor %vm5658_vm9, %vm5659_vm8  ;;  %v5665_v63 = vor.u32 1.1754944e-38, %v5664_v26  ;;  %v4198_v23 = vld [vmem:[%s7518_s23 + $0x40] sm:$0xff]  ;;  %v4057_v59 = vpop.permute.xlu0 %4056 }
 0x6f9   : > { %v4913_v57 = vadd.f32 %v9956_v17, %v4800_v24  ;;  %4123 = vst.msk [vmem:[#allocation4 + $0x680] sm:$0xff] %vm889_vm5, %v4057_v59  ;;  %v5677_v17 = vand.u32 2147483647, %v10395_v10  ;;  %vm5673_vm13 = vweird.f32 %v10395_v10  ;;  %v10458_v24 = vpop.f32.mrf.mxu0  ;;  %v4409_v59 = vld [vmem:[#allocation4 + $0x5d8] sm:$0xff] }
 0x6fa   : > { %v10414_v47 = vadd.f32 %v5359_v45, %v4197_v48  ;;  %v5656_v11 = vmul.f32 %v7191_v62, %v5655_v43  ;;  %vm5663_vm11 = vcmp.eq.f32.partialorder %v5662_v37, 8.507059e+37  ;;  %v5679_v45 = vand.u32 2147483648, %v10395_v10 }
 0x6fb   : > { %7040 = vmatmul.msk.f32.gmra.mxu2 %vm310_vm2, %v4424_v15  ;;  %v5026_v48 = vadd.f32 %v10265_v40, %v4913_v57  ;;  %v10453_v40 = vpop.f32.mrf.mxu3  ;;  %vm5678_vm15 = vcmp.eq.f32.partialorder %v5677_v17, 8.507059e+37 }
 0x6fc   : > { %v7193_v22 = vpop.eup %7192  ;;  %v7051_v36 = vmul.f32 -1.442695, %v10414_v47  ;;  %v5657_v12 = vadd.f32 %v7191_v62, %v5656_v11  ;;  %v4803_v11 = vadd.f32 %v10023_v7, %v9807_v3 }
 0x6fd   : > { %v7195_v8 = vpop.eup %7194  ;;  %v10427_v53 = vadd.f32 1.0, %v7193_v22  ;;  %v5248_v4 = vpop.f32.mrf.mxu1  ;;  %v5139_v55 = vadd.f32 %v10270_v61, %v5026_v48 }
 0x6fe   : > { %7196 = vpow2.f32 %v7051_v36  ;;  %v5249_v51 = vadd.f32 %v5248_v4, %v5136_v44  ;;  %v5661_v0 = vsel %vm5660_vm10, %v7191_v62, %v5657_v12  ;;  %v5669_v25 = vmul.f32 %v7195_v8, %v10395_v10  ;;  %v10441_v29 = vpop.f32.mrf.mxu2  ;;  %v4402_v44 = vld [vmem:[#allocation4 + $0x5a0] sm:$0xff]  ;;  %v4156_v12 = vld [vmem:[#allocation2 + $0x1cc] sm:$0xff] }
 0x6ff   : > { %7198 = vrcp.f32 %v10427_v53  ;;  %v10434_v60 = vsel %vm5663_vm11, %v5665_v63, %v5661_v0  ;;  %vm5674_vm12 = vweird.f32 %v7195_v8  ;;  %v5680_v4 = vor.u32 1.1754944e-38, %v5679_v45  ;;  %4188 = vst.msk [vmem:[#allocation4 + $0x6c0] sm:$0xff] %vm310_vm2, %v4156_v12  ;;  %v4199_v10 = vld [vmem:[%s7518_s23 + $0x48] sm:$0xff] }
 0x700   : > { %v5362_v2 = vadd.f32 %v10317_v13, %v5249_v51  ;;  %5295 = vmatmul.f32.gmra.mxu1 %v4395_v58  ;;  %6177 = vrot.lane.b32.xlu1 %v10434_v60, %s7469_s29  ;;  %v5670_v62 = vsub.f32 1.0, %v5669_v25  ;;  %v4431_v58 = vld [vmem:[#allocation4 + $0x688] sm:$0xff]  ;;  %vm5675_vm14 = vmor %vm5673_vm13, %vm5674_vm12  ;;  %v4916_v7 = vadd.f32 %v9978_v32, %v4803_v11  ;;  %v4059_v25 = vpop.permute.xlu1 %4058  ;;  %vm5688_vm1 = vweird.f32 %v10427_v53  ;;  %v4157_v11 = vld [vmem:[#allocation2 + $0x1d4] sm:$0xff] }
 0x701   : > { %4124 = vst.msk [vmem:[#allocation4 + $0x6b8] sm:$0xff] %vm889_vm5, %v4059_v25  ;;  %v10497_v12 = vpop.f32.mrf.mxu0 }
 0x702   : > { %v10444_v46 = vadd.f32 %v5362_v2, %v4198_v23  ;;  %v5671_v43 = vmul.f32 %v7195_v8, %v5670_v62  ;;  %v5029_v0 = vadd.f32 %v10292_v30, %v4916_v7  ;;  %v5694_v23 = vand.u32 2147483648, %v10427_v53  ;;  %4189 = vst.msk [vmem:[#allocation4 + $0x6f8] sm:$0xff] %vm310_vm2, %v4157_v11  ;;  %v11525_v11 = vld [vmem:[#allocation39_spill] sm:$0xff] }
 0x703   : > { %7041 = vmatmul.msk.f32.gmra.mxu2 %vm310_vm2, %v4431_v58 }
 0x704   : > { %v7197_v13 = vpop.eup %7196  ;;  %v7052_v26 = vmul.f32 -1.442695, %v10444_v46  ;;  %v5672_v36 = vadd.f32 %v7195_v8, %v5671_v43  ;;  %v5142_v62 = vadd.f32 %v10303_v39, %v5029_v0  ;;  %v4806_v43 = vadd.f32 %v10037_v14, %v9824_v9  ;;  %v4200_v9 = vld [vmem:[%s7518_s23 + $0x50] sm:$0xff] }
 0x705   : > { %v7199_v33 = vpop.eup %7198  ;;  %v10455_v37 = vadd.f32 1.0, %v7197_v13  ;;  %v5251_v22 = vpop.f32.mrf.mxu1 }
 0x706   : > { %7200 = vpow2.f32 %v7052_v26  ;;  %v5252_v61 = vadd.f32 %v5251_v22, %v5139_v55  ;;  %v5684_v3 = vmul.f32 %v7199_v33, %v10427_v53  ;;  %v5676_v63 = vsel %vm5675_vm14, %v7195_v8, %v5672_v36  ;;  %v10474_v32 = vpop.f32.mrf.mxu2  ;;  %v4438_v26 = vld [vmem:[#allocation4 + $0x6c0] sm:$0xff] }
 0x707   : > { %7202 = vrcp.f32 %v10455_v37  ;;  %v10468_v49 = vsel %vm5678_vm15, %v5680_v4, %v5676_v63  ;;  %vm5689_vm0 = vweird.f32 %v7199_v33  ;;  %v5695_v55 = vor.u32 1.1754944e-38, %v5694_v23  ;;  %v11522_v36 = vld [vmem:[#allocation37_spill] sm:$0xff]  ;;  %v4061_v4 = vpop.permute.xlu2 %4060 }
 0x708   : > { %v5365_v15 = vadd.f32 %v10355_v56, %v5252_v61  ;;  %5298 = vmatmul.f32.gmra.mxu1 %v4402_v44  ;;  %11521 = vst [vmem:[#allocation66_spill] sm:$0xff] %v10468_v49  ;;  %v5685_v51 = vsub.f32 1.0, %v5684_v3  ;;  %6179 = vrot.lane.b32.xlu2 %v10468_v49, %s7469_s29  ;;  %v5692_v56 = vand.u32 2147483647, %v10427_v53  ;;  %vm5690_vm3 = vmor %vm5688_vm1, %vm5689_vm0  ;;  %v10489_v53 = vpop.f32.mrf.mxu3  ;;  %v4919_v58 = vadd.f32 %v11522_v36, %v4806_v43 }
 0x709   : > { %v5709_v63 = vand.u32 2147483648, %v10455_v37  ;;  %4125 = vst.msk [vmem:[#allocation4 + $0x6f0] sm:$0xff] %vm889_vm5, %v4061_v4  ;;  %vm5703_vm5 = vweird.f32 %v10455_v37  ;;  %v10537_v4 = vpop.f32.mrf.mxu0 }
 0x70a   : > { %v10476_v57 = vadd.f32 %v5365_v15, %v4199_v10  ;;  %v5686_v8 = vmul.f32 %v7199_v33, %v5685_v51  ;;  %vm5693_vm4 = vcmp.eq.f32.partialorder %v5692_v56, 8.507059e+37  ;;  %v5032_v7 = vadd.f32 %v10335_v6, %v4919_v58  ;;  %v11524_v56 = vld [vmem:[#allocation45_spill] sm:$0xff] }
 0x70b   : > { %7042 = vmatmul.msk.f32.gmra.mxu2 %vm310_vm2, %v4438_v26 }
 0x70c   : > { %v7201_v2 = vpop.eup %7200  ;;  %v7053_v30 = vmul.f32 -1.442695, %v10476_v57  ;;  %v5687_v48 = vadd.f32 %v7199_v33, %v5686_v8  ;;  %v5145_v0 = vadd.f32 %v10346_v1, %v5032_v7  ;;  %v11523_v8 = vld [vmem:[#allocation29_spill] sm:$0xff]  ;;  %v5710_v1 = vor.u32 1.1754944e-38, %v5709_v63 }
 0x70d   : > { %v7203_v45 = vpop.eup %7202  ;;  %v10485_v17 = vadd.f32 1.0, %v7201_v2  ;;  %v5254_v13 = vpop.f32.mrf.mxu1  ;;  %v4809_v6 = vadd.f32 %v11524_v56, %v11523_v8 }
 0x70e   : > { %7204 = vpow2.f32 %v7053_v30  ;;  %v5255_v39 = vadd.f32 %v5254_v13, %v5142_v62  ;;  %v5691_v22 = vsel %vm5690_vm3, %v7199_v33, %v5687_v48  ;;  %v5699_v44 = vmul.f32 %v7203_v45, %v10455_v37  ;;  %v10502_v3 = vpop.f32.mrf.mxu2  ;;  %v4416_v30 = vld [vmem:[#allocation4 + $0x610] sm:$0xff]  ;;  %v4445_v48 = vld [vmem:[#allocation4 + $0x6f8] sm:$0xff] }
 0x70f   : > { %7206 = vrcp.f32 %v10485_v17  ;;  %v10493_v14 = vsel %vm5693_vm4, %v5695_v55, %v5691_v22  ;;  %vm5704_vm6 = vweird.f32 %v7203_v45  ;;  %v4201_v55 = vld [vmem:[%s7518_s23 + $0x58] sm:$0xff]  ;;  %v5722_v36 = vand.u32 2147483647, %v10485_v17 }
 0x710   : > { %v5368_v33 = vadd.f32 %v10381_v34, %v5255_v39  ;;  %5301 = vmatmul.f32.gmra.mxu1 %v4409_v59  ;;  %6181 = vrot.lane.b32.xlu0 %v10493_v14, %s7469_s29  ;;  %v5700_v61 = vsub.f32 1.0, %v5699_v44  ;;  %v5707_v34 = vand.u32 2147483647, %v10455_v37  ;;  %vm5705_vm7 = vmor %vm5703_vm5, %vm5704_vm6  ;;  %v4922_v39 = vadd.f32 %v11525_v11, %v4809_v6  ;;  %v10526_v44 = vpop.f32.mrf.mxu3  ;;  %v4423_v6 = vld [vmem:[#allocation4 + $0x648] sm:$0xff] }
 0x711   : > { %v5724_v58 = vand.u32 2147483648, %v10485_v17  ;;  %vm5718_vm10 = vweird.f32 %v10485_v17  ;;  %vm5723_vm12 = vcmp.eq.f32.partialorder %v5722_v36, 8.507059e+37 }
 0x712   : > { %v10505_v10 = vadd.f32 %v5368_v33, %v4200_v9  ;;  %v5701_v15 = vmul.f32 %v7203_v45, %v5700_v61  ;;  %vm5708_vm8 = vcmp.eq.f32.partialorder %v5707_v34, 8.507059e+37 }
 0x713   : > { %7043 = vmatmul.msk.f32.gmra.mxu2 %vm310_vm2, %v4445_v48  ;;  %v4202_v48 = vld [vmem:[%s7518_s23 + $0x60] sm:$0xff] }
 0x714   : > { %v7205_v51 = vpop.eup %7204  ;;  %v7054_v23 = vmul.f32 -1.442695, %v10505_v10  ;;  %v5702_v59 = vadd.f32 %v7203_v45, %v5701_v15 }
 0x715   : > { %v7207_v25 = vpop.eup %7206  ;;  %v10514_v2 = vadd.f32 1.0, %v7205_v51  ;;  %v5257_v62 = vpop.f32.mrf.mxu1 }
 0x716   : > { %7208 = vpow2.f32 %v7054_v23  ;;  %v5258_v43 = vadd.f32 %v5257_v62, %v5145_v0  ;;  %v5714_v13 = vmul.f32 %v7207_v25, %v10485_v17  ;;  %v5706_v26 = vsel %vm5705_vm7, %v7203_v45, %v5702_v59  ;;  %v10532_v33 = vpop.f32.mrf.mxu2  ;;  %v11527_v0 = vld [vmem:[#allocation30_spill] sm:$0xff]  ;;  %v11528_v23 = vld [vmem:[#allocation47_spill] sm:$0xff] }
 0x717   : > { %7210 = vrcp.f32 %v10514_v2  ;;  %v10524_v37 = vsel %vm5708_vm8, %v5710_v1, %v5706_v26  ;;  %v5035_v45 = vadd.f32 %v10376_v18, %v4922_v39  ;;  %vm5719_vm9 = vweird.f32 %v7207_v25 }
 0x718   : > { %v5371_v22 = vadd.f32 %v10412_v54, %v5258_v43  ;;  %5304 = vmatmul.f32.gmra.mxu1 %v4416_v30  ;;  %11526 = vst [vmem:[#allocation37_spill] sm:$0xff] %v10524_v37  ;;  %v5715_v9 = vsub.f32 1.0, %v5714_v13  ;;  %6183 = vrot.lane.b32.xlu1 %v10524_v37, %s7469_s29  ;;  %v4812_v8 = vadd.f32 %v11528_v23, %v11527_v0  ;;  %vm5720_vm11 = vmor %vm5718_vm10, %vm5719_vm9  ;;  %v5725_v62 = vor.u32 1.1754944e-38, %v5724_v58  ;;  %v11530_v43 = vld [vmem:[#allocation41_spill] sm:$0xff]  ;;  %v10562_v36 = vpop.f32.mrf.mxu3 }
 0x719   : > { %v5148_v63 = vadd.f32 %v10384_v5, %v5035_v45  ;;  %v5737_v26 = vand.u32 2147483647, %v10514_v2  ;;  %vm5733_vm14 = vweird.f32 %v10514_v2 }
 0x71a   : > { %v10535_v61 = vadd.f32 %v5371_v22, %v4201_v55  ;;  %v5716_v54 = vmul.f32 %v7207_v25, %v5715_v9  ;;  %v4925_v1 = vadd.f32 %v11530_v43, %v4812_v8  ;;  %v4430_v8 = vld [vmem:[#allocation4 + $0x680] sm:$0xff] }
 0x71b   : > { %vm5738_vm0 = vcmp.eq.f32.partialorder %v5737_v26, 8.507059e+37 }
 0x71c   : > { %v7209_v7 = vpop.eup %7208  ;;  %v7055_v15 = vmul.f32 -1.442695, %v10535_v61  ;;  %v5717_v34 = vadd.f32 %v7207_v25, %v5716_v54  ;;  %v5038_v39 = vadd.f32 %v10418_v31, %v4925_v1  ;;  %v10569_v31 = vpop.f32.mrf.mxu0 }
 0x71d   : > { %v7211_v51 = vpop.eup %7210  ;;  %v10544_v18 = vadd.f32 1.0, %v7209_v7  ;;  %v5260_v56 = vpop.f32.mrf.mxu1 }
 0x71e   : > { %7212 = vpow2.f32 %v7055_v15  ;;  %v5261_v30 = vadd.f32 %v5260_v56, %v5148_v63  ;;  %v5721_v5 = vsel %vm5720_vm11, %v7207_v25, %v5717_v34  ;;  %v5729_v59 = vmul.f32 %v7211_v51, %v10514_v2  ;;  %v10557_v11 = vpop.f32.mrf.mxu2  ;;  %v11531_v63 = vld [vmem:[#allocation31_spill] sm:$0xff]  ;;  %v11532_v15 = vld [vmem:[#allocation49_spill] sm:$0xff] }
 0x71f   : > { %7214 = vrcp.f32 %v10544_v18  ;;  %v10549_v17 = vsel %vm5723_vm12, %v5725_v62, %v5721_v5  ;;  %v5739_v25 = vand.u32 2147483648, %v10514_v2  ;;  %vm5734_vm13 = vweird.f32 %v7211_v51  ;;  %v4203_v2 = vld [vmem:[%s7518_s23 + $0x68] sm:$0xff]  ;;  %v11533_v5 = vld [vmem:[#allocation43_spill] sm:$0xff] }
 0x720   : > { %11529 = vst [vmem:[#allocation29_spill] sm:$0xff] %v10549_v17  ;;  %v5374_v13 = vadd.f32 %v10441_v29, %v5261_v30  ;;  %5307 = vmatmul.f32.gmra.mxu1 %v4423_v6  ;;  %6185 = vrot.lane.b32.xlu2 %v10549_v17, %s7469_s29  ;;  %v5730_v55 = vsub.f32 1.0, %v5729_v59  ;;  %v5151_v58 = vadd.f32 %v10421_v20, %v5038_v39  ;;  %vm5735_vm15 = vmor %vm5733_vm14, %vm5734_vm13  ;;  %v5752_v1 = vand.u32 2147483647, %v10544_v18 }
 0x721   : > { %v4815_v34 = vadd.f32 %v11532_v15, %v11531_v63  ;;  %v5740_v56 = vor.u32 1.1754944e-38, %v5739_v25  ;;  %vm5748_vm3 = vweird.f32 %v10544_v18  ;;  %v10594_v15 = vpop.f32.mrf.mxu3 }
 0x722   : > { %v10560_v22 = vadd.f32 %v5374_v13, %v4202_v48  ;;  %v5731_v9 = vmul.f32 %v7211_v51, %v5730_v55  ;;  %vm5753_vm6 = vcmp.eq.f32.partialorder %v5752_v1, 8.507059e+37 }
 0x723   : > { %v4928_v59 = vadd.f32 %v11533_v5, %v4815_v34 }
 0x724   : > { %v7213_v29 = vpop.eup %7212  ;;  %v7056_v45 = vmul.f32 -1.442695, %v10560_v22  ;;  %v5732_v54 = vadd.f32 %v7211_v51, %v5731_v9 }
 0x725   : > { %v7215_v7 = vpop.eup %7214  ;;  %v10571_v0 = vadd.f32 1.0, %v7213_v29  ;;  %v5263_v23 = vpop.f32.mrf.mxu1  ;;  %v5041_v55 = vadd.f32 %v10453_v40, %v4928_v59 }
 0x726   : > { %7216 = vpow2.f32 %v7056_v45  ;;  %v5264_v20 = vadd.f32 %v5263_v23, %v5151_v58  ;;  %v5736_v6 = vsel %vm5735_vm15, %v7211_v51, %v5732_v54  ;;  %v5744_v62 = vmul.f32 %v7215_v7, %v10544_v18  ;;  %v10584_v13 = vpop.f32.mrf.mxu2  ;;  %v11534_v45 = vld [vmem:[#allocation32_spill] sm:$0xff]  ;;  %v11535_v54 = vld [vmem:[#allocation51_spill] sm:$0xff] }
 0x727   : > { %7218 = vrcp.f32 %v10571_v0  ;;  %v10576_v30 = vsel %vm5738_vm0, %v5740_v56, %v5736_v6  ;;  %v5754_v51 = vand.u32 2147483648, %v10544_v18  ;;  %vm5749_vm1 = vweird.f32 %v7215_v7  ;;  %v4437_v23 = vld [vmem:[#allocation4 + $0x6b8] sm:$0xff]  ;;  %v10599_v18 = vpop.f32.mrf.mxu0  ;;  %v4204_v6 = vld [vmem:[%s7518_s23 + $0x70] sm:$0xff] }
 0x728   : > { %v5377_v48 = vadd.f32 %v10474_v32, %v5264_v20  ;;  %5310 = vmatmul.f32.gmra.mxu1 %v4430_v8  ;;  %6187 = vrot.lane.b32.xlu0 %v10576_v30, %s7469_s29  ;;  %v5745_v43 = vsub.f32 1.0, %v5744_v62  ;;  %v5154_v32 = vadd.f32 %v10458_v24, %v5041_v55  ;;  %v4818_v63 = vadd.f32 %v11535_v54, %v11534_v45  ;;  %vm5750_vm4 = vmor %vm5748_vm3, %vm5749_vm1  ;;  %v11538_v45 = vld [vmem:[#allocation33_spill] sm:$0xff] }
 0x729   : > { %v5755_v8 = vor.u32 1.1754944e-38, %v5754_v51  ;;  %vm5763_vm7 = vweird.f32 %v10571_v0  ;;  %v11539_v54 = vld [vmem:[#allocation53_spill] sm:$0xff] }
 0x72a   : > { %v10587_v26 = vadd.f32 %v5377_v48, %v4203_v2  ;;  %v5746_v25 = vmul.f32 %v7215_v7, %v5745_v43  ;;  %v11537_v2 = vld [vmem:[#allocation46_spill] sm:$0xff]  ;;  %v5769_v43 = vand.u32 2147483648, %v10571_v0 }
 0x72b   : > { %v4931_v5 = vadd.f32 %v11537_v2, %v4818_v63  ;;  %v4821_v63 = vadd.f32 %v11539_v54, %v11538_v45  ;;  %v11541_v2 = vld [vmem:[#allocation48_spill] sm:$0xff]  ;;  %v11542_v54 = vld [vmem:[#allocation34_spill] sm:$0xff] }
 0x72c   : > { %v7217_v39 = vpop.eup %7216  ;;  %v7057_v9 = vmul.f32 -1.442695, %v10587_v26  ;;  %v5747_v29 = vadd.f32 %v7215_v7, %v5746_v25 }
 0x72d   : > { %v7219_v58 = vpop.eup %7218  ;;  %v10596_v40 = vadd.f32 1.0, %v7217_v39  ;;  %v5266_v34 = vpop.f32.mrf.mxu1  ;;  %v5044_v1 = vadd.f32 %v10489_v53, %v4931_v5  ;;  %v4934_v5 = vadd.f32 %v11541_v2, %v4821_v63  ;;  %v11543_v63 = vld [vmem:[#allocation55_spill] sm:$0xff]  ;;  %v11544_v2 = vld [vmem:[#allocation50_spill] sm:$0xff] }
 0x72e   : > { %7220 = vpow2.f32 %v7057_v9  ;;  %v5267_v24 = vadd.f32 %v5266_v34, %v5154_v32  ;;  %v5751_v56 = vsel %vm5750_vm4, %v7215_v7, %v5747_v29  ;;  %v5759_v20 = vmul.f32 %v7219_v58, %v10571_v0  ;;  %v10614_v25 = vpop.f32.mrf.mxu2 }
 0x72f   : > { %7222 = vrcp.f32 %v10596_v40  ;;  %v10603_v62 = vsel %vm5753_vm6, %v5755_v8, %v5751_v56  ;;  %v5767_v7 = vand.u32 2147483647, %v10571_v0  ;;  %vm5764_vm5 = vweird.f32 %v7219_v58  ;;  %v4205_v0 = vld [vmem:[%s7518_s23 + $0x78] sm:$0xff] }
 0x730   : > { %11536 = vst [vmem:[#allocation45_spill] sm:$0xff] %v10603_v62  ;;  %v5380_v59 = vadd.f32 %v10502_v3, %v5267_v24  ;;  %5313 = vmatmul.f32.gmra.mxu1 %v4437_v23  ;;  %6189 = vrot.lane.b32.xlu1 %v10603_v62, %s7469_s29  ;;  %v5760_v48 = vsub.f32 1.0, %v5759_v20  ;;  %v5157_v3 = vadd.f32 %v10497_v12, %v5044_v1  ;;  %v4444_v23 = vld [vmem:[#allocation4 + $0x6f0] sm:$0xff]  ;;  %vm5765_vm8 = vmor %vm5763_vm7, %vm5764_vm5  ;;  %v5770_v8 = vor.u32 1.1754944e-38, %v5769_v43  ;;  %v10624_v20 = vpop.f32.mrf.mxu3 }
 0x731   : > { %vm5768_vm9 = vcmp.eq.f32.partialorder %v5767_v7, 8.507059e+37  ;;  %v10634_v7 = vpop.f32.mrf.mxu0  ;;  %v5784_v43 = vand.u32 2147483648, %v10596_v40  ;;  %v5047_v1 = vadd.f32 %v10526_v44, %v4934_v5  ;;  %vm5778_vm11 = vweird.f32 %v10596_v40 }
 0x732   : > { %v10612_v51 = vadd.f32 %v5380_v59, %v4204_v6  ;;  %v5761_v55 = vmul.f32 %v7219_v58, %v5760_v48 }
 0x734   : > { %v7221_v39 = vpop.eup %7220  ;;  %v7058_v32 = vmul.f32 -1.442695, %v10612_v51  ;;  %v5762_v9 = vadd.f32 %v7219_v58, %v5761_v55 }
 0x735   : > { %v7223_v29 = vpop.eup %7222  ;;  %v10621_v53 = vadd.f32 1.0, %v7221_v39  ;;  %v5269_v34 = vpop.f32.mrf.mxu1 }
 0x736   : > { %7224 = vpow2.f32 %v7058_v32  ;;  %v5270_v24 = vadd.f32 %v5269_v34, %v5157_v3  ;;  %v5766_v12 = vsel %vm5765_vm8, %v7219_v58, %v5762_v9  ;;  %v5774_v56 = vmul.f32 %v7223_v29, %v10596_v40 }
 0x737   : > { %7226 = vrcp.f32 %v10621_v53  ;;  %v10628_v6 = vsel %vm5768_vm9, %v5770_v8, %v5766_v12  ;;  %v5782_v58 = vand.u32 2147483647, %v10596_v40  ;;  %vm5779_vm10 = vweird.f32 %v7223_v29  ;;  %v4206_v40 = vld [vmem:[%s7518_s23 + $0x80] sm:$0xff] }
 0x738   : > { %11540 = vst [vmem:[#allocation39_spill] sm:$0xff] %v10628_v6  ;;  %v5383_v59 = vadd.f32 %v10532_v33, %v5270_v24  ;;  %5316 = vmatmul.f32.gmra.mxu1 %v4444_v23  ;;  %6191 = vrot.lane.b32.xlu2 %v10628_v6, %s7469_s29  ;;  %v5775_v48 = vsub.f32 1.0, %v5774_v56  ;;  %v5160_v33 = vadd.f32 %v10537_v4, %v5047_v1  ;;  %vm5780_vm12 = vmor %vm5778_vm11, %vm5779_vm10  ;;  %v5785_v8 = vor.u32 1.1754944e-38, %v5784_v43  ;;  %v10648_v24 = vpop.f32.mrf.mxu2 }
 0x739   : > { %v4824_v34 = vadd.f32 %v11543_v63, %v11542_v54  ;;  %vm5783_vm13 = vcmp.eq.f32.partialorder %v5782_v58, 8.507059e+37  ;;  %v10659_v58 = vpop.f32.mrf.mxu3  ;;  %v5797_v43 = vand.u32 2147483647, %v10621_v53  ;;  %vm5793_vm15 = vweird.f32 %v10621_v53 }
 0x73a   : > { %v10639_v55 = vadd.f32 %v5383_v59, %v4205_v0  ;;  %v5776_v39 = vmul.f32 %v7223_v29, %v5775_v48 }
 0x73b   : > { %v4937_v5 = vadd.f32 %v11544_v2, %v4824_v34  ;;  %v11545_v34 = vld [vmem:[#allocation35_spill] sm:$0xff]  ;;  %vm5798_vm1 = vcmp.eq.f32.partialorder %v5797_v43, 8.507059e+37  ;;  %v4207_v2 = vld [vmem:[%s7518_s23 + $0x88] sm:$0xff] }
 0x73c   : > { %v7225_v3 = vpop.eup %7224  ;;  %v7059_v32 = vmul.f32 -1.442695, %v10639_v55  ;;  %v5777_v9 = vadd.f32 %v7223_v29, %v5776_v39 }
 0x73d   : > { %v7227_v45 = vpop.eup %7226  ;;  %v10646_v23 = vadd.f32 1.0, %v7225_v3  ;;  %v5272_v44 = vpop.f32.mrf.mxu1  ;;  %v5050_v1 = vadd.f32 %v10562_v36, %v4937_v5 }
 0x73e   : > { %7228 = vpow2.f32 %v7059_v32  ;;  %v5273_v4 = vadd.f32 %v5272_v44, %v5160_v33  ;;  %v5781_v12 = vsel %vm5780_vm12, %v7223_v29, %v5777_v9  ;;  %v5789_v56 = vmul.f32 %v7227_v45, %v10621_v53  ;;  %v10666_v33 = vpop.f32.mrf.mxu0  ;;  %v11546_v44 = vld [vmem:[#allocation57_spill] sm:$0xff] }
 0x73f   : > { %7230 = vrcp.f32 %v10646_v23  ;;  %v10653_v0 = vsel %vm5783_vm13, %v5785_v8, %v5781_v12  ;;  %v5799_v29 = vand.u32 2147483648, %v10621_v53  ;;  %vm5794_vm14 = vweird.f32 %v7227_v45 }
 0x740   : > { %v5386_v59 = vadd.f32 %v10557_v11, %v5273_v4  ;;  %6193 = vrot.lane.b32.xlu0 %v10653_v0, %s7469_s29  ;;  %v5790_v48 = vsub.f32 1.0, %v5789_v56  ;;  %v5163_v11 = vadd.f32 %v10569_v31, %v5050_v1  ;;  %v4827_v8 = vadd.f32 %v11546_v44, %v11545_v34  ;;  %vm5795_vm0 = vmor %vm5793_vm15, %vm5794_vm14  ;;  %v10680_v53 = vpop.f32.mrf.mxu2 }
 0x741   : > { %v5800_v12 = vor.u32 1.1754944e-38, %v5799_v29  ;;  %v5812_v29 = vand.u32 2147483647, %v10646_v23  ;;  %vm5808_vm4 = vweird.f32 %v10646_v23 }
 0x742   : > { %v10664_v39 = vadd.f32 %v5386_v59, %v4206_v40  ;;  %v5791_v3 = vmul.f32 %v7227_v45, %v5790_v48  ;;  %v11548_v59 = vld [vmem:[#allocation52_spill] sm:$0xff] }
 0x743   : > { %v4940_v48 = vadd.f32 %v11548_v59, %v4827_v8  ;;  %vm5813_vm5 = vcmp.eq.f32.partialorder %v5812_v29, 8.507059e+37 }
 0x744   : > { %v7229_v32 = vpop.eup %7228  ;;  %v7060_v9 = vmul.f32 -1.442695, %v10664_v39  ;;  %v5792_v54 = vadd.f32 %v7227_v45, %v5791_v3 }
 0x745   : > { %v7231_v63 = vpop.eup %7230  ;;  %v10673_v36 = vadd.f32 1.0, %v7229_v32  ;;  %v5275_v4 = vpop.f32.mrf.mxu1  ;;  %v5053_v3 = vadd.f32 %v10594_v15, %v4940_v48 }
 0x746   : > { %7232 = vpow2.f32 %v7060_v9  ;;  %v5276_v56 = vadd.f32 %v5275_v4, %v5163_v11  ;;  %v5796_v40 = vsel %vm5795_vm0, %v7227_v45, %v5792_v54  ;;  %v5804_v31 = vmul.f32 %v7231_v63, %v10646_v23  ;;  %v10691_v9 = vpop.f32.mrf.mxu3  ;;  %v11549_v4 = vld [vmem:[#allocation36_spill] sm:$0xff]  ;;  %v10698_v15 = vpop.f32.mrf.mxu0 }
 0x747   : > { %7234 = vrcp.f32 %v10673_v36  ;;  %v10678_v5 = vsel %vm5798_vm1, %v5800_v12, %v5796_v40  ;;  %v5814_v45 = vand.u32 2147483648, %v10646_v23  ;;  %vm5809_vm3 = vweird.f32 %v7231_v63  ;;  %v11550_v12 = vld [vmem:[#allocation59_spill] sm:$0xff] }
 0x748   : > { %11547 = vst [vmem:[#allocation30_spill] sm:$0xff] %v10678_v5  ;;  %v5389_v1 = vadd.f32 %v10584_v13, %v5276_v56  ;;  %6195 = vrot.lane.b32.xlu1 %v10678_v5, %s7469_s29  ;;  %v5805_v43 = vsub.f32 1.0, %v5804_v31  ;;  %v5166_v34 = vadd.f32 %v10599_v18, %v5053_v3  ;;  %v4830_v56 = vadd.f32 %v11550_v12, %v11549_v4  ;;  %vm5810_vm6 = vmor %vm5808_vm4, %vm5809_vm3  ;;  %v4208_v23 = vld [vmem:[%s7518_s23 + $0x90] sm:$0xff]  ;;  %v11567_v5 = vld [vmem:[#allocation62_spill] sm:$0xff] }
 0x749   : > { %v5827_v29 = vand.u32 2147483647, %v10673_v36  ;;  %vm5823_vm8 = vweird.f32 %v10673_v36 }
 0x74a   : > { %v10689_v32 = vadd.f32 %v5389_v1, %v4207_v2  ;;  %v5806_v11 = vmul.f32 %v7231_v63, %v5805_v43  ;;  %v5815_v2 = vor.u32 1.1754944e-38, %v5814_v45  ;;  %v11552_v43 = vld [vmem:[#allocation54_spill] sm:$0xff]  ;;  %v5829_v45 = vand.u32 2147483648, %v10673_v36 }
 0x74b   : > { %v4943_v3 = vadd.f32 %v11552_v43, %v4830_v56  ;;  %vm5828_vm10 = vcmp.eq.f32.partialorder %v5827_v29, 8.507059e+37 }
 0x74c   : > { %v7233_v54 = vpop.eup %7232  ;;  %v7061_v13 = vmul.f32 -1.442695, %v10689_v32  ;;  %v5807_v44 = vadd.f32 %v7231_v63, %v5806_v11  ;;  %v5830_v43 = vor.u32 1.1754944e-38, %v5829_v45 }
 0x74d   : > { %v7235_v8 = vpop.eup %7234  ;;  %v10700_v40 = vadd.f32 1.0, %v7233_v54  ;;  %v5278_v31 = vpop.f32.mrf.mxu1 }
 0x74e   : > { %7236 = vpow2.f32 %v7061_v13  ;;  %v5279_v18 = vadd.f32 %v5278_v31, %v5166_v34  ;;  %v5811_v59 = vsel %vm5810_vm6, %v7231_v63, %v5807_v44  ;;  %v5819_v48 = vmul.f32 %v7235_v8, %v10673_v36  ;;  %v10713_v63 = vpop.f32.mrf.mxu2  ;;  %v4209_v36 = vld [vmem:[%s7518_s23 + $0x98] sm:$0xff] }
 0x74f   : > { %7238 = vrcp.f32 %v10700_v40  ;;  %v10705_v1 = vsel %vm5813_vm5, %v5815_v2, %v5811_v59  ;;  %v5056_v34 = vadd.f32 %v10624_v20, %v4943_v3  ;;  %vm5824_vm7 = vweird.f32 %v7235_v8  ;;  %v11553_v2 = vld [vmem:[#allocation38_spill] sm:$0xff] }
 0x750   : > { %11551 = vst [vmem:[#allocation47_spill] sm:$0xff] %v10705_v1  ;;  %v5392_v11 = vadd.f32 %v10614_v25, %v5279_v18  ;;  %6197 = vrot.lane.b32.xlu2 %v10705_v1, %s7469_s29  ;;  %v5820_v54 = vsub.f32 1.0, %v5819_v48  ;;  %v11554_v18 = vld [vmem:[#allocation61_spill] sm:$0xff]  ;;  %v10723_v48 = vpop.f32.mrf.mxu3  ;;  %vm5825_vm9 = vmor %vm5823_vm8, %vm5824_vm7  ;;  %v5842_v45 = vand.u32 2147483647, %v10700_v40  ;;  %vm5838_vm12 = vweird.f32 %v10700_v40  ;;  %v11559_v1 = vld [vmem:[#allocation58_spill] sm:$0xff] }
 0x751   : > { %v5169_v12 = vadd.f32 %v10634_v7, %v5056_v34  ;;  %v4833_v59 = vadd.f32 %v11554_v18, %v11553_v2 }
 0x752   : > { %v10716_v13 = vadd.f32 %v5392_v11, %v4208_v23  ;;  %v5821_v44 = vmul.f32 %v7235_v8, %v5820_v54  ;;  %v10728_v54 = vpop.f32.mrf.mxu0  ;;  %vm5843_vm14 = vcmp.eq.f32.partialorder %v5842_v45, 8.507059e+37 }
 0x754   : > { %v7237_v4 = vpop.eup %7236  ;;  %v7062_v25 = vmul.f32 -1.442695, %v10716_v13  ;;  %v5822_v56 = vadd.f32 %v7235_v8, %v5821_v44  ;;  %v11555_v44 = vld [vmem:[#allocation56_spill] sm:$0xff] }
 0x755   : > { %v7239_v31 = vpop.eup %7238  ;;  %v10725_v20 = vadd.f32 1.0, %v7237_v4  ;;  %v5281_v23 = vpop.f32.mrf.mxu1  ;;  %v4946_v2 = vadd.f32 %v11555_v44, %v4833_v59 }
 0x756   : > { %7240 = vpow2.f32 %v7062_v25  ;;  %v5282_v7 = vadd.f32 %v5281_v23, %v5169_v12  ;;  %v5826_v3 = vsel %vm5825_vm9, %v7235_v8, %v5822_v56  ;;  %v5834_v11 = vmul.f32 %v7239_v31, %v10700_v40  ;;  %v10743_v18 = vpop.f32.mrf.mxu2 }
 0x757   : > { %7242 = vrcp.f32 %v10725_v20  ;;  %v10732_v34 = vsel %vm5828_vm10, %v5830_v43, %v5826_v3  ;;  %v5844_v8 = vand.u32 2147483648, %v10700_v40  ;;  %v5059_v12 = vadd.f32 %v10659_v58, %v4946_v2  ;;  %v11556_v3 = vld [vmem:[#allocation40_spill] sm:$0xff]  ;;  %v4210_v40 = vld [vmem:[%s7518_s23 + $0xa0] sm:$0xff] }
 0x758   : > { %v5395_v4 = vadd.f32 %v10648_v24, %v5282_v7  ;;  %6199 = vrot.lane.b32.xlu0 %v10732_v34, %s7469_s29  ;;  %v5835_v29 = vsub.f32 1.0, %v5834_v11  ;;  %vm5839_vm11 = vweird.f32 %v7239_v31  ;;  %v11557_v11 = vld [vmem:[#allocation63_spill] sm:$0xff]  ;;  %vm5853_vm0 = vweird.f32 %v10725_v20 }
 0x759   : > { %v5172_v59 = vadd.f32 %v10666_v33, %v5059_v12  ;;  %v4836_v44 = vadd.f32 %v11557_v11, %v11556_v3  ;;  %vm5840_vm13 = vmor %vm5838_vm12, %vm5839_vm11  ;;  %v5845_v2 = vor.u32 1.1754944e-38, %v5844_v8  ;;  %v10753_v12 = vpop.f32.mrf.mxu3 }
 0x75a   : > { %v10741_v25 = vadd.f32 %v5395_v4, %v4209_v36  ;;  %v5836_v56 = vmul.f32 %v7239_v31, %v5835_v29  ;;  %v10763_v8 = vpop.f32.mrf.mxu0 }
 0x75b   : > { %v4949_v3 = vadd.f32 %v11559_v1, %v4836_v44 }
 0x75c   : > { %v7241_v23 = vpop.eup %7240  ;;  %v7063_v24 = vmul.f32 -1.442695, %v10741_v25  ;;  %v5837_v43 = vadd.f32 %v7239_v31, %v5836_v56 }
 0x75d   : > { %v7243_v7 = vpop.eup %7242  ;;  %v10750_v58 = vadd.f32 1.0, %v7241_v23  ;;  %v5284_v36 = vpop.f32.mrf.mxu1 }
 0x75e   : > { %7244 = vpow2.f32 %v7063_v24  ;;  %v5285_v4 = vadd.f32 %v5284_v36, %v5172_v59  ;;  %v5841_v29 = vsel %vm5840_vm13, %v7239_v31, %v5837_v43  ;;  %v5849_v33 = vmul.f32 %v7243_v7, %v10725_v20 }
 0x75f   : > { %7246 = vrcp.f32 %v10750_v58  ;;  %v10757_v56 = vsel %vm5843_vm14, %v5845_v2, %v5841_v29  ;;  %v5857_v31 = vand.u32 2147483647, %v10725_v20  ;;  %v5859_v59 = vand.u32 2147483648, %v10725_v20  ;;  %v11561_v29 = vld [vmem:[#allocation64_spill] sm:$0xff]  ;;  %v4211_v20 = vld [vmem:[%s7518_s23 + $0xa8] sm:$0xff] }
 0x760   : > { %11558 = vst [vmem:[#allocation41_spill] sm:$0xff] %v10757_v56  ;;  %v5398_v23 = vadd.f32 %v10680_v53, %v5285_v4  ;;  %6201 = vrot.lane.b32.xlu1 %v10757_v56, %s7469_s29  ;;  %v5850_v45 = vsub.f32 1.0, %v5849_v33  ;;  %v5062_v24 = vadd.f32 %v10691_v9, %v4949_v3  ;;  %vm5854_vm15 = vweird.f32 %v7243_v7  ;;  %v11560_v4 = vld [vmem:[#allocation42_spill] sm:$0xff]  ;;  %v10777_v3 = vpop.f32.mrf.mxu2 }
 0x761   : > { %v4839_v33 = vadd.f32 %v11561_v29, %v11560_v4  ;;  %vm5855_vm1 = vmor %vm5853_vm0, %vm5854_vm15  ;;  %vm5858_vm3 = vcmp.eq.f32.partialorder %v5857_v31, 8.507059e+37  ;;  %vm5868_vm6 = vweird.f32 %v10750_v58 }
 0x762   : > { %v10768_v43 = vadd.f32 %v5398_v23, %v4210_v40  ;;  %v5851_v11 = vmul.f32 %v7243_v7, %v5850_v45  ;;  %v5175_v1 = vadd.f32 %v10698_v15, %v5062_v24  ;;  %v5860_v40 = vor.u32 1.1754944e-38, %v5859_v59  ;;  %v10788_v59 = vpop.f32.mrf.mxu3 }
 0x764   : > { %v7245_v36 = vpop.eup %7244  ;;  %v7064_v53 = vmul.f32 -1.442695, %v10768_v43  ;;  %v5852_v44 = vadd.f32 %v7243_v7, %v5851_v11  ;;  %v11563_v11 = vld [vmem:[#allocation60_spill] sm:$0xff] }
 0x765   : > { %v7247_v2 = vpop.eup %7246  ;;  %v10775_v56 = vadd.f32 1.0, %v7245_v36  ;;  %v5287_v9 = vpop.f32.mrf.mxu1  ;;  %v4952_v4 = vadd.f32 %v11563_v11, %v4839_v33  ;;  %v11565_v11 = vld [vmem:[#allocation65_spill] sm:$0xff] }
 0x766   : > { %7248 = vpow2.f32 %v7064_v53  ;;  %v5288_v15 = vadd.f32 %v5287_v9, %v5175_v1  ;;  %v5856_v23 = vsel %vm5855_vm1, %v7243_v7, %v5852_v44  ;;  %v5864_v45 = vmul.f32 %v7247_v2, %v10750_v58  ;;  %v10795_v9 = vpop.f32.mrf.mxu0 }
 0x767   : > { %7250 = vrcp.f32 %v10775_v56  ;;  %v10782_v24 = vsel %vm5858_vm3, %v5860_v40, %v5856_v23  ;;  %v5872_v1 = vand.u32 2147483647, %v10750_v58  ;;  %v5874_v7 = vand.u32 2147483648, %v10750_v58 }
 0x768   : > { %11562 = vst [vmem:[#allocation31_spill] sm:$0xff] %v10782_v24  ;;  %v5401_v36 = vadd.f32 %v10713_v63, %v5288_v15  ;;  %6203 = vrot.lane.b32.xlu2 %v10782_v24, %s7469_s29  ;;  %v5865_v31 = vsub.f32 1.0, %v5864_v45  ;;  %v5065_v53 = vadd.f32 %v10723_v48, %v4952_v4  ;;  %vm5869_vm4 = vweird.f32 %v7247_v2  ;;  %v11564_v45 = vld [vmem:[#allocation44_spill] sm:$0xff]  ;;  %v10809_v58 = vpop.f32.mrf.mxu2 }
 0x769   : > { %v4842_v24 = vadd.f32 %v11565_v11, %v11564_v45  ;;  %vm5870_vm5 = vmor %vm5868_vm6, %vm5869_vm4  ;;  %vm5873_vm7 = vcmp.eq.f32.partialorder %v5872_v1, 8.507059e+37  ;;  %v5875_v4 = vor.u32 1.1754944e-38, %v5874_v7  ;;  %v5887_v7 = vand.u32 2147483647, %v10775_v56 }
 0x76a   : > { %v10793_v44 = vadd.f32 %v5401_v36, %v4211_v20  ;;  %v5866_v29 = vmul.f32 %v7247_v2, %v5865_v31  ;;  %v5178_v63 = vadd.f32 %v10728_v54, %v5065_v53  ;;  %v4212_v53 = vld [vmem:[%s7518_s23 + $0xb0] sm:$0xff]  ;;  %v5073_v11 = vpop.f32.mrf.mxu3  ;;  %vm5883_vm9 = vweird.f32 %v10775_v56 }
 0x76b   : > { %v4955_v45 = vadd.f32 %v11567_v5, %v4842_v24  ;;  %vm5888_vm11 = vcmp.eq.f32.partialorder %v5887_v7, 8.507059e+37 }
 0x76c   : > { %v7249_v33 = vpop.eup %7248  ;;  %v7065_v40 = vmul.f32 -1.442695, %v10793_v44  ;;  %v5867_v15 = vadd.f32 %v7247_v2, %v5866_v29 }
 0x76d   : > { %v7251_v23 = vpop.eup %7250  ;;  %v10802_v48 = vadd.f32 1.0, %v7249_v33  ;;  %v5290_v20 = vpop.f32.mrf.mxu1 }
 0x76e   : > { %7252 = vpow2.f32 %v7065_v40  ;;  %v5291_v36 = vadd.f32 %v5290_v20, %v5178_v63  ;;  %v5871_v31 = vsel %vm5870_vm5, %v7247_v2, %v5867_v15  ;;  %v5879_v54 = vmul.f32 %v7251_v23, %v10775_v56  ;;  %v5186_v6 = vpop.f32.mrf.mxu0 }
 0x76f   : > { %7254 = vrcp.f32 %v10802_v48  ;;  %v10807_v29 = vsel %vm5873_vm7, %v5875_v4, %v5871_v31  ;;  %v5889_v2 = vand.u32 2147483648, %v10775_v56  ;;  %v5068_v63 = vadd.f32 %v10753_v12, %v4955_v45  ;;  %v11569_v31 = vld [vmem:[#allocation13_spill] sm:$0xff] }
 0x770   : > { %11566 = vst [vmem:[#allocation49_spill] sm:$0xff] %v10807_v29  ;;  %v5404_v33 = vadd.f32 %v10743_v18, %v5291_v36  ;;  %6205 = vrot.lane.b32.xlu0 %v10807_v29, %s7469_s29  ;;  %v5880_v1 = vsub.f32 1.0, %v5879_v54  ;;  %vm5884_vm8 = vweird.f32 %v7251_v23  ;;  %v11568_v36 = vld [vmem:[#allocation5_spill] sm:$0xff]  ;;  %v5902_v7 = vand.u32 2147483647, %v10802_v48 }
 0x771   : > { %v5181_v5 = vadd.f32 %v10763_v8, %v5068_v63  ;;  %v4845_v54 = vadd.f32 %v11569_v31, %v11568_v36  ;;  %vm5885_vm10 = vmor %vm5883_vm9, %vm5884_vm8  ;;  %v5890_v45 = vor.u32 1.1754944e-38, %v5889_v2  ;;  %v4213_v63 = vld [vmem:[%s7518_s23 + $0xb8] sm:$0xff]  ;;  %v5904_v2 = vand.u32 2147483648, %v10802_v48 }
 0x772   : > { %v10818_v40 = vadd.f32 %v5404_v33, %v4212_v53  ;;  %v5881_v15 = vmul.f32 %v7251_v23, %v5880_v1  ;;  %vm5898_vm13 = vweird.f32 %v10802_v48  ;;  %vm5903_vm15 = vcmp.eq.f32.partialorder %v5902_v7, 8.507059e+37 }
 0x774   : > { %v7253_v20 = vpop.eup %7252  ;;  %v7066_v18 = vmul.f32 -1.442695, %v10818_v40  ;;  %v5882_v24 = vadd.f32 %v7251_v23, %v5881_v15  ;;  %v11571_v15 = vld [vmem:[#allocation21_spill] sm:$0xff] }
 0x775   : > { %v7255_v4 = vpop.eup %7254  ;;  %v10825_v12 = vadd.f32 1.0, %v7253_v20  ;;  %v5293_v53 = vpop.f32.mrf.mxu1  ;;  %v4958_v62 = vadd.f32 %v11571_v15, %v4845_v54 }
 0x776   : > { %7256 = vpow2.f32 %v7066_v18  ;;  %v5294_v33 = vadd.f32 %v5293_v53, %v5181_v5  ;;  %v5886_v8 = vsel %vm5885_vm10, %v7251_v23, %v5882_v24  ;;  %v5894_v1 = vmul.f32 %v7255_v4, %v10802_v48  ;;  %v5412_v23 = vpop.f32.mrf.mxu2  ;;  %v5076_v15 = vpop.f32.mrf.mxu3  ;;  %v4214_v48 = vld [vmem:[%s7518_s23 + $0xc0] sm:$0xff] }
 0x777   : > { %7258 = vrcp.f32 %v10825_v12  ;;  %v10830_v56 = vsel %vm5888_vm11, %v5890_v45, %v5886_v8  ;;  %v5071_v5 = vadd.f32 %v10788_v59, %v4958_v62  ;;  %vm5899_vm12 = vweird.f32 %v7255_v4  ;;  %v11573_v8 = vld [vmem:[#allocation14_spill] sm:$0xff] }
 0x778   : > { %11570 = vst [vmem:[#allocation43_spill] sm:$0xff] %v10830_v56  ;;  %v5407_v36 = vadd.f32 %v10777_v3, %v5294_v33  ;;  %6207 = vrot.lane.b32.xlu1 %v10830_v56, %s7469_s29  ;;  %v5895_v20 = vsub.f32 1.0, %v5894_v1  ;;  %v11572_v33 = vld [vmem:[#allocation6_spill] sm:$0xff]  ;;  %vm5900_vm14 = vmor %vm5898_vm13, %vm5899_vm12  ;;  %v5905_v59 = vor.u32 1.1754944e-38, %v5904_v2  ;;  %v5917_v2 = vand.u32 2147483647, %v10825_v12 }
 0x779   : > { %v5184_v54 = vadd.f32 %v10795_v9, %v5071_v5  ;;  %v4848_v1 = vadd.f32 %v11573_v8, %v11572_v33  ;;  %vm5913_vm1 = vweird.f32 %v10825_v12 }
 0x77a   : > { %v10839_v18 = vadd.f32 %v5407_v36, %v4213_v63  ;;  %v5896_v24 = vmul.f32 %v7255_v4, %v5895_v20  ;;  %v5189_v20 = vpop.f32.mrf.mxu0  ;;  %vm5918_vm4 = vcmp.eq.f32.partialorder %v5917_v2, 8.507059e+37 }
 0x77c   : > { %v7257_v31 = vpop.eup %7256  ;;  %v7067_v3 = vmul.f32 -1.442695, %v10839_v18  ;;  %v5897_v53 = vadd.f32 %v7255_v4, %v5896_v24  ;;  %v11575_v24 = vld [vmem:[#allocation22_spill] sm:$0xff] }
 0x77d   : > { %v7259_v45 = vpop.eup %7258  ;;  %v10846_v56 = vadd.f32 1.0, %v7257_v31  ;;  %v5296_v62 = vpop.f32.mrf.mxu1  ;;  %v4961_v33 = vadd.f32 %v11575_v24, %v4848_v1 }
 0x77e   : > { %7260 = vpow2.f32 %v7067_v3  ;;  %v5297_v63 = vadd.f32 %v5296_v62, %v5184_v54  ;;  %v5901_v9 = vsel %vm5900_vm14, %v7255_v4, %v5897_v53  ;;  %v5909_v36 = vmul.f32 %v7259_v45, %v10825_v12  ;;  %v5415_v8 = vpop.f32.mrf.mxu2 }
 0x77f   : > { %7262 = vrcp.f32 %v10846_v56  ;;  %v10851_v5 = vsel %vm5903_vm15, %v5905_v59, %v5901_v9  ;;  %v5919_v4 = vand.u32 2147483648, %v10825_v12  ;;  %v5074_v54 = vadd.f32 %v5073_v11, %v4961_v33  ;;  %v11576_v9 = vld [vmem:[#allocation7_spill] sm:$0xff] }
 0x780   : > { %11574 = vst [vmem:[#allocation32_spill] sm:$0xff] %v10851_v5  ;;  %v5410_v31 = vadd.f32 %v10809_v58, %v5297_v63  ;;  %6209 = vrot.lane.b32.xlu2 %v10851_v5, %s7469_s29  ;;  %v5910_v7 = vsub.f32 1.0, %v5909_v36  ;;  %vm5914_vm0 = vweird.f32 %v7259_v45  ;;  %v11577_v36 = vld [vmem:[#allocation15_spill] sm:$0xff]  ;;  %vm5928_vm5 = vweird.f32 %v10846_v56 }
 0x781   : > { %v5187_v59 = vadd.f32 %v5186_v6, %v5074_v54  ;;  %v4851_v24 = vadd.f32 %v11577_v36, %v11576_v9  ;;  %vm5915_vm3 = vmor %vm5913_vm1, %vm5914_vm0  ;;  %v4215_v54 = vld [vmem:[%s7518_s23 + $0xc8] sm:$0xff] }
 0x782   : > { %v10859_v3 = vadd.f32 %v5410_v31, %v4214_v48  ;;  %v5911_v53 = vmul.f32 %v7259_v45, %v5910_v7  ;;  %v5920_v48 = vor.u32 1.1754944e-38, %v5919_v4  ;;  %v5079_v7 = vpop.f32.mrf.mxu3  ;;  %v5192_v2 = vpop.f32.mrf.mxu0  ;;  %v5932_v4 = vand.u32 2147483647, %v10846_v56 }
 0x784   : > { %v7261_v62 = vpop.eup %7260  ;;  %v7068_v1 = vmul.f32 -1.442695, %v10859_v3  ;;  %v5912_v58 = vadd.f32 %v7259_v45, %v5911_v53  ;;  %v11579_v53 = vld [vmem:[#allocation23_spill] sm:$0xff]  ;;  %vm5933_vm8 = vcmp.eq.f32.partialorder %v5932_v4, 8.507059e+37 }
 0x785   : > { %v7263_v63 = vpop.eup %7262  ;;  %v10865_v5 = vadd.f32 1.0, %v7261_v62  ;;  %v5299_v11 = vpop.f32.mrf.mxu1  ;;  %v4964_v17 = vadd.f32 %v11579_v53, %v4851_v24 }
 0x786   : > { %7264 = vpow2.f32 %v7068_v1  ;;  %v5300_v33 = vadd.f32 %v5299_v11, %v5187_v59  ;;  %v5916_v31 = vsel %vm5915_vm3, %v7259_v45, %v5912_v58  ;;  %v5924_v6 = vmul.f32 %v7263_v63, %v10846_v56 }
 0x787   : > { %7266 = vrcp.f32 %v10865_v5  ;;  %v10870_v12 = vsel %vm5918_vm4, %v5920_v48, %v5916_v31  ;;  %v5934_v45 = vand.u32 2147483648, %v10846_v56  ;;  %v5077_v59 = vadd.f32 %v5076_v15, %v4964_v17  ;;  %v11581_v31 = vld [vmem:[#allocation16_spill] sm:$0xff]  ;;  %v5418_v15 = vpop.f32.mrf.mxu2 }
 0x788   : > { %11578 = vst [vmem:[#allocation51_spill] sm:$0xff] %v10870_v12  ;;  %v5413_v9 = vadd.f32 %v5412_v23, %v5300_v33  ;;  %6211 = vrot.lane.b32.xlu0 %v10870_v12, %s7469_s29  ;;  %v5925_v62 = vsub.f32 1.0, %v5924_v6  ;;  %vm5929_vm6 = vweird.f32 %v7263_v63  ;;  %v11580_v33 = vld [vmem:[#allocation8_spill] sm:$0xff]  ;;  %vm5943_vm10 = vweird.f32 %v10865_v5 }
 0x789   : > { %v5190_v11 = vadd.f32 %v5189_v20, %v5077_v59  ;;  %v4854_v6 = vadd.f32 %v11581_v31, %v11580_v33  ;;  %vm5930_vm7 = vmor %vm5928_vm5, %vm5929_vm6  ;;  %v5935_v17 = vor.u32 1.1754944e-38, %v5934_v45  ;;  %v11583_v59 = vld [vmem:[#allocation24_spill] sm:$0xff]  ;;  %v5947_v45 = vand.u32 2147483647, %v10865_v5 }
 0x78a   : > { %v10877_v1 = vadd.f32 %v5413_v9, %v4215_v54  ;;  %v5926_v58 = vmul.f32 %v7263_v63, %v5925_v62  ;;  %v4216_v62 = vld [vmem:[%s7518_s23 + $0xd0] sm:$0xff]  ;;  %v5082_v4 = vpop.f32.mrf.mxu3 }
 0x78b   : > { %vm5948_vm12 = vcmp.eq.f32.partialorder %v5947_v45, 8.507059e+37 }
 0x78c   : > { %v7265_v36 = vpop.eup %7264  ;;  %v7069_v48 = vmul.f32 -1.442695, %v10877_v1  ;;  %v5927_v23 = vadd.f32 %v7263_v63, %v5926_v58  ;;  %v4967_v58 = vadd.f32 %v11583_v59, %v4854_v6 }
 0x78d   : > { %v7267_v24 = vpop.eup %7266  ;;  %v10883_v53 = vadd.f32 1.0, %v7265_v36  ;;  %v5302_v12 = vpop.f32.mrf.mxu1 }
 0x78e   : > { %7268 = vpow2.f32 %v7069_v48  ;;  %v5303_v54 = vadd.f32 %v5302_v12, %v5190_v11  ;;  %v5931_v20 = vsel %vm5930_vm7, %v7263_v63, %v5927_v23  ;;  %v5939_v9 = vmul.f32 %v7267_v24, %v10865_v5  ;;  %v5195_v23 = vpop.f32.mrf.mxu0 }
 0x78f   : > { %7270 = vrcp.f32 %v10883_v53  ;;  %v10888_v56 = vsel %vm5933_vm8, %v5935_v17, %v5931_v20  ;;  %v5949_v12 = vand.u32 2147483648, %v10865_v5  ;;  %v5080_v63 = vadd.f32 %v5079_v7, %v4967_v58  ;;  %v11584_v20 = vld [vmem:[#allocation9_spill] sm:$0xff]  ;;  %v5421_v5 = vpop.f32.mrf.mxu2 }
 0x790   : > { %11582 = vst [vmem:[#allocation46_spill] sm:$0xff] %v10888_v56  ;;  %v5416_v33 = vadd.f32 %v5415_v8, %v5303_v54  ;;  %6213 = vrot.lane.b32.xlu1 %v10888_v56, %s7469_s29  ;;  %v5940_v36 = vsub.f32 1.0, %v5939_v9  ;;  %vm5944_vm9 = vweird.f32 %v7267_v24  ;;  %v11585_v9 = vld [vmem:[#allocation17_spill] sm:$0xff]  ;;  %v5962_v45 = vand.u32 2147483647, %v10883_v53 }
 0x791   : > { %v5193_v17 = vadd.f32 %v5192_v2, %v5080_v63  ;;  %v4857_v59 = vadd.f32 %v11585_v9, %v11584_v20  ;;  %vm5945_vm11 = vmor %vm5943_vm10, %vm5944_vm9  ;;  %vm5958_vm14 = vweird.f32 %v10883_v53 }
 0x792   : > { %v10895_v11 = vadd.f32 %v5416_v33, %v4216_v62  ;;  %v5941_v48 = vmul.f32 %v7267_v24, %v5940_v36  ;;  %v5950_v62 = vor.u32 1.1754944e-38, %v5949_v12  ;;  %v4217_v36 = vld [vmem:[%s7518_s23 + $0xd8] sm:$0xff]  ;;  %v5964_v12 = vand.u32 2147483648, %v10883_v53 }
 0x793   : > { %vm5963_vm0 = vcmp.eq.f32.partialorder %v5962_v45, 8.507059e+37 }
 0x794   : > { %v7269_v31 = vpop.eup %7268  ;;  %v7070_v8 = vmul.f32 -1.442695, %v10895_v11  ;;  %v5942_v6 = vadd.f32 %v7267_v24, %v5941_v48  ;;  %v11587_v48 = vld [vmem:[#allocation25_spill] sm:$0xff] }
 0x795   : > { %v7271_v54 = vpop.eup %7270  ;;  %v10901_v56 = vadd.f32 1.0, %v7269_v31  ;;  %v5305_v7 = vpop.f32.mrf.mxu1  ;;  %v4970_v29 = vadd.f32 %v11587_v48, %v4857_v59 }
 0x796   : > { %7272 = vpow2.f32 %v7070_v8  ;;  %v5306_v58 = vadd.f32 %v5305_v7, %v5193_v17  ;;  %v5946_v33 = vsel %vm5945_vm11, %v7267_v24, %v5942_v6  ;;  %v5954_v2 = vmul.f32 %v7271_v54, %v10883_v53  ;;  %v5085_v6 = vpop.f32.mrf.mxu3  ;;  %v5198_v48 = vpop.f32.mrf.mxu0 }
 0x797   : > { %7274 = vrcp.f32 %v10901_v56  ;;  %v10906_v63 = vsel %vm5948_vm12, %v5950_v62, %v5946_v33  ;;  %v5083_v24 = vadd.f32 %v5082_v4, %v4970_v29  ;;  %vm5959_vm13 = vweird.f32 %v7271_v54  ;;  %v11589_v33 = vld [vmem:[#allocation18_spill] sm:$0xff] }
 0x798   : > { %11586 = vst [vmem:[#allocation33_spill] sm:$0xff] %v10906_v63  ;;  %v5419_v20 = vadd.f32 %v5418_v15, %v5306_v58  ;;  %6215 = vrot.lane.b32.xlu2 %v10906_v63, %s7469_s29  ;;  %v5955_v31 = vsub.f32 1.0, %v5954_v2  ;;  %v11588_v58 = vld [vmem:[#allocation10_spill] sm:$0xff]  ;;  %vm5960_vm15 = vmor %vm5958_vm14, %vm5959_vm13  ;;  %v5965_v4 = vor.u32 1.1754944e-38, %v5964_v12  ;;  %v5977_v45 = vand.u32 2147483647, %v10901_v56 }
 0x799   : > { %v5196_v7 = vadd.f32 %v5195_v23, %v5083_v24  ;;  %v4860_v2 = vadd.f32 %v11589_v33, %v11588_v58  ;;  %v11591_v24 = vld [vmem:[#allocation26_spill] sm:$0xff]  ;;  %v5424_v33 = vpop.f32.mrf.mxu2  ;;  %v5979_v12 = vand.u32 2147483648, %v10901_v56  ;;  %vm5973_vm3 = vweird.f32 %v10901_v56 }
 0x79a   : > { %v10913_v17 = vadd.f32 %v5419_v20, %v4217_v36  ;;  %v5956_v8 = vmul.f32 %v7271_v54, %v5955_v31  ;;  %v4218_v31 = vld [vmem:[%s7518_s23 + $0xe0] sm:$0xff]  ;;  %vm5978_vm6 = vcmp.eq.f32.partialorder %v5977_v45, 8.507059e+37 }
 0x79c   : > { %v7273_v9 = vpop.eup %7272  ;;  %v7071_v62 = vmul.f32 -1.442695, %v10913_v17  ;;  %v5957_v15 = vadd.f32 %v7271_v54, %v5956_v8  ;;  %v4973_v8 = vadd.f32 %v11591_v24, %v4860_v2 }
 0x79d   : > { %v7275_v59 = vpop.eup %7274  ;;  %v10919_v63 = vadd.f32 1.0, %v7273_v9  ;;  %v5308_v29 = vpop.f32.mrf.mxu1 }
 0x79e   : > { %7276 = vpow2.f32 %v7071_v62  ;;  %v5309_v36 = vadd.f32 %v5308_v29, %v5196_v7  ;;  %v5961_v23 = vsel %vm5960_vm15, %v7271_v54, %v5957_v15  ;;  %v5969_v20 = vmul.f32 %v7275_v59, %v10901_v56  ;;  %v5088_v24 = vpop.f32.mrf.mxu3  ;;  %v4219_v56 = vld [vmem:[%s7518_s23 + $0xe8] sm:$0xff] }
 0x79f   : > { %7278 = vrcp.f32 %v10919_v63  ;;  %v10924_v53 = vsel %vm5963_vm0, %v5965_v4, %v5961_v23  ;;  %v5086_v54 = vadd.f32 %v5085_v6, %v4973_v8  ;;  %vm5974_vm1 = vweird.f32 %v7275_v59  ;;  %v11593_v23 = vld [vmem:[#allocation19_spill] sm:$0xff] }
 0x7a0   : > { %11590 = vst [vmem:[#allocation53_spill] sm:$0xff] %v10924_v53  ;;  %v5422_v58 = vadd.f32 %v5421_v5, %v5309_v36  ;;  %6217 = vrot.lane.b32.xlu0 %v10924_v53, %s7469_s29  ;;  %v5970_v9 = vsub.f32 1.0, %v5969_v20  ;;  %v11592_v36 = vld [vmem:[#allocation11_spill] sm:$0xff]  ;;  %vm5975_vm4 = vmor %vm5973_vm3, %vm5974_vm1  ;;  %v5992_v45 = vand.u32 2147483647, %v10919_v63  ;;  %vm5988_vm7 = vweird.f32 %v10919_v63 }
 0x7a1   : > { %v5199_v29 = vadd.f32 %v5198_v48, %v5086_v54  ;;  %v4863_v20 = vadd.f32 %v11593_v23, %v11592_v36 }
 0x7a2   : > { %v10931_v7 = vadd.f32 %v5422_v58, %v4218_v31  ;;  %v5971_v62 = vmul.f32 %v7275_v59, %v5970_v9  ;;  %v5980_v31 = vor.u32 1.1754944e-38, %v5979_v12  ;;  %v5201_v9 = vpop.f32.mrf.mxu0  ;;  %v5994_v12 = vand.u32 2147483648, %v10919_v63 }
 0x7a3   : > { %vm5993_vm9 = vcmp.eq.f32.partialorder %v5992_v45, 8.507059e+37 }
 0x7a4   : > { %v7277_v15 = vpop.eup %7276  ;;  %v7072_v4 = vmul.f32 -1.442695, %v10931_v7  ;;  %v5972_v2 = vadd.f32 %v7275_v59, %v5971_v62  ;;  %v11595_v62 = vld [vmem:[#allocation27_spill] sm:$0xff] }
 0x7a5   : > { %v7279_v5 = vpop.eup %7278  ;;  %v10937_v53 = vadd.f32 1.0, %v7277_v15  ;;  %v5311_v6 = vpop.f32.mrf.mxu1  ;;  %v4976_v36 = vadd.f32 %v11595_v62, %v4863_v20 }
 0x7a6   : > { %7280 = vpow2.f32 %v7072_v4  ;;  %v5312_v8 = vadd.f32 %v5311_v6, %v5199_v29  ;;  %v5976_v48 = vsel %vm5975_vm4, %v7275_v59, %v5972_v2  ;;  %v5984_v58 = vmul.f32 %v7279_v5, %v10919_v63  ;;  %v5427_v2 = vpop.f32.mrf.mxu2  ;;  %v11598_v63 = vld [vmem:[#allocation28_spill] sm:$0xff] }
 0x7a7   : > { %7282 = vrcp.f32 %v10937_v53  ;;  %v10942_v54 = vsel %vm5978_vm6, %v5980_v31, %v5976_v48  ;;  %v5089_v59 = vadd.f32 %v5088_v24, %v4976_v36  ;;  %vm5989_vm5 = vweird.f32 %v7279_v5 }
 0x7a8   : > { %11594 = vst [vmem:[#allocation48_spill] sm:$0xff] %v10942_v54  ;;  %v5425_v23 = vadd.f32 %v5424_v33, %v5312_v8  ;;  %6219 = vrot.lane.b32.xlu1 %v10942_v54, %s7469_s29  ;;  %v5985_v15 = vsub.f32 1.0, %v5984_v58  ;;  %v11596_v8 = vld [vmem:[#allocation12_spill] sm:$0xff]  ;;  %vm5990_vm8 = vmor %vm5988_vm7, %vm5989_vm5  ;;  %v5995_v24 = vor.u32 1.1754944e-38, %v5994_v12  ;;  %v6007_v45 = vand.u32 2147483647, %v10937_v53 }
 0x7a9   : > { %v5202_v31 = vadd.f32 %v5201_v9, %v5089_v59  ;;  %v11597_v58 = vld [vmem:[#allocation20_spill] sm:$0xff]  ;;  %vm6003_vm11 = vweird.f32 %v10937_v53 }
 0x7aa   : > { %v10949_v29 = vadd.f32 %v5425_v23, %v4219_v56  ;;  %v5986_v4 = vmul.f32 %v7279_v5, %v5985_v15  ;;  %v4866_v62 = vadd.f32 %v11597_v58, %v11596_v8  ;;  %v5091_v23 = vpop.f32.mrf.mxu3  ;;  %v4220_v15 = vld [vmem:[%s7518_s23 + $0xf0] sm:$0xff]  ;;  %v5204_v8 = vpop.f32.mrf.mxu0  ;;  %vm6008_vm13 = vcmp.eq.f32.partialorder %v6007_v45, 8.507059e+37 }
 0x7ac   : > { %v7281_v6 = vpop.eup %7280  ;;  %v7073_v48 = vmul.f32 -1.442695, %v10949_v29  ;;  %v5987_v33 = vadd.f32 %v7279_v5, %v5986_v4  ;;  %v4979_v4 = vadd.f32 %v11598_v63, %v4866_v62  ;;  %v4221_v63 = vld [vmem:[%s7518_s23 + $0xf8] sm:$0xff] }
 0x7ad   : > { %v7283_v20 = vpop.eup %7282  ;;  %v5589_v54 = vadd.f32 1.0, %v7281_v6  ;;  %v5314_v37 = vpop.f32.mrf.mxu1 }
 0x7ae   : > { %7284 = vpow2.f32 %v7073_v48  ;;  %v5315_v56 = vadd.f32 %v5314_v37, %v5202_v31  ;;  %v5991_v36 = vsel %vm5990_vm8, %v7279_v5, %v5987_v33  ;;  %v5999_v9 = vmul.f32 %v7283_v20, %v10937_v53 }
 0x7af   : > { %7286 = vrcp.f32 %v5589_v54  ;;  %v10957_v59 = vsel %vm5993_vm9, %v5995_v24, %v5991_v36  ;;  %v6009_v37 = vand.u32 2147483648, %v10937_v53  ;;  %v5092_v5 = vadd.f32 %v5091_v23, %v4979_v4  ;;  %v5430_v36 = vpop.f32.mrf.mxu2 }
 0x7b0   : > { %v5428_v49 = vadd.f32 %v5427_v2, %v5315_v56  ;;  %6221 = vrot.lane.b32.xlu2 %v10957_v59, %s7469_s29  ;;  %v6000_v6 = vsub.f32 1.0, %v5999_v9  ;;  %vm6004_vm10 = vweird.f32 %v7283_v20  ;;  %v6022_v45 = vand.u32 2147483647, %v5589_v54 }
 0x7b1   : > { %v5205_v33 = vadd.f32 %v5204_v8, %v5092_v5  ;;  %vm6005_vm12 = vmor %vm6003_vm11, %vm6004_vm10  ;;  %v6010_v9 = vor.u32 1.1754944e-38, %v6009_v37  ;;  %v6024_v8 = vand.u32 2147483648, %v5589_v54  ;;  %vm6018_vm15 = vweird.f32 %v5589_v54 }
 0x7b2   : > { %v10964_v12 = vadd.f32 %v5428_v49, %v4220_v15  ;;  %v6001_v31 = vmul.f32 %v7283_v20, %v6000_v6  ;;  %vm6023_vm1 = vcmp.eq.f32.partialorder %v6022_v45, 8.507059e+37 }
 0x7b4   : > { %v7285_v48 = vpop.eup %7284  ;;  %v7074_v58 = vmul.f32 -1.442695, %v10964_v12  ;;  %v6002_v2 = vadd.f32 %v7283_v20, %v6001_v31 }
 0x7b5   : > { %v7287_v62 = vpop.eup %7286  ;;  %v5590_v24 = vadd.f32 1.0, %v7285_v48  ;;  %v5317_v56 = vpop.f32.mrf.mxu1 }
 0x7b6   : > { %7288 = vpow2.f32 %v7074_v58  ;;  %v5318_v49 = vadd.f32 %v5317_v56, %v5205_v33  ;;  %v6006_v23 = vsel %vm6005_vm12, %v7283_v20, %v6002_v2  ;;  %v6014_v15 = vmul.f32 %v7287_v62, %v5589_v54 }
 0x7b7   : > { %7290 = vrcp.f32 %v5590_v24  ;;  %v10969_v4 = vsel %vm6008_vm13, %v6010_v9, %v6006_v23  ;;  %vm6019_vm14 = vweird.f32 %v7287_v62  ;;  %v6025_v2 = vor.u32 1.1754944e-38, %v6024_v8 }
 0x7b8   : > { %v5431_v6 = vadd.f32 %v5430_v36, %v5318_v49  ;;  %6223 = vrot.lane.b32.xlu0 %v10969_v4, %s7469_s29  ;;  %v6015_v53 = vsub.f32 1.0, %v6014_v15  ;;  %vm6020_vm0 = vmor %vm6018_vm15, %vm6019_vm14  ;;  %v6039_v23 = vand.u32 2147483648, %v5590_v24  ;;  %vm6033_vm4 = vweird.f32 %v5590_v24 }
 0x7ba   : > { %v10973_v5 = vadd.f32 %v5431_v6, %v4221_v63  ;;  %v6016_v31 = vmul.f32 %v7287_v62, %v6015_v53  ;;  %v6037_v63 = vand.u32 2147483647, %v5590_v24 }
 0x7bc   : > { %v7289_v37 = vpop.eup %7288  ;;  %v7075_v48 = vmul.f32 -1.442695, %v10973_v5  ;;  %v6017_v20 = vadd.f32 %v7287_v62, %v6016_v31  ;;  %vm6038_vm5 = vcmp.eq.f32.partialorder %v6037_v63, 8.507059e+37 }
 0x7bd   : > { %v7291_v33 = vpop.eup %7290  ;;  %v5591_v58 = vadd.f32 1.0, %v7289_v37 }
 0x7be   : > { %7292 = vpow2.f32 %v7075_v48  ;;  %v6021_v56 = vsel %vm6020_vm0, %v7287_v62, %v6017_v20  ;;  %v6029_v36 = vmul.f32 %v7291_v33, %v5590_v24  ;;  %vm6034_vm3 = vweird.f32 %v7291_v33 }
 0x7bf   : > { %7294 = vrcp.f32 %v5591_v58  ;;  %v10976_v9 = vsel %vm6023_vm1, %v6025_v2, %v6021_v56  ;;  %vm6035_vm6 = vmor %vm6033_vm4, %vm6034_vm3  ;;  %v6040_v62 = vor.u32 1.1754944e-38, %v6039_v23  ;;  %v6054_v20 = vand.u32 2147483648, %v5591_v58 }
 0x7c0   : > { %6225 = vrot.lane.b32.xlu1 %v10976_v9, %s7469_s29  ;;  %v6030_v49 = vsub.f32 1.0, %v6029_v36  ;;  %v6052_v24 = vand.u32 2147483647, %v5591_v58  ;;  %vm6048_vm8 = vweird.f32 %v5591_v58 }
 0x7c2   : > { %v6031_v15 = vmul.f32 %v7291_v33, %v6030_v49  ;;  %vm6053_vm10 = vcmp.eq.f32.partialorder %v6052_v24, 8.507059e+37 }
 0x7c4   : > { %v7293_v54 = vpop.eup %7292  ;;  %v6032_v6 = vadd.f32 %v7291_v33, %v6031_v15 }
 0x7c5   : > { %v7295_v53 = vpop.eup %7294  ;;  %v5592_v8 = vadd.f32 1.0, %v7293_v54 }
 0x7c6   : > { %v6036_v31 = vsel %vm6035_vm6, %v7291_v33, %v6032_v6  ;;  %v6044_v45 = vmul.f32 %v7295_v53, %v5591_v58  ;;  %vm6049_vm7 = vweird.f32 %v7295_v53  ;;  %v6055_v33 = vor.u32 1.1754944e-38, %v6054_v20 }
 0x7c7   : > { %7296 = vrcp.f32 %v5592_v8  ;;  %v10980_v37 = vsel %vm6038_vm5, %v6040_v62, %v6036_v31  ;;  %vm6050_vm9 = vmor %vm6048_vm8, %vm6049_vm7  ;;  %v6069_v54 = vand.u32 2147483648, %v5592_v8  ;;  %v6067_v6 = vand.u32 2147483647, %v5592_v8 }
 0x7c8   : > { %6227 = vrot.lane.b32.xlu2 %v10980_v37, %s7469_s29  ;;  %v6045_v48 = vsub.f32 1.0, %v6044_v45  ;;  %7298 = vtanh.f32 %v10226_v28  ;;  %vm6063_vm12 = vweird.f32 %v5592_v8 }
 0x7c9   : > { %7300 = vtanh.f32 %v10246_v41  ;;  %v6070_v62 = vor.u32 1.1754944e-38, %v6069_v54  ;;  %vm6068_vm14 = vcmp.eq.f32.partialorder %v6067_v6, 8.507059e+37  ;;  %v11001_v41 = vpop.permute.xlu2 %6173 }
 0x7ca   : > { %v6046_v2 = vmul.f32 %v7295_v53, %v6045_v48  ;;  %7302 = vtanh.f32 %v10289_v21 }
 0x7cb   : > { %7304 = vtanh.f32 %v10267_v50 }
 0x7cc   : > { %v6047_v56 = vadd.f32 %v7295_v53, %v6046_v2  ;;  %7306 = vtanh.f32 %v10320_v52 }
 0x7cd   : > { %v7297_v36 = vpop.eup %7296  ;;  %7308 = vtanh.f32 %v10386_v27 }
 0x7ce   : > { %v6051_v49 = vsel %vm6050_vm9, %v7295_v53, %v6047_v56  ;;  %v6059_v23 = vmul.f32 %v7297_v36, %v5592_v8  ;;  %v7299_v15 = vpop.eup %7298  ;;  %vm6064_vm11 = vweird.f32 %v7297_v36  ;;  %7310 = vtanh.f32 %v10357_v42 }
 0x7cf   : > { %v10985_v63 = vsel %vm6053_vm10, %v6055_v33, %v6051_v49  ;;  %vm6065_vm13 = vmor %vm6063_vm12, %vm6064_vm11  ;;  %v7301_v45 = vpop.eup %7300  ;;  %7312 = vtanh.f32 %v10414_v47 }
 0x7d0   : > { %6229 = vrot.lane.b32.xlu0 %v10985_v63, %s7469_s29  ;;  %6329 = vrot.lane.b32.xlu2 %v7299_v15, %s7467_s27  ;;  %v6060_v28 = vsub.f32 1.0, %v6059_v23  ;;  %v7303_v20 = vpop.eup %7302  ;;  %7314 = vtanh.f32 %v10476_v57 }
 0x7d1   : > { %v7305_v21 = vpop.eup %7304  ;;  %v11009_v50 = vpop.permute.xlu2 %6179  ;;  %7316 = vtanh.f32 %v10444_v46 }
 0x7d2   : > { %v6061_v58 = vmul.f32 %v7297_v36, %v6060_v28  ;;  %v7307_v8 = vpop.eup %7306  ;;  %7318 = vtanh.f32 %v10505_v10  ;;  %v11025_v46 = vpop.permute.xlu0 %6169 }
 0x7d3   : > { %v7309_v2 = vpop.eup %7308  ;;  %7320 = vtanh.f32 %v10560_v22 }
 0x7d4   : > { %v6062_v53 = vadd.f32 %v7297_v36, %v6061_v58  ;;  %v7311_v52 = vpop.eup %7310  ;;  %7322 = vtanh.f32 %v10535_v61  ;;  %v11033_v61 = vpop.permute.xlu1 %6171 }
 0x7d5   : > { %v7313_v27 = vpop.eup %7312  ;;  %7324 = vtanh.f32 %v10587_v26 }
 0x7d6   : > { %v6066_v31 = vsel %vm6065_vm13, %v7297_v36, %v6062_v53  ;;  %v7315_v24 = vpop.eup %7314  ;;  %7326 = vtanh.f32 %v10639_v55 }
 0x7d7   : > { %v10992_v48 = vsel %vm6068_vm14, %v6070_v62, %v6066_v31  ;;  %v7317_v47 = vpop.eup %7316  ;;  %7328 = vtanh.f32 %v10612_v51 }
 0x7d8   : > { %6231 = vrot.lane.b32.xlu1 %v10992_v48, %s7469_s29  ;;  %6331 = vrot.lane.b32.xlu0 %v7301_v45, %s7467_s27  ;;  %v7319_v57 = vpop.eup %7318  ;;  %7330 = vtanh.f32 %v10664_v39 }
 0x7d9   : > { %6335 = vrot.lane.b32.xlu2 %v7303_v20, %s7467_s27  ;;  %v11017_v42 = vpop.permute.xlu2 %6185  ;;  %v7321_v56 = vpop.eup %7320  ;;  %7332 = vtanh.f32 %v10716_v13 }
 0x7da   : > { %v7323_v22 = vpop.eup %7322  ;;  %v11037_v26 = vpop.permute.xlu0 %6175  ;;  %7334 = vtanh.f32 %v10689_v32 }
 0x7db   : > { %v7325_v36 = vpop.eup %7324  ;;  %7336 = vtanh.f32 %v10741_v25 }
 0x7dc   : > { %v7327_v33 = vpop.eup %7326  ;;  %v11045_v51 = vpop.permute.xlu1 %6177  ;;  %7338 = vtanh.f32 %v10793_v44 }
 0x7dd   : > { %v7329_v49 = vpop.eup %7328  ;;  %7340 = vtanh.f32 %v10768_v43 }
 0x7de   : > { %v7331_v23 = vpop.eup %7330  ;;  %7342 = vtanh.f32 %v10818_v40 }
 0x7df   : > { %v7333_v15 = vpop.eup %7332  ;;  %7344 = vtanh.f32 %v10859_v3 }
 0x7e0   : > { %6333 = vrot.lane.b32.xlu1 %v7305_v21, %s7467_s27  ;;  %6337 = vrot.lane.b32.xlu0 %v7307_v8, %s7467_s27  ;;  %v7335_v28 = vpop.eup %7334  ;;  %7346 = vtanh.f32 %v10839_v18 }
 0x7e1   : > { %6341 = vrot.lane.b32.xlu2 %v7309_v2, %s7467_s27  ;;  %v11027_v10 = vpop.permute.xlu2 %6191  ;;  %v7337_v54 = vpop.eup %7336  ;;  %7348 = vtanh.f32 %v10877_v1 }
 0x7e2   : > { %v11049_v39 = vpop.permute.xlu0 %6181  ;;  %v7339_v58 = vpop.eup %7338  ;;  %7350 = vtanh.f32 %v10913_v17 }
 0x7e3   : > { %v7341_v6 = vpop.eup %7340  ;;  %7352 = vtanh.f32 %v10895_v11 }
 0x7e4   : > { %v11057_v32 = vpop.permute.xlu1 %6183  ;;  %v7343_v53 = vpop.eup %7342  ;;  %7354 = vtanh.f32 %v10931_v7 }
 0x7e5   : > { %v7345_v62 = vpop.eup %7344  ;;  %7356 = vtanh.f32 %v10964_v12 }
 0x7e6   : > { %v7347_v31 = vpop.eup %7346  ;;  %7358 = vtanh.f32 %v10949_v29 }
 0x7e7   : > { %v7349_v45 = vpop.eup %7348  ;;  %7360 = vtanh.f32 %v10973_v5 }
 0x7e8   : > { %6339 = vrot.lane.b32.xlu1 %v7311_v52, %s7467_s27  ;;  %6343 = vrot.lane.b32.xlu0 %v7313_v27, %s7467_s27  ;;  %v7351_v20 = vpop.eup %7350 }
 0x7e9   : > { %6347 = vrot.lane.b32.xlu2 %v7315_v24, %s7467_s27  ;;  %v11039_v55 = vpop.permute.xlu2 %6197  ;;  %v7353_v21 = vpop.eup %7352  ;;  %v6105_v24 = vld [vmem:[#allocation3] sm:$0xff] }
 0x7ea   : > { %v11061_v25 = vpop.permute.xlu0 %6187  ;;  %v7355_v8 = vpop.eup %7354 }
 0x7eb   : > { %v7357_v2 = vpop.eup %7356 }
 0x7ec   : > { %v11069_v43 = vpop.permute.xlu1 %6189  ;;  %v7359_v52 = vpop.eup %7358 }
 0x7ed   : > { %v7361_v27 = vpop.eup %7360 }
 0x7f0   : > { %6345 = vrot.lane.b32.xlu1 %v7317_v47, %s7467_s27  ;;  %6349 = vrot.lane.b32.xlu0 %v7319_v57, %s7467_s27  ;;  %v6265_v57 = vmul.f32 %v11025_v46, %v6105_v24  ;;  %v6111_v46 = vld [vmem:[#allocation3 + $0x30] sm:$0xff] }
 0x7f1   : > { %6353 = vrot.lane.b32.xlu2 %v7321_v56, %s7467_s27  ;;  %v11051_v13 = vpop.permute.xlu2 %6203 }
 0x7f2   : > { %v11073_v40 = vpop.permute.xlu0 %6193 }
 0x7f4   : > { %v11081_v18 = vpop.permute.xlu1 %6195 }
 0x7f8   : > { %6351 = vrot.lane.b32.xlu1 %v7323_v22, %s7467_s27  ;;  %6355 = vrot.lane.b32.xlu0 %v7325_v36, %s7467_s27  ;;  %v6108_v36 = vld [vmem:[#allocation3 + $0x18] sm:$0xff] }
 0x7f9   : > { %6359 = vrot.lane.b32.xlu2 %v7327_v33, %s7467_s27  ;;  %v11063_v44 = vpop.permute.xlu2 %6209 }
 0x7fa   : > { %v11085_v1 = vpop.permute.xlu0 %6199 }
 0x7fc   : > { %v11093_v11 = vpop.permute.xlu1 %6201 }
 0x800   : > { %6357 = vrot.lane.b32.xlu1 %v7329_v49, %s7467_s27  ;;  %6361 = vrot.lane.b32.xlu0 %v7331_v23, %s7467_s27 }
 0x801   : > { %6365 = vrot.lane.b32.xlu2 %v7333_v15, %s7467_s27  ;;  %v11075_v3 = vpop.permute.xlu2 %6215  ;;  %v6268_v15 = vmul.f32 %v11037_v26, %v6108_v36 }
 0x802   : > { %v11096_v7 = vpop.permute.xlu0 %6205 }
 0x804   : > { %v11102_v29 = vpop.permute.xlu1 %6207 }
 0x808   : > { %6363 = vrot.lane.b32.xlu1 %v7335_v28, %s7467_s27  ;;  %6367 = vrot.lane.b32.xlu0 %v7337_v54, %s7467_s27 }
 0x809   : > { %6371 = vrot.lane.b32.xlu2 %v7339_v58, %s7467_s27 }
 0x80a   : > { %v11087_v17 = vpop.permute.xlu2 %6221  ;;  %v11104_v47 = vpop.permute.xlu0 %6211 }
 0x80c   : > { %v11109_v33 = vpop.permute.xlu1 %6213 }
 0x810   : > { %6369 = vrot.lane.b32.xlu1 %v7341_v6, %s7467_s27  ;;  %6373 = vrot.lane.b32.xlu0 %v7343_v53, %s7467_s27 }
 0x811   : > { %6377 = vrot.lane.b32.xlu2 %v7345_v62, %s7467_s27 }
 0x812   : > { %v11111_v49 = vpop.permute.xlu0 %6217 }
 0x818   : > { %6379 = vrot.lane.b32.xlu0 %v7349_v45, %s7467_s27  ;;  %6375 = vrot.lane.b32.xlu1 %v7347_v31, %s7467_s27  ;;  %v6271_v31 = vmul.f32 %v11049_v39, %v6111_v46 }
 0x819   : > { %6383 = vrot.lane.b32.xlu2 %v7351_v20, %s7467_s27 }
 0x81a   : > { %v11117_v6 = vpop.permute.xlu1 %6219 }
 0x820   : > { %6385 = vrot.lane.b32.xlu0 %v7355_v8, %s7467_s27  ;;  %6381 = vrot.lane.b32.xlu1 %v7353_v21, %s7467_s27  ;;  %v6114_v21 = vld [vmem:[#allocation3 + $0x48] sm:$0xff] }
 0x821   : > { %6389 = vrot.lane.b32.xlu2 %v7357_v2, %s7467_s27 }
 0x822   : > { %v11098_v12 = vpop.permute.xlu2 %6227 }
 0x828   : > { %6391 = vrot.lane.b32.xlu0 %v7361_v27, %s7467_s27  ;;  %6387 = vrot.lane.b32.xlu1 %v7359_v52, %s7467_s27  ;;  %v6274_v27 = vmul.f32 %v11061_v25, %v6114_v21 }
 0x82a   : > { %v6330_v5 = vpop.permute.xlu2 %6329  ;;  %v11119_v53 = vpop.permute.xlu0 %6223 }
 0x82b   : > { %v6425_v56 = vmul.f32 %v6330_v5, %v10309_v35 }
 0x82d   : > { %v6457_v22 = vadd.f32 %v6425_v56, %v6265_v57  ;;  %v6106_v57 = vld [vmem:[#allocation3 + $0x8] sm:$0xff]  ;;  %v6117_v56 = vld [vmem:[#allocation3 + $0x60] sm:$0xff] }
 0x82e   : > { %v6277_v25 = vmul.f32 %v11073_v40, %v6117_v56 }
 0x82f   : > { %7362 = vtanh.f32 %v6457_v22  ;;  %6681 = vst.msk [vmem:[#allocation3] sm:$0xff] %vm310_vm2, %v6457_v22 }
 0x832   : > { %v11125_v8 = vpop.permute.xlu1 %6225 }
 0x833   : > { %v6336_v23 = vpop.permute.xlu2 %6335 }
 0x834   : > { %v6428_v28 = vmul.f32 %v6336_v23, %v10406_v16  ;;  %v6266_v23 = vmul.f32 %v11033_v61, %v6106_v57  ;;  %v6120_v61 = vld [vmem:[#allocation3 + $0x78] sm:$0xff] }
 0x835   : > { %v7363_v54 = vpop.eup %7362 }
 0x836   : > { %v6460_v58 = vadd.f32 %v6428_v28, %v6268_v15  ;;  %6553 = vrot.lane.b32.xlu1 %v7363_v54, %s7468_s28 }
 0x838   : > { %7364 = vtanh.f32 %v6460_v58  ;;  %6684 = vst.msk [vmem:[#allocation3 + $0x18] sm:$0xff] %vm310_vm2, %v6460_v58 }
 0x83b   : > { %v6342_v62 = vpop.permute.xlu2 %6341 }
 0x83c   : > { %v6431_v45 = vmul.f32 %v6342_v62, %v10493_v14 }
 0x83e   : > { %v7365_v26 = vpop.eup %7364  ;;  %v6463_v20 = vadd.f32 %v6431_v45, %v6271_v31  ;;  %v6107_v31 = vld [vmem:[#allocation3 + $0x10] sm:$0xff]  ;;  %v6109_v45 = vld [vmem:[#allocation3 + $0x20] sm:$0xff] }
 0x83f   : > { %6559 = vrot.lane.b32.xlu1 %v7365_v26, %s7468_s28  ;;  %v6267_v40 = vmul.f32 %v11001_v41, %v6107_v31  ;;  %v6269_v21 = vmul.f32 %v11045_v51, %v6109_v45  ;;  %v6110_v41 = vld [vmem:[#allocation3 + $0x28] sm:$0xff]  ;;  %v6112_v51 = vld [vmem:[#allocation3 + $0x38] sm:$0xff]  ;;  %v11600_v31 = vld [vmem:[#allocation37_spill] sm:$0xff] }
 0x840   : > { %7366 = vtanh.f32 %v6463_v20  ;;  %6687 = vst.msk [vmem:[#allocation3 + $0x30] sm:$0xff] %vm310_vm2, %v6463_v20 }
 0x842   : > { %v11127_v2 = vpop.permute.xlu0 %6229 }
 0x843   : > { %v6348_v52 = vpop.permute.xlu2 %6347 }
 0x844   : > { %v6434_v24 = vmul.f32 %v6348_v52, %v10576_v30 }
 0x846   : > { %v7367_v39 = vpop.eup %7366  ;;  %v6466_v5 = vadd.f32 %v6434_v24, %v6274_v27 }
 0x847   : > { %6565 = vrot.lane.b32.xlu1 %v7367_v39, %s7468_s28  ;;  %v6280_v39 = vmul.f32 %v11085_v1, %v6120_v61  ;;  %v6123_v1 = vld [vmem:[#allocation3 + $0x90] sm:$0xff] }
 0x848   : > { %7368 = vtanh.f32 %v6466_v5  ;;  %6690 = vst.msk [vmem:[#allocation3 + $0x48] sm:$0xff] %vm310_vm2, %v6466_v5 }
 0x84a   : > { %v11133_v22 = vpop.permute.xlu1 %6231  ;;  %v6332_v36 = vpop.permute.xlu0 %6331 }
 0x84b   : > { %v6426_v15 = vmul.f32 %v6332_v36, %v10349_v38  ;;  %v6354_v28 = vpop.permute.xlu2 %6353 }
 0x84c   : > { %v6437_v54 = vmul.f32 %v6354_v28, %v10653_v0 }
 0x84d   : > { %v6458_v58 = vadd.f32 %v6426_v15, %v6266_v23 }
 0x84e   : > { %v7369_v46 = vpop.eup %7368  ;;  %v6469_v62 = vadd.f32 %v6437_v54, %v6277_v25  ;;  %v6270_v54 = vmul.f32 %v11009_v50, %v6110_v41  ;;  %v6113_v50 = vld [vmem:[#allocation3 + $0x40] sm:$0xff] }
 0x84f   : > { %7370 = vtanh.f32 %v6458_v58  ;;  %6682 = vst.msk [vmem:[#allocation3 + $0x8] sm:$0xff] %vm310_vm2, %v6458_v58  ;;  %6571 = vrot.lane.b32.xlu1 %v7369_v46, %s7468_s28  ;;  %v6272_v58 = vmul.f32 %v11057_v32, %v6112_v51  ;;  %v11599_v46 = vld [vmem:[#allocation66_spill] sm:$0xff]  ;;  %v6115_v32 = vld [vmem:[#allocation3 + $0x50] sm:$0xff]  ;;  %v11603_v51 = vld [vmem:[#allocation45_spill] sm:$0xff] }
 0x850   : > { %7372 = vtanh.f32 %v6469_v62  ;;  %6693 = vst.msk [vmem:[#allocation3 + $0x60] sm:$0xff] %vm310_vm2, %v6469_v62 }
 0x852   : > { %v6334_v26 = vpop.permute.xlu1 %6333  ;;  %v6338_v20 = vpop.permute.xlu0 %6337 }
 0x853   : > { %v6427_v52 = vmul.f32 %v6334_v26, %v10372_v19  ;;  %v6429_v27 = vmul.f32 %v6338_v20, %v10434_v60  ;;  %v6360_v24 = vpop.permute.xlu2 %6359  ;;  %v6283_v26 = vmul.f32 %v11096_v7, %v6123_v1  ;;  %v11601_v20 = vld [vmem:[#allocation49_spill] sm:$0xff]  ;;  %v6126_v7 = vld [vmem:[#allocation3 + $0xa8] sm:$0xff] }
 0x854   : > { %v6440_v5 = vmul.f32 %v6360_v24, %v10732_v34 }
 0x855   : > { %v7371_v57 = vpop.eup %7370  ;;  %v6459_v56 = vadd.f32 %v6427_v52, %v6267_v40  ;;  %v6461_v36 = vadd.f32 %v6429_v27, %v6269_v21 }
 0x856   : > { %v7373_v23 = vpop.eup %7372  ;;  %v6472_v15 = vadd.f32 %v6440_v5, %v6280_v39  ;;  %6555 = vrot.lane.b32.xlu2 %v7371_v57, %s7468_s28 }
 0x857   : > { %7374 = vtanh.f32 %v6459_v56  ;;  %6683 = vst.msk [vmem:[#allocation3 + $0x10] sm:$0xff] %vm310_vm2, %v6459_v56  ;;  %6577 = vrot.lane.b32.xlu1 %v7373_v23, %s7468_s28  ;;  %v6275_v23 = vmul.f32 %v11069_v43, %v6115_v32  ;;  %v6118_v43 = vld [vmem:[#allocation3 + $0x68] sm:$0xff] }
 0x858   : > { %7376 = vtanh.f32 %v6461_v36  ;;  %6685 = vst.msk [vmem:[#allocation3 + $0x20] sm:$0xff] %vm310_vm2, %v6461_v36  ;;  %v6273_v36 = vmul.f32 %v11017_v42, %v6113_v50  ;;  %v6116_v42 = vld [vmem:[#allocation3 + $0x58] sm:$0xff]  ;;  %v11606_v32 = vld [vmem:[#allocation30_spill] sm:$0xff] }
 0x859   : > { %7378 = vtanh.f32 %v6472_v15  ;;  %6696 = vst.msk [vmem:[#allocation3 + $0x78] sm:$0xff] %vm310_vm2, %v6472_v15  ;;  %v11602_v15 = vld [vmem:[#allocation29_spill] sm:$0xff] }
 0x85a   : > { %v6340_v28 = vpop.permute.xlu1 %6339  ;;  %v6344_v25 = vpop.permute.xlu0 %6343 }
 0x85b   : > { %v6430_v62 = vmul.f32 %v6340_v28, %v11599_v46  ;;  %v6432_v45 = vmul.f32 %v6344_v25, %v11600_v31  ;;  %v6366_v61 = vpop.permute.xlu2 %6365  ;;  %v6286_v25 = vmul.f32 %v11104_v47, %v6126_v7  ;;  %v6129_v47 = vld [vmem:[#allocation3 + $0xc0] sm:$0xff] }
 0x85c   : > { %v6443_v40 = vmul.f32 %v6366_v61, %v11601_v20 }
 0x85d   : > { %v7375_v21 = vpop.eup %7374  ;;  %v6462_v52 = vadd.f32 %v6430_v62, %v6270_v54  ;;  %v6464_v27 = vadd.f32 %v6432_v45, %v6272_v58  ;;  %v11604_v54 = vld [vmem:[#allocation51_spill] sm:$0xff] }
 0x85e   : > { %v7377_v24 = vpop.eup %7376  ;;  %v6475_v39 = vadd.f32 %v6443_v40, %v6283_v26  ;;  %6557 = vrot.lane.b32.xlu0 %v7375_v21, %s7468_s28 }
 0x85f   : > { %v7379_v5 = vpop.eup %7378  ;;  %7380 = vtanh.f32 %v6462_v52  ;;  %6686 = vst.msk [vmem:[#allocation3 + $0x28] sm:$0xff] %vm310_vm2, %v6462_v52  ;;  %6561 = vrot.lane.b32.xlu2 %v7377_v24, %s7468_s28  ;;  %v6276_v24 = vmul.f32 %v11027_v10, %v6116_v42  ;;  %v6119_v10 = vld [vmem:[#allocation3 + $0x70] sm:$0xff] }
 0x860   : > { %7382 = vtanh.f32 %v6464_v27  ;;  %6688 = vst.msk [vmem:[#allocation3 + $0x38] sm:$0xff] %vm310_vm2, %v6464_v27  ;;  %6583 = vrot.lane.b32.xlu1 %v7379_v5, %s7468_s28  ;;  %v11605_v5 = vld [vmem:[#allocation39_spill] sm:$0xff] }
 0x861   : > { %7384 = vtanh.f32 %v6475_v39  ;;  %6699 = vst.msk [vmem:[#allocation3 + $0x90] sm:$0xff] %vm310_vm2, %v6475_v39  ;;  %v6278_v39 = vmul.f32 %v11081_v18, %v6118_v43  ;;  %v6121_v18 = vld [vmem:[#allocation3 + $0x80] sm:$0xff] }
 0x862   : > { %v6346_v57 = vpop.permute.xlu1 %6345  ;;  %v6350_v56 = vpop.permute.xlu0 %6349  ;;  %v11609_v43 = vld [vmem:[#allocation41_spill] sm:$0xff] }
 0x863   : > { %v6433_v41 = vmul.f32 %v6346_v57, %v11602_v15  ;;  %v6435_v1 = vmul.f32 %v6350_v56, %v11603_v51  ;;  %v6372_v28 = vpop.permute.xlu2 %6371  ;;  %v6289_v56 = vmul.f32 %v11111_v49, %v6129_v47  ;;  %v6132_v49 = vld [vmem:[#allocation3 + $0xd8] sm:$0xff] }
 0x864   : > { %v6446_v58 = vmul.f32 %v6372_v28, %v11604_v54 }
 0x865   : > { %v7381_v62 = vpop.eup %7380  ;;  %v6465_v45 = vadd.f32 %v6433_v41, %v6273_v36  ;;  %v6467_v61 = vadd.f32 %v6435_v1, %v6275_v23  ;;  %v11607_v36 = vld [vmem:[#allocation53_spill] sm:$0xff] }
 0x866   : > { %v7383_v26 = vpop.eup %7382  ;;  %v6478_v40 = vadd.f32 %v6446_v58, %v6286_v25  ;;  %6563 = vrot.lane.b32.xlu0 %v7381_v62, %s7468_s28 }
 0x867   : > { %v7385_v21 = vpop.eup %7384  ;;  %7386 = vtanh.f32 %v6465_v45  ;;  %6689 = vst.msk [vmem:[#allocation3 + $0x40] sm:$0xff] %vm310_vm2, %v6465_v45  ;;  %6567 = vrot.lane.b32.xlu2 %v7383_v26, %s7468_s28  ;;  %v6279_v26 = vmul.f32 %v11039_v55, %v6119_v10  ;;  %v6122_v55 = vld [vmem:[#allocation3 + $0x88] sm:$0xff]  ;;  %v11611_v10 = vld [vmem:[#allocation43_spill] sm:$0xff] }
 0x868   : > { %7388 = vtanh.f32 %v6467_v61  ;;  %6691 = vst.msk [vmem:[#allocation3 + $0x50] sm:$0xff] %vm310_vm2, %v6467_v61  ;;  %6589 = vrot.lane.b32.xlu1 %v7385_v21, %s7468_s28  ;;  %v11608_v21 = vld [vmem:[#allocation47_spill] sm:$0xff] }
 0x869   : > { %7390 = vtanh.f32 %v6478_v40  ;;  %6702 = vst.msk [vmem:[#allocation3 + $0xa8] sm:$0xff] %vm310_vm2, %v6478_v40  ;;  %v6281_v40 = vmul.f32 %v11093_v11, %v6121_v18  ;;  %v6124_v11 = vld [vmem:[#allocation3 + $0x98] sm:$0xff] }
 0x86a   : > { %v6352_v52 = vpop.permute.xlu1 %6351  ;;  %v6356_v27 = vpop.permute.xlu0 %6355 }
 0x86b   : > { %v6436_v50 = vmul.f32 %v6352_v52, %v11605_v5  ;;  %v6438_v7 = vmul.f32 %v6356_v27, %v11606_v32  ;;  %v6378_v57 = vpop.permute.xlu2 %6377  ;;  %v6292_v27 = vmul.f32 %v11119_v53, %v6132_v49  ;;  %v6135_v53 = vld [vmem:[#allocation3 + $0xf0] sm:$0xff] }
 0x86c   : > { %v6449_v23 = vmul.f32 %v6378_v57, %v11607_v36 }
 0x86d   : > { %v7387_v41 = vpop.eup %7386  ;;  %v6468_v1 = vadd.f32 %v6436_v50, %v6276_v24  ;;  %v6470_v28 = vadd.f32 %v6438_v7, %v6278_v39 }
 0x86e   : > { %v7389_v25 = vpop.eup %7388  ;;  %v6481_v58 = vadd.f32 %v6449_v23, %v6289_v56  ;;  %6569 = vrot.lane.b32.xlu0 %v7387_v41, %s7468_s28 }
 0x86f   : > { %v7391_v62 = vpop.eup %7390  ;;  %7392 = vtanh.f32 %v6468_v1  ;;  %6692 = vst.msk [vmem:[#allocation3 + $0x58] sm:$0xff] %vm310_vm2, %v6468_v1  ;;  %6573 = vrot.lane.b32.xlu2 %v7389_v25, %s7468_s28  ;;  %v6284_v25 = vmul.f32 %v11102_v29, %v6124_v11  ;;  %v6127_v29 = vld [vmem:[#allocation3 + $0xb0] sm:$0xff] }
 0x870   : > { %7394 = vtanh.f32 %v6470_v28  ;;  %6694 = vst.msk [vmem:[#allocation3 + $0x68] sm:$0xff] %vm310_vm2, %v6470_v28  ;;  %6595 = vrot.lane.b32.xlu1 %v7391_v62, %s7468_s28  ;;  %v6282_v28 = vmul.f32 %v11051_v13, %v6122_v55  ;;  %v6125_v13 = vld [vmem:[#allocation3 + $0xa0] sm:$0xff] }
 0x871   : > { %7396 = vtanh.f32 %v6481_v58  ;;  %6705 = vst.msk [vmem:[#allocation3 + $0xc0] sm:$0xff] %vm310_vm2, %v6481_v58  ;;  %v11610_v58 = vld [vmem:[#allocation31_spill] sm:$0xff] }
 0x872   : > { %v6358_v45 = vpop.permute.xlu1 %6357  ;;  %v6362_v61 = vpop.permute.xlu0 %6361 }
 0x873   : > { %v6439_v42 = vmul.f32 %v6358_v45, %v11608_v21  ;;  %v6441_v47 = vmul.f32 %v6362_v61, %v11609_v43  ;;  %v6384_v52 = vpop.permute.xlu2 %6383  ;;  %v6295_v45 = vmul.f32 %v11127_v2, %v6135_v53 }
 0x874   : > { %v6452_v24 = vmul.f32 %v6384_v52, %v10969_v4 }
 0x875   : > { %v7393_v39 = vpop.eup %7392  ;;  %v6471_v50 = vadd.f32 %v6439_v42, %v6279_v26  ;;  %v6473_v7 = vadd.f32 %v6441_v47, %v6281_v40 }
 0x876   : > { %v7395_v57 = vpop.eup %7394  ;;  %v6484_v56 = vadd.f32 %v6452_v24, %v6292_v27  ;;  %6575 = vrot.lane.b32.xlu0 %v7393_v39, %s7468_s28  ;;  %v6285_v39 = vmul.f32 %v11063_v44, %v6125_v13  ;;  %v6130_v44 = vld [vmem:[#allocation3 + $0xc8] sm:$0xff]  ;;  %v6133_v13 = vld [vmem:[#allocation3 + $0xe0] sm:$0xff] }
 0x877   : > { %v7397_v23 = vpop.eup %7396  ;;  %7398 = vtanh.f32 %v6471_v50  ;;  %6695 = vst.msk [vmem:[#allocation3 + $0x70] sm:$0xff] %vm310_vm2, %v6471_v50  ;;  %6579 = vrot.lane.b32.xlu2 %v7395_v57, %s7468_s28  ;;  %v6287_v50 = vmul.f32 %v11109_v33, %v6127_v29 }
 0x878   : > { %7400 = vtanh.f32 %v6473_v7  ;;  %6697 = vst.msk [vmem:[#allocation3 + $0x80] sm:$0xff] %vm310_vm2, %v6473_v7  ;;  %6601 = vrot.lane.b32.xlu1 %v7397_v23, %s7468_s28  ;;  %v11612_v7 = vld [vmem:[#allocation32_spill] sm:$0xff] }
 0x879   : > { %7402 = vtanh.f32 %v6484_v56  ;;  %6708 = vst.msk [vmem:[#allocation3 + $0xd8] sm:$0xff] %vm310_vm2, %v6484_v56  ;;  %v11613_v56 = vld [vmem:[#allocation46_spill] sm:$0xff] }
 0x87a   : > { %v6364_v41 = vpop.permute.xlu1 %6363  ;;  %v6368_v1 = vpop.permute.xlu0 %6367 }
 0x87b   : > { %v6442_v62 = vmul.f32 %v6364_v41, %v11610_v58  ;;  %v6444_v18 = vmul.f32 %v6368_v1, %v11611_v10  ;;  %v6390_v49 = vpop.permute.xlu2 %6389 }
 0x87c   : > { %v6455_v61 = vmul.f32 %v6390_v49, %v10985_v63  ;;  %v11614_v49 = vld [vmem:[#allocation48_spill] sm:$0xff] }
 0x87d   : > { %v7399_v26 = vpop.eup %7398  ;;  %v6474_v40 = vadd.f32 %v6442_v62, %v6282_v28  ;;  %v6476_v42 = vadd.f32 %v6444_v18, %v6284_v25  ;;  %v6128_v28 = vld [vmem:[#allocation3 + $0xb8] sm:$0xff]  ;;  %v6290_v18 = vmul.f32 %v11117_v6, %v6130_v44 }
 0x87e   : > { %v7401_v47 = vpop.eup %7400  ;;  %v6487_v52 = vadd.f32 %v6455_v61, %v6295_v45  ;;  %6581 = vrot.lane.b32.xlu0 %v7399_v26, %s7468_s28  ;;  %v6288_v62 = vmul.f32 %v11075_v3, %v6128_v28  ;;  %v11615_v61 = vld [vmem:[#allocation33_spill] sm:$0xff] }
 0x87f   : > { %v7403_v27 = vpop.eup %7402  ;;  %7404 = vtanh.f32 %v6474_v40  ;;  %6698 = vst.msk [vmem:[#allocation3 + $0x88] sm:$0xff] %vm310_vm2, %v6474_v40  ;;  %6585 = vrot.lane.b32.xlu2 %v7401_v47, %s7468_s28 }
 0x880   : > { %7406 = vtanh.f32 %v6476_v42  ;;  %6700 = vst.msk [vmem:[#allocation3 + $0x98] sm:$0xff] %vm310_vm2, %v6476_v42  ;;  %6607 = vrot.lane.b32.xlu1 %v7403_v27, %s7468_s28  ;;  %v6131_v27 = vld [vmem:[#allocation3 + $0xd0] sm:$0xff] }
 0x881   : > { %7408 = vtanh.f32 %v6487_v52  ;;  %6711 = vst.msk [vmem:[#allocation3 + $0xf0] sm:$0xff] %vm310_vm2, %v6487_v52  ;;  %v6291_v29 = vmul.f32 %v11087_v17, %v6131_v27 }
 0x882   : > { %v6370_v2 = vpop.permute.xlu1 %6369  ;;  %v6374_v24 = vpop.permute.xlu0 %6373 }
 0x883   : > { %v6445_v57 = vmul.f32 %v6370_v2, %v11612_v7  ;;  %v6447_v23 = vmul.f32 %v6374_v24, %v11613_v56  ;;  %v6293_v2 = vmul.f32 %v11125_v8, %v6133_v13 }
 0x885   : > { %v7405_v55 = vpop.eup %7404  ;;  %v6477_v11 = vadd.f32 %v6445_v57, %v6285_v39  ;;  %v6479_v53 = vadd.f32 %v6447_v23, %v6287_v50 }
 0x886   : > { %v7407_v41 = vpop.eup %7406  ;;  %6587 = vrot.lane.b32.xlu0 %v7405_v55, %s7468_s28 }
 0x887   : > { %v7409_v1 = vpop.eup %7408  ;;  %7410 = vtanh.f32 %v6477_v11  ;;  %6701 = vst.msk [vmem:[#allocation3 + $0xa0] sm:$0xff] %vm310_vm2, %v6477_v11  ;;  %6591 = vrot.lane.b32.xlu2 %v7407_v41, %s7468_s28  ;;  %v6134_v11 = vld [vmem:[#allocation3 + $0xe8] sm:$0xff] }
 0x888   : > { %7412 = vtanh.f32 %v6479_v53  ;;  %6703 = vst.msk [vmem:[#allocation3 + $0xb0] sm:$0xff] %vm310_vm2, %v6479_v53  ;;  %6613 = vrot.lane.b32.xlu1 %v7409_v1, %s7468_s28  ;;  %v6136_v53 = vld [vmem:[#allocation3 + $0xf8] sm:$0xff]  ;;  %v6294_v41 = vmul.f32 %v11098_v12, %v6134_v11 }
 0x889   : > { %v6296_v1 = vmul.f32 %v11133_v22, %v6136_v53 }
 0x88a   : > { %v6380_v33 = vpop.permute.xlu0 %6379  ;;  %v6376_v25 = vpop.permute.xlu1 %6375 }
 0x88b   : > { %v6450_v45 = vmul.f32 %v6380_v33, %v11614_v49  ;;  %v6448_v26 = vmul.f32 %v6376_v25, %v11615_v61 }
 0x88d   : > { %v7411_v40 = vpop.eup %7410  ;;  %v6482_v42 = vadd.f32 %v6450_v45, %v6290_v18  ;;  %v6480_v47 = vadd.f32 %v6448_v26, %v6288_v62 }
 0x88e   : > { %v7413_v52 = vpop.eup %7412  ;;  %6593 = vrot.lane.b32.xlu0 %v7411_v40, %s7468_s28 }
 0x88f   : > { %7414 = vtanh.f32 %v6482_v42  ;;  %6706 = vst.msk [vmem:[#allocation3 + $0xc8] sm:$0xff] %vm310_vm2, %v6482_v42  ;;  %6597 = vrot.lane.b32.xlu2 %v7413_v52, %s7468_s28 }
 0x890   : > { %7416 = vtanh.f32 %v6480_v47  ;;  %6704 = vst.msk [vmem:[#allocation3 + $0xb8] sm:$0xff] %vm310_vm2, %v6480_v47 }
 0x892   : > { %v6386_v3 = vpop.permute.xlu0 %6385  ;;  %v6382_v6 = vpop.permute.xlu1 %6381 }
 0x893   : > { %v6453_v24 = vmul.f32 %v6386_v3, %v10976_v9  ;;  %v6451_v39 = vmul.f32 %v6382_v6, %v10957_v59 }
 0x895   : > { %v7415_v50 = vpop.eup %7414  ;;  %v6485_v57 = vadd.f32 %v6453_v24, %v6293_v2  ;;  %v6483_v23 = vadd.f32 %v6451_v39, %v6291_v29 }
 0x896   : > { %v7417_v55 = vpop.eup %7416 }
 0x897   : > { %7418 = vtanh.f32 %v6485_v57  ;;  %6709 = vst.msk [vmem:[#allocation3 + $0xe0] sm:$0xff] %vm310_vm2, %v6485_v57  ;;  %6603 = vrot.lane.b32.xlu2 %v7415_v50, %s7468_s28  ;;  %6599 = vrot.lane.b32.xlu0 %v7417_v55, %s7468_s28 }
 0x898   : > { %7420 = vtanh.f32 %v6483_v23  ;;  %6707 = vst.msk [vmem:[#allocation3 + $0xd0] sm:$0xff] %vm310_vm2, %v6483_v23 }
 0x89a   : > { %v6392_v17 = vpop.permute.xlu0 %6391  ;;  %v6388_v8 = vpop.permute.xlu1 %6387 }
 0x89b   : > { %v6456_v28 = vmul.f32 %v6392_v17, %v10992_v48  ;;  %v6454_v44 = vmul.f32 %v6388_v8, %v10980_v37 }
 0x89d   : > { %v7419_v33 = vpop.eup %7418  ;;  %v6488_v25 = vadd.f32 %v6456_v28, %v6296_v1  ;;  %v6486_v62 = vadd.f32 %v6454_v44, %v6294_v41 }
 0x89e   : > { %v7421_v18 = vpop.eup %7420 }
 0x89f   : > { %7422 = vtanh.f32 %v6488_v25  ;;  %6712 = vst.msk [vmem:[#allocation3 + $0xf8] sm:$0xff] %vm310_vm2, %v6488_v25  ;;  %6609 = vrot.lane.b32.xlu2 %v7419_v33, %s7468_s28  ;;  %6605 = vrot.lane.b32.xlu0 %v7421_v18, %s7468_s28 }
 0x8a0   : > { %7424 = vtanh.f32 %v6486_v62  ;;  %6710 = vst.msk [vmem:[#allocation3 + $0xe8] sm:$0xff] %vm310_vm2, %v6486_v62 }
 0x8a5   : > { %v7423_v12 = vpop.eup %7422 }
 0x8a6   : > { %v7425_v22 = vpop.eup %7424 }
 0x8a7   : > { %6615 = vrot.lane.b32.xlu2 %v7423_v12, %s7468_s28  ;;  %6611 = vrot.lane.b32.xlu0 %v7425_v22, %s7468_s28 }
 0x8a8   : > { %v6554_v45 = vpop.permute.xlu1 %6553 }
 0x8a9   : > { %v6649_v26 = vmul.f32 %v6554_v45, %v10309_v35 }
 0x8af   : > { %6745 = vrot.lane.b32.xlu0 %v6649_v26, %s7468_s28 }
 0x8b0   : > { %v6556_v40 = vpop.permute.xlu2 %6555 }
 0x8b1   : > { %v6560_v42 = vpop.permute.xlu1 %6559  ;;  %v6650_v47 = vmul.f32 %v6556_v40, %v10349_v38 }
 0x8b2   : > { %v6652_v52 = vmul.f32 %v6560_v42, %v10406_v16 }
 0x8b3   : > { %6747 = vrot.lane.b32.xlu1 %v6650_v47, %s7468_s28 }
 0x8b7   : > { %6751 = vrot.lane.b32.xlu0 %v6652_v52, %s7468_s28 }
 0x8b9   : > { %v6566_v27 = vpop.permute.xlu1 %6565  ;;  %v6562_v13 = vpop.permute.xlu2 %6561 }
 0x8ba   : > { %v6653_v3 = vmul.f32 %v6562_v13, %v10434_v60  ;;  %v6655_v35 = vmul.f32 %v6566_v27, %v10493_v14 }
 0x8bc   : > { %6753 = vrot.lane.b32.xlu1 %v6653_v3, %s7468_s28 }
 0x8bf   : > { %6757 = vrot.lane.b32.xlu0 %v6655_v35, %s7468_s28 }
 0x8c1   : > { %v6572_v6 = vpop.permute.xlu1 %6571  ;;  %v6568_v29 = vpop.permute.xlu2 %6567 }
 0x8c2   : > { %v6656_v38 = vmul.f32 %v6568_v29, %v11600_v31  ;;  %v6658_v16 = vmul.f32 %v6572_v6, %v10576_v30 }
 0x8c4   : > { %6759 = vrot.lane.b32.xlu1 %v6656_v38, %s7468_s28 }
 0x8c7   : > { %6763 = vrot.lane.b32.xlu0 %v6658_v16, %s7468_s28 }
 0x8c9   : > { %v6578_v2 = vpop.permute.xlu1 %6577  ;;  %v6574_v24 = vpop.permute.xlu2 %6573 }
 0x8ca   : > { %v6659_v60 = vmul.f32 %v6574_v24, %v11603_v51  ;;  %v6661_v14 = vmul.f32 %v6578_v2, %v10653_v0 }
 0x8cc   : > { %6765 = vrot.lane.b32.xlu1 %v6659_v60, %s7468_s28 }
 0x8cf   : > { %6769 = vrot.lane.b32.xlu0 %v6661_v14, %s7468_s28 }
 0x8d0   : > { %v6558_v39 = vpop.permute.xlu0 %6557 }
 0x8d1   : > { %v6651_v50 = vmul.f32 %v6558_v39, %v10372_v19  ;;  %v6580_v31 = vpop.permute.xlu2 %6579 }
 0x8d2   : > { %v6584_v57 = vpop.permute.xlu1 %6583  ;;  %v6662_v23 = vmul.f32 %v6580_v31, %v11606_v32 }
 0x8d3   : > { %6749 = vrot.lane.b32.xlu2 %v6651_v50, %s7468_s28  ;;  %v6664_v30 = vmul.f32 %v6584_v57, %v10732_v34 }
 0x8d4   : > { %6771 = vrot.lane.b32.xlu1 %v6662_v23, %s7468_s28 }
 0x8d7   : > { %6775 = vrot.lane.b32.xlu0 %v6664_v30, %s7468_s28 }
 0x8d8   : > { %v6564_v51 = vpop.permute.xlu0 %6563 }
 0x8d9   : > { %v6654_v0 = vmul.f32 %v6564_v51, %v11599_v46  ;;  %v6586_v55 = vpop.permute.xlu2 %6585 }
 0x8da   : > { %v6590_v11 = vpop.permute.xlu1 %6589  ;;  %v6665_v53 = vmul.f32 %v6586_v55, %v11609_v43 }
 0x8db   : > { %6755 = vrot.lane.b32.xlu2 %v6654_v0, %s7468_s28  ;;  %v6667_v19 = vmul.f32 %v6590_v11, %v11601_v20 }
 0x8dc   : > { %6777 = vrot.lane.b32.xlu1 %v6665_v53, %s7468_s28 }
 0x8df   : > { %6781 = vrot.lane.b32.xlu0 %v6667_v19, %s7468_s28 }
 0x8e0   : > { %v6570_v32 = vpop.permute.xlu0 %6569 }
 0x8e1   : > { %v6657_v34 = vmul.f32 %v6570_v32, %v11602_v15  ;;  %v6592_v17 = vpop.permute.xlu2 %6591 }
 0x8e2   : > { %v6596_v8 = vpop.permute.xlu1 %6595  ;;  %v6668_v41 = vmul.f32 %v6592_v17, %v11611_v10 }
 0x8e3   : > { %6761 = vrot.lane.b32.xlu2 %v6657_v34, %s7468_s28  ;;  %v6670_v46 = vmul.f32 %v6596_v8, %v11604_v54 }
 0x8e4   : > { %6783 = vrot.lane.b32.xlu1 %v6668_v41, %s7468_s28 }
 0x8e7   : > { %6787 = vrot.lane.b32.xlu0 %v6670_v46, %s7468_s28 }
 0x8e8   : > { %v6576_v43 = vpop.permute.xlu0 %6575 }
 0x8e9   : > { %v6660_v20 = vmul.f32 %v6576_v43, %v11605_v5  ;;  %v6598_v1 = vpop.permute.xlu2 %6597 }
 0x8ea   : > { %v6602_v28 = vpop.permute.xlu1 %6601  ;;  %v6671_v44 = vmul.f32 %v6598_v1, %v11613_v56 }
 0x8eb   : > { %6767 = vrot.lane.b32.xlu2 %v6660_v20, %s7468_s28  ;;  %v6673_v15 = vmul.f32 %v6602_v28, %v11607_v36 }
 0x8ec   : > { %6789 = vrot.lane.b32.xlu1 %v6671_v44, %s7468_s28 }
 0x8ef   : > { %6793 = vrot.lane.b32.xlu0 %v6673_v15, %s7468_s28 }
 0x8f0   : > { %v6582_v10 = vpop.permute.xlu0 %6581 }
 0x8f1   : > { %v6663_v54 = vmul.f32 %v6582_v10, %v11608_v21  ;;  %v6604_v33 = vpop.permute.xlu2 %6603 }
 0x8f2   : > { %v6608_v25 = vpop.permute.xlu1 %6607  ;;  %v6674_v62 = vmul.f32 %v6604_v33, %v11614_v49 }
 0x8f3   : > { %6773 = vrot.lane.b32.xlu2 %v6663_v54, %s7468_s28  ;;  %v6676_v5 = vmul.f32 %v6608_v25, %v10969_v4 }
 0x8f4   : > { %6795 = vrot.lane.b32.xlu1 %v6674_v62, %s7468_s28 }
 0x8f7   : > { %6799 = vrot.lane.b32.xlu0 %v6676_v5, %s7468_s28 }
 0x8f8   : > { %v6588_v56 = vpop.permute.xlu0 %6587 }
 0x8f9   : > { %v6666_v36 = vmul.f32 %v6588_v56, %v11610_v58  ;;  %v6610_v18 = vpop.permute.xlu2 %6609 }
 0x8fa   : > { %v6614_v12 = vpop.permute.xlu1 %6613  ;;  %v6677_v22 = vmul.f32 %v6610_v18, %v10976_v9 }
 0x8fb   : > { %6779 = vrot.lane.b32.xlu2 %v6666_v36, %s7468_s28  ;;  %v6679_v21 = vmul.f32 %v6614_v12, %v10985_v63 }
 0x8fc   : > { %6801 = vrot.lane.b32.xlu1 %v6677_v22, %s7468_s28 }
 0x8ff   : > { %6805 = vrot.lane.b32.xlu0 %v6679_v21, %s7468_s28 }
 0x900   : > { %v6594_v49 = vpop.permute.xlu0 %6593 }
 0x901   : > { %v6669_v4 = vmul.f32 %v6594_v49, %v11612_v7  ;;  %v6616_v45 = vpop.permute.xlu2 %6615 }
 0x902   : > { %v6680_v26 = vmul.f32 %v6616_v45, %v10992_v48 }
 0x903   : > { %6785 = vrot.lane.b32.xlu2 %v6669_v4, %s7468_s28 }
 0x904   : > { %6807 = vrot.lane.b32.xlu1 %v6680_v26, %s7468_s28 }
 0x909   : > { %v6600_v9 = vpop.permute.xlu0 %6599 }
 0x90a   : > { %v6672_v58 = vmul.f32 %v6600_v9, %v11615_v61 }
 0x90c   : > { %6791 = vrot.lane.b32.xlu2 %v6672_v58, %s7468_s28 }
 0x911   : > { %v6606_v63 = vpop.permute.xlu0 %6605 }
 0x912   : > { %v6675_v40 = vmul.f32 %v6606_v63, %v10957_v59 }
 0x914   : > { %6797 = vrot.lane.b32.xlu2 %v6675_v40, %s7468_s28 }
 0x919   : > { %v6612_v7 = vpop.permute.xlu0 %6611 }
 0x91a   : > { %v6678_v48 = vmul.f32 %v6612_v7, %v10980_v37 }
 0x91c   : > { %6803 = vrot.lane.b32.xlu2 %v6678_v48, %s7468_s28 }
 0x921   : > { %v6746_v42 = vpop.permute.xlu0 %6745 }
 0x922   : > { %6841 = vst.msk [vmem:[#allocation2 + $0x32] sm:$0xff] %vm310_vm2, %v6746_v42 }
 0x923   : > { %6873 = vst.msk [vmem:[%s7523_s26] sm:$0xff] %vm310_vm2, %v6746_v42 }
 0x925   : > { %v6748_v61 = vpop.permute.xlu1 %6747 }
 0x926   : > { %6842 = vst.msk [vmem:[#allocation2 + $0x3a] sm:$0xff] %vm310_vm2, %v6748_v61 }
 0x927   : > { %6874 = vst.msk [vmem:[%s7523_s26 + $0x8] sm:$0xff] %vm310_vm2, %v6748_v61 }
 0x929   : > { %v6752_v59 = vpop.permute.xlu0 %6751 }
 0x92a   : > { %6844 = vst.msk [vmem:[#allocation2 + $0x52] sm:$0xff] %vm310_vm2, %v6752_v59 }
 0x92b   : > { %6876 = vst.msk [vmem:[%s7523_s26 + $0x18] sm:$0xff] %vm310_vm2, %v6752_v59 }
 0x92d   : > { %v6750_v37 = vpop.permute.xlu2 %6749 }
 0x92e   : > { %v6754_v47 = vpop.permute.xlu1 %6753  ;;  %6843 = vst.msk [vmem:[#allocation2 + $0x4a] sm:$0xff] %vm310_vm2, %v6750_v37 }
 0x92f   : > { %6845 = vst.msk [vmem:[#allocation2 + $0x62] sm:$0xff] %vm310_vm2, %v6754_v47 }
 0x930   : > { %6877 = vst.msk [vmem:[%s7523_s26 + $0x20] sm:$0xff] %vm310_vm2, %v6754_v47 }
 0x931   : > { %6875 = vst.msk [vmem:[%s7523_s26 + $0x10] sm:$0xff] %vm310_vm2, %v6750_v37  ;;  %v6758_v52 = vpop.permute.xlu0 %6757 }
 0x932   : > { %6847 = vst.msk [vmem:[#allocation2 + $0x7a] sm:$0xff] %vm310_vm2, %v6758_v52 }
 0x933   : > { %6879 = vst.msk [vmem:[%s7523_s26 + $0x30] sm:$0xff] %vm310_vm2, %v6758_v52 }
 0x935   : > { %v6756_v27 = vpop.permute.xlu2 %6755 }
 0x936   : > { %v6760_v13 = vpop.permute.xlu1 %6759  ;;  %6846 = vst.msk [vmem:[#allocation2 + $0x6a] sm:$0xff] %vm310_vm2, %v6756_v27 }
 0x937   : > { %6848 = vst.msk [vmem:[#allocation2 + $0x82] sm:$0xff] %vm310_vm2, %v6760_v13 }
 0x938   : > { %6880 = vst.msk [vmem:[%s7523_s26 + $0x38] sm:$0xff] %vm310_vm2, %v6760_v13 }
 0x939   : > { %6878 = vst.msk [vmem:[%s7523_s26 + $0x28] sm:$0xff] %vm310_vm2, %v6756_v27  ;;  %v6764_v3 = vpop.permute.xlu0 %6763 }
 0x93a   : > { %6850 = vst.msk [vmem:[#allocation2 + $0x9a] sm:$0xff] %vm310_vm2, %v6764_v3 }
 0x93b   : > { %6882 = vst.msk [vmem:[%s7523_s26 + $0x48] sm:$0xff] %vm310_vm2, %v6764_v3 }
 0x93d   : > { %v6762_v35 = vpop.permute.xlu2 %6761 }
 0x93e   : > { %v6766_v6 = vpop.permute.xlu1 %6765  ;;  %6849 = vst.msk [vmem:[#allocation2 + $0x92] sm:$0xff] %vm310_vm2, %v6762_v35 }
 0x93f   : > { %6851 = vst.msk [vmem:[#allocation2 + $0xaa] sm:$0xff] %vm310_vm2, %v6766_v6 }
 0x940   : > { %6883 = vst.msk [vmem:[%s7523_s26 + $0x50] sm:$0xff] %vm310_vm2, %v6766_v6 }
 0x941   : > { %6881 = vst.msk [vmem:[%s7523_s26 + $0x40] sm:$0xff] %vm310_vm2, %v6762_v35  ;;  %v6770_v29 = vpop.permute.xlu0 %6769 }
 0x942   : > { %6853 = vst.msk [vmem:[#allocation2 + $0xc2] sm:$0xff] %vm310_vm2, %v6770_v29 }
 0x943   : > { %6885 = vst.msk [vmem:[%s7523_s26 + $0x60] sm:$0xff] %vm310_vm2, %v6770_v29 }
 0x945   : > { %v6768_v38 = vpop.permute.xlu2 %6767 }
 0x946   : > { %v6772_v16 = vpop.permute.xlu1 %6771  ;;  %6852 = vst.msk [vmem:[#allocation2 + $0xb2] sm:$0xff] %vm310_vm2, %v6768_v38 }
 0x947   : > { %6854 = vst.msk [vmem:[#allocation2 + $0xca] sm:$0xff] %vm310_vm2, %v6772_v16 }
 0x948   : > { %6886 = vst.msk [vmem:[%s7523_s26 + $0x68] sm:$0xff] %vm310_vm2, %v6772_v16 }
 0x949   : > { %6884 = vst.msk [vmem:[%s7523_s26 + $0x58] sm:$0xff] %vm310_vm2, %v6768_v38  ;;  %v6776_v2 = vpop.permute.xlu0 %6775 }
 0x94a   : > { %6856 = vst.msk [vmem:[#allocation2 + $0xe2] sm:$0xff] %vm310_vm2, %v6776_v2 }
 0x94b   : > { %6888 = vst.msk [vmem:[%s7523_s26 + $0x78] sm:$0xff] %vm310_vm2, %v6776_v2 }
 0x94d   : > { %v6774_v24 = vpop.permute.xlu2 %6773 }
 0x94e   : > { %v6778_v60 = vpop.permute.xlu1 %6777  ;;  %6855 = vst.msk [vmem:[#allocation2 + $0xda] sm:$0xff] %vm310_vm2, %v6774_v24 }
 0x94f   : > { %6857 = vst.msk [vmem:[#allocation2 + $0xf2] sm:$0xff] %vm310_vm2, %v6778_v60 }
 0x950   : > { %6889 = vst.msk [vmem:[%s7523_s26 + $0x80] sm:$0xff] %vm310_vm2, %v6778_v60 }
 0x951   : > { %6887 = vst.msk [vmem:[%s7523_s26 + $0x70] sm:$0xff] %vm310_vm2, %v6774_v24  ;;  %v6782_v14 = vpop.permute.xlu0 %6781 }
 0x952   : > { %6859 = vst.msk [vmem:[#allocation2 + $0x10a] sm:$0xff] %vm310_vm2, %v6782_v14 }
 0x953   : > { %6891 = vst.msk [vmem:[%s7523_s26 + $0x90] sm:$0xff] %vm310_vm2, %v6782_v14 }
 0x955   : > { %v6780_v39 = vpop.permute.xlu2 %6779 }
 0x956   : > { %v6784_v50 = vpop.permute.xlu1 %6783  ;;  %6858 = vst.msk [vmem:[#allocation2 + $0xfa] sm:$0xff] %vm310_vm2, %v6780_v39 }
 0x957   : > { %6860 = vst.msk [vmem:[#allocation2 + $0x112] sm:$0xff] %vm310_vm2, %v6784_v50 }
 0x958   : > { %6892 = vst.msk [vmem:[%s7523_s26 + $0x98] sm:$0xff] %vm310_vm2, %v6784_v50 }
 0x959   : > { %6890 = vst.msk [vmem:[%s7523_s26 + $0x88] sm:$0xff] %vm310_vm2, %v6780_v39  ;;  %v6788_v31 = vpop.permute.xlu0 %6787 }
 0x95a   : > { %6862 = vst.msk [vmem:[#allocation2 + $0x12a] sm:$0xff] %vm310_vm2, %v6788_v31 }
 0x95b   : > { %6894 = vst.msk [vmem:[%s7523_s26 + $0xa8] sm:$0xff] %vm310_vm2, %v6788_v31 }
 0x95d   : > { %v6786_v57 = vpop.permute.xlu2 %6785 }
 0x95e   : > { %v6790_v23 = vpop.permute.xlu1 %6789  ;;  %6861 = vst.msk [vmem:[#allocation2 + $0x122] sm:$0xff] %vm310_vm2, %v6786_v57 }
 0x95f   : > { %6863 = vst.msk [vmem:[#allocation2 + $0x13a] sm:$0xff] %vm310_vm2, %v6790_v23 }
 0x960   : > { %6895 = vst.msk [vmem:[%s7523_s26 + $0xb0] sm:$0xff] %vm310_vm2, %v6790_v23 }
 0x961   : > { %6893 = vst.msk [vmem:[%s7523_s26 + $0xa0] sm:$0xff] %vm310_vm2, %v6786_v57  ;;  %v6794_v30 = vpop.permute.xlu0 %6793 }
 0x962   : > { %6865 = vst.msk [vmem:[#allocation2 + $0x152] sm:$0xff] %vm310_vm2, %v6794_v30 }
 0x963   : > { %6897 = vst.msk [vmem:[%s7523_s26 + $0xc0] sm:$0xff] %vm310_vm2, %v6794_v30 }
 0x966   : > { %v6796_v51 = vpop.permute.xlu1 %6795  ;;  %v6792_v0 = vpop.permute.xlu2 %6791 }
 0x967   : > { %6866 = vst.msk [vmem:[#allocation2 + $0x15a] sm:$0xff] %vm310_vm2, %v6796_v51 }
 0x968   : > { %6898 = vst.msk [vmem:[%s7523_s26 + $0xc8] sm:$0xff] %vm310_vm2, %v6796_v51 }
 0x969   : > { %6864 = vst.msk [vmem:[#allocation2 + $0x142] sm:$0xff] %vm310_vm2, %v6792_v0  ;;  %v6800_v55 = vpop.permute.xlu0 %6799 }
 0x96a   : > { %6896 = vst.msk [vmem:[%s7523_s26 + $0xb8] sm:$0xff] %vm310_vm2, %v6792_v0 }
 0x96b   : > { %6868 = vst.msk [vmem:[#allocation2 + $0x172] sm:$0xff] %vm310_vm2, %v6800_v55 }
 0x96c   : > { %6900 = vst.msk [vmem:[%s7523_s26 + $0xd8] sm:$0xff] %vm310_vm2, %v6800_v55 }
 0x96e   : > { %v6802_v11 = vpop.permute.xlu1 %6801  ;;  %v6798_v53 = vpop.permute.xlu2 %6797 }
 0x96f   : > { %6869 = vst.msk [vmem:[#allocation2 + $0x182] sm:$0xff] %vm310_vm2, %v6802_v11 }
 0x970   : > { %6901 = vst.msk [vmem:[%s7523_s26 + $0xe0] sm:$0xff] %vm310_vm2, %v6802_v11 }
 0x971   : > { %6867 = vst.msk [vmem:[#allocation2 + $0x16a] sm:$0xff] %vm310_vm2, %v6798_v53  ;;  %v6806_v19 = vpop.permute.xlu0 %6805 }
 0x972   : > { %6899 = vst.msk [vmem:[%s7523_s26 + $0xd0] sm:$0xff] %vm310_vm2, %v6798_v53 }
 0x973   : > { %6871 = vst.msk [vmem:[#allocation2 + $0x19a] sm:$0xff] %vm310_vm2, %v6806_v19 }
 0x974   : > { %6903 = vst.msk [vmem:[%s7523_s26 + $0xf0] sm:$0xff] %vm310_vm2, %v6806_v19 }
 0x976   : > { %v6808_v32 = vpop.permute.xlu1 %6807  ;;  %v6804_v34 = vpop.permute.xlu2 %6803 }
 0x977   : > { %6872 = vst.msk [vmem:[#allocation2 + $0x1a2] sm:$0xff] %vm310_vm2, %v6808_v32 }
 0x978   : > { %6904 = vst.msk [vmem:[%s7523_s26 + $0xf8] sm:$0xff] %vm310_vm2, %v6808_v32 }
 0x979   : > { %6870 = vst.msk [vmem:[#allocation2 + $0x18a] sm:$0xff] %vm310_vm2, %v6804_v34 }
 0x97a   : > { %6902 = vst.msk [vmem:[%s7523_s26 + $0xe8] sm:$0xff] %vm310_vm2, %v6804_v34 }
 0x97b PF: > { %s12_s13 = sadd.s32 1, %s7464_s13   ;;  %s11616_s9 = smov %s7456_s11 }
 0x97c   : > { %p9_p8 = scmp.ge.s32.totalorder %s12_s13, 18   ;;  %s11617_s10 = smov %s7460_s12 }
 0x97d   : > { %s11618_s11 = smov %s11621_s14  ;;  %s11619_s12 = smov %s11625_s15 }
 0x97e   :  { %11 = sbr.rel (!%p9_p8) target bundleno = 3 (0x3), region = 66 }

</bundles_post_ra>
